<compile_context>
chip_gen: v5e
topology: v5e:2x2
jax: 0.10.0
libtpu: 0.0.40
codegen_flags: <defaults>
</compile_context>

<pallas_src>
import math
import functools
import numpy as np

import jax
import jax.numpy as jnp
from jax.experimental import pallas as pl
from jax.experimental.pallas import tpu as pltpu


# ----------------------------------------------------------------------------
# Tiling helpers
# ----------------------------------------------------------------------------

def _pick_hw_tile(hw, max_tile=512):
    """Largest multiple of 128 that divides hw (<= max_tile); else full extent.
    Keeps every per-step block a few hundred KB so double-buffering fits the
    64 MiB v7x VMEM as well as v5e/v6e."""
    if hw % 128 != 0:
        return hw
    t = min(max_tile, hw)
    t -= t % 128
    while t >= 128:
        if hw % t == 0:
            return t
        t -= 128
    return hw


def _lane_dense_2d(shape):
    """Pick a (rows, lanes) 2-D view with a lane-dense last dim."""
    n = int(np.prod(shape))
    lanes = n
    for cand in (512, 256, 128):
        if n % cand == 0:
            lanes = cand
            break
    return n // lanes, lanes


def _pick_row_tile(rows, max_tile=1024):
    if rows <= max_tile:
        return rows
    for d in range(max_tile - max_tile % 8, 7, -8):
        if rows % d == 0:
            return d
    return rows


# ----------------------------------------------------------------------------
# Pos2Weight MLP kernel: Linear(3,256) -> LeakyReLU(0.2) -> Linear(256, 9*C*C)
# Emits the per-pixel weights already transposed / column-permuted into the
# (S, C*K, HW) layout consumed by the local filter (HW lane-dense).
# ----------------------------------------------------------------------------

def _p2w_kernel(pos_ref, w1_ref, b1_ref, w2_ref, b2_ref, out_ref):
    # pos_ref: (3, HWt); w1_ref: (256, 3); b1_ref: (256, 1)
    # w2_ref: (C*K, 256); b2_ref: (C*K, 1); out_ref: (C*K, HWt)
    h = jnp.dot(w1_ref[...], pos_ref[...], preferred_element_type=jnp.float32)
    h = h + b1_ref[...]
    h = jnp.where(h > 0, h, 0.2 * h)                       # LeakyReLU(0.2)
    o = jnp.dot(w2_ref[...], h, preferred_element_type=jnp.float32)
    out_ref[...] = (o + b2_ref[...]).astype(out_ref.dtype)


def pos2weight(pos_t, params):
    """pos_t: (S, 3, HW) -> per-pixel weights (S, C*K, HW), lane-dense in HW."""
    w1t, b1t, w2ct, b2ct = params
    S, _, HW = pos_t.shape
    CK = w2ct.shape[0]
    hwt = _pick_hw_tile(HW)
    grid = (S, HW // hwt)
    const2 = lambda s, t: (0, 0)   # MLP weights stay resident across the grid
    return pl.pallas_call(
        _p2w_kernel,
        grid=grid,
        out_shape=jax.ShapeDtypeStruct((S, CK, HW), jnp.float32),
        in_specs=[
            pl.BlockSpec((pl.Squeezed(), 3, hwt), lambda s, t: (s, 0, t)),
            pl.BlockSpec(w1t.shape, const2),
            pl.BlockSpec(b1t.shape, const2),
            pl.BlockSpec(w2ct.shape, const2),
            pl.BlockSpec(b2ct.shape, const2),
        ],
        out_specs=pl.BlockSpec((pl.Squeezed(), CK, hwt), lambda s, t: (s, 0, t)),
        compiler_params=pltpu.CompilerParams(
            dimension_semantics=("parallel", "parallel")),
    )(pos_t, w1t, b1t, w2ct, b2ct)


# ----------------------------------------------------------------------------
# Per-output-pixel local filter:
#   out[s, n, c, p] = sum_k cols[n, k, p] * wt[s, c*K + k, p]
# HW stays lane-dense on input, weight and output blocks.
# ----------------------------------------------------------------------------

def _local_filter_kernel(cols_ref, wt_ref, out_ref, *, C, K):
    # cols_ref: (N, K, HWt)   K on sublanes, HW on lanes
    # wt_ref:   (C*K, HWt)    row index d = c*K + k
    # out_ref:  (N, C, HWt)   lane-dense output block
    if K <= 64:
        # Unrolled VPU FMA accumulation over K: no XLU cross-lane reduce and
        # no (N, HW, C, K) broadcast intermediate.
        acc = [cols_ref[:, 0, :] * wt_ref[c * K:c * K + 1, :] for c in range(C)]
        for k in range(1, K):
            col_k = cols_ref[:, k, :]                            # (N, HWt)
            for c in range(C):
                acc[c] = acc[c] + col_k * wt_ref[c * K + k:c * K + k + 1, :]
    else:
        # Large contraction fallback: reduce over the sublane (K) axis per c.
        cols = cols_ref[...]
        acc = [jnp.sum(cols * wt_ref[c * K:(c + 1) * K, :][None, :, :], axis=1)
               for c in range(C)]
    for c in range(C):
        out_ref[:, c, :] = acc[c].astype(out_ref.dtype)


def local_filter(cols, wt, C):
    """cols: (N, K, HW); wt: (S, C*K, HW) -> (S, N, C, HW)."""
    N, K, HW = cols.shape
    S, CK, _ = wt.shape
    assert CK == C * K
    hwt = _pick_hw_tile(HW)
    grid = (S, HW // hwt)
    return pl.pallas_call(
        functools.partial(_local_filter_kernel, C=C, K=K),
        grid=grid,
        out_shape=jax.ShapeDtypeStruct((S, N, C, HW), jnp.float32),
        in_specs=[
            pl.BlockSpec((N, K, hwt), lambda s, t: (0, 0, t)),
            pl.BlockSpec((pl.Squeezed(), CK, hwt), lambda s, t: (s, 0, t)),
        ],
        out_specs=pl.BlockSpec((pl.Squeezed(), N, C, hwt),
                               lambda s, t: (s, 0, 0, t)),
        compiler_params=pltpu.CompilerParams(
            dimension_semantics=("parallel", "parallel")),
    )(cols, wt)


# ----------------------------------------------------------------------------
# Tiled lane-dense elementwise kernels (subtract / residual-add + abs-max fuse)
# ----------------------------------------------------------------------------

def _sub_kernel(a_ref, b_ref, o_ref):
    o_ref[...] = a_ref[...] - b_ref[...]


def _fuse_kernel(fa_ref, fb_ref, ff_ref, ea_ref, eb_ref, oa_ref, ob_ref, of_ref):
    ea = ea_ref[...]
    eb = eb_ref[...]
    oa_ref[...] = fa_ref[...] + ea
    ob_ref[...] = fb_ref[...] + eb
    # TODO(synk): abs_max is not defined in the reference source; assumed the
    # standard fusion rule: per element keep the value with the larger
    # magnitude (ties -> first operand).
    emax = jnp.where(jnp.abs(ea) >= jnp.abs(eb), ea, eb)
    of_ref[...] = ff_ref[...] + emax


def ew_sub(a, b):
    rows, lanes = _lane_dense_2d(a.shape)
    rt = _pick_row_tile(rows)
    spec = pl.BlockSpec((rt, lanes), lambda i: (i, 0))
    out = pl.pallas_call(
        _sub_kernel,
        grid=(rows // rt,),
        out_shape=jax.ShapeDtypeStruct((rows, lanes), a.dtype),
        in_specs=[spec, spec],
        out_specs=spec,
        compiler_params=pltpu.CompilerParams(dimension_semantics=("parallel",)),
    )(a.reshape(rows, lanes), b.reshape(rows, lanes))
    return out.reshape(a.shape)


def fuse(fa_up, fb_up, f_fused, err_a_up, err_b_up):
    shape = fa_up.shape
    rows, lanes = _lane_dense_2d(shape)
    rt = _pick_row_tile(rows)
    spec = pl.BlockSpec((rt, lanes), lambda i: (i, 0))
    shp = jax.ShapeDtypeStruct((rows, lanes), fa_up.dtype)
    flat = [x.reshape(rows, lanes)
            for x in (fa_up, fb_up, f_fused, err_a_up, err_b_up)]
    oa, ob, of = pl.pallas_call(
        _fuse_kernel,
        grid=(rows // rt,),
        out_shape=(shp, shp, shp),
        in_specs=[spec] * 5,
        out_specs=(spec, spec, spec),
        compiler_params=pltpu.CompilerParams(dimension_semantics=("parallel",)),
    )(*flat)
    return oa.reshape(shape), ob.reshape(shape), of.reshape(shape)


# ----------------------------------------------------------------------------
# JAX glue: unfold, parameter re-layout, MetaLearner / RCM forward
# ----------------------------------------------------------------------------

def unfold3x3(x):
    """F.unfold(x, kernel_size=3, padding=1): (N, C, H, W) -> (N, C*9, H*W).
    Channel-major (c, ki, kj) feature ordering, matching PyTorch.
    # TODO(synk): could be fused into the local-filter kernel with a haloed
    # DMA tile to avoid the 9x-expanded HBM round trip; kept as XLA glue."""
    N, C, H, W = x.shape
    xp = jnp.pad(x, ((0, 0), (0, 0), (1, 1), (1, 1)))
    pat = [xp[:, :, i:i + H, j:j + W] for i in range(3) for j in range(3)]
    pat = jnp.stack(pat, axis=2)          # (N, C, 9, H, W)
    return pat.reshape(N, C * 9, H * W)   # K index = c*9 + ki*3 + kj


def init_p2w_params(key, C):
    """Synthetic Pos2Weight params (inC = outC = C, kernel 3), PyTorch layout."""
    k1, k2, k3, k4 = jax.random.split(key, 4)
    dout = 3 * 3 * C * C
    w1 = jax.random.normal(k1, (3, 256), jnp.float32) * 0.1
    b1 = jax.random.normal(k2, (256,), jnp.float32) * 0.1
    w2 = jax.random.normal(k3, (256, dout), jnp.float32) * 0.05
    b2 = jax.random.normal(k4, (dout,), jnp.float32) * 0.05
    return (w1, b1, w2, b2)


def prep_p2w_params(raw, C):
    """One-time re-layout of the Pos2Weight params so the p2w kernel emits
    weights directly in the (C*K, HW) layout the local filter consumes.
    Output column d_old = k*C + c moves to row d_new = c*K + k (exact same
    function, zero runtime cost)."""
    w1, b1, w2, b2 = raw
    K = 9 * C
    new = np.arange(K * C)
    c, k = new // K, new % K
    old = jnp.asarray(k * C + c)                        # old column feeding new row
    w1t = jnp.asarray(w1).T                             # (256, 3)
    b1t = jnp.asarray(b1).reshape(256, 1)               # (256, 1)
    w2ct = jnp.take(jnp.asarray(w2).T, old, axis=0)     # (C*K, 256)
    b2ct = jnp.take(jnp.asarray(b2), old, axis=0).reshape(-1, 1)
    return (w1t, b1t, w2ct, b2ct)


def meta_learner_forward(params, x, r, pos_mat, sel):
    """MetaLearner.forward.
    x: (N, C, H, W); pos_mat: (1, (H*s)*(W*s), 3) with s = ceil(r);
    sel: None (keep every output pixel) or (row_idx, col_idx) index arrays —
    the structural, on-device equivalent of the reference boolean mask."""
    scale = int(math.ceil(r))
    N, C, H, W = x.shape
    S = scale * scale

    # (1, P, 3) -> (S, 3, H*W): sub-pixel-major row order, 3 on sublanes.
    # Tiny tensor; this replaces the big (P, 9*C*C) weight transposes.
    pos = pos_mat.reshape(H, scale, W, scale, 3).astype(jnp.float32)
    pos_t = jnp.transpose(pos, (1, 3, 4, 0, 2)).reshape(S, 3, H * W)

    wt = pos2weight(pos_t, params)               # (S, C*K, H*W)

    # repeat_x makes scale**2 identical copies of x, so the unfolded columns
    # are independent of the sub-pixel index.
    cols = unfold3x3(x)                          # (N, K, H*W), HW lane-dense

    out = local_filter(cols, wt, C)              # (S, N, C, H*W)

    out = out.reshape(scale, scale, N, C, H, W)
    out = jnp.transpose(out, (2, 3, 4, 0, 5, 1))
    out = out.reshape(N, C, scale * H, scale * W)

    # torch.masked_select + reshape: the reference masks are structural, so
    # select on-device with gathers (no host sync, jittable).
    # TODO(synk): assumes pos_mat's mask is separable into row/col keep sets,
    # which holds for the reference pos_mat construction.
    if sel is not None:
        row_idx, col_idx = sel
        out = jnp.take(out, row_idx, axis=2)
        out = jnp.take(out, col_idx, axis=3)
    return out


def rcm_forward(params, fa, fb, fa_up, fb_up, f_fused, rs,
                pos_mat_a_up, sel_a_up, pos_mat_b_up, sel_b_up,
                pos_mat_a_down, sel_a_down, pos_mat_b_down, sel_b_down):
    # TODO(synk): conv_after_meta_down (Conv_S) is constructed in RCM.__init__
    # but never used in RCM.forward (and Conv_S is undefined in the reference),
    # so it is omitted.
    p_down = params["meta_f_down"]
    p_up = params["meta_error_up"]

    fa_down = meta_learner_forward(p_down, fa_up, rs[2], pos_mat_a_down, sel_a_down)
    error_a = ew_sub(fa, fa_down)
    error_a_up = meta_learner_forward(p_up, error_a, rs[0], pos_mat_a_up, sel_a_up)

    fb_down = meta_learner_forward(p_down, fb_up, rs[3], pos_mat_b_down, sel_b_down)
    error_b = ew_sub(fb, fb_down)
    error_b_up = meta_learner_forward(p_up, error_b, rs[1], pos_mat_b_up, sel_b_up)

    return fuse(fa_up, fb_up, f_fused, error_a_up, error_b_up)


# ----------------------------------------------------------------------------
# Pure-JAX reference (used only for the self-check in the demo)
# ----------------------------------------------------------------------------

def _ref_meta(raw, x, r, pos_mat, sel):
    w1, b1, w2, b2 = raw
    scale = int(math.ceil(r))
    N, C, H, W = x.shape
    P = pos_mat.shape[1]
    pos = pos_mat.reshape(P, 3).astype(jnp.float32)
    h = jnp.dot(pos, w1, precision="highest") + b1
    h = jnp.where(h > 0, h, 0.2 * h)
    lw = jnp.dot(h, w2, precision="highest") + b2                 # (P, 9*C*C)
    cols = jnp.transpose(unfold3x3(x), (0, 2, 1))                 # (N, HW, 9C)
    lw = lw.reshape(H, scale, W, scale, 9 * C, C)
    lw = jnp.transpose(lw, (1, 3, 0, 2, 4, 5)).reshape(scale ** 2, H * W, 9 * C, C)
    out = jnp.einsum('npk,spkc->snpc', cols, lw, precision="highest")
    out = out.reshape(scale, scale, N, H, W, C)
    out = jnp.transpose(out, (2, 5, 3, 0, 4, 1)).reshape(N, C, scale * H, scale * W)
    if sel is not None:
        out = jnp.take(out, sel[0], axis=2)
        out = jnp.take(out, sel[1], axis=3)
    return out


def _ref_rcm(raw_params, fa, fb, fa_up, fb_up, f_fused, rs,
             pa_up, sa_up, pb_up, sb_up, pa_dn, sa_dn, pb_dn, sb_dn):
    fa_down = _ref_meta(raw_params["meta_f_down"], fa_up, rs[2], pa_dn, sa_dn)
    ea = fa - fa_down
    ea_up = _ref_meta(raw_params["meta_error_up"], ea, rs[0], pa_up, sa_up)
    fb_down = _ref_meta(raw_params["meta_f_down"], fb_up, rs[3], pb_dn, sb_dn)
    eb = fb - fb_down
    eb_up = _ref_meta(raw_params["meta_error_up"], eb, rs[1], pb_up, sb_up)
    emax = jnp.where(jnp.abs(ea_up) >= jnp.abs(eb_up), ea_up, eb_up)
    return fa_up + ea_up, fb_up + eb_up, f_fused + emax


# ----------------------------------------------------------------------------
# Demo
# ----------------------------------------------------------------------------

if __name__ == "__main__":
    key = jax.random.PRNGKey(0)
    keys = jax.random.split(key, 12)

    N, C, H, W = 2, 4, 8, 8            # meta_C = 4
    scale = 2
    Hu, Wu = H * scale, W * scale

    fa = jax.random.normal(keys[0], (N, C, H, W), jnp.float32)
    fb = jax.random.normal(keys[1], (N, C, H, W), jnp.float32)
    fa_up = jax.random.normal(keys[2], (N, C, Hu, Wu), jnp.float32)
    fb_up = jax.random.normal(keys[3], (N, C, Hu, Wu), jnp.float32)
    f_fused = jax.random.normal(keys[4], (N, C, Hu, Wu), jnp.float32)

    # rs = (r_a_up, r_b_up, 1/r_a_up, 1/r_b_up)
    rs = (2.0, 2.0, 0.5, 0.5)

    # pos_mat: (1, (H*ceil(r)) * (W*ceil(r)), 3)
    pos_a_up = jax.random.normal(keys[5], (1, Hu * Wu, 3), jnp.float32)
    pos_b_up = jax.random.normal(keys[6], (1, Hu * Wu, 3), jnp.float32)
    pos_a_dn = jax.random.normal(keys[7], (1, Hu * Wu, 3), jnp.float32)  # ceil(0.5)=1
    pos_b_dn = jax.random.normal(keys[8], (1, Hu * Wu, 3), jnp.float32)

    # Structural masks: the up path keeps every output pixel; the down path
    # keeps the ::scale sub-grid (exactly what the reference boolean mask does).
    sel_up = None
    sel_dn = (jnp.arange(0, Hu, scale, dtype=jnp.int32),
              jnp.arange(0, Wu, scale, dtype=jnp.int32))

    raw_params = {
        "meta_f_down": init_p2w_params(keys[9], C),
        "meta_error_up": init_p2w_params(keys[10], C),
    }
    params = {name: prep_p2w_params(p, C) for name, p in raw_params.items()}

    rcm = jax.jit(rcm_forward, static_argnums=(6,))
    fa_up_o, fb_up_o, f_fused_o = rcm(
        params, fa, fb, fa_up, fb_up, f_fused, rs,
        pos_a_up, sel_up, pos_b_up, sel_up,
        pos_a_dn, sel_dn, pos_b_dn, sel_dn)
    jax.block_until_ready((fa_up_o, fb_up_o, f_fused_o))

    assert fa_up_o.shape == (N, C, Hu, Wu)
    assert fb_up_o.shape == (N, C, Hu, Wu)
    assert f_fused_o.shape == (N, C, Hu, Wu)

    # Numerical self-check against a pure-JAX reference of the same forward.
    ra, rb, rf = _ref_rcm(raw_params, fa, fb, fa_up, fb_up, f_fused, rs,
                          pos_a_up, sel_up, pos_b_up, sel_up,
                          pos_a_dn, sel_dn, pos_b_dn, sel_dn)
    for got, want in ((fa_up_o, ra), (fb_up_o, rb), (f_fused_o, rf)):
        err = float(jnp.max(jnp.abs(got - want)))
        assert err < 5e-2, f"mismatch vs pure-JAX reference: {err}"

    print("KERNEL_OK")
</pallas_src>

<mosaic_0001>
module attributes {stable_mosaic.version = 11 : i64} {
  func.func @_p2w_kernel(%arg0: i32, %arg1: i32, %arg2: memref<1x3x256xf32, #tpu.memory_space<vmem>>, %arg3: memref<256x3xf32, #tpu.memory_space<vmem>>, %arg4: memref<256x1xf32, #tpu.memory_space<vmem>>, %arg5: memref<144x256xf32, #tpu.memory_space<vmem>>, %arg6: memref<144x1xf32, #tpu.memory_space<vmem>>, %arg7: memref<1x144x256xf32, #tpu.memory_space<vmem>>) attributes {dimension_semantics = [#tpu.dimension_semantics<parallel>, #tpu.dimension_semantics<parallel>], iteration_bounds = array<i64: 1, 1>, scalar_prefetch = 0 : i64, scratch_operands = 0 : i64, tpu.core_type = #tpu.core_type<tc>, window_params = [{transform_indices = @transform_0, window_bounds = array<i64: 1, 3, 256>}, {pipeline_mode = #tpu.pipeline_mode<synchronous>, transform_indices = @transform_1, window_bounds = array<i64: 256, 3>}, {pipeline_mode = #tpu.pipeline_mode<synchronous>, transform_indices = @transform_2, window_bounds = array<i64: 256, 1>}, {pipeline_mode = #tpu.pipeline_mode<synchronous>, transform_indices = @transform_3, window_bounds = array<i64: 144, 256>}, {pipeline_mode = #tpu.pipeline_mode<synchronous>, transform_indices = @transform_4, window_bounds = array<i64: 144, 1>}, {transform_indices = @transform_5, window_bounds = array<i64: 1, 144, 256>}]} {
    %c0 = arith.constant 0 : index
    %c0_0 = arith.constant 0 : index
    %0 = vector.load %arg3[%c0, %c0_0] : memref<256x3xf32, #tpu.memory_space<vmem>>, vector<256x3xf32>
    %c0_1 = arith.constant 0 : index
    %c0_2 = arith.constant 0 : index
    %c0_3 = arith.constant 0 : index
    %1 = vector.load %arg2[%c0_1, %c0_2, %c0_3] : memref<1x3x256xf32, #tpu.memory_space<vmem>>, vector<1x3x256xf32>
    %2 = vector.shape_cast %1 : vector<1x3x256xf32> to vector<3x256xf32>
    %cst = arith.constant dense<0.000000e+00> : vector<256x256xf32>
    %3 = tpu.matmul %0, %2, %cst {dimension_numbers = #tpu.dot_dimension_numbers<[1], [0], [0], [1], [0, 0, 1, 1], [], []>} : vector<256x3xf32>, vector<3x256xf32>, vector<256x256xf32> -> vector<256x256xf32>
    %c0_4 = arith.constant 0 : index
    %c0_5 = arith.constant 0 : index
    %4 = vector.load %arg4[%c0_4, %c0_5] : memref<256x1xf32, #tpu.memory_space<vmem>>, vector<256x1xf32>
    %5 = vector.broadcast %4 : vector<256x1xf32> to vector<256x256xf32>
    %6 = arith.addf %3, %5 : vector<256x256xf32>
    %cst_6 = arith.constant 0.000000e+00 : f32
    %7 = vector.broadcast %cst_6 : f32 to vector<256x256xf32>
    %8 = arith.cmpf ogt, %6, %7 : vector<256x256xf32>
    %cst_7 = arith.constant 2.000000e-01 : f32
    %9 = vector.broadcast %cst_7 : f32 to vector<256x256xf32>
    %10 = arith.mulf %9, %6 : vector<256x256xf32>
    %11 = arith.select %8, %6, %10 : vector<256x256xi1>, vector<256x256xf32>
    %c0_8 = arith.constant 0 : index
    %c0_9 = arith.constant 0 : index
    %12 = vector.load %arg5[%c0_8, %c0_9] : memref<144x256xf32, #tpu.memory_space<vmem>>, vector<144x256xf32>
    %cst_10 = arith.constant dense<0.000000e+00> : vector<144x256xf32>
    %13 = tpu.matmul %12, %11, %cst_10 {dimension_numbers = #tpu.dot_dimension_numbers<[1], [0], [0], [1], [0, 0, 1, 1], [], []>} : vector<144x256xf32>, vector<256x256xf32>, vector<144x256xf32> -> vector<144x256xf32>
    %c0_11 = arith.constant 0 : index
    %c0_12 = arith.constant 0 : index
    %14 = vector.load %arg6[%c0_11, %c0_12] : memref<144x1xf32, #tpu.memory_space<vmem>>, vector<144x1xf32>
    %15 = vector.broadcast %14 : vector<144x1xf32> to vector<144x256xf32>
    %16 = arith.addf %13, %15 : vector<144x256xf32>
    %c0_13 = arith.constant 0 : index
    %c0_14 = arith.constant 0 : index
    %c0_15 = arith.constant 0 : index
    %17 = vector.load %arg7[%c0_13, %c0_14, %c0_15] : memref<1x144x256xf32, #tpu.memory_space<vmem>>, vector<1x144x256xf32>
    %18 = vector.shape_cast %17 : vector<1x144x256xf32> to vector<144x256xf32>
    %19 = vector.shape_cast %16 : vector<144x256xf32> to vector<1x144x256xf32>
    tpu.vector_store %arg7[%c0_13, %c0_14, %c0_15], %19 {strides = array<i32>} : memref<1x144x256xf32, #tpu.memory_space<vmem>>, vector<1x144x256xf32>,
    return
  }
  func.func @transform_0(%arg0: i32, %arg1: i32) -> (i32, i32, i32) {
    %c0_i32 = arith.constant 0 : i32
    %c0_i32_0 = arith.constant 0 : i32
    return %arg0, %c0_i32, %arg1 : i32, i32, i32
  }
  func.func @transform_1(%arg0: i32, %arg1: i32) -> (i32, i32) {
    %c0_i32 = arith.constant 0 : i32
    %c0_i32_0 = arith.constant 0 : i32
    %c0_i32_1 = arith.constant 0 : i32
    return %c0_i32, %c0_i32_0 : i32, i32
  }
  func.func @transform_2(%arg0: i32, %arg1: i32) -> (i32, i32) {
    %c0_i32 = arith.constant 0 : i32
    %c0_i32_0 = arith.constant 0 : i32
    %c0_i32_1 = arith.constant 0 : i32
    return %c0_i32, %c0_i32_0 : i32, i32
  }
  func.func @transform_3(%arg0: i32, %arg1: i32) -> (i32, i32) {
    %c0_i32 = arith.constant 0 : i32
    %c0_i32_0 = arith.constant 0 : i32
    %c0_i32_1 = arith.constant 0 : i32
    return %c0_i32, %c0_i32_0 : i32, i32
  }
  func.func @transform_4(%arg0: i32, %arg1: i32) -> (i32, i32) {
    %c0_i32 = arith.constant 0 : i32
    %c0_i32_0 = arith.constant 0 : i32
    %c0_i32_1 = arith.constant 0 : i32
    return %c0_i32, %c0_i32_0 : i32, i32
  }
  func.func @transform_5(%arg0: i32, %arg1: i32) -> (i32, i32, i32) {
    %c0_i32 = arith.constant 0 : i32
    %c0_i32_0 = arith.constant 0 : i32
    return %arg0, %c0_i32, %arg1 : i32, i32, i32
  }
}

module attributes {stable_mosaic.version = 11 : i64} {
  func.func @_local_filter_kernel(%arg0: i32, %arg1: i32, %arg2: memref<2x36x256xf32, #tpu.memory_space<vmem>>, %arg3: memref<1x144x256xf32, #tpu.memory_space<vmem>>, %arg4: memref<1x2x4x256xf32, #tpu.memory_space<vmem>>) attributes {dimension_semantics = [#tpu.dimension_semantics<parallel>, #tpu.dimension_semantics<parallel>], iteration_bounds = array<i64: 1, 1>, scalar_prefetch = 0 : i64, scratch_operands = 0 : i64, tpu.core_type = #tpu.core_type<tc>, window_params = [{transform_indices = @transform_0, window_bounds = array<i64: 2, 36, 256>}, {transform_indices = @transform_1, window_bounds = array<i64: 1, 144, 256>}, {transform_indices = @transform_2, window_bounds = array<i64: 1, 2, 4, 256>}]} {
    %c0 = arith.constant 0 : index
    %c0_0 = arith.constant 0 : index
    %c0_1 = arith.constant 0 : index
    %0 = vector.load %arg2[%c0, %c0_0, %c0_1] : memref<2x36x256xf32, #tpu.memory_space<vmem>>, vector<2x1x256xf32>
    %1 = vector.shape_cast %0 : vector<2x1x256xf32> to vector<2x256xf32>
    %c0_2 = arith.constant 0 : index
    %c0_3 = arith.constant 0 : index
    %c0_4 = arith.constant 0 : index
    %2 = vector.load %arg3[%c0_2, %c0_3, %c0_4] : memref<1x144x256xf32, #tpu.memory_space<vmem>>, vector<1x1x256xf32>
    %3 = vector.shape_cast %2 : vector<1x1x256xf32> to vector<1x256xf32>
    %4 = vector.broadcast %3 : vector<1x256xf32> to vector<2x256xf32>
    %5 = arith.mulf %1, %4 : vector<2x256xf32>
    %c0_5 = arith.constant 0 : index
    %c0_6 = arith.constant 0 : index
    %c0_7 = arith.constant 0 : index
    %6 = vector.load %arg2[%c0_5, %c0_6, %c0_7] : memref<2x36x256xf32, #tpu.memory_space<vmem>>, vector<2x1x256xf32>
    %7 = vector.shape_cast %6 : vector<2x1x256xf32> to vector<2x256xf32>
    %c0_8 = arith.constant 0 : index
    %c36 = arith.constant 36 : index
    %c0_9 = arith.constant 0 : index
    %8 = vector.load %arg3[%c0_8, %c36, %c0_9] : memref<1x144x256xf32, #tpu.memory_space<vmem>>, vector<1x1x256xf32>
    %9 = vector.shape_cast %8 : vector<1x1x256xf32> to vector<1x256xf32>
    %10 = vector.broadcast %9 : vector<1x256xf32> to vector<2x256xf32>
    %11 = arith.mulf %7, %10 : vector<2x256xf32>
    %c0_10 = arith.constant 0 : index
    %c0_11 = arith.constant 0 : index
    %c0_12 = arith.constant 0 : index
    %12 = vector.load %arg2[%c0_10, %c0_11, %c0_12] : memref<2x36x256xf32, #tpu.memory_space<vmem>>, vector<2x1x256xf32>
    %13 = vector.shape_cast %12 : vector<2x1x256xf32> to vector<2x256xf32>
    %c0_13 = arith.constant 0 : index
    %c72 = arith.constant 72 : index
    %c0_14 = arith.constant 0 : index
    %14 = vector.load %arg3[%c0_13, %c72, %c0_14] : memref<1x144x256xf32, #tpu.memory_space<vmem>>, vector<1x1x256xf32>
    %15 = vector.shape_cast %14 : vector<1x1x256xf32> to vector<1x256xf32>
    %16 = vector.broadcast %15 : vector<1x256xf32> to vector<2x256xf32>
    %17 = arith.mulf %13, %16 : vector<2x256xf32>
    %c0_15 = arith.constant 0 : index
    %c0_16 = arith.constant 0 : index
    %c0_17 = arith.constant 0 : index
    %18 = vector.load %arg2[%c0_15, %c0_16, %c0_17] : memref<2x36x256xf32, #tpu.memory_space<vmem>>, vector<2x1x256xf32>
    %19 = vector.shape_cast %18 : vector<2x1x256xf32> to vector<2x256xf32>
    %c0_18 = arith.constant 0 : index
    %c108 = arith.constant 108 : index
    %c0_19 = arith.constant 0 : index
    %20 = vector.load %arg3[%c0_18, %c108, %c0_19] : memref<1x144x256xf32, #tpu.memory_space<vmem>>, vector<1x1x256xf32>
    %21 = vector.shape_cast %20 : vector<1x1x256xf32> to vector<1x256xf32>
    %22 = vector.broadcast %21 : vector<1x256xf32> to vector<2x256xf32>
    %23 = arith.mulf %19, %22 : vector<2x256xf32>
    %c0_20 = arith.constant 0 : index
    %c1 = arith.constant 1 : index
    %c0_21 = arith.constant 0 : index
    %24 = vector.load %arg2[%c0_20, %c1, %c0_21] : memref<2x36x256xf32, #tpu.memory_space<vmem>>, vector<2x1x256xf32>
    %25 = vector.shape_cast %24 : vector<2x1x256xf32> to vector<2x256xf32>
    %c0_22 = arith.constant 0 : index
    %c1_23 = arith.constant 1 : index
    %c0_24 = arith.constant 0 : index
    %26 = vector.load %arg3[%c0_22, %c1_23, %c0_24] : memref<1x144x256xf32, #tpu.memory_space<vmem>>, vector<1x1x256xf32>
    %27 = vector.shape_cast %26 : vector<1x1x256xf32> to vector<1x256xf32>
    %28 = vector.broadcast %27 : vector<1x256xf32> to vector<2x256xf32>
    %29 = arith.mulf %25, %28 : vector<2x256xf32>
    %30 = arith.addf %5, %29 : vector<2x256xf32>
    %c0_25 = arith.constant 0 : index
    %c37 = arith.constant 37 : index
    %c0_26 = arith.constant 0 : index
    %31 = vector.load %arg3[%c0_25, %c37, %c0_26] : memref<1x144x256xf32, #tpu.memory_space<vmem>>, vector<1x1x256xf32>
    %32 = vector.shape_cast %31 : vector<1x1x256xf32> to vector<1x256xf32>
    %33 = vector.broadcast %32 : vector<1x256xf32> to vector<2x256xf32>
    %34 = arith.mulf %25, %33 : vector<2x256xf32>
    %35 = arith.addf %11, %34 : vector<2x256xf32>
    %c0_27 = arith.constant 0 : index
    %c73 = arith.constant 73 : index
    %c0_28 = arith.constant 0 : index
    %36 = vector.load %arg3[%c0_27, %c73, %c0_28] : memref<1x144x256xf32, #tpu.memory_space<vmem>>, vector<1x1x256xf32>
    %37 = vector.shape_cast %36 : vector<1x1x256xf32> to vector<1x256xf32>
    %38 = vector.broadcast %37 : vector<1x256xf32> to vector<2x256xf32>
    %39 = arith.mulf %25, %38 : vector<2x256xf32>
    %40 = arith.addf %17, %39 : vector<2x256xf32>
    %c0_29 = arith.constant 0 : index
    %c109 = arith.constant 109 : index
    %c0_30 = arith.constant 0 : index
    %41 = vector.load %arg3[%c0_29, %c109, %c0_30] : memref<1x144x256xf32, #tpu.memory_space<vmem>>, vector<1x1x256xf32>
    %42 = vector.shape_cast %41 : vector<1x1x256xf32> to vector<1x256xf32>
    %43 = vector.broadcast %42 : vector<1x256xf32> to vector<2x256xf32>
    %44 = arith.mulf %25, %43 : vector<2x256xf32>
    %45 = arith.addf %23, %44 : vector<2x256xf32>
    %c0_31 = arith.constant 0 : index
    %c2 = arith.constant 2 : index
    %c0_32 = arith.constant 0 : index
    %46 = vector.load %arg2[%c0_31, %c2, %c0_32] : memref<2x36x256xf32, #tpu.memory_space<vmem>>, vector<2x1x256xf32>
    %47 = vector.shape_cast %46 : vector<2x1x256xf32> to vector<2x256xf32>
    %c0_33 = arith.constant 0 : index
    %c2_34 = arith.constant 2 : index
    %c0_35 = arith.constant 0 : index
    %48 = vector.load %arg3[%c0_33, %c2_34, %c0_35] : memref<1x144x256xf32, #tpu.memory_space<vmem>>, vector<1x1x256xf32>
    %49 = vector.shape_cast %48 : vector<1x1x256xf32> to vector<1x256xf32>
    %50 = vector.broadcast %49 : vector<1x256xf32> to vector<2x256xf32>
    %51 = arith.mulf %47, %50 : vector<2x256xf32>
    %52 = arith.addf %30, %51 : vector<2x256xf32>
    %c0_36 = arith.constant 0 : index
    %c38 = arith.constant 38 : index
    %c0_37 = arith.constant 0 : index
    %53 = vector.load %arg3[%c0_36, %c38, %c0_37] : memref<1x144x256xf32, #tpu.memory_space<vmem>>, vector<1x1x256xf32>
    %54 = vector.shape_cast %53 : vector<1x1x256xf32> to vector<1x256xf32>
    %55 = vector.broadcast %54 : vector<1x256xf32> to vector<2x256xf32>
    %56 = arith.mulf %47, %55 : vector<2x256xf32>
    %57 = arith.addf %35, %56 : vector<2x256xf32>
    %c0_38 = arith.constant 0 : index
    %c74 = arith.constant 74 : index
    %c0_39 = arith.constant 0 : index
    %58 = vector.load %arg3[%c0_38, %c74, %c0_39] : memref<1x144x256xf32, #tpu.memory_space<vmem>>, vector<1x1x256xf32>
    %59 = vector.shape_cast %58 : vector<1x1x256xf32> to vector<1x256xf32>
    %60 = vector.broadcast %59 : vector<1x256xf32> to vector<2x256xf32>
    %61 = arith.mulf %47, %60 : vector<2x256xf32>
    %62 = arith.addf %40, %61 : vector<2x256xf32>
    %c0_40 = arith.constant 0 : index
    %c110 = arith.constant 110 : index
    %c0_41 = arith.constant 0 : index
    %63 = vector.load %arg3[%c0_40, %c110, %c0_41] : memref<1x144x256xf32, #tpu.memory_space<vmem>>, vector<1x1x256xf32>
    %64 = vector.shape_cast %63 : vector<1x1x256xf32> to vector<1x256xf32>
    %65 = vector.broadcast %64 : vector<1x256xf32> to vector<2x256xf32>
    %66 = arith.mulf %47, %65 : vector<2x256xf32>
    %67 = arith.addf %45, %66 : vector<2x256xf32>
    %c0_42 = arith.constant 0 : index
    %c3 = arith.constant 3 : index
    %c0_43 = arith.constant 0 : index
    %68 = vector.load %arg2[%c0_42, %c3, %c0_43] : memref<2x36x256xf32, #tpu.memory_space<vmem>>, vector<2x1x256xf32>
    %69 = vector.shape_cast %68 : vector<2x1x256xf32> to vector<2x256xf32>
    %c0_44 = arith.constant 0 : index
    %c3_45 = arith.constant 3 : index
    %c0_46 = arith.constant 0 : index
    %70 = vector.load %arg3[%c0_44, %c3_45, %c0_46] : memref<1x144x256xf32, #tpu.memory_space<vmem>>, vector<1x1x256xf32>
    %71 = vector.shape_cast %70 : vector<1x1x256xf32> to vector<1x256xf32>
    %72 = vector.broadcast %71 : vector<1x256xf32> to vector<2x256xf32>
    %73 = arith.mulf %69, %72 : vector<2x256xf32>
    %74 = arith.addf %52, %73 : vector<2x256xf32>
    %c0_47 = arith.constant 0 : index
    %c39 = arith.constant 39 : index
    %c0_48 = arith.constant 0 : index
    %75 = vector.load %arg3[%c0_47, %c39, %c0_48] : memref<1x144x256xf32, #tpu.memory_space<vmem>>, vector<1x1x256xf32>
    %76 = vector.shape_cast %75 : vector<1x1x256xf32> to vector<1x256xf32>
    %77 = vector.broadcast %76 : vector<1x256xf32> to vector<2x256xf32>
    %78 = arith.mulf %69, %77 : vector<2x256xf32>
    %79 = arith.addf %57, %78 : vector<2x256xf32>
    %c0_49 = arith.constant 0 : index
    %c75 = arith.constant 75 : index
    %c0_50 = arith.constant 0 : index
    %80 = vector.load %arg3[%c0_49, %c75, %c0_50] : memref<1x144x256xf32, #tpu.memory_space<vmem>>, vector<1x1x256xf32>
    %81 = vector.shape_cast %80 : vector<1x1x256xf32> to vector<1x256xf32>
    %82 = vector.broadcast %81 : vector<1x256xf32> to vector<2x256xf32>
    %83 = arith.mulf %69, %82 : vector<2x256xf32>
    %84 = arith.addf %62, %83 : vector<2x256xf32>
    %c0_51 = arith.constant 0 : index
    %c111 = arith.constant 111 : index
    %c0_52 = arith.constant 0 : index
    %85 = vector.load %arg3[%c0_51, %c111, %c0_52] : memref<1x144x256xf32, #tpu.memory_space<vmem>>, vector<1x1x256xf32>
    %86 = vector.shape_cast %85 : vector<1x1x256xf32> to vector<1x256xf32>
    %87 = vector.broadcast %86 : vector<1x256xf32> to vector<2x256xf32>
    %88 = arith.mulf %69, %87 : vector<2x256xf32>
    %89 = arith.addf %67, %88 : vector<2x256xf32>
    %c0_53 = arith.constant 0 : index
    %c4 = arith.constant 4 : index
    %c0_54 = arith.constant 0 : index
    %90 = vector.load %arg2[%c0_53, %c4, %c0_54] : memref<2x36x256xf32, #tpu.memory_space<vmem>>, vector<2x1x256xf32>
    %91 = vector.shape_cast %90 : vector<2x1x256xf32> to vector<2x256xf32>
    %c0_55 = arith.constant 0 : index
    %c4_56 = arith.constant 4 : index
    %c0_57 = arith.constant 0 : index
    %92 = vector.load %arg3[%c0_55, %c4_56, %c0_57] : memref<1x144x256xf32, #tpu.memory_space<vmem>>, vector<1x1x256xf32>
    %93 = vector.shape_cast %92 : vector<1x1x256xf32> to vector<1x256xf32>
    %94 = vector.broadcast %93 : vector<1x256xf32> to vector<2x256xf32>
    %95 = arith.mulf %91, %94 : vector<2x256xf32>
    %96 = arith.addf %74, %95 : vector<2x256xf32>
    %c0_58 = arith.constant 0 : index
    %c40 = arith.constant 40 : index
    %c0_59 = arith.constant 0 : index
    %97 = vector.load %arg3[%c0_58, %c40, %c0_59] : memref<1x144x256xf32, #tpu.memory_space<vmem>>, vector<1x1x256xf32>
    %98 = vector.shape_cast %97 : vector<1x1x256xf32> to vector<1x256xf32>
    %99 = vector.broadcast %98 : vector<1x256xf32> to vector<2x256xf32>
    %100 = arith.mulf %91, %99 : vector<2x256xf32>
    %101 = arith.addf %79, %100 : vector<2x256xf32>
    %c0_60 = arith.constant 0 : index
    %c76 = arith.constant 76 : index
    %c0_61 = arith.constant 0 : index
    %102 = vector.load %arg3[%c0_60, %c76, %c0_61] : memref<1x144x256xf32, #tpu.memory_space<vmem>>, vector<1x1x256xf32>
    %103 = vector.shape_cast %102 : vector<1x1x256xf32> to vector<1x256xf32>
    %104 = vector.broadcast %103 : vector<1x256xf32> to vector<2x256xf32>
    %105 = arith.mulf %91, %104 : vector<2x256xf32>
    %106 = arith.addf %84, %105 : vector<2x256xf32>
    %c0_62 = arith.constant 0 : index
    %c112 = arith.constant 112 : index
    %c0_63 = arith.constant 0 : index
    %107 = vector.load %arg3[%c0_62, %c112, %c0_63] : memref<1x144x256xf32, #tpu.memory_space<vmem>>, vector<1x1x256xf32>
    %108 = vector.shape_cast %107 : vector<1x1x256xf32> to vector<1x256xf32>
    %109 = vector.broadcast %108 : vector<1x256xf32> to vector<2x256xf32>
    %110 = arith.mulf %91, %109 : vector<2x256xf32>
    %111 = arith.addf %89, %110 : vector<2x256xf32>
    %c0_64 = arith.constant 0 : index
    %c5 = arith.constant 5 : index
    %c0_65 = arith.constant 0 : index
    %112 = vector.load %arg2[%c0_64, %c5, %c0_65] : memref<2x36x256xf32, #tpu.memory_space<vmem>>, vector<2x1x256xf32>
    %113 = vector.shape_cast %112 : vector<2x1x256xf32> to vector<2x256xf32>
    %c0_66 = arith.constant 0 : index
    %c5_67 = arith.constant 5 : index
    %c0_68 = arith.constant 0 : index
    %114 = vector.load %arg3[%c0_66, %c5_67, %c0_68] : memref<1x144x256xf32, #tpu.memory_space<vmem>>, vector<1x1x256xf32>
    %115 = vector.shape_cast %114 : vector<1x1x256xf32> to vector<1x256xf32>
    %116 = vector.broadcast %115 : vector<1x256xf32> to vector<2x256xf32>
    %117 = arith.mulf %113, %116 : vector<2x256xf32>
    %118 = arith.addf %96, %117 : vector<2x256xf32>
    %c0_69 = arith.constant 0 : index
    %c41 = arith.constant 41 : index
    %c0_70 = arith.constant 0 : index
    %119 = vector.load %arg3[%c0_69, %c41, %c0_70] : memref<1x144x256xf32, #tpu.memory_space<vmem>>, vector<1x1x256xf32>
    %120 = vector.shape_cast %119 : vector<1x1x256xf32> to vector<1x256xf32>
    %121 = vector.broadcast %120 : vector<1x256xf32> to vector<2x256xf32>
    %122 = arith.mulf %113, %121 : vector<2x256xf32>
    %123 = arith.addf %101, %122 : vector<2x256xf32>
    %c0_71 = arith.constant 0 : index
    %c77 = arith.constant 77 : index
    %c0_72 = arith.constant 0 : index
    %124 = vector.load %arg3[%c0_71, %c77, %c0_72] : memref<1x144x256xf32, #tpu.memory_space<vmem>>, vector<1x1x256xf32>
    %125 = vector.shape_cast %124 : vector<1x1x256xf32> to vector<1x256xf32>
    %126 = vector.broadcast %125 : vector<1x256xf32> to vector<2x256xf32>
    %127 = arith.mulf %113, %126 : vector<2x256xf32>
    %128 = arith.addf %106, %127 : vector<2x256xf32>
    %c0_73 = arith.constant 0 : index
    %c113 = arith.constant 113 : index
    %c0_74 = arith.constant 0 : index
    %129 = vector.load %arg3[%c0_73, %c113, %c0_74] : memref<1x144x256xf32, #tpu.memory_space<vmem>>, vector<1x1x256xf32>
    %130 = vector.shape_cast %129 : vector<1x1x256xf32> to vector<1x256xf32>
    %131 = vector.broadcast %130 : vector<1x256xf32> to vector<2x256xf32>
    %132 = arith.mulf %113, %131 : vector<2x256xf32>
    %133 = arith.addf %111, %132 : vector<2x256xf32>
    %c0_75 = arith.constant 0 : index
    %c6 = arith.constant 6 : index
    %c0_76 = arith.constant 0 : index
    %134 = vector.load %arg2[%c0_75, %c6, %c0_76] : memref<2x36x256xf32, #tpu.memory_space<vmem>>, vector<2x1x256xf32>
    %135 = vector.shape_cast %134 : vector<2x1x256xf32> to vector<2x256xf32>
    %c0_77 = arith.constant 0 : index
    %c6_78 = arith.constant 6 : index
    %c0_79 = arith.constant 0 : index
    %136 = vector.load %arg3[%c0_77, %c6_78, %c0_79] : memref<1x144x256xf32, #tpu.memory_space<vmem>>, vector<1x1x256xf32>
    %137 = vector.shape_cast %136 : vector<1x1x256xf32> to vector<1x256xf32>
    %138 = vector.broadcast %137 : vector<1x256xf32> to vector<2x256xf32>
    %139 = arith.mulf %135, %138 : vector<2x256xf32>
    %140 = arith.addf %118, %139 : vector<2x256xf32>
    %c0_80 = arith.constant 0 : index
    %c42 = arith.constant 42 : index
    %c0_81 = arith.constant 0 : index
    %141 = vector.load %arg3[%c0_80, %c42, %c0_81] : memref<1x144x256xf32, #tpu.memory_space<vmem>>, vector<1x1x256xf32>
    %142 = vector.shape_cast %141 : vector<1x1x256xf32> to vector<1x256xf32>
    %143 = vector.broadcast %142 : vector<1x256xf32> to vector<2x256xf32>
    %144 = arith.mulf %135, %143 : vector<2x256xf32>
    %145 = arith.addf %123, %144 : vector<2x256xf32>
    %c0_82 = arith.constant 0 : index
    %c78 = arith.constant 78 : index
    %c0_83 = arith.constant 0 : index
    %146 = vector.load %arg3[%c0_82, %c78, %c0_83] : memref<1x144x256xf32, #tpu.memory_space<vmem>>, vector<1x1x256xf32>
    %147 = vector.shape_cast %146 : vector<1x1x256xf32> to vector<1x256xf32>
    %148 = vector.broadcast %147 : vector<1x256xf32> to vector<2x256xf32>
    %149 = arith.mulf %135, %148 : vector<2x256xf32>
    %150 = arith.addf %128, %149 : vector<2x256xf32>
    %c0_84 = arith.constant 0 : index
    %c114 = arith.constant 114 : index
    %c0_85 = arith.constant 0 : index
    %151 = vector.load %arg3[%c0_84, %c114, %c0_85] : memref<1x144x256xf32, #tpu.memory_space<vmem>>, vector<1x1x256xf32>
    %152 = vector.shape_cast %151 : vector<1x1x256xf32> to vector<1x256xf32>
    %153 = vector.broadcast %152 : vector<1x256xf32> to vector<2x256xf32>
    %154 = arith.mulf %135, %153 : vector<2x256xf32>
    %155 = arith.addf %133, %154 : vector<2x256xf32>
    %c0_86 = arith.constant 0 : index
    %c7 = arith.constant 7 : index
    %c0_87 = arith.constant 0 : index
    %156 = vector.load %arg2[%c0_86, %c7, %c0_87] : memref<2x36x256xf32, #tpu.memory_space<vmem>>, vector<2x1x256xf32>
    %157 = vector.shape_cast %156 : vector<2x1x256xf32> to vector<2x256xf32>
    %c0_88 = arith.constant 0 : index
    %c7_89 = arith.constant 7 : index
    %c0_90 = arith.constant 0 : index
    %158 = vector.load %arg3[%c0_88, %c7_89, %c0_90] : memref<1x144x256xf32, #tpu.memory_space<vmem>>, vector<1x1x256xf32>
    %159 = vector.shape_cast %158 : vector<1x1x256xf32> to vector<1x256xf32>
    %160 = vector.broadcast %159 : vector<1x256xf32> to vector<2x256xf32>
    %161 = arith.mulf %157, %160 : vector<2x256xf32>
    %162 = arith.addf %140, %161 : vector<2x256xf32>
    %c0_91 = arith.constant 0 : index
    %c43 = arith.constant 43 : index
    %c0_92 = arith.constant 0 : index
    %163 = vector.load %arg3[%c0_91, %c43, %c0_92] : memref<1x144x256xf32, #tpu.memory_space<vmem>>, vector<1x1x256xf32>
    %164 = vector.shape_cast %163 : vector<1x1x256xf32> to vector<1x256xf32>
    %165 = vector.broadcast %164 : vector<1x256xf32> to vector<2x256xf32>
    %166 = arith.mulf %157, %165 : vector<2x256xf32>
    %167 = arith.addf %145, %166 : vector<2x256xf32>
    %c0_93 = arith.constant 0 : index
    %c79 = arith.constant 79 : index
    %c0_94 = arith.constant 0 : index
    %168 = vector.load %arg3[%c0_93, %c79, %c0_94] : memref<1x144x256xf32, #tpu.memory_space<vmem>>, vector<1x1x256xf32>
    %169 = vector.shape_cast %168 : vector<1x1x256xf32> to vector<1x256xf32>
    %170 = vector.broadcast %169 : vector<1x256xf32> to vector<2x256xf32>
    %171 = arith.mulf %157, %170 : vector<2x256xf32>
    %172 = arith.addf %150, %171 : vector<2x256xf32>
    %c0_95 = arith.constant 0 : index
    %c115 = arith.constant 115 : index
    %c0_96 = arith.constant 0 : index
    %173 = vector.load %arg3[%c0_95, %c115, %c0_96] : memref<1x144x256xf32, #tpu.memory_space<vmem>>, vector<1x1x256xf32>
    %174 = vector.shape_cast %173 : vector<1x1x256xf32> to vector<1x256xf32>
    %175 = vector.broadcast %174 : vector<1x256xf32> to vector<2x256xf32>
    %176 = arith.mulf %157, %175 : vector<2x256xf32>
    %177 = arith.addf %155, %176 : vector<2x256xf32>
    %c0_97 = arith.constant 0 : index
    %c8 = arith.constant 8 : index
    %c0_98 = arith.constant 0 : index
    %178 = vector.load %arg2[%c0_97, %c8, %c0_98] : memref<2x36x256xf32, #tpu.memory_space<vmem>>, vector<2x1x256xf32>
    %179 = vector.shape_cast %178 : vector<2x1x256xf32> to vector<2x256xf32>
    %c0_99 = arith.constant 0 : index
    %c8_100 = arith.constant 8 : index
    %c0_101 = arith.constant 0 : index
    %180 = vector.load %arg3[%c0_99, %c8_100, %c0_101] : memref<1x144x256xf32, #tpu.memory_space<vmem>>, vector<1x1x256xf32>
    %181 = vector.shape_cast %180 : vector<1x1x256xf32> to vector<1x256xf32>
    %182 = vector.broadcast %181 : vector<1x256xf32> to vector<2x256xf32>
    %183 = arith.mulf %179, %182 : vector<2x256xf32>
    %184 = arith.addf %162, %183 : vector<2x256xf32>
    %c0_102 = arith.constant 0 : index
    %c44 = arith.constant 44 : index
    %c0_103 = arith.constant 0 : index
    %185 = vector.load %arg3[%c0_102, %c44, %c0_103] : memref<1x144x256xf32, #tpu.memory_space<vmem>>, vector<1x1x256xf32>
    %186 = vector.shape_cast %185 : vector<1x1x256xf32> to vector<1x256xf32>
    %187 = vector.broadcast %186 : vector<1x256xf32> to vector<2x256xf32>
    %188 = arith.mulf %179, %187 : vector<2x256xf32>
    %189 = arith.addf %167, %188 : vector<2x256xf32>
    %c0_104 = arith.constant 0 : index
    %c80 = arith.constant 80 : index
    %c0_105 = arith.constant 0 : index
    %190 = vector.load %arg3[%c0_104, %c80, %c0_105] : memref<1x144x256xf32, #tpu.memory_space<vmem>>, vector<1x1x256xf32>
    %191 = vector.shape_cast %190 : vector<1x1x256xf32> to vector<1x256xf32>
    %192 = vector.broadcast %191 : vector<1x256xf32> to vector<2x256xf32>
    %193 = arith.mulf %179, %192 : vector<2x256xf32>
    %194 = arith.addf %172, %193 : vector<2x256xf32>
    %c0_106 = arith.constant 0 : index
    %c116 = arith.constant 116 : index
    %c0_107 = arith.constant 0 : index
    %195 = vector.load %arg3[%c0_106, %c116, %c0_107] : memref<1x144x256xf32, #tpu.memory_space<vmem>>, vector<1x1x256xf32>
    %196 = vector.shape_cast %195 : vector<1x1x256xf32> to vector<1x256xf32>
    %197 = vector.broadcast %196 : vector<1x256xf32> to vector<2x256xf32>
    %198 = arith.mulf %179, %197 : vector<2x256xf32>
    %199 = arith.addf %177, %198 : vector<2x256xf32>
    %c0_108 = arith.constant 0 : index
    %c9 = arith.constant 9 : index
    %c0_109 = arith.constant 0 : index
    %200 = vector.load %arg2[%c0_108, %c9, %c0_109] : memref<2x36x256xf32, #tpu.memory_space<vmem>>, vector<2x1x256xf32>
    %201 = vector.shape_cast %200 : vector<2x1x256xf32> to vector<2x256xf32>
    %c0_110 = arith.constant 0 : index
    %c9_111 = arith.constant 9 : index
    %c0_112 = arith.constant 0 : index
    %202 = vector.load %arg3[%c0_110, %c9_111, %c0_112] : memref<1x144x256xf32, #tpu.memory_space<vmem>>, vector<1x1x256xf32>
    %203 = vector.shape_cast %202 : vector<1x1x256xf32> to vector<1x256xf32>
    %204 = vector.broadcast %203 : vector<1x256xf32> to vector<2x256xf32>
    %205 = arith.mulf %201, %204 : vector<2x256xf32>
    %206 = arith.addf %184, %205 : vector<2x256xf32>
    %c0_113 = arith.constant 0 : index
    %c45 = arith.constant 45 : index
    %c0_114 = arith.constant 0 : index
    %207 = vector.load %arg3[%c0_113, %c45, %c0_114] : memref<1x144x256xf32, #tpu.memory_space<vmem>>, vector<1x1x256xf32>
    %208 = vector.shape_cast %207 : vector<1x1x256xf32> to vector<1x256xf32>
    %209 = vector.broadcast %208 : vector<1x256xf32> to vector<2x256xf32>
    %210 = arith.mulf %201, %209 : vector<2x256xf32>
    %211 = arith.addf %189, %210 : vector<2x256xf32>
    %c0_115 = arith.constant 0 : index
    %c81 = arith.constant 81 : index
    %c0_116 = arith.constant 0 : index
    %212 = vector.load %arg3[%c0_115, %c81, %c0_116] : memref<1x144x256xf32, #tpu.memory_space<vmem>>, vector<1x1x256xf32>
    %213 = vector.shape_cast %212 : vector<1x1x256xf32> to vector<1x256xf32>
    %214 = vector.broadcast %213 : vector<1x256xf32> to vector<2x256xf32>
    %215 = arith.mulf %201, %214 : vector<2x256xf32>
    %216 = arith.addf %194, %215 : vector<2x256xf32>
    %c0_117 = arith.constant 0 : index
    %c117 = arith.constant 117 : index
    %c0_118 = arith.constant 0 : index
    %217 = vector.load %arg3[%c0_117, %c117, %c0_118] : memref<1x144x256xf32, #tpu.memory_space<vmem>>, vector<1x1x256xf32>
    %218 = vector.shape_cast %217 : vector<1x1x256xf32> to vector<1x256xf32>
    %219 = vector.broadcast %218 : vector<1x256xf32> to vector<2x256xf32>
    %220 = arith.mulf %201, %219 : vector<2x256xf32>
    %221 = arith.addf %199, %220 : vector<2x256xf32>
    %c0_119 = arith.constant 0 : index
    %c10 = arith.constant 10 : index
    %c0_120 = arith.constant 0 : index
    %222 = vector.load %arg2[%c0_119, %c10, %c0_120] : memref<2x36x256xf32, #tpu.memory_space<vmem>>, vector<2x1x256xf32>
    %223 = vector.shape_cast %222 : vector<2x1x256xf32> to vector<2x256xf32>
    %c0_121 = arith.constant 0 : index
    %c10_122 = arith.constant 10 : index
    %c0_123 = arith.constant 0 : index
    %224 = vector.load %arg3[%c0_121, %c10_122, %c0_123] : memref<1x144x256xf32, #tpu.memory_space<vmem>>, vector<1x1x256xf32>
    %225 = vector.shape_cast %224 : vector<1x1x256xf32> to vector<1x256xf32>
    %226 = vector.broadcast %225 : vector<1x256xf32> to vector<2x256xf32>
    %227 = arith.mulf %223, %226 : vector<2x256xf32>
    %228 = arith.addf %206, %227 : vector<2x256xf32>
    %c0_124 = arith.constant 0 : index
    %c46 = arith.constant 46 : index
    %c0_125 = arith.constant 0 : index
    %229 = vector.load %arg3[%c0_124, %c46, %c0_125] : memref<1x144x256xf32, #tpu.memory_space<vmem>>, vector<1x1x256xf32>
    %230 = vector.shape_cast %229 : vector<1x1x256xf32> to vector<1x256xf32>
    %231 = vector.broadcast %230 : vector<1x256xf32> to vector<2x256xf32>
    %232 = arith.mulf %223, %231 : vector<2x256xf32>
    %233 = arith.addf %211, %232 : vector<2x256xf32>
    %c0_126 = arith.constant 0 : index
    %c82 = arith.constant 82 : index
    %c0_127 = arith.constant 0 : index
    %234 = vector.load %arg3[%c0_126, %c82, %c0_127] : memref<1x144x256xf32, #tpu.memory_space<vmem>>, vector<1x1x256xf32>
    %235 = vector.shape_cast %234 : vector<1x1x256xf32> to vector<1x256xf32>
    %236 = vector.broadcast %235 : vector<1x256xf32> to vector<2x256xf32>
    %237 = arith.mulf %223, %236 : vector<2x256xf32>
    %238 = arith.addf %216, %237 : vector<2x256xf32>
    %c0_128 = arith.constant 0 : index
    %c118 = arith.constant 118 : index
    %c0_129 = arith.constant 0 : index
    %239 = vector.load %arg3[%c0_128, %c118, %c0_129] : memref<1x144x256xf32, #tpu.memory_space<vmem>>, vector<1x1x256xf32>
    %240 = vector.shape_cast %239 : vector<1x1x256xf32> to vector<1x256xf32>
    %241 = vector.broadcast %240 : vector<1x256xf32> to vector<2x256xf32>
    %242 = arith.mulf %223, %241 : vector<2x256xf32>
    %243 = arith.addf %221, %242 : vector<2x256xf32>
    %c0_130 = arith.constant 0 : index
    %c11 = arith.constant 11 : index
    %c0_131 = arith.constant 0 : index
    %244 = vector.load %arg2[%c0_130, %c11, %c0_131] : memref<2x36x256xf32, #tpu.memory_space<vmem>>, vector<2x1x256xf32>
    %245 = vector.shape_cast %244 : vector<2x1x256xf32> to vector<2x256xf32>
    %c0_132 = arith.constant 0 : index
    %c11_133 = arith.constant 11 : index
    %c0_134 = arith.constant 0 : index
    %246 = vector.load %arg3[%c0_132, %c11_133, %c0_134] : memref<1x144x256xf32, #tpu.memory_space<vmem>>, vector<1x1x256xf32>
    %247 = vector.shape_cast %246 : vector<1x1x256xf32> to vector<1x256xf32>
    %248 = vector.broadcast %247 : vector<1x256xf32> to vector<2x256xf32>
    %249 = arith.mulf %245, %248 : vector<2x256xf32>
    %250 = arith.addf %228, %249 : vector<2x256xf32>
    %c0_135 = arith.constant 0 : index
    %c47 = arith.constant 47 : index
    %c0_136 = arith.constant 0 : index
    %251 = vector.load %arg3[%c0_135, %c47, %c0_136] : memref<1x144x256xf32, #tpu.memory_space<vmem>>, vector<1x1x256xf32>
    %252 = vector.shape_cast %251 : vector<1x1x256xf32> to vector<1x256xf32>
    %253 = vector.broadcast %252 : vector<1x256xf32> to vector<2x256xf32>
    %254 = arith.mulf %245, %253 : vector<2x256xf32>
    %255 = arith.addf %233, %254 : vector<2x256xf32>
    %c0_137 = arith.constant 0 : index
    %c83 = arith.constant 83 : index
    %c0_138 = arith.constant 0 : index
    %256 = vector.load %arg3[%c0_137, %c83, %c0_138] : memref<1x144x256xf32, #tpu.memory_space<vmem>>, vector<1x1x256xf32>
    %257 = vector.shape_cast %256 : vector<1x1x256xf32> to vector<1x256xf32>
    %258 = vector.broadcast %257 : vector<1x256xf32> to vector<2x256xf32>
    %259 = arith.mulf %245, %258 : vector<2x256xf32>
    %260 = arith.addf %238, %259 : vector<2x256xf32>
    %c0_139 = arith.constant 0 : index
    %c119 = arith.constant 119 : index
    %c0_140 = arith.constant 0 : index
    %261 = vector.load %arg3[%c0_139, %c119, %c0_140] : memref<1x144x256xf32, #tpu.memory_space<vmem>>, vector<1x1x256xf32>
    %262 = vector.shape_cast %261 : vector<1x1x256xf32> to vector<1x256xf32>
    %263 = vector.broadcast %262 : vector<1x256xf32> to vector<2x256xf32>
    %264 = arith.mulf %245, %263 : vector<2x256xf32>
    %265 = arith.addf %243, %264 : vector<2x256xf32>
    %c0_141 = arith.constant 0 : index
    %c12 = arith.constant 12 : index
    %c0_142 = arith.constant 0 : index
    %266 = vector.load %arg2[%c0_141, %c12, %c0_142] : memref<2x36x256xf32, #tpu.memory_space<vmem>>, vector<2x1x256xf32>
    %267 = vector.shape_cast %266 : vector<2x1x256xf32> to vector<2x256xf32>
    %c0_143 = arith.constant 0 : index
    %c12_144 = arith.constant 12 : index
    %c0_145 = arith.constant 0 : index
    %268 = vector.load %arg3[%c0_143, %c12_144, %c0_145] : memref<1x144x256xf32, #tpu.memory_space<vmem>>, vector<1x1x256xf32>
    %269 = vector.shape_cast %268 : vector<1x1x256xf32> to vector<1x256xf32>
    %270 = vector.broadcast %269 : vector<1x256xf32> to vector<2x256xf32>
    %271 = arith.mulf %267, %270 : vector<2x256xf32>
    %272 = arith.addf %250, %271 : vector<2x256xf32>
    %c0_146 = arith.constant 0 : index
    %c48 = arith.constant 48 : index
    %c0_147 = arith.constant 0 : index
    %273 = vector.load %arg3[%c0_146, %c48, %c0_147] : memref<1x144x256xf32, #tpu.memory_space<vmem>>, vector<1x1x256xf32>
    %274 = vector.shape_cast %273 : vector<1x1x256xf32> to vector<1x256xf32>
    %275 = vector.broadcast %274 : vector<1x256xf32> to vector<2x256xf32>
    %276 = arith.mulf %267, %275 : vector<2x256xf32>
    %277 = arith.addf %255, %276 : vector<2x256xf32>
    %c0_148 = arith.constant 0 : index
    %c84 = arith.constant 84 : index
    %c0_149 = arith.constant 0 : index
    %278 = vector.load %arg3[%c0_148, %c84, %c0_149] : memref<1x144x256xf32, #tpu.memory_space<vmem>>, vector<1x1x256xf32>
    %279 = vector.shape_cast %278 : vector<1x1x256xf32> to vector<1x256xf32>
    %280 = vector.broadcast %279 : vector<1x256xf32> to vector<2x256xf32>
    %281 = arith.mulf %267, %280 : vector<2x256xf32>
    %282 = arith.addf %260, %281 : vector<2x256xf32>
    %c0_150 = arith.constant 0 : index
    %c120 = arith.constant 120 : index
    %c0_151 = arith.constant 0 : index
    %283 = vector.load %arg3[%c0_150, %c120, %c0_151] : memref<1x144x256xf32, #tpu.memory_space<vmem>>, vector<1x1x256xf32>
    %284 = vector.shape_cast %283 : vector<1x1x256xf32> to vector<1x256xf32>
    %285 = vector.broadcast %284 : vector<1x256xf32> to vector<2x256xf32>
    %286 = arith.mulf %267, %285 : vector<2x256xf32>
    %287 = arith.addf %265, %286 : vector<2x256xf32>
    %c0_152 = arith.constant 0 : index
    %c13 = arith.constant 13 : index
    %c0_153 = arith.constant 0 : index
    %288 = vector.load %arg2[%c0_152, %c13, %c0_153] : memref<2x36x256xf32, #tpu.memory_space<vmem>>, vector<2x1x256xf32>
    %289 = vector.shape_cast %288 : vector<2x1x256xf32> to vector<2x256xf32>
    %c0_154 = arith.constant 0 : index
    %c13_155 = arith.constant 13 : index
    %c0_156 = arith.constant 0 : index
    %290 = vector.load %arg3[%c0_154, %c13_155, %c0_156] : memref<1x144x256xf32, #tpu.memory_space<vmem>>, vector<1x1x256xf32>
    %291 = vector.shape_cast %290 : vector<1x1x256xf32> to vector<1x256xf32>
    %292 = vector.broadcast %291 : vector<1x256xf32> to vector<2x256xf32>
    %293 = arith.mulf %289, %292 : vector<2x256xf32>
    %294 = arith.addf %272, %293 : vector<2x256xf32>
    %c0_157 = arith.constant 0 : index
    %c49 = arith.constant 49 : index
    %c0_158 = arith.constant 0 : index
    %295 = vector.load %arg3[%c0_157, %c49, %c0_158] : memref<1x144x256xf32, #tpu.memory_space<vmem>>, vector<1x1x256xf32>
    %296 = vector.shape_cast %295 : vector<1x1x256xf32> to vector<1x256xf32>
    %297 = vector.broadcast %296 : vector<1x256xf32> to vector<2x256xf32>
    %298 = arith.mulf %289, %297 : vector<2x256xf32>
    %299 = arith.addf %277, %298 : vector<2x256xf32>
    %c0_159 = arith.constant 0 : index
    %c85 = arith.constant 85 : index
    %c0_160 = arith.constant 0 : index
    %300 = vector.load %arg3[%c0_159, %c85, %c0_160] : memref<1x144x256xf32, #tpu.memory_space<vmem>>, vector<1x1x256xf32>
    %301 = vector.shape_cast %300 : vector<1x1x256xf32> to vector<1x256xf32>
    %302 = vector.broadcast %301 : vector<1x256xf32> to vector<2x256xf32>
    %303 = arith.mulf %289, %302 : vector<2x256xf32>
    %304 = arith.addf %282, %303 : vector<2x256xf32>
    %c0_161 = arith.constant 0 : index
    %c121 = arith.constant 121 : index
    %c0_162 = arith.constant 0 : index
    %305 = vector.load %arg3[%c0_161, %c121, %c0_162] : memref<1x144x256xf32, #tpu.memory_space<vmem>>, vector<1x1x256xf32>
    %306 = vector.shape_cast %305 : vector<1x1x256xf32> to vector<1x256xf32>
    %307 = vector.broadcast %306 : vector<1x256xf32> to vector<2x256xf32>
    %308 = arith.mulf %289, %307 : vector<2x256xf32>
    %309 = arith.addf %287, %308 : vector<2x256xf32>
    %c0_163 = arith.constant 0 : index
    %c14 = arith.constant 14 : index
    %c0_164 = arith.constant 0 : index
    %310 = vector.load %arg2[%c0_163, %c14, %c0_164] : memref<2x36x256xf32, #tpu.memory_space<vmem>>, vector<2x1x256xf32>
    %311 = vector.shape_cast %310 : vector<2x1x256xf32> to vector<2x256xf32>
    %c0_165 = arith.constant 0 : index
    %c14_166 = arith.constant 14 : index
    %c0_167 = arith.constant 0 : index
    %312 = vector.load %arg3[%c0_165, %c14_166, %c0_167] : memref<1x144x256xf32, #tpu.memory_space<vmem>>, vector<1x1x256xf32>
    %313 = vector.shape_cast %312 : vector<1x1x256xf32> to vector<1x256xf32>
    %314 = vector.broadcast %313 : vector<1x256xf32> to vector<2x256xf32>
    %315 = arith.mulf %311, %314 : vector<2x256xf32>
    %316 = arith.addf %294, %315 : vector<2x256xf32>
    %c0_168 = arith.constant 0 : index
    %c50 = arith.constant 50 : index
    %c0_169 = arith.constant 0 : index
    %317 = vector.load %arg3[%c0_168, %c50, %c0_169] : memref<1x144x256xf32, #tpu.memory_space<vmem>>, vector<1x1x256xf32>
    %318 = vector.shape_cast %317 : vector<1x1x256xf32> to vector<1x256xf32>
    %319 = vector.broadcast %318 : vector<1x256xf32> to vector<2x256xf32>
    %320 = arith.mulf %311, %319 : vector<2x256xf32>
    %321 = arith.addf %299, %320 : vector<2x256xf32>
    %c0_170 = arith.constant 0 : index
    %c86 = arith.constant 86 : index
    %c0_171 = arith.constant 0 : index
    %322 = vector.load %arg3[%c0_170, %c86, %c0_171] : memref<1x144x256xf32, #tpu.memory_space<vmem>>, vector<1x1x256xf32>
    %323 = vector.shape_cast %322 : vector<1x1x256xf32> to vector<1x256xf32>
    %324 = vector.broadcast %323 : vector<1x256xf32> to vector<2x256xf32>
    %325 = arith.mulf %311, %324 : vector<2x256xf32>
    %326 = arith.addf %304, %325 : vector<2x256xf32>
    %c0_172 = arith.constant 0 : index
    %c122 = arith.constant 122 : index
    %c0_173 = arith.constant 0 : index
    %327 = vector.load %arg3[%c0_172, %c122, %c0_173] : memref<1x144x256xf32, #tpu.memory_space<vmem>>, vector<1x1x256xf32>
    %328 = vector.shape_cast %327 : vector<1x1x256xf32> to vector<1x256xf32>
    %329 = vector.broadcast %328 : vector<1x256xf32> to vector<2x256xf32>
    %330 = arith.mulf %311, %329 : vector<2x256xf32>
    %331 = arith.addf %309, %330 : vector<2x256xf32>
    %c0_174 = arith.constant 0 : index
    %c15 = arith.constant 15 : index
    %c0_175 = arith.constant 0 : index
    %332 = vector.load %arg2[%c0_174, %c15, %c0_175] : memref<2x36x256xf32, #tpu.memory_space<vmem>>, vector<2x1x256xf32>
    %333 = vector.shape_cast %332 : vector<2x1x256xf32> to vector<2x256xf32>
    %c0_176 = arith.constant 0 : index
    %c15_177 = arith.constant 15 : index
    %c0_178 = arith.constant 0 : index
    %334 = vector.load %arg3[%c0_176, %c15_177, %c0_178] : memref<1x144x256xf32, #tpu.memory_space<vmem>>, vector<1x1x256xf32>
    %335 = vector.shape_cast %334 : vector<1x1x256xf32> to vector<1x256xf32>
    %336 = vector.broadcast %335 : vector<1x256xf32> to vector<2x256xf32>
    %337 = arith.mulf %333, %336 : vector<2x256xf32>
    %338 = arith.addf %316, %337 : vector<2x256xf32>
    %c0_179 = arith.constant 0 : index
    %c51 = arith.constant 51 : index
    %c0_180 = arith.constant 0 : index
    %339 = vector.load %arg3[%c0_179, %c51, %c0_180] : memref<1x144x256xf32, #tpu.memory_space<vmem>>, vector<1x1x256xf32>
    %340 = vector.shape_cast %339 : vector<1x1x256xf32> to vector<1x256xf32>
    %341 = vector.broadcast %340 : vector<1x256xf32> to vector<2x256xf32>
    %342 = arith.mulf %333, %341 : vector<2x256xf32>
    %343 = arith.addf %321, %342 : vector<2x256xf32>
    %c0_181 = arith.constant 0 : index
    %c87 = arith.constant 87 : index
    %c0_182 = arith.constant 0 : index
    %344 = vector.load %arg3[%c0_181, %c87, %c0_182] : memref<1x144x256xf32, #tpu.memory_space<vmem>>, vector<1x1x256xf32>
    %345 = vector.shape_cast %344 : vector<1x1x256xf32> to vector<1x256xf32>
    %346 = vector.broadcast %345 : vector<1x256xf32> to vector<2x256xf32>
    %347 = arith.mulf %333, %346 : vector<2x256xf32>
    %348 = arith.addf %326, %347 : vector<2x256xf32>
    %c0_183 = arith.constant 0 : index
    %c123 = arith.constant 123 : index
    %c0_184 = arith.constant 0 : index
    %349 = vector.load %arg3[%c0_183, %c123, %c0_184] : memref<1x144x256xf32, #tpu.memory_space<vmem>>, vector<1x1x256xf32>
    %350 = vector.shape_cast %349 : vector<1x1x256xf32> to vector<1x256xf32>
    %351 = vector.broadcast %350 : vector<1x256xf32> to vector<2x256xf32>
    %352 = arith.mulf %333, %351 : vector<2x256xf32>
    %353 = arith.addf %331, %352 : vector<2x256xf32>
    %c0_185 = arith.constant 0 : index
    %c16 = arith.constant 16 : index
    %c0_186 = arith.constant 0 : index
    %354 = vector.load %arg2[%c0_185, %c16, %c0_186] : memref<2x36x256xf32, #tpu.memory_space<vmem>>, vector<2x1x256xf32>
    %355 = vector.shape_cast %354 : vector<2x1x256xf32> to vector<2x256xf32>
    %c0_187 = arith.constant 0 : index
    %c16_188 = arith.constant 16 : index
    %c0_189 = arith.constant 0 : index
    %356 = vector.load %arg3[%c0_187, %c16_188, %c0_189] : memref<1x144x256xf32, #tpu.memory_space<vmem>>, vector<1x1x256xf32>
    %357 = vector.shape_cast %356 : vector<1x1x256xf32> to vector<1x256xf32>
    %358 = vector.broadcast %357 : vector<1x256xf32> to vector<2x256xf32>
    %359 = arith.mulf %355, %358 : vector<2x256xf32>
    %360 = arith.addf %338, %359 : vector<2x256xf32>
    %c0_190 = arith.constant 0 : index
    %c52 = arith.constant 52 : index
    %c0_191 = arith.constant 0 : index
    %361 = vector.load %arg3[%c0_190, %c52, %c0_191] : memref<1x144x256xf32, #tpu.memory_space<vmem>>, vector<1x1x256xf32>
    %362 = vector.shape_cast %361 : vector<1x1x256xf32> to vector<1x256xf32>
    %363 = vector.broadcast %362 : vector<1x256xf32> to vector<2x256xf32>
    %364 = arith.mulf %355, %363 : vector<2x256xf32>
    %365 = arith.addf %343, %364 : vector<2x256xf32>
    %c0_192 = arith.constant 0 : index
    %c88 = arith.constant 88 : index
    %c0_193 = arith.constant 0 : index
    %366 = vector.load %arg3[%c0_192, %c88, %c0_193] : memref<1x144x256xf32, #tpu.memory_space<vmem>>, vector<1x1x256xf32>
    %367 = vector.shape_cast %366 : vector<1x1x256xf32> to vector<1x256xf32>
    %368 = vector.broadcast %367 : vector<1x256xf32> to vector<2x256xf32>
    %369 = arith.mulf %355, %368 : vector<2x256xf32>
    %370 = arith.addf %348, %369 : vector<2x256xf32>
    %c0_194 = arith.constant 0 : index
    %c124 = arith.constant 124 : index
    %c0_195 = arith.constant 0 : index
    %371 = vector.load %arg3[%c0_194, %c124, %c0_195] : memref<1x144x256xf32, #tpu.memory_space<vmem>>, vector<1x1x256xf32>
    %372 = vector.shape_cast %371 : vector<1x1x256xf32> to vector<1x256xf32>
    %373 = vector.broadcast %372 : vector<1x256xf32> to vector<2x256xf32>
    %374 = arith.mulf %355, %373 : vector<2x256xf32>
    %375 = arith.addf %353, %374 : vector<2x256xf32>
    %c0_196 = arith.constant 0 : index
    %c17 = arith.constant 17 : index
    %c0_197 = arith.constant 0 : index
    %376 = vector.load %arg2[%c0_196, %c17, %c0_197] : memref<2x36x256xf32, #tpu.memory_space<vmem>>, vector<2x1x256xf32>
    %377 = vector.shape_cast %376 : vector<2x1x256xf32> to vector<2x256xf32>
    %c0_198 = arith.constant 0 : index
    %c17_199 = arith.constant 17 : index
    %c0_200 = arith.constant 0 : index
    %378 = vector.load %arg3[%c0_198, %c17_199, %c0_200] : memref<1x144x256xf32, #tpu.memory_space<vmem>>, vector<1x1x256xf32>
    %379 = vector.shape_cast %378 : vector<1x1x256xf32> to vector<1x256xf32>
    %380 = vector.broadcast %379 : vector<1x256xf32> to vector<2x256xf32>
    %381 = arith.mulf %377, %380 : vector<2x256xf32>
    %382 = arith.addf %360, %381 : vector<2x256xf32>
    %c0_201 = arith.constant 0 : index
    %c53 = arith.constant 53 : index
    %c0_202 = arith.constant 0 : index
    %383 = vector.load %arg3[%c0_201, %c53, %c0_202] : memref<1x144x256xf32, #tpu.memory_space<vmem>>, vector<1x1x256xf32>
    %384 = vector.shape_cast %383 : vector<1x1x256xf32> to vector<1x256xf32>
    %385 = vector.broadcast %384 : vector<1x256xf32> to vector<2x256xf32>
    %386 = arith.mulf %377, %385 : vector<2x256xf32>
    %387 = arith.addf %365, %386 : vector<2x256xf32>
    %c0_203 = arith.constant 0 : index
    %c89 = arith.constant 89 : index
    %c0_204 = arith.constant 0 : index
    %388 = vector.load %arg3[%c0_203, %c89, %c0_204] : memref<1x144x256xf32, #tpu.memory_space<vmem>>, vector<1x1x256xf32>
    %389 = vector.shape_cast %388 : vector<1x1x256xf32> to vector<1x256xf32>
    %390 = vector.broadcast %389 : vector<1x256xf32> to vector<2x256xf32>
    %391 = arith.mulf %377, %390 : vector<2x256xf32>
    %392 = arith.addf %370, %391 : vector<2x256xf32>
    %c0_205 = arith.constant 0 : index
    %c125 = arith.constant 125 : index
    %c0_206 = arith.constant 0 : index
    %393 = vector.load %arg3[%c0_205, %c125, %c0_206] : memref<1x144x256xf32, #tpu.memory_space<vmem>>, vector<1x1x256xf32>
    %394 = vector.shape_cast %393 : vector<1x1x256xf32> to vector<1x256xf32>
    %395 = vector.broadcast %394 : vector<1x256xf32> to vector<2x256xf32>
    %396 = arith.mulf %377, %395 : vector<2x256xf32>
    %397 = arith.addf %375, %396 : vector<2x256xf32>
    %c0_207 = arith.constant 0 : index
    %c18 = arith.constant 18 : index
    %c0_208 = arith.constant 0 : index
    %398 = vector.load %arg2[%c0_207, %c18, %c0_208] : memref<2x36x256xf32, #tpu.memory_space<vmem>>, vector<2x1x256xf32>
    %399 = vector.shape_cast %398 : vector<2x1x256xf32> to vector<2x256xf32>
    %c0_209 = arith.constant 0 : index
    %c18_210 = arith.constant 18 : index
    %c0_211 = arith.constant 0 : index
    %400 = vector.load %arg3[%c0_209, %c18_210, %c0_211] : memref<1x144x256xf32, #tpu.memory_space<vmem>>, vector<1x1x256xf32>
    %401 = vector.shape_cast %400 : vector<1x1x256xf32> to vector<1x256xf32>
    %402 = vector.broadcast %401 : vector<1x256xf32> to vector<2x256xf32>
    %403 = arith.mulf %399, %402 : vector<2x256xf32>
    %404 = arith.addf %382, %403 : vector<2x256xf32>
    %c0_212 = arith.constant 0 : index
    %c54 = arith.constant 54 : index
    %c0_213 = arith.constant 0 : index
    %405 = vector.load %arg3[%c0_212, %c54, %c0_213] : memref<1x144x256xf32, #tpu.memory_space<vmem>>, vector<1x1x256xf32>
    %406 = vector.shape_cast %405 : vector<1x1x256xf32> to vector<1x256xf32>
    %407 = vector.broadcast %406 : vector<1x256xf32> to vector<2x256xf32>
    %408 = arith.mulf %399, %407 : vector<2x256xf32>
    %409 = arith.addf %387, %408 : vector<2x256xf32>
    %c0_214 = arith.constant 0 : index
    %c90 = arith.constant 90 : index
    %c0_215 = arith.constant 0 : index
    %410 = vector.load %arg3[%c0_214, %c90, %c0_215] : memref<1x144x256xf32, #tpu.memory_space<vmem>>, vector<1x1x256xf32>
    %411 = vector.shape_cast %410 : vector<1x1x256xf32> to vector<1x256xf32>
    %412 = vector.broadcast %411 : vector<1x256xf32> to vector<2x256xf32>
    %413 = arith.mulf %399, %412 : vector<2x256xf32>
    %414 = arith.addf %392, %413 : vector<2x256xf32>
    %c0_216 = arith.constant 0 : index
    %c126 = arith.constant 126 : index
    %c0_217 = arith.constant 0 : index
    %415 = vector.load %arg3[%c0_216, %c126, %c0_217] : memref<1x144x256xf32, #tpu.memory_space<vmem>>, vector<1x1x256xf32>
    %416 = vector.shape_cast %415 : vector<1x1x256xf32> to vector<1x256xf32>
    %417 = vector.broadcast %416 : vector<1x256xf32> to vector<2x256xf32>
    %418 = arith.mulf %399, %417 : vector<2x256xf32>
    %419 = arith.addf %397, %418 : vector<2x256xf32>
    %c0_218 = arith.constant 0 : index
    %c19 = arith.constant 19 : index
    %c0_219 = arith.constant 0 : index
    %420 = vector.load %arg2[%c0_218, %c19, %c0_219] : memref<2x36x256xf32, #tpu.memory_space<vmem>>, vector<2x1x256xf32>
    %421 = vector.shape_cast %420 : vector<2x1x256xf32> to vector<2x256xf32>
    %c0_220 = arith.constant 0 : index
    %c19_221 = arith.constant 19 : index
    %c0_222 = arith.constant 0 : index
    %422 = vector.load %arg3[%c0_220, %c19_221, %c0_222] : memref<1x144x256xf32, #tpu.memory_space<vmem>>, vector<1x1x256xf32>
    %423 = vector.shape_cast %422 : vector<1x1x256xf32> to vector<1x256xf32>
    %424 = vector.broadcast %423 : vector<1x256xf32> to vector<2x256xf32>
    %425 = arith.mulf %421, %424 : vector<2x256xf32>
    %426 = arith.addf %404, %425 : vector<2x256xf32>
    %c0_223 = arith.constant 0 : index
    %c55 = arith.constant 55 : index
    %c0_224 = arith.constant 0 : index
    %427 = vector.load %arg3[%c0_223, %c55, %c0_224] : memref<1x144x256xf32, #tpu.memory_space<vmem>>, vector<1x1x256xf32>
    %428 = vector.shape_cast %427 : vector<1x1x256xf32> to vector<1x256xf32>
    %429 = vector.broadcast %428 : vector<1x256xf32> to vector<2x256xf32>
    %430 = arith.mulf %421, %429 : vector<2x256xf32>
    %431 = arith.addf %409, %430 : vector<2x256xf32>
    %c0_225 = arith.constant 0 : index
    %c91 = arith.constant 91 : index
    %c0_226 = arith.constant 0 : index
    %432 = vector.load %arg3[%c0_225, %c91, %c0_226] : memref<1x144x256xf32, #tpu.memory_space<vmem>>, vector<1x1x256xf32>
    %433 = vector.shape_cast %432 : vector<1x1x256xf32> to vector<1x256xf32>
    %434 = vector.broadcast %433 : vector<1x256xf32> to vector<2x256xf32>
    %435 = arith.mulf %421, %434 : vector<2x256xf32>
    %436 = arith.addf %414, %435 : vector<2x256xf32>
    %c0_227 = arith.constant 0 : index
    %c127 = arith.constant 127 : index
    %c0_228 = arith.constant 0 : index
    %437 = vector.load %arg3[%c0_227, %c127, %c0_228] : memref<1x144x256xf32, #tpu.memory_space<vmem>>, vector<1x1x256xf32>
    %438 = vector.shape_cast %437 : vector<1x1x256xf32> to vector<1x256xf32>
    %439 = vector.broadcast %438 : vector<1x256xf32> to vector<2x256xf32>
    %440 = arith.mulf %421, %439 : vector<2x256xf32>
    %441 = arith.addf %419, %440 : vector<2x256xf32>
    %c0_229 = arith.constant 0 : index
    %c20 = arith.constant 20 : index
    %c0_230 = arith.constant 0 : index
    %442 = vector.load %arg2[%c0_229, %c20, %c0_230] : memref<2x36x256xf32, #tpu.memory_space<vmem>>, vector<2x1x256xf32>
    %443 = vector.shape_cast %442 : vector<2x1x256xf32> to vector<2x256xf32>
    %c0_231 = arith.constant 0 : index
    %c20_232 = arith.constant 20 : index
    %c0_233 = arith.constant 0 : index
    %444 = vector.load %arg3[%c0_231, %c20_232, %c0_233] : memref<1x144x256xf32, #tpu.memory_space<vmem>>, vector<1x1x256xf32>
    %445 = vector.shape_cast %444 : vector<1x1x256xf32> to vector<1x256xf32>
    %446 = vector.broadcast %445 : vector<1x256xf32> to vector<2x256xf32>
    %447 = arith.mulf %443, %446 : vector<2x256xf32>
    %448 = arith.addf %426, %447 : vector<2x256xf32>
    %c0_234 = arith.constant 0 : index
    %c56 = arith.constant 56 : index
    %c0_235 = arith.constant 0 : index
    %449 = vector.load %arg3[%c0_234, %c56, %c0_235] : memref<1x144x256xf32, #tpu.memory_space<vmem>>, vector<1x1x256xf32>
    %450 = vector.shape_cast %449 : vector<1x1x256xf32> to vector<1x256xf32>
    %451 = vector.broadcast %450 : vector<1x256xf32> to vector<2x256xf32>
    %452 = arith.mulf %443, %451 : vector<2x256xf32>
    %453 = arith.addf %431, %452 : vector<2x256xf32>
    %c0_236 = arith.constant 0 : index
    %c92 = arith.constant 92 : index
    %c0_237 = arith.constant 0 : index
    %454 = vector.load %arg3[%c0_236, %c92, %c0_237] : memref<1x144x256xf32, #tpu.memory_space<vmem>>, vector<1x1x256xf32>
    %455 = vector.shape_cast %454 : vector<1x1x256xf32> to vector<1x256xf32>
    %456 = vector.broadcast %455 : vector<1x256xf32> to vector<2x256xf32>
    %457 = arith.mulf %443, %456 : vector<2x256xf32>
    %458 = arith.addf %436, %457 : vector<2x256xf32>
    %c0_238 = arith.constant 0 : index
    %c128 = arith.constant 128 : index
    %c0_239 = arith.constant 0 : index
    %459 = vector.load %arg3[%c0_238, %c128, %c0_239] : memref<1x144x256xf32, #tpu.memory_space<vmem>>, vector<1x1x256xf32>
    %460 = vector.shape_cast %459 : vector<1x1x256xf32> to vector<1x256xf32>
    %461 = vector.broadcast %460 : vector<1x256xf32> to vector<2x256xf32>
    %462 = arith.mulf %443, %461 : vector<2x256xf32>
    %463 = arith.addf %441, %462 : vector<2x256xf32>
    %c0_240 = arith.constant 0 : index
    %c21 = arith.constant 21 : index
    %c0_241 = arith.constant 0 : index
    %464 = vector.load %arg2[%c0_240, %c21, %c0_241] : memref<2x36x256xf32, #tpu.memory_space<vmem>>, vector<2x1x256xf32>
    %465 = vector.shape_cast %464 : vector<2x1x256xf32> to vector<2x256xf32>
    %c0_242 = arith.constant 0 : index
    %c21_243 = arith.constant 21 : index
    %c0_244 = arith.constant 0 : index
    %466 = vector.load %arg3[%c0_242, %c21_243, %c0_244] : memref<1x144x256xf32, #tpu.memory_space<vmem>>, vector<1x1x256xf32>
    %467 = vector.shape_cast %466 : vector<1x1x256xf32> to vector<1x256xf32>
    %468 = vector.broadcast %467 : vector<1x256xf32> to vector<2x256xf32>
    %469 = arith.mulf %465, %468 : vector<2x256xf32>
    %470 = arith.addf %448, %469 : vector<2x256xf32>
    %c0_245 = arith.constant 0 : index
    %c57 = arith.constant 57 : index
    %c0_246 = arith.constant 0 : index
    %471 = vector.load %arg3[%c0_245, %c57, %c0_246] : memref<1x144x256xf32, #tpu.memory_space<vmem>>, vector<1x1x256xf32>
    %472 = vector.shape_cast %471 : vector<1x1x256xf32> to vector<1x256xf32>
    %473 = vector.broadcast %472 : vector<1x256xf32> to vector<2x256xf32>
    %474 = arith.mulf %465, %473 : vector<2x256xf32>
    %475 = arith.addf %453, %474 : vector<2x256xf32>
    %c0_247 = arith.constant 0 : index
    %c93 = arith.constant 93 : index
    %c0_248 = arith.constant 0 : index
    %476 = vector.load %arg3[%c0_247, %c93, %c0_248] : memref<1x144x256xf32, #tpu.memory_space<vmem>>, vector<1x1x256xf32>
    %477 = vector.shape_cast %476 : vector<1x1x256xf32> to vector<1x256xf32>
    %478 = vector.broadcast %477 : vector<1x256xf32> to vector<2x256xf32>
    %479 = arith.mulf %465, %478 : vector<2x256xf32>
    %480 = arith.addf %458, %479 : vector<2x256xf32>
    %c0_249 = arith.constant 0 : index
    %c129 = arith.constant 129 : index
    %c0_250 = arith.constant 0 : index
    %481 = vector.load %arg3[%c0_249, %c129, %c0_250] : memref<1x144x256xf32, #tpu.memory_space<vmem>>, vector<1x1x256xf32>
    %482 = vector.shape_cast %481 : vector<1x1x256xf32> to vector<1x256xf32>
    %483 = vector.broadcast %482 : vector<1x256xf32> to vector<2x256xf32>
    %484 = arith.mulf %465, %483 : vector<2x256xf32>
    %485 = arith.addf %463, %484 : vector<2x256xf32>
    %c0_251 = arith.constant 0 : index
    %c22 = arith.constant 22 : index
    %c0_252 = arith.constant 0 : index
    %486 = vector.load %arg2[%c0_251, %c22, %c0_252] : memref<2x36x256xf32, #tpu.memory_space<vmem>>, vector<2x1x256xf32>
    %487 = vector.shape_cast %486 : vector<2x1x256xf32> to vector<2x256xf32>
    %c0_253 = arith.constant 0 : index
    %c22_254 = arith.constant 22 : index
    %c0_255 = arith.constant 0 : index
    %488 = vector.load %arg3[%c0_253, %c22_254, %c0_255] : memref<1x144x256xf32, #tpu.memory_space<vmem>>, vector<1x1x256xf32>
    %489 = vector.shape_cast %488 : vector<1x1x256xf32> to vector<1x256xf32>
    %490 = vector.broadcast %489 : vector<1x256xf32> to vector<2x256xf32>
    %491 = arith.mulf %487, %490 : vector<2x256xf32>
    %492 = arith.addf %470, %491 : vector<2x256xf32>
    %c0_256 = arith.constant 0 : index
    %c58 = arith.constant 58 : index
    %c0_257 = arith.constant 0 : index
    %493 = vector.load %arg3[%c0_256, %c58, %c0_257] : memref<1x144x256xf32, #tpu.memory_space<vmem>>, vector<1x1x256xf32>
    %494 = vector.shape_cast %493 : vector<1x1x256xf32> to vector<1x256xf32>
    %495 = vector.broadcast %494 : vector<1x256xf32> to vector<2x256xf32>
    %496 = arith.mulf %487, %495 : vector<2x256xf32>
    %497 = arith.addf %475, %496 : vector<2x256xf32>
    %c0_258 = arith.constant 0 : index
    %c94 = arith.constant 94 : index
    %c0_259 = arith.constant 0 : index
    %498 = vector.load %arg3[%c0_258, %c94, %c0_259] : memref<1x144x256xf32, #tpu.memory_space<vmem>>, vector<1x1x256xf32>
    %499 = vector.shape_cast %498 : vector<1x1x256xf32> to vector<1x256xf32>
    %500 = vector.broadcast %499 : vector<1x256xf32> to vector<2x256xf32>
    %501 = arith.mulf %487, %500 : vector<2x256xf32>
    %502 = arith.addf %480, %501 : vector<2x256xf32>
    %c0_260 = arith.constant 0 : index
    %c130 = arith.constant 130 : index
    %c0_261 = arith.constant 0 : index
    %503 = vector.load %arg3[%c0_260, %c130, %c0_261] : memref<1x144x256xf32, #tpu.memory_space<vmem>>, vector<1x1x256xf32>
    %504 = vector.shape_cast %503 : vector<1x1x256xf32> to vector<1x256xf32>
    %505 = vector.broadcast %504 : vector<1x256xf32> to vector<2x256xf32>
    %506 = arith.mulf %487, %505 : vector<2x256xf32>
    %507 = arith.addf %485, %506 : vector<2x256xf32>
    %c0_262 = arith.constant 0 : index
    %c23 = arith.constant 23 : index
    %c0_263 = arith.constant 0 : index
    %508 = vector.load %arg2[%c0_262, %c23, %c0_263] : memref<2x36x256xf32, #tpu.memory_space<vmem>>, vector<2x1x256xf32>
    %509 = vector.shape_cast %508 : vector<2x1x256xf32> to vector<2x256xf32>
    %c0_264 = arith.constant 0 : index
    %c23_265 = arith.constant 23 : index
    %c0_266 = arith.constant 0 : index
    %510 = vector.load %arg3[%c0_264, %c23_265, %c0_266] : memref<1x144x256xf32, #tpu.memory_space<vmem>>, vector<1x1x256xf32>
    %511 = vector.shape_cast %510 : vector<1x1x256xf32> to vector<1x256xf32>
    %512 = vector.broadcast %511 : vector<1x256xf32> to vector<2x256xf32>
    %513 = arith.mulf %509, %512 : vector<2x256xf32>
    %514 = arith.addf %492, %513 : vector<2x256xf32>
    %c0_267 = arith.constant 0 : index
    %c59 = arith.constant 59 : index
    %c0_268 = arith.constant 0 : index
    %515 = vector.load %arg3[%c0_267, %c59, %c0_268] : memref<1x144x256xf32, #tpu.memory_space<vmem>>, vector<1x1x256xf32>
    %516 = vector.shape_cast %515 : vector<1x1x256xf32> to vector<1x256xf32>
    %517 = vector.broadcast %516 : vector<1x256xf32> to vector<2x256xf32>
    %518 = arith.mulf %509, %517 : vector<2x256xf32>
    %519 = arith.addf %497, %518 : vector<2x256xf32>
    %c0_269 = arith.constant 0 : index
    %c95 = arith.constant 95 : index
    %c0_270 = arith.constant 0 : index
    %520 = vector.load %arg3[%c0_269, %c95, %c0_270] : memref<1x144x256xf32, #tpu.memory_space<vmem>>, vector<1x1x256xf32>
    %521 = vector.shape_cast %520 : vector<1x1x256xf32> to vector<1x256xf32>
    %522 = vector.broadcast %521 : vector<1x256xf32> to vector<2x256xf32>
    %523 = arith.mulf %509, %522 : vector<2x256xf32>
    %524 = arith.addf %502, %523 : vector<2x256xf32>
    %c0_271 = arith.constant 0 : index
    %c131 = arith.constant 131 : index
    %c0_272 = arith.constant 0 : index
    %525 = vector.load %arg3[%c0_271, %c131, %c0_272] : memref<1x144x256xf32, #tpu.memory_space<vmem>>, vector<1x1x256xf32>
    %526 = vector.shape_cast %525 : vector<1x1x256xf32> to vector<1x256xf32>
    %527 = vector.broadcast %526 : vector<1x256xf32> to vector<2x256xf32>
    %528 = arith.mulf %509, %527 : vector<2x256xf32>
    %529 = arith.addf %507, %528 : vector<2x256xf32>
    %c0_273 = arith.constant 0 : index
    %c24 = arith.constant 24 : index
    %c0_274 = arith.constant 0 : index
    %530 = vector.load %arg2[%c0_273, %c24, %c0_274] : memref<2x36x256xf32, #tpu.memory_space<vmem>>, vector<2x1x256xf32>
    %531 = vector.shape_cast %530 : vector<2x1x256xf32> to vector<2x256xf32>
    %c0_275 = arith.constant 0 : index
    %c24_276 = arith.constant 24 : index
    %c0_277 = arith.constant 0 : index
    %532 = vector.load %arg3[%c0_275, %c24_276, %c0_277] : memref<1x144x256xf32, #tpu.memory_space<vmem>>, vector<1x1x256xf32>
    %533 = vector.shape_cast %532 : vector<1x1x256xf32> to vector<1x256xf32>
    %534 = vector.broadcast %533 : vector<1x256xf32> to vector<2x256xf32>
    %535 = arith.mulf %531, %534 : vector<2x256xf32>
    %536 = arith.addf %514, %535 : vector<2x256xf32>
    %c0_278 = arith.constant 0 : index
    %c60 = arith.constant 60 : index
    %c0_279 = arith.constant 0 : index
    %537 = vector.load %arg3[%c0_278, %c60, %c0_279] : memref<1x144x256xf32, #tpu.memory_space<vmem>>, vector<1x1x256xf32>
    %538 = vector.shape_cast %537 : vector<1x1x256xf32> to vector<1x256xf32>
    %539 = vector.broadcast %538 : vector<1x256xf32> to vector<2x256xf32>
    %540 = arith.mulf %531, %539 : vector<2x256xf32>
    %541 = arith.addf %519, %540 : vector<2x256xf32>
    %c0_280 = arith.constant 0 : index
    %c96 = arith.constant 96 : index
    %c0_281 = arith.constant 0 : index
    %542 = vector.load %arg3[%c0_280, %c96, %c0_281] : memref<1x144x256xf32, #tpu.memory_space<vmem>>, vector<1x1x256xf32>
    %543 = vector.shape_cast %542 : vector<1x1x256xf32> to vector<1x256xf32>
    %544 = vector.broadcast %543 : vector<1x256xf32> to vector<2x256xf32>
    %545 = arith.mulf %531, %544 : vector<2x256xf32>
    %546 = arith.addf %524, %545 : vector<2x256xf32>
    %c0_282 = arith.constant 0 : index
    %c132 = arith.constant 132 : index
    %c0_283 = arith.constant 0 : index
    %547 = vector.load %arg3[%c0_282, %c132, %c0_283] : memref<1x144x256xf32, #tpu.memory_space<vmem>>, vector<1x1x256xf32>
    %548 = vector.shape_cast %547 : vector<1x1x256xf32> to vector<1x256xf32>
    %549 = vector.broadcast %548 : vector<1x256xf32> to vector<2x256xf32>
    %550 = arith.mulf %531, %549 : vector<2x256xf32>
    %551 = arith.addf %529, %550 : vector<2x256xf32>
    %c0_284 = arith.constant 0 : index
    %c25 = arith.constant 25 : index
    %c0_285 = arith.constant 0 : index
    %552 = vector.load %arg2[%c0_284, %c25, %c0_285] : memref<2x36x256xf32, #tpu.memory_space<vmem>>, vector<2x1x256xf32>
    %553 = vector.shape_cast %552 : vector<2x1x256xf32> to vector<2x256xf32>
    %c0_286 = arith.constant 0 : index
    %c25_287 = arith.constant 25 : index
    %c0_288 = arith.constant 0 : index
    %554 = vector.load %arg3[%c0_286, %c25_287, %c0_288] : memref<1x144x256xf32, #tpu.memory_space<vmem>>, vector<1x1x256xf32>
    %555 = vector.shape_cast %554 : vector<1x1x256xf32> to vector<1x256xf32>
    %556 = vector.broadcast %555 : vector<1x256xf32> to vector<2x256xf32>
    %557 = arith.mulf %553, %556 : vector<2x256xf32>
    %558 = arith.addf %536, %557 : vector<2x256xf32>
    %c0_289 = arith.constant 0 : index
    %c61 = arith.constant 61 : index
    %c0_290 = arith.constant 0 : index
    %559 = vector.load %arg3[%c0_289, %c61, %c0_290] : memref<1x144x256xf32, #tpu.memory_space<vmem>>, vector<1x1x256xf32>
    %560 = vector.shape_cast %559 : vector<1x1x256xf32> to vector<1x256xf32>
    %561 = vector.broadcast %560 : vector<1x256xf32> to vector<2x256xf32>
    %562 = arith.mulf %553, %561 : vector<2x256xf32>
    %563 = arith.addf %541, %562 : vector<2x256xf32>
    %c0_291 = arith.constant 0 : index
    %c97 = arith.constant 97 : index
    %c0_292 = arith.constant 0 : index
    %564 = vector.load %arg3[%c0_291, %c97, %c0_292] : memref<1x144x256xf32, #tpu.memory_space<vmem>>, vector<1x1x256xf32>
    %565 = vector.shape_cast %564 : vector<1x1x256xf32> to vector<1x256xf32>
    %566 = vector.broadcast %565 : vector<1x256xf32> to vector<2x256xf32>
    %567 = arith.mulf %553, %566 : vector<2x256xf32>
    %568 = arith.addf %546, %567 : vector<2x256xf32>
    %c0_293 = arith.constant 0 : index
    %c133 = arith.constant 133 : index
    %c0_294 = arith.constant 0 : index
    %569 = vector.load %arg3[%c0_293, %c133, %c0_294] : memref<1x144x256xf32, #tpu.memory_space<vmem>>, vector<1x1x256xf32>
    %570 = vector.shape_cast %569 : vector<1x1x256xf32> to vector<1x256xf32>
    %571 = vector.broadcast %570 : vector<1x256xf32> to vector<2x256xf32>
    %572 = arith.mulf %553, %571 : vector<2x256xf32>
    %573 = arith.addf %551, %572 : vector<2x256xf32>
    %c0_295 = arith.constant 0 : index
    %c26 = arith.constant 26 : index
    %c0_296 = arith.constant 0 : index
    %574 = vector.load %arg2[%c0_295, %c26, %c0_296] : memref<2x36x256xf32, #tpu.memory_space<vmem>>, vector<2x1x256xf32>
    %575 = vector.shape_cast %574 : vector<2x1x256xf32> to vector<2x256xf32>
    %c0_297 = arith.constant 0 : index
    %c26_298 = arith.constant 26 : index
    %c0_299 = arith.constant 0 : index
    %576 = vector.load %arg3[%c0_297, %c26_298, %c0_299] : memref<1x144x256xf32, #tpu.memory_space<vmem>>, vector<1x1x256xf32>
    %577 = vector.shape_cast %576 : vector<1x1x256xf32> to vector<1x256xf32>
    %578 = vector.broadcast %577 : vector<1x256xf32> to vector<2x256xf32>
    %579 = arith.mulf %575, %578 : vector<2x256xf32>
    %580 = arith.addf %558, %579 : vector<2x256xf32>
    %c0_300 = arith.constant 0 : index
    %c62 = arith.constant 62 : index
    %c0_301 = arith.constant 0 : index
    %581 = vector.load %arg3[%c0_300, %c62, %c0_301] : memref<1x144x256xf32, #tpu.memory_space<vmem>>, vector<1x1x256xf32>
    %582 = vector.shape_cast %581 : vector<1x1x256xf32> to vector<1x256xf32>
    %583 = vector.broadcast %582 : vector<1x256xf32> to vector<2x256xf32>
    %584 = arith.mulf %575, %583 : vector<2x256xf32>
    %585 = arith.addf %563, %584 : vector<2x256xf32>
    %c0_302 = arith.constant 0 : index
    %c98 = arith.constant 98 : index
    %c0_303 = arith.constant 0 : index
    %586 = vector.load %arg3[%c0_302, %c98, %c0_303] : memref<1x144x256xf32, #tpu.memory_space<vmem>>, vector<1x1x256xf32>
    %587 = vector.shape_cast %586 : vector<1x1x256xf32> to vector<1x256xf32>
    %588 = vector.broadcast %587 : vector<1x256xf32> to vector<2x256xf32>
    %589 = arith.mulf %575, %588 : vector<2x256xf32>
    %590 = arith.addf %568, %589 : vector<2x256xf32>
    %c0_304 = arith.constant 0 : index
    %c134 = arith.constant 134 : index
    %c0_305 = arith.constant 0 : index
    %591 = vector.load %arg3[%c0_304, %c134, %c0_305] : memref<1x144x256xf32, #tpu.memory_space<vmem>>, vector<1x1x256xf32>
    %592 = vector.shape_cast %591 : vector<1x1x256xf32> to vector<1x256xf32>
    %593 = vector.broadcast %592 : vector<1x256xf32> to vector<2x256xf32>
    %594 = arith.mulf %575, %593 : vector<2x256xf32>
    %595 = arith.addf %573, %594 : vector<2x256xf32>
    %c0_306 = arith.constant 0 : index
    %c27 = arith.constant 27 : index
    %c0_307 = arith.constant 0 : index
    %596 = vector.load %arg2[%c0_306, %c27, %c0_307] : memref<2x36x256xf32, #tpu.memory_space<vmem>>, vector<2x1x256xf32>
    %597 = vector.shape_cast %596 : vector<2x1x256xf32> to vector<2x256xf32>
    %c0_308 = arith.constant 0 : index
    %c27_309 = arith.constant 27 : index
    %c0_310 = arith.constant 0 : index
    %598 = vector.load %arg3[%c0_308, %c27_309, %c0_310] : memref<1x144x256xf32, #tpu.memory_space<vmem>>, vector<1x1x256xf32>
    %599 = vector.shape_cast %598 : vector<1x1x256xf32> to vector<1x256xf32>
    %600 = vector.broadcast %599 : vector<1x256xf32> to vector<2x256xf32>
    %601 = arith.mulf %597, %600 : vector<2x256xf32>
    %602 = arith.addf %580, %601 : vector<2x256xf32>
    %c0_311 = arith.constant 0 : index
    %c63 = arith.constant 63 : index
    %c0_312 = arith.constant 0 : index
    %603 = vector.load %arg3[%c0_311, %c63, %c0_312] : memref<1x144x256xf32, #tpu.memory_space<vmem>>, vector<1x1x256xf32>
    %604 = vector.shape_cast %603 : vector<1x1x256xf32> to vector<1x256xf32>
    %605 = vector.broadcast %604 : vector<1x256xf32> to vector<2x256xf32>
    %606 = arith.mulf %597, %605 : vector<2x256xf32>
    %607 = arith.addf %585, %606 : vector<2x256xf32>
    %c0_313 = arith.constant 0 : index
    %c99 = arith.constant 99 : index
    %c0_314 = arith.constant 0 : index
    %608 = vector.load %arg3[%c0_313, %c99, %c0_314] : memref<1x144x256xf32, #tpu.memory_space<vmem>>, vector<1x1x256xf32>
    %609 = vector.shape_cast %608 : vector<1x1x256xf32> to vector<1x256xf32>
    %610 = vector.broadcast %609 : vector<1x256xf32> to vector<2x256xf32>
    %611 = arith.mulf %597, %610 : vector<2x256xf32>
    %612 = arith.addf %590, %611 : vector<2x256xf32>
    %c0_315 = arith.constant 0 : index
    %c135 = arith.constant 135 : index
    %c0_316 = arith.constant 0 : index
    %613 = vector.load %arg3[%c0_315, %c135, %c0_316] : memref<1x144x256xf32, #tpu.memory_space<vmem>>, vector<1x1x256xf32>
    %614 = vector.shape_cast %613 : vector<1x1x256xf32> to vector<1x256xf32>
    %615 = vector.broadcast %614 : vector<1x256xf32> to vector<2x256xf32>
    %616 = arith.mulf %597, %615 : vector<2x256xf32>
    %617 = arith.addf %595, %616 : vector<2x256xf32>
    %c0_317 = arith.constant 0 : index
    %c28 = arith.constant 28 : index
    %c0_318 = arith.constant 0 : index
    %618 = vector.load %arg2[%c0_317, %c28, %c0_318] : memref<2x36x256xf32, #tpu.memory_space<vmem>>, vector<2x1x256xf32>
    %619 = vector.shape_cast %618 : vector<2x1x256xf32> to vector<2x256xf32>
    %c0_319 = arith.constant 0 : index
    %c28_320 = arith.constant 28 : index
    %c0_321 = arith.constant 0 : index
    %620 = vector.load %arg3[%c0_319, %c28_320, %c0_321] : memref<1x144x256xf32, #tpu.memory_space<vmem>>, vector<1x1x256xf32>
    %621 = vector.shape_cast %620 : vector<1x1x256xf32> to vector<1x256xf32>
    %622 = vector.broadcast %621 : vector<1x256xf32> to vector<2x256xf32>
    %623 = arith.mulf %619, %622 : vector<2x256xf32>
    %624 = arith.addf %602, %623 : vector<2x256xf32>
    %c0_322 = arith.constant 0 : index
    %c64 = arith.constant 64 : index
    %c0_323 = arith.constant 0 : index
    %625 = vector.load %arg3[%c0_322, %c64, %c0_323] : memref<1x144x256xf32, #tpu.memory_space<vmem>>, vector<1x1x256xf32>
    %626 = vector.shape_cast %625 : vector<1x1x256xf32> to vector<1x256xf32>
    %627 = vector.broadcast %626 : vector<1x256xf32> to vector<2x256xf32>
    %628 = arith.mulf %619, %627 : vector<2x256xf32>
    %629 = arith.addf %607, %628 : vector<2x256xf32>
    %c0_324 = arith.constant 0 : index
    %c100 = arith.constant 100 : index
    %c0_325 = arith.constant 0 : index
    %630 = vector.load %arg3[%c0_324, %c100, %c0_325] : memref<1x144x256xf32, #tpu.memory_space<vmem>>, vector<1x1x256xf32>
    %631 = vector.shape_cast %630 : vector<1x1x256xf32> to vector<1x256xf32>
    %632 = vector.broadcast %631 : vector<1x256xf32> to vector<2x256xf32>
    %633 = arith.mulf %619, %632 : vector<2x256xf32>
    %634 = arith.addf %612, %633 : vector<2x256xf32>
    %c0_326 = arith.constant 0 : index
    %c136 = arith.constant 136 : index
    %c0_327 = arith.constant 0 : index
    %635 = vector.load %arg3[%c0_326, %c136, %c0_327] : memref<1x144x256xf32, #tpu.memory_space<vmem>>, vector<1x1x256xf32>
    %636 = vector.shape_cast %635 : vector<1x1x256xf32> to vector<1x256xf32>
    %637 = vector.broadcast %636 : vector<1x256xf32> to vector<2x256xf32>
    %638 = arith.mulf %619, %637 : vector<2x256xf32>
    %639 = arith.addf %617, %638 : vector<2x256xf32>
    %c0_328 = arith.constant 0 : index
    %c29 = arith.constant 29 : index
    %c0_329 = arith.constant 0 : index
    %640 = vector.load %arg2[%c0_328, %c29, %c0_329] : memref<2x36x256xf32, #tpu.memory_space<vmem>>, vector<2x1x256xf32>
    %641 = vector.shape_cast %640 : vector<2x1x256xf32> to vector<2x256xf32>
    %c0_330 = arith.constant 0 : index
    %c29_331 = arith.constant 29 : index
    %c0_332 = arith.constant 0 : index
    %642 = vector.load %arg3[%c0_330, %c29_331, %c0_332] : memref<1x144x256xf32, #tpu.memory_space<vmem>>, vector<1x1x256xf32>
    %643 = vector.shape_cast %642 : vector<1x1x256xf32> to vector<1x256xf32>
    %644 = vector.broadcast %643 : vector<1x256xf32> to vector<2x256xf32>
    %645 = arith.mulf %641, %644 : vector<2x256xf32>
    %646 = arith.addf %624, %645 : vector<2x256xf32>
    %c0_333 = arith.constant 0 : index
    %c65 = arith.constant 65 : index
    %c0_334 = arith.constant 0 : index
    %647 = vector.load %arg3[%c0_333, %c65, %c0_334] : memref<1x144x256xf32, #tpu.memory_space<vmem>>, vector<1x1x256xf32>
    %648 = vector.shape_cast %647 : vector<1x1x256xf32> to vector<1x256xf32>
    %649 = vector.broadcast %648 : vector<1x256xf32> to vector<2x256xf32>
    %650 = arith.mulf %641, %649 : vector<2x256xf32>
    %651 = arith.addf %629, %650 : vector<2x256xf32>
    %c0_335 = arith.constant 0 : index
    %c101 = arith.constant 101 : index
    %c0_336 = arith.constant 0 : index
    %652 = vector.load %arg3[%c0_335, %c101, %c0_336] : memref<1x144x256xf32, #tpu.memory_space<vmem>>, vector<1x1x256xf32>
    %653 = vector.shape_cast %652 : vector<1x1x256xf32> to vector<1x256xf32>
    %654 = vector.broadcast %653 : vector<1x256xf32> to vector<2x256xf32>
    %655 = arith.mulf %641, %654 : vector<2x256xf32>
    %656 = arith.addf %634, %655 : vector<2x256xf32>
    %c0_337 = arith.constant 0 : index
    %c137 = arith.constant 137 : index
    %c0_338 = arith.constant 0 : index
    %657 = vector.load %arg3[%c0_337, %c137, %c0_338] : memref<1x144x256xf32, #tpu.memory_space<vmem>>, vector<1x1x256xf32>
    %658 = vector.shape_cast %657 : vector<1x1x256xf32> to vector<1x256xf32>
    %659 = vector.broadcast %658 : vector<1x256xf32> to vector<2x256xf32>
    %660 = arith.mulf %641, %659 : vector<2x256xf32>
    %661 = arith.addf %639, %660 : vector<2x256xf32>
    %c0_339 = arith.constant 0 : index
    %c30 = arith.constant 30 : index
    %c0_340 = arith.constant 0 : index
    %662 = vector.load %arg2[%c0_339, %c30, %c0_340] : memref<2x36x256xf32, #tpu.memory_space<vmem>>, vector<2x1x256xf32>
    %663 = vector.shape_cast %662 : vector<2x1x256xf32> to vector<2x256xf32>
    %c0_341 = arith.constant 0 : index
    %c30_342 = arith.constant 30 : index
    %c0_343 = arith.constant 0 : index
    %664 = vector.load %arg3[%c0_341, %c30_342, %c0_343] : memref<1x144x256xf32, #tpu.memory_space<vmem>>, vector<1x1x256xf32>
    %665 = vector.shape_cast %664 : vector<1x1x256xf32> to vector<1x256xf32>
    %666 = vector.broadcast %665 : vector<1x256xf32> to vector<2x256xf32>
    %667 = arith.mulf %663, %666 : vector<2x256xf32>
    %668 = arith.addf %646, %667 : vector<2x256xf32>
    %c0_344 = arith.constant 0 : index
    %c66 = arith.constant 66 : index
    %c0_345 = arith.constant 0 : index
    %669 = vector.load %arg3[%c0_344, %c66, %c0_345] : memref<1x144x256xf32, #tpu.memory_space<vmem>>, vector<1x1x256xf32>
    %670 = vector.shape_cast %669 : vector<1x1x256xf32> to vector<1x256xf32>
    %671 = vector.broadcast %670 : vector<1x256xf32> to vector<2x256xf32>
    %672 = arith.mulf %663, %671 : vector<2x256xf32>
    %673 = arith.addf %651, %672 : vector<2x256xf32>
    %c0_346 = arith.constant 0 : index
    %c102 = arith.constant 102 : index
    %c0_347 = arith.constant 0 : index
    %674 = vector.load %arg3[%c0_346, %c102, %c0_347] : memref<1x144x256xf32, #tpu.memory_space<vmem>>, vector<1x1x256xf32>
    %675 = vector.shape_cast %674 : vector<1x1x256xf32> to vector<1x256xf32>
    %676 = vector.broadcast %675 : vector<1x256xf32> to vector<2x256xf32>
    %677 = arith.mulf %663, %676 : vector<2x256xf32>
    %678 = arith.addf %656, %677 : vector<2x256xf32>
    %c0_348 = arith.constant 0 : index
    %c138 = arith.constant 138 : index
    %c0_349 = arith.constant 0 : index
    %679 = vector.load %arg3[%c0_348, %c138, %c0_349] : memref<1x144x256xf32, #tpu.memory_space<vmem>>, vector<1x1x256xf32>
    %680 = vector.shape_cast %679 : vector<1x1x256xf32> to vector<1x256xf32>
    %681 = vector.broadcast %680 : vector<1x256xf32> to vector<2x256xf32>
    %682 = arith.mulf %663, %681 : vector<2x256xf32>
    %683 = arith.addf %661, %682 : vector<2x256xf32>
    %c0_350 = arith.constant 0 : index
    %c31 = arith.constant 31 : index
    %c0_351 = arith.constant 0 : index
    %684 = vector.load %arg2[%c0_350, %c31, %c0_351] : memref<2x36x256xf32, #tpu.memory_space<vmem>>, vector<2x1x256xf32>
    %685 = vector.shape_cast %684 : vector<2x1x256xf32> to vector<2x256xf32>
    %c0_352 = arith.constant 0 : index
    %c31_353 = arith.constant 31 : index
    %c0_354 = arith.constant 0 : index
    %686 = vector.load %arg3[%c0_352, %c31_353, %c0_354] : memref<1x144x256xf32, #tpu.memory_space<vmem>>, vector<1x1x256xf32>
    %687 = vector.shape_cast %686 : vector<1x1x256xf32> to vector<1x256xf32>
    %688 = vector.broadcast %687 : vector<1x256xf32> to vector<2x256xf32>
    %689 = arith.mulf %685, %688 : vector<2x256xf32>
    %690 = arith.addf %668, %689 : vector<2x256xf32>
    %c0_355 = arith.constant 0 : index
    %c67 = arith.constant 67 : index
    %c0_356 = arith.constant 0 : index
    %691 = vector.load %arg3[%c0_355, %c67, %c0_356] : memref<1x144x256xf32, #tpu.memory_space<vmem>>, vector<1x1x256xf32>
    %692 = vector.shape_cast %691 : vector<1x1x256xf32> to vector<1x256xf32>
    %693 = vector.broadcast %692 : vector<1x256xf32> to vector<2x256xf32>
    %694 = arith.mulf %685, %693 : vector<2x256xf32>
    %695 = arith.addf %673, %694 : vector<2x256xf32>
    %c0_357 = arith.constant 0 : index
    %c103 = arith.constant 103 : index
    %c0_358 = arith.constant 0 : index
    %696 = vector.load %arg3[%c0_357, %c103, %c0_358] : memref<1x144x256xf32, #tpu.memory_space<vmem>>, vector<1x1x256xf32>
    %697 = vector.shape_cast %696 : vector<1x1x256xf32> to vector<1x256xf32>
    %698 = vector.broadcast %697 : vector<1x256xf32> to vector<2x256xf32>
    %699 = arith.mulf %685, %698 : vector<2x256xf32>
    %700 = arith.addf %678, %699 : vector<2x256xf32>
    %c0_359 = arith.constant 0 : index
    %c139 = arith.constant 139 : index
    %c0_360 = arith.constant 0 : index
    %701 = vector.load %arg3[%c0_359, %c139, %c0_360] : memref<1x144x256xf32, #tpu.memory_space<vmem>>, vector<1x1x256xf32>
    %702 = vector.shape_cast %701 : vector<1x1x256xf32> to vector<1x256xf32>
    %703 = vector.broadcast %702 : vector<1x256xf32> to vector<2x256xf32>
    %704 = arith.mulf %685, %703 : vector<2x256xf32>
    %705 = arith.addf %683, %704 : vector<2x256xf32>
    %c0_361 = arith.constant 0 : index
    %c32 = arith.constant 32 : index
    %c0_362 = arith.constant 0 : index
    %706 = vector.load %arg2[%c0_361, %c32, %c0_362] : memref<2x36x256xf32, #tpu.memory_space<vmem>>, vector<2x1x256xf32>
    %707 = vector.shape_cast %706 : vector<2x1x256xf32> to vector<2x256xf32>
    %c0_363 = arith.constant 0 : index
    %c32_364 = arith.constant 32 : index
    %c0_365 = arith.constant 0 : index
    %708 = vector.load %arg3[%c0_363, %c32_364, %c0_365] : memref<1x144x256xf32, #tpu.memory_space<vmem>>, vector<1x1x256xf32>
    %709 = vector.shape_cast %708 : vector<1x1x256xf32> to vector<1x256xf32>
    %710 = vector.broadcast %709 : vector<1x256xf32> to vector<2x256xf32>
    %711 = arith.mulf %707, %710 : vector<2x256xf32>
    %712 = arith.addf %690, %711 : vector<2x256xf32>
    %c0_366 = arith.constant 0 : index
    %c68 = arith.constant 68 : index
    %c0_367 = arith.constant 0 : index
    %713 = vector.load %arg3[%c0_366, %c68, %c0_367] : memref<1x144x256xf32, #tpu.memory_space<vmem>>, vector<1x1x256xf32>
    %714 = vector.shape_cast %713 : vector<1x1x256xf32> to vector<1x256xf32>
    %715 = vector.broadcast %714 : vector<1x256xf32> to vector<2x256xf32>
    %716 = arith.mulf %707, %715 : vector<2x256xf32>
    %717 = arith.addf %695, %716 : vector<2x256xf32>
    %c0_368 = arith.constant 0 : index
    %c104 = arith.constant 104 : index
    %c0_369 = arith.constant 0 : index
    %718 = vector.load %arg3[%c0_368, %c104, %c0_369] : memref<1x144x256xf32, #tpu.memory_space<vmem>>, vector<1x1x256xf32>
    %719 = vector.shape_cast %718 : vector<1x1x256xf32> to vector<1x256xf32>
    %720 = vector.broadcast %719 : vector<1x256xf32> to vector<2x256xf32>
    %721 = arith.mulf %707, %720 : vector<2x256xf32>
    %722 = arith.addf %700, %721 : vector<2x256xf32>
    %c0_370 = arith.constant 0 : index
    %c140 = arith.constant 140 : index
    %c0_371 = arith.constant 0 : index
    %723 = vector.load %arg3[%c0_370, %c140, %c0_371] : memref<1x144x256xf32, #tpu.memory_space<vmem>>, vector<1x1x256xf32>
    %724 = vector.shape_cast %723 : vector<1x1x256xf32> to vector<1x256xf32>
    %725 = vector.broadcast %724 : vector<1x256xf32> to vector<2x256xf32>
    %726 = arith.mulf %707, %725 : vector<2x256xf32>
    %727 = arith.addf %705, %726 : vector<2x256xf32>
    %c0_372 = arith.constant 0 : index
    %c33 = arith.constant 33 : index
    %c0_373 = arith.constant 0 : index
    %728 = vector.load %arg2[%c0_372, %c33, %c0_373] : memref<2x36x256xf32, #tpu.memory_space<vmem>>, vector<2x1x256xf32>
    %729 = vector.shape_cast %728 : vector<2x1x256xf32> to vector<2x256xf32>
    %c0_374 = arith.constant 0 : index
    %c33_375 = arith.constant 33 : index
    %c0_376 = arith.constant 0 : index
    %730 = vector.load %arg3[%c0_374, %c33_375, %c0_376] : memref<1x144x256xf32, #tpu.memory_space<vmem>>, vector<1x1x256xf32>
    %731 = vector.shape_cast %730 : vector<1x1x256xf32> to vector<1x256xf32>
    %732 = vector.broadcast %731 : vector<1x256xf32> to vector<2x256xf32>
    %733 = arith.mulf %729, %732 : vector<2x256xf32>
    %734 = arith.addf %712, %733 : vector<2x256xf32>
    %c0_377 = arith.constant 0 : index
    %c69 = arith.constant 69 : index
    %c0_378 = arith.constant 0 : index
    %735 = vector.load %arg3[%c0_377, %c69, %c0_378] : memref<1x144x256xf32, #tpu.memory_space<vmem>>, vector<1x1x256xf32>
    %736 = vector.shape_cast %735 : vector<1x1x256xf32> to vector<1x256xf32>
    %737 = vector.broadcast %736 : vector<1x256xf32> to vector<2x256xf32>
    %738 = arith.mulf %729, %737 : vector<2x256xf32>
    %739 = arith.addf %717, %738 : vector<2x256xf32>
    %c0_379 = arith.constant 0 : index
    %c105 = arith.constant 105 : index
    %c0_380 = arith.constant 0 : index
    %740 = vector.load %arg3[%c0_379, %c105, %c0_380] : memref<1x144x256xf32, #tpu.memory_space<vmem>>, vector<1x1x256xf32>
    %741 = vector.shape_cast %740 : vector<1x1x256xf32> to vector<1x256xf32>
    %742 = vector.broadcast %741 : vector<1x256xf32> to vector<2x256xf32>
    %743 = arith.mulf %729, %742 : vector<2x256xf32>
    %744 = arith.addf %722, %743 : vector<2x256xf32>
    %c0_381 = arith.constant 0 : index
    %c141 = arith.constant 141 : index
    %c0_382 = arith.constant 0 : index
    %745 = vector.load %arg3[%c0_381, %c141, %c0_382] : memref<1x144x256xf32, #tpu.memory_space<vmem>>, vector<1x1x256xf32>
    %746 = vector.shape_cast %745 : vector<1x1x256xf32> to vector<1x256xf32>
    %747 = vector.broadcast %746 : vector<1x256xf32> to vector<2x256xf32>
    %748 = arith.mulf %729, %747 : vector<2x256xf32>
    %749 = arith.addf %727, %748 : vector<2x256xf32>
    %c0_383 = arith.constant 0 : index
    %c34 = arith.constant 34 : index
    %c0_384 = arith.constant 0 : index
    %750 = vector.load %arg2[%c0_383, %c34, %c0_384] : memref<2x36x256xf32, #tpu.memory_space<vmem>>, vector<2x1x256xf32>
    %751 = vector.shape_cast %750 : vector<2x1x256xf32> to vector<2x256xf32>
    %c0_385 = arith.constant 0 : index
    %c34_386 = arith.constant 34 : index
    %c0_387 = arith.constant 0 : index
    %752 = vector.load %arg3[%c0_385, %c34_386, %c0_387] : memref<1x144x256xf32, #tpu.memory_space<vmem>>, vector<1x1x256xf32>
    %753 = vector.shape_cast %752 : vector<1x1x256xf32> to vector<1x256xf32>
    %754 = vector.broadcast %753 : vector<1x256xf32> to vector<2x256xf32>
    %755 = arith.mulf %751, %754 : vector<2x256xf32>
    %756 = arith.addf %734, %755 : vector<2x256xf32>
    %c0_388 = arith.constant 0 : index
    %c70 = arith.constant 70 : index
    %c0_389 = arith.constant 0 : index
    %757 = vector.load %arg3[%c0_388, %c70, %c0_389] : memref<1x144x256xf32, #tpu.memory_space<vmem>>, vector<1x1x256xf32>
    %758 = vector.shape_cast %757 : vector<1x1x256xf32> to vector<1x256xf32>
    %759 = vector.broadcast %758 : vector<1x256xf32> to vector<2x256xf32>
    %760 = arith.mulf %751, %759 : vector<2x256xf32>
    %761 = arith.addf %739, %760 : vector<2x256xf32>
    %c0_390 = arith.constant 0 : index
    %c106 = arith.constant 106 : index
    %c0_391 = arith.constant 0 : index
    %762 = vector.load %arg3[%c0_390, %c106, %c0_391] : memref<1x144x256xf32, #tpu.memory_space<vmem>>, vector<1x1x256xf32>
    %763 = vector.shape_cast %762 : vector<1x1x256xf32> to vector<1x256xf32>
    %764 = vector.broadcast %763 : vector<1x256xf32> to vector<2x256xf32>
    %765 = arith.mulf %751, %764 : vector<2x256xf32>
    %766 = arith.addf %744, %765 : vector<2x256xf32>
    %c0_392 = arith.constant 0 : index
    %c142 = arith.constant 142 : index
    %c0_393 = arith.constant 0 : index
    %767 = vector.load %arg3[%c0_392, %c142, %c0_393] : memref<1x144x256xf32, #tpu.memory_space<vmem>>, vector<1x1x256xf32>
    %768 = vector.shape_cast %767 : vector<1x1x256xf32> to vector<1x256xf32>
    %769 = vector.broadcast %768 : vector<1x256xf32> to vector<2x256xf32>
    %770 = arith.mulf %751, %769 : vector<2x256xf32>
    %771 = arith.addf %749, %770 : vector<2x256xf32>
    %c0_394 = arith.constant 0 : index
    %c35 = arith.constant 35 : index
    %c0_395 = arith.constant 0 : index
    %772 = vector.load %arg2[%c0_394, %c35, %c0_395] : memref<2x36x256xf32, #tpu.memory_space<vmem>>, vector<2x1x256xf32>
    %773 = vector.shape_cast %772 : vector<2x1x256xf32> to vector<2x256xf32>
    %c0_396 = arith.constant 0 : index
    %c35_397 = arith.constant 35 : index
    %c0_398 = arith.constant 0 : index
    %774 = vector.load %arg3[%c0_396, %c35_397, %c0_398] : memref<1x144x256xf32, #tpu.memory_space<vmem>>, vector<1x1x256xf32>
    %775 = vector.shape_cast %774 : vector<1x1x256xf32> to vector<1x256xf32>
    %776 = vector.broadcast %775 : vector<1x256xf32> to vector<2x256xf32>
    %777 = arith.mulf %773, %776 : vector<2x256xf32>
    %778 = arith.addf %756, %777 : vector<2x256xf32>
    %c0_399 = arith.constant 0 : index
    %c71 = arith.constant 71 : index
    %c0_400 = arith.constant 0 : index
    %779 = vector.load %arg3[%c0_399, %c71, %c0_400] : memref<1x144x256xf32, #tpu.memory_space<vmem>>, vector<1x1x256xf32>
    %780 = vector.shape_cast %779 : vector<1x1x256xf32> to vector<1x256xf32>
    %781 = vector.broadcast %780 : vector<1x256xf32> to vector<2x256xf32>
    %782 = arith.mulf %773, %781 : vector<2x256xf32>
    %783 = arith.addf %761, %782 : vector<2x256xf32>
    %c0_401 = arith.constant 0 : index
    %c107 = arith.constant 107 : index
    %c0_402 = arith.constant 0 : index
    %784 = vector.load %arg3[%c0_401, %c107, %c0_402] : memref<1x144x256xf32, #tpu.memory_space<vmem>>, vector<1x1x256xf32>
    %785 = vector.shape_cast %784 : vector<1x1x256xf32> to vector<1x256xf32>
    %786 = vector.broadcast %785 : vector<1x256xf32> to vector<2x256xf32>
    %787 = arith.mulf %773, %786 : vector<2x256xf32>
    %788 = arith.addf %766, %787 : vector<2x256xf32>
    %c0_403 = arith.constant 0 : index
    %c143 = arith.constant 143 : index
    %c0_404 = arith.constant 0 : index
    %789 = vector.load %arg3[%c0_403, %c143, %c0_404] : memref<1x144x256xf32, #tpu.memory_space<vmem>>, vector<1x1x256xf32>
    %790 = vector.shape_cast %789 : vector<1x1x256xf32> to vector<1x256xf32>
    %791 = vector.broadcast %790 : vector<1x256xf32> to vector<2x256xf32>
    %792 = arith.mulf %773, %791 : vector<2x256xf32>
    %793 = arith.addf %771, %792 : vector<2x256xf32>
    %c0_405 = arith.constant 0 : index
    %c0_406 = arith.constant 0 : index
    %c0_407 = arith.constant 0 : index
    %c0_408 = arith.constant 0 : index
    %794 = vector.load %arg4[%c0_405, %c0_406, %c0_407, %c0_408] : memref<1x2x4x256xf32, #tpu.memory_space<vmem>>, vector<1x2x1x256xf32>
    %795 = vector.shape_cast %794 : vector<1x2x1x256xf32> to vector<2x256xf32>
    %796 = vector.shape_cast %778 : vector<2x256xf32> to vector<1x2x1x256xf32>
    tpu.vector_store %arg4[%c0_405, %c0_406, %c0_407, %c0_408], %796 {strides = array<i32>} : memref<1x2x4x256xf32, #tpu.memory_space<vmem>>, vector<1x2x1x256xf32>,
    %c0_409 = arith.constant 0 : index
    %c0_410 = arith.constant 0 : index
    %c1_411 = arith.constant 1 : index
    %c0_412 = arith.constant 0 : index
    %797 = vector.load %arg4[%c0_409, %c0_410, %c1_411, %c0_412] : memref<1x2x4x256xf32, #tpu.memory_space<vmem>>, vector<1x2x1x256xf32>
    %798 = vector.shape_cast %797 : vector<1x2x1x256xf32> to vector<2x256xf32>
    %799 = vector.shape_cast %783 : vector<2x256xf32> to vector<1x2x1x256xf32>
    tpu.vector_store %arg4[%c0_409, %c0_410, %c1_411, %c0_412], %799 {strides = array<i32>} : memref<1x2x4x256xf32, #tpu.memory_space<vmem>>, vector<1x2x1x256xf32>,
    %c0_413 = arith.constant 0 : index
    %c0_414 = arith.constant 0 : index
    %c2_415 = arith.constant 2 : index
    %c0_416 = arith.constant 0 : index
    %800 = vector.load %arg4[%c0_413, %c0_414, %c2_415, %c0_416] : memref<1x2x4x256xf32, #tpu.memory_space<vmem>>, vector<1x2x1x256xf32>
    %801 = vector.shape_cast %800 : vector<1x2x1x256xf32> to vector<2x256xf32>
    %802 = vector.shape_cast %788 : vector<2x256xf32> to vector<1x2x1x256xf32>
    tpu.vector_store %arg4[%c0_413, %c0_414, %c2_415, %c0_416], %802 {strides = array<i32>} : memref<1x2x4x256xf32, #tpu.memory_space<vmem>>, vector<1x2x1x256xf32>,
    %c0_417 = arith.constant 0 : index
    %c0_418 = arith.constant 0 : index
    %c3_419 = arith.constant 3 : index
    %c0_420 = arith.constant 0 : index
    %803 = vector.load %arg4[%c0_417, %c0_418, %c3_419, %c0_420] : memref<1x2x4x256xf32, #tpu.memory_space<vmem>>, vector<1x2x1x256xf32>
    %804 = vector.shape_cast %803 : vector<1x2x1x256xf32> to vector<2x256xf32>
    %805 = vector.shape_cast %793 : vector<2x256xf32> to vector<1x2x1x256xf32>
    tpu.vector_store %arg4[%c0_417, %c0_418, %c3_419, %c0_420], %805 {strides = array<i32>} : memref<1x2x4x256xf32, #tpu.memory_space<vmem>>, vector<1x2x1x256xf32>,
    return
  }
  func.func @transform_0(%arg0: i32, %arg1: i32) -> (i32, i32, i32) {
    %c0_i32 = arith.constant 0 : i32
    %c0_i32_0 = arith.constant 0 : i32
    %c0_i32_1 = arith.constant 0 : i32
    return %c0_i32, %c0_i32_0, %arg1 : i32, i32, i32
  }
  func.func @transform_1(%arg0: i32, %arg1: i32) -> (i32, i32, i32) {
    %c0_i32 = arith.constant 0 : i32
    %c0_i32_0 = arith.constant 0 : i32
    return %arg0, %c0_i32, %arg1 : i32, i32, i32
  }
  func.func @transform_2(%arg0: i32, %arg1: i32) -> (i32, i32, i32, i32) {
    %c0_i32 = arith.constant 0 : i32
    %c0_i32_0 = arith.constant 0 : i32
    %c0_i32_1 = arith.constant 0 : i32
    return %arg0, %c0_i32, %c0_i32_0, %arg1 : i32, i32, i32, i32
  }
}

module attributes {stable_mosaic.version = 11 : i64} {
  func.func @_sub_kernel(%arg0: i32, %arg1: memref<1x512xf32, #tpu.memory_space<vmem>>, %arg2: memref<1x512xf32, #tpu.memory_space<vmem>>, %arg3: memref<1x512xf32, #tpu.memory_space<vmem>>) attributes {dimension_semantics = [#tpu.dimension_semantics<parallel>], iteration_bounds = array<i64: 1>, scalar_prefetch = 0 : i64, scratch_operands = 0 : i64, tpu.core_type = #tpu.core_type<tc>, window_params = [{transform_indices = @transform_0, window_bounds = array<i64: 1, 512>}, {transform_indices = @transform_1, window_bounds = array<i64: 1, 512>}, {transform_indices = @transform_2, window_bounds = array<i64: 1, 512>}]} {
    %c0 = arith.constant 0 : index
    %c0_0 = arith.constant 0 : index
    %0 = vector.load %arg1[%c0, %c0_0] : memref<1x512xf32, #tpu.memory_space<vmem>>, vector<1x512xf32>
    %c0_1 = arith.constant 0 : index
    %c0_2 = arith.constant 0 : index
    %1 = vector.load %arg2[%c0_1, %c0_2] : memref<1x512xf32, #tpu.memory_space<vmem>>, vector<1x512xf32>
    %2 = arith.subf %0, %1 : vector<1x512xf32>
    %c0_3 = arith.constant 0 : index
    %c0_4 = arith.constant 0 : index
    %3 = vector.load %arg3[%c0_3, %c0_4] : memref<1x512xf32, #tpu.memory_space<vmem>>, vector<1x512xf32>
    tpu.vector_store %arg3[%c0_3, %c0_4], %2 {strides = array<i32>} : memref<1x512xf32, #tpu.memory_space<vmem>>, vector<1x512xf32>,
    return
  }
  func.func @transform_0(%arg0: i32) -> (i32, i32) {
    %c0_i32 = arith.constant 0 : i32
    %c0_i32_0 = arith.constant 0 : i32
    return %arg0, %c0_i32 : i32, i32
  }
  func.func @transform_1(%arg0: i32) -> (i32, i32) {
    %c0_i32 = arith.constant 0 : i32
    %c0_i32_0 = arith.constant 0 : i32
    return %arg0, %c0_i32 : i32, i32
  }
  func.func @transform_2(%arg0: i32) -> (i32, i32) {
    %c0_i32 = arith.constant 0 : i32
    %c0_i32_0 = arith.constant 0 : i32
    return %arg0, %c0_i32 : i32, i32
  }
}

module attributes {stable_mosaic.version = 11 : i64} {
  func.func @_p2w_kernel(%arg0: i32, %arg1: i32, %arg2: memref<1x3x64xf32, #tpu.memory_space<vmem>>, %arg3: memref<256x3xf32, #tpu.memory_space<vmem>>, %arg4: memref<256x1xf32, #tpu.memory_space<vmem>>, %arg5: memref<144x256xf32, #tpu.memory_space<vmem>>, %arg6: memref<144x1xf32, #tpu.memory_space<vmem>>, %arg7: memref<1x144x64xf32, #tpu.memory_space<vmem>>) attributes {dimension_semantics = [#tpu.dimension_semantics<parallel>, #tpu.dimension_semantics<parallel>], iteration_bounds = array<i64: 4, 1>, scalar_prefetch = 0 : i64, scratch_operands = 0 : i64, tpu.core_type = #tpu.core_type<tc>, window_params = [{transform_indices = @transform_0, window_bounds = array<i64: 1, 3, 64>}, {pipeline_mode = #tpu.pipeline_mode<synchronous>, transform_indices = @transform_1, window_bounds = array<i64: 256, 3>}, {pipeline_mode = #tpu.pipeline_mode<synchronous>, transform_indices = @transform_2, window_bounds = array<i64: 256, 1>}, {pipeline_mode = #tpu.pipeline_mode<synchronous>, transform_indices = @transform_3, window_bounds = array<i64: 144, 256>}, {pipeline_mode = #tpu.pipeline_mode<synchronous>, transform_indices = @transform_4, window_bounds = array<i64: 144, 1>}, {transform_indices = @transform_5, window_bounds = array<i64: 1, 144, 64>}]} {
    %c0 = arith.constant 0 : index
    %c0_0 = arith.constant 0 : index
    %0 = vector.load %arg3[%c0, %c0_0] : memref<256x3xf32, #tpu.memory_space<vmem>>, vector<256x3xf32>
    %c0_1 = arith.constant 0 : index
    %c0_2 = arith.constant 0 : index
    %c0_3 = arith.constant 0 : index
    %1 = vector.load %arg2[%c0_1, %c0_2, %c0_3] : memref<1x3x64xf32, #tpu.memory_space<vmem>>, vector<1x3x64xf32>
    %2 = vector.shape_cast %1 : vector<1x3x64xf32> to vector<3x64xf32>
    %cst = arith.constant dense<0.000000e+00> : vector<256x64xf32>
    %3 = tpu.matmul %0, %2, %cst {dimension_numbers = #tpu.dot_dimension_numbers<[1], [0], [0], [1], [0, 0, 1, 1], [], []>} : vector<256x3xf32>, vector<3x64xf32>, vector<256x64xf32> -> vector<256x64xf32>
    %c0_4 = arith.constant 0 : index
    %c0_5 = arith.constant 0 : index
    %4 = vector.load %arg4[%c0_4, %c0_5] : memref<256x1xf32, #tpu.memory_space<vmem>>, vector<256x1xf32>
    %5 = vector.broadcast %4 : vector<256x1xf32> to vector<256x64xf32>
    %6 = arith.addf %3, %5 : vector<256x64xf32>
    %cst_6 = arith.constant 0.000000e+00 : f32
    %7 = vector.broadcast %cst_6 : f32 to vector<256x64xf32>
    %8 = arith.cmpf ogt, %6, %7 : vector<256x64xf32>
    %cst_7 = arith.constant 2.000000e-01 : f32
    %9 = vector.broadcast %cst_7 : f32 to vector<256x64xf32>
    %10 = arith.mulf %9, %6 : vector<256x64xf32>
    %11 = arith.select %8, %6, %10 : vector<256x64xi1>, vector<256x64xf32>
    %c0_8 = arith.constant 0 : index
    %c0_9 = arith.constant 0 : index
    %12 = vector.load %arg5[%c0_8, %c0_9] : memref<144x256xf32, #tpu.memory_space<vmem>>, vector<144x256xf32>
    %cst_10 = arith.constant dense<0.000000e+00> : vector<144x64xf32>
    %13 = tpu.matmul %12, %11, %cst_10 {dimension_numbers = #tpu.dot_dimension_numbers<[1], [0], [0], [1], [0, 0, 1, 1], [], []>} : vector<144x256xf32>, vector<256x64xf32>, vector<144x64xf32> -> vector<144x64xf32>
    %c0_11 = arith.constant 0 : index
    %c0_12 = arith.constant 0 : index
    %14 = vector.load %arg6[%c0_11, %c0_12] : memref<144x1xf32, #tpu.memory_space<vmem>>, vector<144x1xf32>
    %15 = vector.broadcast %14 : vector<144x1xf32> to vector<144x64xf32>
    %16 = arith.addf %13, %15 : vector<144x64xf32>
    %c0_13 = arith.constant 0 : index
    %c0_14 = arith.constant 0 : index
    %c0_15 = arith.constant 0 : index
    %17 = vector.load %arg7[%c0_13, %c0_14, %c0_15] : memref<1x144x64xf32, #tpu.memory_space<vmem>>, vector<1x144x64xf32>
    %18 = vector.shape_cast %17 : vector<1x144x64xf32> to vector<144x64xf32>
    %19 = vector.shape_cast %16 : vector<144x64xf32> to vector<1x144x64xf32>
    tpu.vector_store %arg7[%c0_13, %c0_14, %c0_15], %19 {strides = array<i32>} : memref<1x144x64xf32, #tpu.memory_space<vmem>>, vector<1x144x64xf32>,
    return
  }
  func.func @transform_0(%arg0: i32, %arg1: i32) -> (i32, i32, i32) {
    %c0_i32 = arith.constant 0 : i32
    %c0_i32_0 = arith.constant 0 : i32
    return %arg0, %c0_i32, %arg1 : i32, i32, i32
  }
  func.func @transform_1(%arg0: i32, %arg1: i32) -> (i32, i32) {
    %c0_i32 = arith.constant 0 : i32
    %c0_i32_0 = arith.constant 0 : i32
    %c0_i32_1 = arith.constant 0 : i32
    return %c0_i32, %c0_i32_0 : i32, i32
  }
  func.func @transform_2(%arg0: i32, %arg1: i32) -> (i32, i32) {
    %c0_i32 = arith.constant 0 : i32
    %c0_i32_0 = arith.constant 0 : i32
    %c0_i32_1 = arith.constant 0 : i32
    return %c0_i32, %c0_i32_0 : i32, i32
  }
  func.func @transform_3(%arg0: i32, %arg1: i32) -> (i32, i32) {
    %c0_i32 = arith.constant 0 : i32
    %c0_i32_0 = arith.constant 0 : i32
    %c0_i32_1 = arith.constant 0 : i32
    return %c0_i32, %c0_i32_0 : i32, i32
  }
  func.func @transform_4(%arg0: i32, %arg1: i32) -> (i32, i32) {
    %c0_i32 = arith.constant 0 : i32
    %c0_i32_0 = arith.constant 0 : i32
    %c0_i32_1 = arith.constant 0 : i32
    return %c0_i32, %c0_i32_0 : i32, i32
  }
  func.func @transform_5(%arg0: i32, %arg1: i32) -> (i32, i32, i32) {
    %c0_i32 = arith.constant 0 : i32
    %c0_i32_0 = arith.constant 0 : i32
    return %arg0, %c0_i32, %arg1 : i32, i32, i32
  }
}

module attributes {stable_mosaic.version = 11 : i64} {
  func.func @_local_filter_kernel(%arg0: i32, %arg1: i32, %arg2: memref<2x36x64xf32, #tpu.memory_space<vmem>>, %arg3: memref<1x144x64xf32, #tpu.memory_space<vmem>>, %arg4: memref<1x2x4x64xf32, #tpu.memory_space<vmem>>) attributes {dimension_semantics = [#tpu.dimension_semantics<parallel>, #tpu.dimension_semantics<parallel>], iteration_bounds = array<i64: 4, 1>, scalar_prefetch = 0 : i64, scratch_operands = 0 : i64, tpu.core_type = #tpu.core_type<tc>, window_params = [{transform_indices = @transform_0, window_bounds = array<i64: 2, 36, 64>}, {transform_indices = @transform_1, window_bounds = array<i64: 1, 144, 64>}, {transform_indices = @transform_2, window_bounds = array<i64: 1, 2, 4, 64>}]} {
    %c0 = arith.constant 0 : index
    %c0_0 = arith.constant 0 : index
    %c0_1 = arith.constant 0 : index
    %0 = vector.load %arg2[%c0, %c0_0, %c0_1] : memref<2x36x64xf32, #tpu.memory_space<vmem>>, vector<2x1x64xf32>
    %1 = vector.shape_cast %0 : vector<2x1x64xf32> to vector<2x64xf32>
    %c0_2 = arith.constant 0 : index
    %c0_3 = arith.constant 0 : index
    %c0_4 = arith.constant 0 : index
    %2 = vector.load %arg3[%c0_2, %c0_3, %c0_4] : memref<1x144x64xf32, #tpu.memory_space<vmem>>, vector<1x1x64xf32>
    %3 = vector.shape_cast %2 : vector<1x1x64xf32> to vector<1x64xf32>
    %4 = vector.broadcast %3 : vector<1x64xf32> to vector<2x64xf32>
    %5 = arith.mulf %1, %4 : vector<2x64xf32>
    %c0_5 = arith.constant 0 : index
    %c0_6 = arith.constant 0 : index
    %c0_7 = arith.constant 0 : index
    %6 = vector.load %arg2[%c0_5, %c0_6, %c0_7] : memref<2x36x64xf32, #tpu.memory_space<vmem>>, vector<2x1x64xf32>
    %7 = vector.shape_cast %6 : vector<2x1x64xf32> to vector<2x64xf32>
    %c0_8 = arith.constant 0 : index
    %c36 = arith.constant 36 : index
    %c0_9 = arith.constant 0 : index
    %8 = vector.load %arg3[%c0_8, %c36, %c0_9] : memref<1x144x64xf32, #tpu.memory_space<vmem>>, vector<1x1x64xf32>
    %9 = vector.shape_cast %8 : vector<1x1x64xf32> to vector<1x64xf32>
    %10 = vector.broadcast %9 : vector<1x64xf32> to vector<2x64xf32>
    %11 = arith.mulf %7, %10 : vector<2x64xf32>
    %c0_10 = arith.constant 0 : index
    %c0_11 = arith.constant 0 : index
    %c0_12 = arith.constant 0 : index
    %12 = vector.load %arg2[%c0_10, %c0_11, %c0_12] : memref<2x36x64xf32, #tpu.memory_space<vmem>>, vector<2x1x64xf32>
    %13 = vector.shape_cast %12 : vector<2x1x64xf32> to vector<2x64xf32>
    %c0_13 = arith.constant 0 : index
    %c72 = arith.constant 72 : index
    %c0_14 = arith.constant 0 : index
    %14 = vector.load %arg3[%c0_13, %c72, %c0_14] : memref<1x144x64xf32, #tpu.memory_space<vmem>>, vector<1x1x64xf32>
    %15 = vector.shape_cast %14 : vector<1x1x64xf32> to vector<1x64xf32>
    %16 = vector.broadcast %15 : vector<1x64xf32> to vector<2x64xf32>
    %17 = arith.mulf %13, %16 : vector<2x64xf32>
    %c0_15 = arith.constant 0 : index
    %c0_16 = arith.constant 0 : index
    %c0_17 = arith.constant 0 : index
    %18 = vector.load %arg2[%c0_15, %c0_16, %c0_17] : memref<2x36x64xf32, #tpu.memory_space<vmem>>, vector<2x1x64xf32>
    %19 = vector.shape_cast %18 : vector<2x1x64xf32> to vector<2x64xf32>
    %c0_18 = arith.constant 0 : index
    %c108 = arith.constant 108 : index
    %c0_19 = arith.constant 0 : index
    %20 = vector.load %arg3[%c0_18, %c108, %c0_19] : memref<1x144x64xf32, #tpu.memory_space<vmem>>, vector<1x1x64xf32>
    %21 = vector.shape_cast %20 : vector<1x1x64xf32> to vector<1x64xf32>
    %22 = vector.broadcast %21 : vector<1x64xf32> to vector<2x64xf32>
    %23 = arith.mulf %19, %22 : vector<2x64xf32>
    %c0_20 = arith.constant 0 : index
    %c1 = arith.constant 1 : index
    %c0_21 = arith.constant 0 : index
    %24 = vector.load %arg2[%c0_20, %c1, %c0_21] : memref<2x36x64xf32, #tpu.memory_space<vmem>>, vector<2x1x64xf32>
    %25 = vector.shape_cast %24 : vector<2x1x64xf32> to vector<2x64xf32>
    %c0_22 = arith.constant 0 : index
    %c1_23 = arith.constant 1 : index
    %c0_24 = arith.constant 0 : index
    %26 = vector.load %arg3[%c0_22, %c1_23, %c0_24] : memref<1x144x64xf32, #tpu.memory_space<vmem>>, vector<1x1x64xf32>
    %27 = vector.shape_cast %26 : vector<1x1x64xf32> to vector<1x64xf32>
    %28 = vector.broadcast %27 : vector<1x64xf32> to vector<2x64xf32>
    %29 = arith.mulf %25, %28 : vector<2x64xf32>
    %30 = arith.addf %5, %29 : vector<2x64xf32>
    %c0_25 = arith.constant 0 : index
    %c37 = arith.constant 37 : index
    %c0_26 = arith.constant 0 : index
    %31 = vector.load %arg3[%c0_25, %c37, %c0_26] : memref<1x144x64xf32, #tpu.memory_space<vmem>>, vector<1x1x64xf32>
    %32 = vector.shape_cast %31 : vector<1x1x64xf32> to vector<1x64xf32>
    %33 = vector.broadcast %32 : vector<1x64xf32> to vector<2x64xf32>
    %34 = arith.mulf %25, %33 : vector<2x64xf32>
    %35 = arith.addf %11, %34 : vector<2x64xf32>
    %c0_27 = arith.constant 0 : index
    %c73 = arith.constant 73 : index
    %c0_28 = arith.constant 0 : index
    %36 = vector.load %arg3[%c0_27, %c73, %c0_28] : memref<1x144x64xf32, #tpu.memory_space<vmem>>, vector<1x1x64xf32>
    %37 = vector.shape_cast %36 : vector<1x1x64xf32> to vector<1x64xf32>
    %38 = vector.broadcast %37 : vector<1x64xf32> to vector<2x64xf32>
    %39 = arith.mulf %25, %38 : vector<2x64xf32>
    %40 = arith.addf %17, %39 : vector<2x64xf32>
    %c0_29 = arith.constant 0 : index
    %c109 = arith.constant 109 : index
    %c0_30 = arith.constant 0 : index
    %41 = vector.load %arg3[%c0_29, %c109, %c0_30] : memref<1x144x64xf32, #tpu.memory_space<vmem>>, vector<1x1x64xf32>
    %42 = vector.shape_cast %41 : vector<1x1x64xf32> to vector<1x64xf32>
    %43 = vector.broadcast %42 : vector<1x64xf32> to vector<2x64xf32>
    %44 = arith.mulf %25, %43 : vector<2x64xf32>
    %45 = arith.addf %23, %44 : vector<2x64xf32>
    %c0_31 = arith.constant 0 : index
    %c2 = arith.constant 2 : index
    %c0_32 = arith.constant 0 : index
    %46 = vector.load %arg2[%c0_31, %c2, %c0_32] : memref<2x36x64xf32, #tpu.memory_space<vmem>>, vector<2x1x64xf32>
    %47 = vector.shape_cast %46 : vector<2x1x64xf32> to vector<2x64xf32>
    %c0_33 = arith.constant 0 : index
    %c2_34 = arith.constant 2 : index
    %c0_35 = arith.constant 0 : index
    %48 = vector.load %arg3[%c0_33, %c2_34, %c0_35] : memref<1x144x64xf32, #tpu.memory_space<vmem>>, vector<1x1x64xf32>
    %49 = vector.shape_cast %48 : vector<1x1x64xf32> to vector<1x64xf32>
    %50 = vector.broadcast %49 : vector<1x64xf32> to vector<2x64xf32>
    %51 = arith.mulf %47, %50 : vector<2x64xf32>
    %52 = arith.addf %30, %51 : vector<2x64xf32>
    %c0_36 = arith.constant 0 : index
    %c38 = arith.constant 38 : index
    %c0_37 = arith.constant 0 : index
    %53 = vector.load %arg3[%c0_36, %c38, %c0_37] : memref<1x144x64xf32, #tpu.memory_space<vmem>>, vector<1x1x64xf32>
    %54 = vector.shape_cast %53 : vector<1x1x64xf32> to vector<1x64xf32>
    %55 = vector.broadcast %54 : vector<1x64xf32> to vector<2x64xf32>
    %56 = arith.mulf %47, %55 : vector<2x64xf32>
    %57 = arith.addf %35, %56 : vector<2x64xf32>
    %c0_38 = arith.constant 0 : index
    %c74 = arith.constant 74 : index
    %c0_39 = arith.constant 0 : index
    %58 = vector.load %arg3[%c0_38, %c74, %c0_39] : memref<1x144x64xf32, #tpu.memory_space<vmem>>, vector<1x1x64xf32>
    %59 = vector.shape_cast %58 : vector<1x1x64xf32> to vector<1x64xf32>
    %60 = vector.broadcast %59 : vector<1x64xf32> to vector<2x64xf32>
    %61 = arith.mulf %47, %60 : vector<2x64xf32>
    %62 = arith.addf %40, %61 : vector<2x64xf32>
    %c0_40 = arith.constant 0 : index
    %c110 = arith.constant 110 : index
    %c0_41 = arith.constant 0 : index
    %63 = vector.load %arg3[%c0_40, %c110, %c0_41] : memref<1x144x64xf32, #tpu.memory_space<vmem>>, vector<1x1x64xf32>
    %64 = vector.shape_cast %63 : vector<1x1x64xf32> to vector<1x64xf32>
    %65 = vector.broadcast %64 : vector<1x64xf32> to vector<2x64xf32>
    %66 = arith.mulf %47, %65 : vector<2x64xf32>
    %67 = arith.addf %45, %66 : vector<2x64xf32>
    %c0_42 = arith.constant 0 : index
    %c3 = arith.constant 3 : index
    %c0_43 = arith.constant 0 : index
    %68 = vector.load %arg2[%c0_42, %c3, %c0_43] : memref<2x36x64xf32, #tpu.memory_space<vmem>>, vector<2x1x64xf32>
    %69 = vector.shape_cast %68 : vector<2x1x64xf32> to vector<2x64xf32>
    %c0_44 = arith.constant 0 : index
    %c3_45 = arith.constant 3 : index
    %c0_46 = arith.constant 0 : index
    %70 = vector.load %arg3[%c0_44, %c3_45, %c0_46] : memref<1x144x64xf32, #tpu.memory_space<vmem>>, vector<1x1x64xf32>
    %71 = vector.shape_cast %70 : vector<1x1x64xf32> to vector<1x64xf32>
    %72 = vector.broadcast %71 : vector<1x64xf32> to vector<2x64xf32>
    %73 = arith.mulf %69, %72 : vector<2x64xf32>
    %74 = arith.addf %52, %73 : vector<2x64xf32>
    %c0_47 = arith.constant 0 : index
    %c39 = arith.constant 39 : index
    %c0_48 = arith.constant 0 : index
    %75 = vector.load %arg3[%c0_47, %c39, %c0_48] : memref<1x144x64xf32, #tpu.memory_space<vmem>>, vector<1x1x64xf32>
    %76 = vector.shape_cast %75 : vector<1x1x64xf32> to vector<1x64xf32>
    %77 = vector.broadcast %76 : vector<1x64xf32> to vector<2x64xf32>
    %78 = arith.mulf %69, %77 : vector<2x64xf32>
    %79 = arith.addf %57, %78 : vector<2x64xf32>
    %c0_49 = arith.constant 0 : index
    %c75 = arith.constant 75 : index
    %c0_50 = arith.constant 0 : index
    %80 = vector.load %arg3[%c0_49, %c75, %c0_50] : memref<1x144x64xf32, #tpu.memory_space<vmem>>, vector<1x1x64xf32>
    %81 = vector.shape_cast %80 : vector<1x1x64xf32> to vector<1x64xf32>
    %82 = vector.broadcast %81 : vector<1x64xf32> to vector<2x64xf32>
    %83 = arith.mulf %69, %82 : vector<2x64xf32>
    %84 = arith.addf %62, %83 : vector<2x64xf32>
    %c0_51 = arith.constant 0 : index
    %c111 = arith.constant 111 : index
    %c0_52 = arith.constant 0 : index
    %85 = vector.load %arg3[%c0_51, %c111, %c0_52] : memref<1x144x64xf32, #tpu.memory_space<vmem>>, vector<1x1x64xf32>
    %86 = vector.shape_cast %85 : vector<1x1x64xf32> to vector<1x64xf32>
    %87 = vector.broadcast %86 : vector<1x64xf32> to vector<2x64xf32>
    %88 = arith.mulf %69, %87 : vector<2x64xf32>
    %89 = arith.addf %67, %88 : vector<2x64xf32>
    %c0_53 = arith.constant 0 : index
    %c4 = arith.constant 4 : index
    %c0_54 = arith.constant 0 : index
    %90 = vector.load %arg2[%c0_53, %c4, %c0_54] : memref<2x36x64xf32, #tpu.memory_space<vmem>>, vector<2x1x64xf32>
    %91 = vector.shape_cast %90 : vector<2x1x64xf32> to vector<2x64xf32>
    %c0_55 = arith.constant 0 : index
    %c4_56 = arith.constant 4 : index
    %c0_57 = arith.constant 0 : index
    %92 = vector.load %arg3[%c0_55, %c4_56, %c0_57] : memref<1x144x64xf32, #tpu.memory_space<vmem>>, vector<1x1x64xf32>
    %93 = vector.shape_cast %92 : vector<1x1x64xf32> to vector<1x64xf32>
    %94 = vector.broadcast %93 : vector<1x64xf32> to vector<2x64xf32>
    %95 = arith.mulf %91, %94 : vector<2x64xf32>
    %96 = arith.addf %74, %95 : vector<2x64xf32>
    %c0_58 = arith.constant 0 : index
    %c40 = arith.constant 40 : index
    %c0_59 = arith.constant 0 : index
    %97 = vector.load %arg3[%c0_58, %c40, %c0_59] : memref<1x144x64xf32, #tpu.memory_space<vmem>>, vector<1x1x64xf32>
    %98 = vector.shape_cast %97 : vector<1x1x64xf32> to vector<1x64xf32>
    %99 = vector.broadcast %98 : vector<1x64xf32> to vector<2x64xf32>
    %100 = arith.mulf %91, %99 : vector<2x64xf32>
    %101 = arith.addf %79, %100 : vector<2x64xf32>
    %c0_60 = arith.constant 0 : index
    %c76 = arith.constant 76 : index
    %c0_61 = arith.constant 0 : index
    %102 = vector.load %arg3[%c0_60, %c76, %c0_61] : memref<1x144x64xf32, #tpu.memory_space<vmem>>, vector<1x1x64xf32>
    %103 = vector.shape_cast %102 : vector<1x1x64xf32> to vector<1x64xf32>
    %104 = vector.broadcast %103 : vector<1x64xf32> to vector<2x64xf32>
    %105 = arith.mulf %91, %104 : vector<2x64xf32>
    %106 = arith.addf %84, %105 : vector<2x64xf32>
    %c0_62 = arith.constant 0 : index
    %c112 = arith.constant 112 : index
    %c0_63 = arith.constant 0 : index
    %107 = vector.load %arg3[%c0_62, %c112, %c0_63] : memref<1x144x64xf32, #tpu.memory_space<vmem>>, vector<1x1x64xf32>
    %108 = vector.shape_cast %107 : vector<1x1x64xf32> to vector<1x64xf32>
    %109 = vector.broadcast %108 : vector<1x64xf32> to vector<2x64xf32>
    %110 = arith.mulf %91, %109 : vector<2x64xf32>
    %111 = arith.addf %89, %110 : vector<2x64xf32>
    %c0_64 = arith.constant 0 : index
    %c5 = arith.constant 5 : index
    %c0_65 = arith.constant 0 : index
    %112 = vector.load %arg2[%c0_64, %c5, %c0_65] : memref<2x36x64xf32, #tpu.memory_space<vmem>>, vector<2x1x64xf32>
    %113 = vector.shape_cast %112 : vector<2x1x64xf32> to vector<2x64xf32>
    %c0_66 = arith.constant 0 : index
    %c5_67 = arith.constant 5 : index
    %c0_68 = arith.constant 0 : index
    %114 = vector.load %arg3[%c0_66, %c5_67, %c0_68] : memref<1x144x64xf32, #tpu.memory_space<vmem>>, vector<1x1x64xf32>
    %115 = vector.shape_cast %114 : vector<1x1x64xf32> to vector<1x64xf32>
    %116 = vector.broadcast %115 : vector<1x64xf32> to vector<2x64xf32>
    %117 = arith.mulf %113, %116 : vector<2x64xf32>
    %118 = arith.addf %96, %117 : vector<2x64xf32>
    %c0_69 = arith.constant 0 : index
    %c41 = arith.constant 41 : index
    %c0_70 = arith.constant 0 : index
    %119 = vector.load %arg3[%c0_69, %c41, %c0_70] : memref<1x144x64xf32, #tpu.memory_space<vmem>>, vector<1x1x64xf32>
    %120 = vector.shape_cast %119 : vector<1x1x64xf32> to vector<1x64xf32>
    %121 = vector.broadcast %120 : vector<1x64xf32> to vector<2x64xf32>
    %122 = arith.mulf %113, %121 : vector<2x64xf32>
    %123 = arith.addf %101, %122 : vector<2x64xf32>
    %c0_71 = arith.constant 0 : index
    %c77 = arith.constant 77 : index
    %c0_72 = arith.constant 0 : index
    %124 = vector.load %arg3[%c0_71, %c77, %c0_72] : memref<1x144x64xf32, #tpu.memory_space<vmem>>, vector<1x1x64xf32>
    %125 = vector.shape_cast %124 : vector<1x1x64xf32> to vector<1x64xf32>
    %126 = vector.broadcast %125 : vector<1x64xf32> to vector<2x64xf32>
    %127 = arith.mulf %113, %126 : vector<2x64xf32>
    %128 = arith.addf %106, %127 : vector<2x64xf32>
    %c0_73 = arith.constant 0 : index
    %c113 = arith.constant 113 : index
    %c0_74 = arith.constant 0 : index
    %129 = vector.load %arg3[%c0_73, %c113, %c0_74] : memref<1x144x64xf32, #tpu.memory_space<vmem>>, vector<1x1x64xf32>
    %130 = vector.shape_cast %129 : vector<1x1x64xf32> to vector<1x64xf32>
    %131 = vector.broadcast %130 : vector<1x64xf32> to vector<2x64xf32>
    %132 = arith.mulf %113, %131 : vector<2x64xf32>
    %133 = arith.addf %111, %132 : vector<2x64xf32>
    %c0_75 = arith.constant 0 : index
    %c6 = arith.constant 6 : index
    %c0_76 = arith.constant 0 : index
    %134 = vector.load %arg2[%c0_75, %c6, %c0_76] : memref<2x36x64xf32, #tpu.memory_space<vmem>>, vector<2x1x64xf32>
    %135 = vector.shape_cast %134 : vector<2x1x64xf32> to vector<2x64xf32>
    %c0_77 = arith.constant 0 : index
    %c6_78 = arith.constant 6 : index
    %c0_79 = arith.constant 0 : index
    %136 = vector.load %arg3[%c0_77, %c6_78, %c0_79] : memref<1x144x64xf32, #tpu.memory_space<vmem>>, vector<1x1x64xf32>
    %137 = vector.shape_cast %136 : vector<1x1x64xf32> to vector<1x64xf32>
    %138 = vector.broadcast %137 : vector<1x64xf32> to vector<2x64xf32>
    %139 = arith.mulf %135, %138 : vector<2x64xf32>
    %140 = arith.addf %118, %139 : vector<2x64xf32>
    %c0_80 = arith.constant 0 : index
    %c42 = arith.constant 42 : index
    %c0_81 = arith.constant 0 : index
    %141 = vector.load %arg3[%c0_80, %c42, %c0_81] : memref<1x144x64xf32, #tpu.memory_space<vmem>>, vector<1x1x64xf32>
    %142 = vector.shape_cast %141 : vector<1x1x64xf32> to vector<1x64xf32>
    %143 = vector.broadcast %142 : vector<1x64xf32> to vector<2x64xf32>
    %144 = arith.mulf %135, %143 : vector<2x64xf32>
    %145 = arith.addf %123, %144 : vector<2x64xf32>
    %c0_82 = arith.constant 0 : index
    %c78 = arith.constant 78 : index
    %c0_83 = arith.constant 0 : index
    %146 = vector.load %arg3[%c0_82, %c78, %c0_83] : memref<1x144x64xf32, #tpu.memory_space<vmem>>, vector<1x1x64xf32>
    %147 = vector.shape_cast %146 : vector<1x1x64xf32> to vector<1x64xf32>
    %148 = vector.broadcast %147 : vector<1x64xf32> to vector<2x64xf32>
    %149 = arith.mulf %135, %148 : vector<2x64xf32>
    %150 = arith.addf %128, %149 : vector<2x64xf32>
    %c0_84 = arith.constant 0 : index
    %c114 = arith.constant 114 : index
    %c0_85 = arith.constant 0 : index
    %151 = vector.load %arg3[%c0_84, %c114, %c0_85] : memref<1x144x64xf32, #tpu.memory_space<vmem>>, vector<1x1x64xf32>
    %152 = vector.shape_cast %151 : vector<1x1x64xf32> to vector<1x64xf32>
    %153 = vector.broadcast %152 : vector<1x64xf32> to vector<2x64xf32>
    %154 = arith.mulf %135, %153 : vector<2x64xf32>
    %155 = arith.addf %133, %154 : vector<2x64xf32>
    %c0_86 = arith.constant 0 : index
    %c7 = arith.constant 7 : index
    %c0_87 = arith.constant 0 : index
    %156 = vector.load %arg2[%c0_86, %c7, %c0_87] : memref<2x36x64xf32, #tpu.memory_space<vmem>>, vector<2x1x64xf32>
    %157 = vector.shape_cast %156 : vector<2x1x64xf32> to vector<2x64xf32>
    %c0_88 = arith.constant 0 : index
    %c7_89 = arith.constant 7 : index
    %c0_90 = arith.constant 0 : index
    %158 = vector.load %arg3[%c0_88, %c7_89, %c0_90] : memref<1x144x64xf32, #tpu.memory_space<vmem>>, vector<1x1x64xf32>
    %159 = vector.shape_cast %158 : vector<1x1x64xf32> to vector<1x64xf32>
    %160 = vector.broadcast %159 : vector<1x64xf32> to vector<2x64xf32>
    %161 = arith.mulf %157, %160 : vector<2x64xf32>
    %162 = arith.addf %140, %161 : vector<2x64xf32>
    %c0_91 = arith.constant 0 : index
    %c43 = arith.constant 43 : index
    %c0_92 = arith.constant 0 : index
    %163 = vector.load %arg3[%c0_91, %c43, %c0_92] : memref<1x144x64xf32, #tpu.memory_space<vmem>>, vector<1x1x64xf32>
    %164 = vector.shape_cast %163 : vector<1x1x64xf32> to vector<1x64xf32>
    %165 = vector.broadcast %164 : vector<1x64xf32> to vector<2x64xf32>
    %166 = arith.mulf %157, %165 : vector<2x64xf32>
    %167 = arith.addf %145, %166 : vector<2x64xf32>
    %c0_93 = arith.constant 0 : index
    %c79 = arith.constant 79 : index
    %c0_94 = arith.constant 0 : index
    %168 = vector.load %arg3[%c0_93, %c79, %c0_94] : memref<1x144x64xf32, #tpu.memory_space<vmem>>, vector<1x1x64xf32>
    %169 = vector.shape_cast %168 : vector<1x1x64xf32> to vector<1x64xf32>
    %170 = vector.broadcast %169 : vector<1x64xf32> to vector<2x64xf32>
    %171 = arith.mulf %157, %170 : vector<2x64xf32>
    %172 = arith.addf %150, %171 : vector<2x64xf32>
    %c0_95 = arith.constant 0 : index
    %c115 = arith.constant 115 : index
    %c0_96 = arith.constant 0 : index
    %173 = vector.load %arg3[%c0_95, %c115, %c0_96] : memref<1x144x64xf32, #tpu.memory_space<vmem>>, vector<1x1x64xf32>
    %174 = vector.shape_cast %173 : vector<1x1x64xf32> to vector<1x64xf32>
    %175 = vector.broadcast %174 : vector<1x64xf32> to vector<2x64xf32>
    %176 = arith.mulf %157, %175 : vector<2x64xf32>
    %177 = arith.addf %155, %176 : vector<2x64xf32>
    %c0_97 = arith.constant 0 : index
    %c8 = arith.constant 8 : index
    %c0_98 = arith.constant 0 : index
    %178 = vector.load %arg2[%c0_97, %c8, %c0_98] : memref<2x36x64xf32, #tpu.memory_space<vmem>>, vector<2x1x64xf32>
    %179 = vector.shape_cast %178 : vector<2x1x64xf32> to vector<2x64xf32>
    %c0_99 = arith.constant 0 : index
    %c8_100 = arith.constant 8 : index
    %c0_101 = arith.constant 0 : index
    %180 = vector.load %arg3[%c0_99, %c8_100, %c0_101] : memref<1x144x64xf32, #tpu.memory_space<vmem>>, vector<1x1x64xf32>
    %181 = vector.shape_cast %180 : vector<1x1x64xf32> to vector<1x64xf32>
    %182 = vector.broadcast %181 : vector<1x64xf32> to vector<2x64xf32>
    %183 = arith.mulf %179, %182 : vector<2x64xf32>
    %184 = arith.addf %162, %183 : vector<2x64xf32>
    %c0_102 = arith.constant 0 : index
    %c44 = arith.constant 44 : index
    %c0_103 = arith.constant 0 : index
    %185 = vector.load %arg3[%c0_102, %c44, %c0_103] : memref<1x144x64xf32, #tpu.memory_space<vmem>>, vector<1x1x64xf32>
    %186 = vector.shape_cast %185 : vector<1x1x64xf32> to vector<1x64xf32>
    %187 = vector.broadcast %186 : vector<1x64xf32> to vector<2x64xf32>
    %188 = arith.mulf %179, %187 : vector<2x64xf32>
    %189 = arith.addf %167, %188 : vector<2x64xf32>
    %c0_104 = arith.constant 0 : index
    %c80 = arith.constant 80 : index
    %c0_105 = arith.constant 0 : index
    %190 = vector.load %arg3[%c0_104, %c80, %c0_105] : memref<1x144x64xf32, #tpu.memory_space<vmem>>, vector<1x1x64xf32>
    %191 = vector.shape_cast %190 : vector<1x1x64xf32> to vector<1x64xf32>
    %192 = vector.broadcast %191 : vector<1x64xf32> to vector<2x64xf32>
    %193 = arith.mulf %179, %192 : vector<2x64xf32>
    %194 = arith.addf %172, %193 : vector<2x64xf32>
    %c0_106 = arith.constant 0 : index
    %c116 = arith.constant 116 : index
    %c0_107 = arith.constant 0 : index
    %195 = vector.load %arg3[%c0_106, %c116, %c0_107] : memref<1x144x64xf32, #tpu.memory_space<vmem>>, vector<1x1x64xf32>
    %196 = vector.shape_cast %195 : vector<1x1x64xf32> to vector<1x64xf32>
    %197 = vector.broadcast %196 : vector<1x64xf32> to vector<2x64xf32>
    %198 = arith.mulf %179, %197 : vector<2x64xf32>
    %199 = arith.addf %177, %198 : vector<2x64xf32>
    %c0_108 = arith.constant 0 : index
    %c9 = arith.constant 9 : index
    %c0_109 = arith.constant 0 : index
    %200 = vector.load %arg2[%c0_108, %c9, %c0_109] : memref<2x36x64xf32, #tpu.memory_space<vmem>>, vector<2x1x64xf32>
    %201 = vector.shape_cast %200 : vector<2x1x64xf32> to vector<2x64xf32>
    %c0_110 = arith.constant 0 : index
    %c9_111 = arith.constant 9 : index
    %c0_112 = arith.constant 0 : index
    %202 = vector.load %arg3[%c0_110, %c9_111, %c0_112] : memref<1x144x64xf32, #tpu.memory_space<vmem>>, vector<1x1x64xf32>
    %203 = vector.shape_cast %202 : vector<1x1x64xf32> to vector<1x64xf32>
    %204 = vector.broadcast %203 : vector<1x64xf32> to vector<2x64xf32>
    %205 = arith.mulf %201, %204 : vector<2x64xf32>
    %206 = arith.addf %184, %205 : vector<2x64xf32>
    %c0_113 = arith.constant 0 : index
    %c45 = arith.constant 45 : index
    %c0_114 = arith.constant 0 : index
    %207 = vector.load %arg3[%c0_113, %c45, %c0_114] : memref<1x144x64xf32, #tpu.memory_space<vmem>>, vector<1x1x64xf32>
    %208 = vector.shape_cast %207 : vector<1x1x64xf32> to vector<1x64xf32>
    %209 = vector.broadcast %208 : vector<1x64xf32> to vector<2x64xf32>
    %210 = arith.mulf %201, %209 : vector<2x64xf32>
    %211 = arith.addf %189, %210 : vector<2x64xf32>
    %c0_115 = arith.constant 0 : index
    %c81 = arith.constant 81 : index
    %c0_116 = arith.constant 0 : index
    %212 = vector.load %arg3[%c0_115, %c81, %c0_116] : memref<1x144x64xf32, #tpu.memory_space<vmem>>, vector<1x1x64xf32>
    %213 = vector.shape_cast %212 : vector<1x1x64xf32> to vector<1x64xf32>
    %214 = vector.broadcast %213 : vector<1x64xf32> to vector<2x64xf32>
    %215 = arith.mulf %201, %214 : vector<2x64xf32>
    %216 = arith.addf %194, %215 : vector<2x64xf32>
    %c0_117 = arith.constant 0 : index
    %c117 = arith.constant 117 : index
    %c0_118 = arith.constant 0 : index
    %217 = vector.load %arg3[%c0_117, %c117, %c0_118] : memref<1x144x64xf32, #tpu.memory_space<vmem>>, vector<1x1x64xf32>
    %218 = vector.shape_cast %217 : vector<1x1x64xf32> to vector<1x64xf32>
    %219 = vector.broadcast %218 : vector<1x64xf32> to vector<2x64xf32>
    %220 = arith.mulf %201, %219 : vector<2x64xf32>
    %221 = arith.addf %199, %220 : vector<2x64xf32>
    %c0_119 = arith.constant 0 : index
    %c10 = arith.constant 10 : index
    %c0_120 = arith.constant 0 : index
    %222 = vector.load %arg2[%c0_119, %c10, %c0_120] : memref<2x36x64xf32, #tpu.memory_space<vmem>>, vector<2x1x64xf32>
    %223 = vector.shape_cast %222 : vector<2x1x64xf32> to vector<2x64xf32>
    %c0_121 = arith.constant 0 : index
    %c10_122 = arith.constant 10 : index
    %c0_123 = arith.constant 0 : index
    %224 = vector.load %arg3[%c0_121, %c10_122, %c0_123] : memref<1x144x64xf32, #tpu.memory_space<vmem>>, vector<1x1x64xf32>
    %225 = vector.shape_cast %224 : vector<1x1x64xf32> to vector<1x64xf32>
    %226 = vector.broadcast %225 : vector<1x64xf32> to vector<2x64xf32>
    %227 = arith.mulf %223, %226 : vector<2x64xf32>
    %228 = arith.addf %206, %227 : vector<2x64xf32>
    %c0_124 = arith.constant 0 : index
    %c46 = arith.constant 46 : index
    %c0_125 = arith.constant 0 : index
    %229 = vector.load %arg3[%c0_124, %c46, %c0_125] : memref<1x144x64xf32, #tpu.memory_space<vmem>>, vector<1x1x64xf32>
    %230 = vector.shape_cast %229 : vector<1x1x64xf32> to vector<1x64xf32>
    %231 = vector.broadcast %230 : vector<1x64xf32> to vector<2x64xf32>
    %232 = arith.mulf %223, %231 : vector<2x64xf32>
    %233 = arith.addf %211, %232 : vector<2x64xf32>
    %c0_126 = arith.constant 0 : index
    %c82 = arith.constant 82 : index
    %c0_127 = arith.constant 0 : index
    %234 = vector.load %arg3[%c0_126, %c82, %c0_127] : memref<1x144x64xf32, #tpu.memory_space<vmem>>, vector<1x1x64xf32>
    %235 = vector.shape_cast %234 : vector<1x1x64xf32> to vector<1x64xf32>
    %236 = vector.broadcast %235 : vector<1x64xf32> to vector<2x64xf32>
    %237 = arith.mulf %223, %236 : vector<2x64xf32>
    %238 = arith.addf %216, %237 : vector<2x64xf32>
    %c0_128 = arith.constant 0 : index
    %c118 = arith.constant 118 : index
    %c0_129 = arith.constant 0 : index
    %239 = vector.load %arg3[%c0_128, %c118, %c0_129] : memref<1x144x64xf32, #tpu.memory_space<vmem>>, vector<1x1x64xf32>
    %240 = vector.shape_cast %239 : vector<1x1x64xf32> to vector<1x64xf32>
    %241 = vector.broadcast %240 : vector<1x64xf32> to vector<2x64xf32>
    %242 = arith.mulf %223, %241 : vector<2x64xf32>
    %243 = arith.addf %221, %242 : vector<2x64xf32>
    %c0_130 = arith.constant 0 : index
    %c11 = arith.constant 11 : index
    %c0_131 = arith.constant 0 : index
    %244 = vector.load %arg2[%c0_130, %c11, %c0_131] : memref<2x36x64xf32, #tpu.memory_space<vmem>>, vector<2x1x64xf32>
    %245 = vector.shape_cast %244 : vector<2x1x64xf32> to vector<2x64xf32>
    %c0_132 = arith.constant 0 : index
    %c11_133 = arith.constant 11 : index
    %c0_134 = arith.constant 0 : index
    %246 = vector.load %arg3[%c0_132, %c11_133, %c0_134] : memref<1x144x64xf32, #tpu.memory_space<vmem>>, vector<1x1x64xf32>
    %247 = vector.shape_cast %246 : vector<1x1x64xf32> to vector<1x64xf32>
    %248 = vector.broadcast %247 : vector<1x64xf32> to vector<2x64xf32>
    %249 = arith.mulf %245, %248 : vector<2x64xf32>
    %250 = arith.addf %228, %249 : vector<2x64xf32>
    %c0_135 = arith.constant 0 : index
    %c47 = arith.constant 47 : index
    %c0_136 = arith.constant 0 : index
    %251 = vector.load %arg3[%c0_135, %c47, %c0_136] : memref<1x144x64xf32, #tpu.memory_space<vmem>>, vector<1x1x64xf32>
    %252 = vector.shape_cast %251 : vector<1x1x64xf32> to vector<1x64xf32>
    %253 = vector.broadcast %252 : vector<1x64xf32> to vector<2x64xf32>
    %254 = arith.mulf %245, %253 : vector<2x64xf32>
    %255 = arith.addf %233, %254 : vector<2x64xf32>
    %c0_137 = arith.constant 0 : index
    %c83 = arith.constant 83 : index
    %c0_138 = arith.constant 0 : index
    %256 = vector.load %arg3[%c0_137, %c83, %c0_138] : memref<1x144x64xf32, #tpu.memory_space<vmem>>, vector<1x1x64xf32>
    %257 = vector.shape_cast %256 : vector<1x1x64xf32> to vector<1x64xf32>
    %258 = vector.broadcast %257 : vector<1x64xf32> to vector<2x64xf32>
    %259 = arith.mulf %245, %258 : vector<2x64xf32>
    %260 = arith.addf %238, %259 : vector<2x64xf32>
    %c0_139 = arith.constant 0 : index
    %c119 = arith.constant 119 : index
    %c0_140 = arith.constant 0 : index
    %261 = vector.load %arg3[%c0_139, %c119, %c0_140] : memref<1x144x64xf32, #tpu.memory_space<vmem>>, vector<1x1x64xf32>
    %262 = vector.shape_cast %261 : vector<1x1x64xf32> to vector<1x64xf32>
    %263 = vector.broadcast %262 : vector<1x64xf32> to vector<2x64xf32>
    %264 = arith.mulf %245, %263 : vector<2x64xf32>
    %265 = arith.addf %243, %264 : vector<2x64xf32>
    %c0_141 = arith.constant 0 : index
    %c12 = arith.constant 12 : index
    %c0_142 = arith.constant 0 : index
    %266 = vector.load %arg2[%c0_141, %c12, %c0_142] : memref<2x36x64xf32, #tpu.memory_space<vmem>>, vector<2x1x64xf32>
    %267 = vector.shape_cast %266 : vector<2x1x64xf32> to vector<2x64xf32>
    %c0_143 = arith.constant 0 : index
    %c12_144 = arith.constant 12 : index
    %c0_145 = arith.constant 0 : index
    %268 = vector.load %arg3[%c0_143, %c12_144, %c0_145] : memref<1x144x64xf32, #tpu.memory_space<vmem>>, vector<1x1x64xf32>
    %269 = vector.shape_cast %268 : vector<1x1x64xf32> to vector<1x64xf32>
    %270 = vector.broadcast %269 : vector<1x64xf32> to vector<2x64xf32>
    %271 = arith.mulf %267, %270 : vector<2x64xf32>
    %272 = arith.addf %250, %271 : vector<2x64xf32>
    %c0_146 = arith.constant 0 : index
    %c48 = arith.constant 48 : index
    %c0_147 = arith.constant 0 : index
    %273 = vector.load %arg3[%c0_146, %c48, %c0_147] : memref<1x144x64xf32, #tpu.memory_space<vmem>>, vector<1x1x64xf32>
    %274 = vector.shape_cast %273 : vector<1x1x64xf32> to vector<1x64xf32>
    %275 = vector.broadcast %274 : vector<1x64xf32> to vector<2x64xf32>
    %276 = arith.mulf %267, %275 : vector<2x64xf32>
    %277 = arith.addf %255, %276 : vector<2x64xf32>
    %c0_148 = arith.constant 0 : index
    %c84 = arith.constant 84 : index
    %c0_149 = arith.constant 0 : index
    %278 = vector.load %arg3[%c0_148, %c84, %c0_149] : memref<1x144x64xf32, #tpu.memory_space<vmem>>, vector<1x1x64xf32>
    %279 = vector.shape_cast %278 : vector<1x1x64xf32> to vector<1x64xf32>
    %280 = vector.broadcast %279 : vector<1x64xf32> to vector<2x64xf32>
    %281 = arith.mulf %267, %280 : vector<2x64xf32>
    %282 = arith.addf %260, %281 : vector<2x64xf32>
    %c0_150 = arith.constant 0 : index
    %c120 = arith.constant 120 : index
    %c0_151 = arith.constant 0 : index
    %283 = vector.load %arg3[%c0_150, %c120, %c0_151] : memref<1x144x64xf32, #tpu.memory_space<vmem>>, vector<1x1x64xf32>
    %284 = vector.shape_cast %283 : vector<1x1x64xf32> to vector<1x64xf32>
    %285 = vector.broadcast %284 : vector<1x64xf32> to vector<2x64xf32>
    %286 = arith.mulf %267, %285 : vector<2x64xf32>
    %287 = arith.addf %265, %286 : vector<2x64xf32>
    %c0_152 = arith.constant 0 : index
    %c13 = arith.constant 13 : index
    %c0_153 = arith.constant 0 : index
    %288 = vector.load %arg2[%c0_152, %c13, %c0_153] : memref<2x36x64xf32, #tpu.memory_space<vmem>>, vector<2x1x64xf32>
    %289 = vector.shape_cast %288 : vector<2x1x64xf32> to vector<2x64xf32>
    %c0_154 = arith.constant 0 : index
    %c13_155 = arith.constant 13 : index
    %c0_156 = arith.constant 0 : index
    %290 = vector.load %arg3[%c0_154, %c13_155, %c0_156] : memref<1x144x64xf32, #tpu.memory_space<vmem>>, vector<1x1x64xf32>
    %291 = vector.shape_cast %290 : vector<1x1x64xf32> to vector<1x64xf32>
    %292 = vector.broadcast %291 : vector<1x64xf32> to vector<2x64xf32>
    %293 = arith.mulf %289, %292 : vector<2x64xf32>
    %294 = arith.addf %272, %293 : vector<2x64xf32>
    %c0_157 = arith.constant 0 : index
    %c49 = arith.constant 49 : index
    %c0_158 = arith.constant 0 : index
    %295 = vector.load %arg3[%c0_157, %c49, %c0_158] : memref<1x144x64xf32, #tpu.memory_space<vmem>>, vector<1x1x64xf32>
    %296 = vector.shape_cast %295 : vector<1x1x64xf32> to vector<1x64xf32>
    %297 = vector.broadcast %296 : vector<1x64xf32> to vector<2x64xf32>
    %298 = arith.mulf %289, %297 : vector<2x64xf32>
    %299 = arith.addf %277, %298 : vector<2x64xf32>
    %c0_159 = arith.constant 0 : index
    %c85 = arith.constant 85 : index
    %c0_160 = arith.constant 0 : index
    %300 = vector.load %arg3[%c0_159, %c85, %c0_160] : memref<1x144x64xf32, #tpu.memory_space<vmem>>, vector<1x1x64xf32>
    %301 = vector.shape_cast %300 : vector<1x1x64xf32> to vector<1x64xf32>
    %302 = vector.broadcast %301 : vector<1x64xf32> to vector<2x64xf32>
    %303 = arith.mulf %289, %302 : vector<2x64xf32>
    %304 = arith.addf %282, %303 : vector<2x64xf32>
    %c0_161 = arith.constant 0 : index
    %c121 = arith.constant 121 : index
    %c0_162 = arith.constant 0 : index
    %305 = vector.load %arg3[%c0_161, %c121, %c0_162] : memref<1x144x64xf32, #tpu.memory_space<vmem>>, vector<1x1x64xf32>
    %306 = vector.shape_cast %305 : vector<1x1x64xf32> to vector<1x64xf32>
    %307 = vector.broadcast %306 : vector<1x64xf32> to vector<2x64xf32>
    %308 = arith.mulf %289, %307 : vector<2x64xf32>
    %309 = arith.addf %287, %308 : vector<2x64xf32>
    %c0_163 = arith.constant 0 : index
    %c14 = arith.constant 14 : index
    %c0_164 = arith.constant 0 : index
    %310 = vector.load %arg2[%c0_163, %c14, %c0_164] : memref<2x36x64xf32, #tpu.memory_space<vmem>>, vector<2x1x64xf32>
    %311 = vector.shape_cast %310 : vector<2x1x64xf32> to vector<2x64xf32>
    %c0_165 = arith.constant 0 : index
    %c14_166 = arith.constant 14 : index
    %c0_167 = arith.constant 0 : index
    %312 = vector.load %arg3[%c0_165, %c14_166, %c0_167] : memref<1x144x64xf32, #tpu.memory_space<vmem>>, vector<1x1x64xf32>
    %313 = vector.shape_cast %312 : vector<1x1x64xf32> to vector<1x64xf32>
    %314 = vector.broadcast %313 : vector<1x64xf32> to vector<2x64xf32>
    %315 = arith.mulf %311, %314 : vector<2x64xf32>
    %316 = arith.addf %294, %315 : vector<2x64xf32>
    %c0_168 = arith.constant 0 : index
    %c50 = arith.constant 50 : index
    %c0_169 = arith.constant 0 : index
    %317 = vector.load %arg3[%c0_168, %c50, %c0_169] : memref<1x144x64xf32, #tpu.memory_space<vmem>>, vector<1x1x64xf32>
    %318 = vector.shape_cast %317 : vector<1x1x64xf32> to vector<1x64xf32>
    %319 = vector.broadcast %318 : vector<1x64xf32> to vector<2x64xf32>
    %320 = arith.mulf %311, %319 : vector<2x64xf32>
    %321 = arith.addf %299, %320 : vector<2x64xf32>
    %c0_170 = arith.constant 0 : index
    %c86 = arith.constant 86 : index
    %c0_171 = arith.constant 0 : index
    %322 = vector.load %arg3[%c0_170, %c86, %c0_171] : memref<1x144x64xf32, #tpu.memory_space<vmem>>, vector<1x1x64xf32>
    %323 = vector.shape_cast %322 : vector<1x1x64xf32> to vector<1x64xf32>
    %324 = vector.broadcast %323 : vector<1x64xf32> to vector<2x64xf32>
    %325 = arith.mulf %311, %324 : vector<2x64xf32>
    %326 = arith.addf %304, %325 : vector<2x64xf32>
    %c0_172 = arith.constant 0 : index
    %c122 = arith.constant 122 : index
    %c0_173 = arith.constant 0 : index
    %327 = vector.load %arg3[%c0_172, %c122, %c0_173] : memref<1x144x64xf32, #tpu.memory_space<vmem>>, vector<1x1x64xf32>
    %328 = vector.shape_cast %327 : vector<1x1x64xf32> to vector<1x64xf32>
    %329 = vector.broadcast %328 : vector<1x64xf32> to vector<2x64xf32>
    %330 = arith.mulf %311, %329 : vector<2x64xf32>
    %331 = arith.addf %309, %330 : vector<2x64xf32>
    %c0_174 = arith.constant 0 : index
    %c15 = arith.constant 15 : index
    %c0_175 = arith.constant 0 : index
    %332 = vector.load %arg2[%c0_174, %c15, %c0_175] : memref<2x36x64xf32, #tpu.memory_space<vmem>>, vector<2x1x64xf32>
    %333 = vector.shape_cast %332 : vector<2x1x64xf32> to vector<2x64xf32>
    %c0_176 = arith.constant 0 : index
    %c15_177 = arith.constant 15 : index
    %c0_178 = arith.constant 0 : index
    %334 = vector.load %arg3[%c0_176, %c15_177, %c0_178] : memref<1x144x64xf32, #tpu.memory_space<vmem>>, vector<1x1x64xf32>
    %335 = vector.shape_cast %334 : vector<1x1x64xf32> to vector<1x64xf32>
    %336 = vector.broadcast %335 : vector<1x64xf32> to vector<2x64xf32>
    %337 = arith.mulf %333, %336 : vector<2x64xf32>
    %338 = arith.addf %316, %337 : vector<2x64xf32>
    %c0_179 = arith.constant 0 : index
    %c51 = arith.constant 51 : index
    %c0_180 = arith.constant 0 : index
    %339 = vector.load %arg3[%c0_179, %c51, %c0_180] : memref<1x144x64xf32, #tpu.memory_space<vmem>>, vector<1x1x64xf32>
    %340 = vector.shape_cast %339 : vector<1x1x64xf32> to vector<1x64xf32>
    %341 = vector.broadcast %340 : vector<1x64xf32> to vector<2x64xf32>
    %342 = arith.mulf %333, %341 : vector<2x64xf32>
    %343 = arith.addf %321, %342 : vector<2x64xf32>
    %c0_181 = arith.constant 0 : index
    %c87 = arith.constant 87 : index
    %c0_182 = arith.constant 0 : index
    %344 = vector.load %arg3[%c0_181, %c87, %c0_182] : memref<1x144x64xf32, #tpu.memory_space<vmem>>, vector<1x1x64xf32>
    %345 = vector.shape_cast %344 : vector<1x1x64xf32> to vector<1x64xf32>
    %346 = vector.broadcast %345 : vector<1x64xf32> to vector<2x64xf32>
    %347 = arith.mulf %333, %346 : vector<2x64xf32>
    %348 = arith.addf %326, %347 : vector<2x64xf32>
    %c0_183 = arith.constant 0 : index
    %c123 = arith.constant 123 : index
    %c0_184 = arith.constant 0 : index
    %349 = vector.load %arg3[%c0_183, %c123, %c0_184] : memref<1x144x64xf32, #tpu.memory_space<vmem>>, vector<1x1x64xf32>
    %350 = vector.shape_cast %349 : vector<1x1x64xf32> to vector<1x64xf32>
    %351 = vector.broadcast %350 : vector<1x64xf32> to vector<2x64xf32>
    %352 = arith.mulf %333, %351 : vector<2x64xf32>
    %353 = arith.addf %331, %352 : vector<2x64xf32>
    %c0_185 = arith.constant 0 : index
    %c16 = arith.constant 16 : index
    %c0_186 = arith.constant 0 : index
    %354 = vector.load %arg2[%c0_185, %c16, %c0_186] : memref<2x36x64xf32, #tpu.memory_space<vmem>>, vector<2x1x64xf32>
    %355 = vector.shape_cast %354 : vector<2x1x64xf32> to vector<2x64xf32>
    %c0_187 = arith.constant 0 : index
    %c16_188 = arith.constant 16 : index
    %c0_189 = arith.constant 0 : index
    %356 = vector.load %arg3[%c0_187, %c16_188, %c0_189] : memref<1x144x64xf32, #tpu.memory_space<vmem>>, vector<1x1x64xf32>
    %357 = vector.shape_cast %356 : vector<1x1x64xf32> to vector<1x64xf32>
    %358 = vector.broadcast %357 : vector<1x64xf32> to vector<2x64xf32>
    %359 = arith.mulf %355, %358 : vector<2x64xf32>
    %360 = arith.addf %338, %359 : vector<2x64xf32>
    %c0_190 = arith.constant 0 : index
    %c52 = arith.constant 52 : index
    %c0_191 = arith.constant 0 : index
    %361 = vector.load %arg3[%c0_190, %c52, %c0_191] : memref<1x144x64xf32, #tpu.memory_space<vmem>>, vector<1x1x64xf32>
    %362 = vector.shape_cast %361 : vector<1x1x64xf32> to vector<1x64xf32>
    %363 = vector.broadcast %362 : vector<1x64xf32> to vector<2x64xf32>
    %364 = arith.mulf %355, %363 : vector<2x64xf32>
    %365 = arith.addf %343, %364 : vector<2x64xf32>
    %c0_192 = arith.constant 0 : index
    %c88 = arith.constant 88 : index
    %c0_193 = arith.constant 0 : index
    %366 = vector.load %arg3[%c0_192, %c88, %c0_193] : memref<1x144x64xf32, #tpu.memory_space<vmem>>, vector<1x1x64xf32>
    %367 = vector.shape_cast %366 : vector<1x1x64xf32> to vector<1x64xf32>
    %368 = vector.broadcast %367 : vector<1x64xf32> to vector<2x64xf32>
    %369 = arith.mulf %355, %368 : vector<2x64xf32>
    %370 = arith.addf %348, %369 : vector<2x64xf32>
    %c0_194 = arith.constant 0 : index
    %c124 = arith.constant 124 : index
    %c0_195 = arith.constant 0 : index
    %371 = vector.load %arg3[%c0_194, %c124, %c0_195] : memref<1x144x64xf32, #tpu.memory_space<vmem>>, vector<1x1x64xf32>
    %372 = vector.shape_cast %371 : vector<1x1x64xf32> to vector<1x64xf32>
    %373 = vector.broadcast %372 : vector<1x64xf32> to vector<2x64xf32>
    %374 = arith.mulf %355, %373 : vector<2x64xf32>
    %375 = arith.addf %353, %374 : vector<2x64xf32>
    %c0_196 = arith.constant 0 : index
    %c17 = arith.constant 17 : index
    %c0_197 = arith.constant 0 : index
    %376 = vector.load %arg2[%c0_196, %c17, %c0_197] : memref<2x36x64xf32, #tpu.memory_space<vmem>>, vector<2x1x64xf32>
    %377 = vector.shape_cast %376 : vector<2x1x64xf32> to vector<2x64xf32>
    %c0_198 = arith.constant 0 : index
    %c17_199 = arith.constant 17 : index
    %c0_200 = arith.constant 0 : index
    %378 = vector.load %arg3[%c0_198, %c17_199, %c0_200] : memref<1x144x64xf32, #tpu.memory_space<vmem>>, vector<1x1x64xf32>
    %379 = vector.shape_cast %378 : vector<1x1x64xf32> to vector<1x64xf32>
    %380 = vector.broadcast %379 : vector<1x64xf32> to vector<2x64xf32>
    %381 = arith.mulf %377, %380 : vector<2x64xf32>
    %382 = arith.addf %360, %381 : vector<2x64xf32>
    %c0_201 = arith.constant 0 : index
    %c53 = arith.constant 53 : index
    %c0_202 = arith.constant 0 : index
    %383 = vector.load %arg3[%c0_201, %c53, %c0_202] : memref<1x144x64xf32, #tpu.memory_space<vmem>>, vector<1x1x64xf32>
    %384 = vector.shape_cast %383 : vector<1x1x64xf32> to vector<1x64xf32>
    %385 = vector.broadcast %384 : vector<1x64xf32> to vector<2x64xf32>
    %386 = arith.mulf %377, %385 : vector<2x64xf32>
    %387 = arith.addf %365, %386 : vector<2x64xf32>
    %c0_203 = arith.constant 0 : index
    %c89 = arith.constant 89 : index
    %c0_204 = arith.constant 0 : index
    %388 = vector.load %arg3[%c0_203, %c89, %c0_204] : memref<1x144x64xf32, #tpu.memory_space<vmem>>, vector<1x1x64xf32>
    %389 = vector.shape_cast %388 : vector<1x1x64xf32> to vector<1x64xf32>
    %390 = vector.broadcast %389 : vector<1x64xf32> to vector<2x64xf32>
    %391 = arith.mulf %377, %390 : vector<2x64xf32>
    %392 = arith.addf %370, %391 : vector<2x64xf32>
    %c0_205 = arith.constant 0 : index
    %c125 = arith.constant 125 : index
    %c0_206 = arith.constant 0 : index
    %393 = vector.load %arg3[%c0_205, %c125, %c0_206] : memref<1x144x64xf32, #tpu.memory_space<vmem>>, vector<1x1x64xf32>
    %394 = vector.shape_cast %393 : vector<1x1x64xf32> to vector<1x64xf32>
    %395 = vector.broadcast %394 : vector<1x64xf32> to vector<2x64xf32>
    %396 = arith.mulf %377, %395 : vector<2x64xf32>
    %397 = arith.addf %375, %396 : vector<2x64xf32>
    %c0_207 = arith.constant 0 : index
    %c18 = arith.constant 18 : index
    %c0_208 = arith.constant 0 : index
    %398 = vector.load %arg2[%c0_207, %c18, %c0_208] : memref<2x36x64xf32, #tpu.memory_space<vmem>>, vector<2x1x64xf32>
    %399 = vector.shape_cast %398 : vector<2x1x64xf32> to vector<2x64xf32>
    %c0_209 = arith.constant 0 : index
    %c18_210 = arith.constant 18 : index
    %c0_211 = arith.constant 0 : index
    %400 = vector.load %arg3[%c0_209, %c18_210, %c0_211] : memref<1x144x64xf32, #tpu.memory_space<vmem>>, vector<1x1x64xf32>
    %401 = vector.shape_cast %400 : vector<1x1x64xf32> to vector<1x64xf32>
    %402 = vector.broadcast %401 : vector<1x64xf32> to vector<2x64xf32>
    %403 = arith.mulf %399, %402 : vector<2x64xf32>
    %404 = arith.addf %382, %403 : vector<2x64xf32>
    %c0_212 = arith.constant 0 : index
    %c54 = arith.constant 54 : index
    %c0_213 = arith.constant 0 : index
    %405 = vector.load %arg3[%c0_212, %c54, %c0_213] : memref<1x144x64xf32, #tpu.memory_space<vmem>>, vector<1x1x64xf32>
    %406 = vector.shape_cast %405 : vector<1x1x64xf32> to vector<1x64xf32>
    %407 = vector.broadcast %406 : vector<1x64xf32> to vector<2x64xf32>
    %408 = arith.mulf %399, %407 : vector<2x64xf32>
    %409 = arith.addf %387, %408 : vector<2x64xf32>
    %c0_214 = arith.constant 0 : index
    %c90 = arith.constant 90 : index
    %c0_215 = arith.constant 0 : index
    %410 = vector.load %arg3[%c0_214, %c90, %c0_215] : memref<1x144x64xf32, #tpu.memory_space<vmem>>, vector<1x1x64xf32>
    %411 = vector.shape_cast %410 : vector<1x1x64xf32> to vector<1x64xf32>
    %412 = vector.broadcast %411 : vector<1x64xf32> to vector<2x64xf32>
    %413 = arith.mulf %399, %412 : vector<2x64xf32>
    %414 = arith.addf %392, %413 : vector<2x64xf32>
    %c0_216 = arith.constant 0 : index
    %c126 = arith.constant 126 : index
    %c0_217 = arith.constant 0 : index
    %415 = vector.load %arg3[%c0_216, %c126, %c0_217] : memref<1x144x64xf32, #tpu.memory_space<vmem>>, vector<1x1x64xf32>
    %416 = vector.shape_cast %415 : vector<1x1x64xf32> to vector<1x64xf32>
    %417 = vector.broadcast %416 : vector<1x64xf32> to vector<2x64xf32>
    %418 = arith.mulf %399, %417 : vector<2x64xf32>
    %419 = arith.addf %397, %418 : vector<2x64xf32>
    %c0_218 = arith.constant 0 : index
    %c19 = arith.constant 19 : index
    %c0_219 = arith.constant 0 : index
    %420 = vector.load %arg2[%c0_218, %c19, %c0_219] : memref<2x36x64xf32, #tpu.memory_space<vmem>>, vector<2x1x64xf32>
    %421 = vector.shape_cast %420 : vector<2x1x64xf32> to vector<2x64xf32>
    %c0_220 = arith.constant 0 : index
    %c19_221 = arith.constant 19 : index
    %c0_222 = arith.constant 0 : index
    %422 = vector.load %arg3[%c0_220, %c19_221, %c0_222] : memref<1x144x64xf32, #tpu.memory_space<vmem>>, vector<1x1x64xf32>
    %423 = vector.shape_cast %422 : vector<1x1x64xf32> to vector<1x64xf32>
    %424 = vector.broadcast %423 : vector<1x64xf32> to vector<2x64xf32>
    %425 = arith.mulf %421, %424 : vector<2x64xf32>
    %426 = arith.addf %404, %425 : vector<2x64xf32>
    %c0_223 = arith.constant 0 : index
    %c55 = arith.constant 55 : index
    %c0_224 = arith.constant 0 : index
    %427 = vector.load %arg3[%c0_223, %c55, %c0_224] : memref<1x144x64xf32, #tpu.memory_space<vmem>>, vector<1x1x64xf32>
    %428 = vector.shape_cast %427 : vector<1x1x64xf32> to vector<1x64xf32>
    %429 = vector.broadcast %428 : vector<1x64xf32> to vector<2x64xf32>
    %430 = arith.mulf %421, %429 : vector<2x64xf32>
    %431 = arith.addf %409, %430 : vector<2x64xf32>
    %c0_225 = arith.constant 0 : index
    %c91 = arith.constant 91 : index
    %c0_226 = arith.constant 0 : index
    %432 = vector.load %arg3[%c0_225, %c91, %c0_226] : memref<1x144x64xf32, #tpu.memory_space<vmem>>, vector<1x1x64xf32>
    %433 = vector.shape_cast %432 : vector<1x1x64xf32> to vector<1x64xf32>
    %434 = vector.broadcast %433 : vector<1x64xf32> to vector<2x64xf32>
    %435 = arith.mulf %421, %434 : vector<2x64xf32>
    %436 = arith.addf %414, %435 : vector<2x64xf32>
    %c0_227 = arith.constant 0 : index
    %c127 = arith.constant 127 : index
    %c0_228 = arith.constant 0 : index
    %437 = vector.load %arg3[%c0_227, %c127, %c0_228] : memref<1x144x64xf32, #tpu.memory_space<vmem>>, vector<1x1x64xf32>
    %438 = vector.shape_cast %437 : vector<1x1x64xf32> to vector<1x64xf32>
    %439 = vector.broadcast %438 : vector<1x64xf32> to vector<2x64xf32>
    %440 = arith.mulf %421, %439 : vector<2x64xf32>
    %441 = arith.addf %419, %440 : vector<2x64xf32>
    %c0_229 = arith.constant 0 : index
    %c20 = arith.constant 20 : index
    %c0_230 = arith.constant 0 : index
    %442 = vector.load %arg2[%c0_229, %c20, %c0_230] : memref<2x36x64xf32, #tpu.memory_space<vmem>>, vector<2x1x64xf32>
    %443 = vector.shape_cast %442 : vector<2x1x64xf32> to vector<2x64xf32>
    %c0_231 = arith.constant 0 : index
    %c20_232 = arith.constant 20 : index
    %c0_233 = arith.constant 0 : index
    %444 = vector.load %arg3[%c0_231, %c20_232, %c0_233] : memref<1x144x64xf32, #tpu.memory_space<vmem>>, vector<1x1x64xf32>
    %445 = vector.shape_cast %444 : vector<1x1x64xf32> to vector<1x64xf32>
    %446 = vector.broadcast %445 : vector<1x64xf32> to vector<2x64xf32>
    %447 = arith.mulf %443, %446 : vector<2x64xf32>
    %448 = arith.addf %426, %447 : vector<2x64xf32>
    %c0_234 = arith.constant 0 : index
    %c56 = arith.constant 56 : index
    %c0_235 = arith.constant 0 : index
    %449 = vector.load %arg3[%c0_234, %c56, %c0_235] : memref<1x144x64xf32, #tpu.memory_space<vmem>>, vector<1x1x64xf32>
    %450 = vector.shape_cast %449 : vector<1x1x64xf32> to vector<1x64xf32>
    %451 = vector.broadcast %450 : vector<1x64xf32> to vector<2x64xf32>
    %452 = arith.mulf %443, %451 : vector<2x64xf32>
    %453 = arith.addf %431, %452 : vector<2x64xf32>
    %c0_236 = arith.constant 0 : index
    %c92 = arith.constant 92 : index
    %c0_237 = arith.constant 0 : index
    %454 = vector.load %arg3[%c0_236, %c92, %c0_237] : memref<1x144x64xf32, #tpu.memory_space<vmem>>, vector<1x1x64xf32>
    %455 = vector.shape_cast %454 : vector<1x1x64xf32> to vector<1x64xf32>
    %456 = vector.broadcast %455 : vector<1x64xf32> to vector<2x64xf32>
    %457 = arith.mulf %443, %456 : vector<2x64xf32>
    %458 = arith.addf %436, %457 : vector<2x64xf32>
    %c0_238 = arith.constant 0 : index
    %c128 = arith.constant 128 : index
    %c0_239 = arith.constant 0 : index
    %459 = vector.load %arg3[%c0_238, %c128, %c0_239] : memref<1x144x64xf32, #tpu.memory_space<vmem>>, vector<1x1x64xf32>
    %460 = vector.shape_cast %459 : vector<1x1x64xf32> to vector<1x64xf32>
    %461 = vector.broadcast %460 : vector<1x64xf32> to vector<2x64xf32>
    %462 = arith.mulf %443, %461 : vector<2x64xf32>
    %463 = arith.addf %441, %462 : vector<2x64xf32>
    %c0_240 = arith.constant 0 : index
    %c21 = arith.constant 21 : index
    %c0_241 = arith.constant 0 : index
    %464 = vector.load %arg2[%c0_240, %c21, %c0_241] : memref<2x36x64xf32, #tpu.memory_space<vmem>>, vector<2x1x64xf32>
    %465 = vector.shape_cast %464 : vector<2x1x64xf32> to vector<2x64xf32>
    %c0_242 = arith.constant 0 : index
    %c21_243 = arith.constant 21 : index
    %c0_244 = arith.constant 0 : index
    %466 = vector.load %arg3[%c0_242, %c21_243, %c0_244] : memref<1x144x64xf32, #tpu.memory_space<vmem>>, vector<1x1x64xf32>
    %467 = vector.shape_cast %466 : vector<1x1x64xf32> to vector<1x64xf32>
    %468 = vector.broadcast %467 : vector<1x64xf32> to vector<2x64xf32>
    %469 = arith.mulf %465, %468 : vector<2x64xf32>
    %470 = arith.addf %448, %469 : vector<2x64xf32>
    %c0_245 = arith.constant 0 : index
    %c57 = arith.constant 57 : index
    %c0_246 = arith.constant 0 : index
    %471 = vector.load %arg3[%c0_245, %c57, %c0_246] : memref<1x144x64xf32, #tpu.memory_space<vmem>>, vector<1x1x64xf32>
    %472 = vector.shape_cast %471 : vector<1x1x64xf32> to vector<1x64xf32>
    %473 = vector.broadcast %472 : vector<1x64xf32> to vector<2x64xf32>
    %474 = arith.mulf %465, %473 : vector<2x64xf32>
    %475 = arith.addf %453, %474 : vector<2x64xf32>
    %c0_247 = arith.constant 0 : index
    %c93 = arith.constant 93 : index
    %c0_248 = arith.constant 0 : index
    %476 = vector.load %arg3[%c0_247, %c93, %c0_248] : memref<1x144x64xf32, #tpu.memory_space<vmem>>, vector<1x1x64xf32>
    %477 = vector.shape_cast %476 : vector<1x1x64xf32> to vector<1x64xf32>
    %478 = vector.broadcast %477 : vector<1x64xf32> to vector<2x64xf32>
    %479 = arith.mulf %465, %478 : vector<2x64xf32>
    %480 = arith.addf %458, %479 : vector<2x64xf32>
    %c0_249 = arith.constant 0 : index
    %c129 = arith.constant 129 : index
    %c0_250 = arith.constant 0 : index
    %481 = vector.load %arg3[%c0_249, %c129, %c0_250] : memref<1x144x64xf32, #tpu.memory_space<vmem>>, vector<1x1x64xf32>
    %482 = vector.shape_cast %481 : vector<1x1x64xf32> to vector<1x64xf32>
    %483 = vector.broadcast %482 : vector<1x64xf32> to vector<2x64xf32>
    %484 = arith.mulf %465, %483 : vector<2x64xf32>
    %485 = arith.addf %463, %484 : vector<2x64xf32>
    %c0_251 = arith.constant 0 : index
    %c22 = arith.constant 22 : index
    %c0_252 = arith.constant 0 : index
    %486 = vector.load %arg2[%c0_251, %c22, %c0_252] : memref<2x36x64xf32, #tpu.memory_space<vmem>>, vector<2x1x64xf32>
    %487 = vector.shape_cast %486 : vector<2x1x64xf32> to vector<2x64xf32>
    %c0_253 = arith.constant 0 : index
    %c22_254 = arith.constant 22 : index
    %c0_255 = arith.constant 0 : index
    %488 = vector.load %arg3[%c0_253, %c22_254, %c0_255] : memref<1x144x64xf32, #tpu.memory_space<vmem>>, vector<1x1x64xf32>
    %489 = vector.shape_cast %488 : vector<1x1x64xf32> to vector<1x64xf32>
    %490 = vector.broadcast %489 : vector<1x64xf32> to vector<2x64xf32>
    %491 = arith.mulf %487, %490 : vector<2x64xf32>
    %492 = arith.addf %470, %491 : vector<2x64xf32>
    %c0_256 = arith.constant 0 : index
    %c58 = arith.constant 58 : index
    %c0_257 = arith.constant 0 : index
    %493 = vector.load %arg3[%c0_256, %c58, %c0_257] : memref<1x144x64xf32, #tpu.memory_space<vmem>>, vector<1x1x64xf32>
    %494 = vector.shape_cast %493 : vector<1x1x64xf32> to vector<1x64xf32>
    %495 = vector.broadcast %494 : vector<1x64xf32> to vector<2x64xf32>
    %496 = arith.mulf %487, %495 : vector<2x64xf32>
    %497 = arith.addf %475, %496 : vector<2x64xf32>
    %c0_258 = arith.constant 0 : index
    %c94 = arith.constant 94 : index
    %c0_259 = arith.constant 0 : index
    %498 = vector.load %arg3[%c0_258, %c94, %c0_259] : memref<1x144x64xf32, #tpu.memory_space<vmem>>, vector<1x1x64xf32>
    %499 = vector.shape_cast %498 : vector<1x1x64xf32> to vector<1x64xf32>
    %500 = vector.broadcast %499 : vector<1x64xf32> to vector<2x64xf32>
    %501 = arith.mulf %487, %500 : vector<2x64xf32>
    %502 = arith.addf %480, %501 : vector<2x64xf32>
    %c0_260 = arith.constant 0 : index
    %c130 = arith.constant 130 : index
    %c0_261 = arith.constant 0 : index
    %503 = vector.load %arg3[%c0_260, %c130, %c0_261] : memref<1x144x64xf32, #tpu.memory_space<vmem>>, vector<1x1x64xf32>
    %504 = vector.shape_cast %503 : vector<1x1x64xf32> to vector<1x64xf32>
    %505 = vector.broadcast %504 : vector<1x64xf32> to vector<2x64xf32>
    %506 = arith.mulf %487, %505 : vector<2x64xf32>
    %507 = arith.addf %485, %506 : vector<2x64xf32>
    %c0_262 = arith.constant 0 : index
    %c23 = arith.constant 23 : index
    %c0_263 = arith.constant 0 : index
    %508 = vector.load %arg2[%c0_262, %c23, %c0_263] : memref<2x36x64xf32, #tpu.memory_space<vmem>>, vector<2x1x64xf32>
    %509 = vector.shape_cast %508 : vector<2x1x64xf32> to vector<2x64xf32>
    %c0_264 = arith.constant 0 : index
    %c23_265 = arith.constant 23 : index
    %c0_266 = arith.constant 0 : index
    %510 = vector.load %arg3[%c0_264, %c23_265, %c0_266] : memref<1x144x64xf32, #tpu.memory_space<vmem>>, vector<1x1x64xf32>
    %511 = vector.shape_cast %510 : vector<1x1x64xf32> to vector<1x64xf32>
    %512 = vector.broadcast %511 : vector<1x64xf32> to vector<2x64xf32>
    %513 = arith.mulf %509, %512 : vector<2x64xf32>
    %514 = arith.addf %492, %513 : vector<2x64xf32>
    %c0_267 = arith.constant 0 : index
    %c59 = arith.constant 59 : index
    %c0_268 = arith.constant 0 : index
    %515 = vector.load %arg3[%c0_267, %c59, %c0_268] : memref<1x144x64xf32, #tpu.memory_space<vmem>>, vector<1x1x64xf32>
    %516 = vector.shape_cast %515 : vector<1x1x64xf32> to vector<1x64xf32>
    %517 = vector.broadcast %516 : vector<1x64xf32> to vector<2x64xf32>
    %518 = arith.mulf %509, %517 : vector<2x64xf32>
    %519 = arith.addf %497, %518 : vector<2x64xf32>
    %c0_269 = arith.constant 0 : index
    %c95 = arith.constant 95 : index
    %c0_270 = arith.constant 0 : index
    %520 = vector.load %arg3[%c0_269, %c95, %c0_270] : memref<1x144x64xf32, #tpu.memory_space<vmem>>, vector<1x1x64xf32>
    %521 = vector.shape_cast %520 : vector<1x1x64xf32> to vector<1x64xf32>
    %522 = vector.broadcast %521 : vector<1x64xf32> to vector<2x64xf32>
    %523 = arith.mulf %509, %522 : vector<2x64xf32>
    %524 = arith.addf %502, %523 : vector<2x64xf32>
    %c0_271 = arith.constant 0 : index
    %c131 = arith.constant 131 : index
    %c0_272 = arith.constant 0 : index
    %525 = vector.load %arg3[%c0_271, %c131, %c0_272] : memref<1x144x64xf32, #tpu.memory_space<vmem>>, vector<1x1x64xf32>
    %526 = vector.shape_cast %525 : vector<1x1x64xf32> to vector<1x64xf32>
    %527 = vector.broadcast %526 : vector<1x64xf32> to vector<2x64xf32>
    %528 = arith.mulf %509, %527 : vector<2x64xf32>
    %529 = arith.addf %507, %528 : vector<2x64xf32>
    %c0_273 = arith.constant 0 : index
    %c24 = arith.constant 24 : index
    %c0_274 = arith.constant 0 : index
    %530 = vector.load %arg2[%c0_273, %c24, %c0_274] : memref<2x36x64xf32, #tpu.memory_space<vmem>>, vector<2x1x64xf32>
    %531 = vector.shape_cast %530 : vector<2x1x64xf32> to vector<2x64xf32>
    %c0_275 = arith.constant 0 : index
    %c24_276 = arith.constant 24 : index
    %c0_277 = arith.constant 0 : index
    %532 = vector.load %arg3[%c0_275, %c24_276, %c0_277] : memref<1x144x64xf32, #tpu.memory_space<vmem>>, vector<1x1x64xf32>
    %533 = vector.shape_cast %532 : vector<1x1x64xf32> to vector<1x64xf32>
    %534 = vector.broadcast %533 : vector<1x64xf32> to vector<2x64xf32>
    %535 = arith.mulf %531, %534 : vector<2x64xf32>
    %536 = arith.addf %514, %535 : vector<2x64xf32>
    %c0_278 = arith.constant 0 : index
    %c60 = arith.constant 60 : index
    %c0_279 = arith.constant 0 : index
    %537 = vector.load %arg3[%c0_278, %c60, %c0_279] : memref<1x144x64xf32, #tpu.memory_space<vmem>>, vector<1x1x64xf32>
    %538 = vector.shape_cast %537 : vector<1x1x64xf32> to vector<1x64xf32>
    %539 = vector.broadcast %538 : vector<1x64xf32> to vector<2x64xf32>
    %540 = arith.mulf %531, %539 : vector<2x64xf32>
    %541 = arith.addf %519, %540 : vector<2x64xf32>
    %c0_280 = arith.constant 0 : index
    %c96 = arith.constant 96 : index
    %c0_281 = arith.constant 0 : index
    %542 = vector.load %arg3[%c0_280, %c96, %c0_281] : memref<1x144x64xf32, #tpu.memory_space<vmem>>, vector<1x1x64xf32>
    %543 = vector.shape_cast %542 : vector<1x1x64xf32> to vector<1x64xf32>
    %544 = vector.broadcast %543 : vector<1x64xf32> to vector<2x64xf32>
    %545 = arith.mulf %531, %544 : vector<2x64xf32>
    %546 = arith.addf %524, %545 : vector<2x64xf32>
    %c0_282 = arith.constant 0 : index
    %c132 = arith.constant 132 : index
    %c0_283 = arith.constant 0 : index
    %547 = vector.load %arg3[%c0_282, %c132, %c0_283] : memref<1x144x64xf32, #tpu.memory_space<vmem>>, vector<1x1x64xf32>
    %548 = vector.shape_cast %547 : vector<1x1x64xf32> to vector<1x64xf32>
    %549 = vector.broadcast %548 : vector<1x64xf32> to vector<2x64xf32>
    %550 = arith.mulf %531, %549 : vector<2x64xf32>
    %551 = arith.addf %529, %550 : vector<2x64xf32>
    %c0_284 = arith.constant 0 : index
    %c25 = arith.constant 25 : index
    %c0_285 = arith.constant 0 : index
    %552 = vector.load %arg2[%c0_284, %c25, %c0_285] : memref<2x36x64xf32, #tpu.memory_space<vmem>>, vector<2x1x64xf32>
    %553 = vector.shape_cast %552 : vector<2x1x64xf32> to vector<2x64xf32>
    %c0_286 = arith.constant 0 : index
    %c25_287 = arith.constant 25 : index
    %c0_288 = arith.constant 0 : index
    %554 = vector.load %arg3[%c0_286, %c25_287, %c0_288] : memref<1x144x64xf32, #tpu.memory_space<vmem>>, vector<1x1x64xf32>
    %555 = vector.shape_cast %554 : vector<1x1x64xf32> to vector<1x64xf32>
    %556 = vector.broadcast %555 : vector<1x64xf32> to vector<2x64xf32>
    %557 = arith.mulf %553, %556 : vector<2x64xf32>
    %558 = arith.addf %536, %557 : vector<2x64xf32>
    %c0_289 = arith.constant 0 : index
    %c61 = arith.constant 61 : index
    %c0_290 = arith.constant 0 : index
    %559 = vector.load %arg3[%c0_289, %c61, %c0_290] : memref<1x144x64xf32, #tpu.memory_space<vmem>>, vector<1x1x64xf32>
    %560 = vector.shape_cast %559 : vector<1x1x64xf32> to vector<1x64xf32>
    %561 = vector.broadcast %560 : vector<1x64xf32> to vector<2x64xf32>
    %562 = arith.mulf %553, %561 : vector<2x64xf32>
    %563 = arith.addf %541, %562 : vector<2x64xf32>
    %c0_291 = arith.constant 0 : index
    %c97 = arith.constant 97 : index
    %c0_292 = arith.constant 0 : index
    %564 = vector.load %arg3[%c0_291, %c97, %c0_292] : memref<1x144x64xf32, #tpu.memory_space<vmem>>, vector<1x1x64xf32>
    %565 = vector.shape_cast %564 : vector<1x1x64xf32> to vector<1x64xf32>
    %566 = vector.broadcast %565 : vector<1x64xf32> to vector<2x64xf32>
    %567 = arith.mulf %553, %566 : vector<2x64xf32>
    %568 = arith.addf %546, %567 : vector<2x64xf32>
    %c0_293 = arith.constant 0 : index
    %c133 = arith.constant 133 : index
    %c0_294 = arith.constant 0 : index
    %569 = vector.load %arg3[%c0_293, %c133, %c0_294] : memref<1x144x64xf32, #tpu.memory_space<vmem>>, vector<1x1x64xf32>
    %570 = vector.shape_cast %569 : vector<1x1x64xf32> to vector<1x64xf32>
    %571 = vector.broadcast %570 : vector<1x64xf32> to vector<2x64xf32>
    %572 = arith.mulf %553, %571 : vector<2x64xf32>
    %573 = arith.addf %551, %572 : vector<2x64xf32>
    %c0_295 = arith.constant 0 : index
    %c26 = arith.constant 26 : index
    %c0_296 = arith.constant 0 : index
    %574 = vector.load %arg2[%c0_295, %c26, %c0_296] : memref<2x36x64xf32, #tpu.memory_space<vmem>>, vector<2x1x64xf32>
    %575 = vector.shape_cast %574 : vector<2x1x64xf32> to vector<2x64xf32>
    %c0_297 = arith.constant 0 : index
    %c26_298 = arith.constant 26 : index
    %c0_299 = arith.constant 0 : index
    %576 = vector.load %arg3[%c0_297, %c26_298, %c0_299] : memref<1x144x64xf32, #tpu.memory_space<vmem>>, vector<1x1x64xf32>
    %577 = vector.shape_cast %576 : vector<1x1x64xf32> to vector<1x64xf32>
    %578 = vector.broadcast %577 : vector<1x64xf32> to vector<2x64xf32>
    %579 = arith.mulf %575, %578 : vector<2x64xf32>
    %580 = arith.addf %558, %579 : vector<2x64xf32>
    %c0_300 = arith.constant 0 : index
    %c62 = arith.constant 62 : index
    %c0_301 = arith.constant 0 : index
    %581 = vector.load %arg3[%c0_300, %c62, %c0_301] : memref<1x144x64xf32, #tpu.memory_space<vmem>>, vector<1x1x64xf32>
    %582 = vector.shape_cast %581 : vector<1x1x64xf32> to vector<1x64xf32>
    %583 = vector.broadcast %582 : vector<1x64xf32> to vector<2x64xf32>
    %584 = arith.mulf %575, %583 : vector<2x64xf32>
    %585 = arith.addf %563, %584 : vector<2x64xf32>
    %c0_302 = arith.constant 0 : index
    %c98 = arith.constant 98 : index
    %c0_303 = arith.constant 0 : index
    %586 = vector.load %arg3[%c0_302, %c98, %c0_303] : memref<1x144x64xf32, #tpu.memory_space<vmem>>, vector<1x1x64xf32>
    %587 = vector.shape_cast %586 : vector<1x1x64xf32> to vector<1x64xf32>
    %588 = vector.broadcast %587 : vector<1x64xf32> to vector<2x64xf32>
    %589 = arith.mulf %575, %588 : vector<2x64xf32>
    %590 = arith.addf %568, %589 : vector<2x64xf32>
    %c0_304 = arith.constant 0 : index
    %c134 = arith.constant 134 : index
    %c0_305 = arith.constant 0 : index
    %591 = vector.load %arg3[%c0_304, %c134, %c0_305] : memref<1x144x64xf32, #tpu.memory_space<vmem>>, vector<1x1x64xf32>
    %592 = vector.shape_cast %591 : vector<1x1x64xf32> to vector<1x64xf32>
    %593 = vector.broadcast %592 : vector<1x64xf32> to vector<2x64xf32>
    %594 = arith.mulf %575, %593 : vector<2x64xf32>
    %595 = arith.addf %573, %594 : vector<2x64xf32>
    %c0_306 = arith.constant 0 : index
    %c27 = arith.constant 27 : index
    %c0_307 = arith.constant 0 : index
    %596 = vector.load %arg2[%c0_306, %c27, %c0_307] : memref<2x36x64xf32, #tpu.memory_space<vmem>>, vector<2x1x64xf32>
    %597 = vector.shape_cast %596 : vector<2x1x64xf32> to vector<2x64xf32>
    %c0_308 = arith.constant 0 : index
    %c27_309 = arith.constant 27 : index
    %c0_310 = arith.constant 0 : index
    %598 = vector.load %arg3[%c0_308, %c27_309, %c0_310] : memref<1x144x64xf32, #tpu.memory_space<vmem>>, vector<1x1x64xf32>
    %599 = vector.shape_cast %598 : vector<1x1x64xf32> to vector<1x64xf32>
    %600 = vector.broadcast %599 : vector<1x64xf32> to vector<2x64xf32>
    %601 = arith.mulf %597, %600 : vector<2x64xf32>
    %602 = arith.addf %580, %601 : vector<2x64xf32>
    %c0_311 = arith.constant 0 : index
    %c63 = arith.constant 63 : index
    %c0_312 = arith.constant 0 : index
    %603 = vector.load %arg3[%c0_311, %c63, %c0_312] : memref<1x144x64xf32, #tpu.memory_space<vmem>>, vector<1x1x64xf32>
    %604 = vector.shape_cast %603 : vector<1x1x64xf32> to vector<1x64xf32>
    %605 = vector.broadcast %604 : vector<1x64xf32> to vector<2x64xf32>
    %606 = arith.mulf %597, %605 : vector<2x64xf32>
    %607 = arith.addf %585, %606 : vector<2x64xf32>
    %c0_313 = arith.constant 0 : index
    %c99 = arith.constant 99 : index
    %c0_314 = arith.constant 0 : index
    %608 = vector.load %arg3[%c0_313, %c99, %c0_314] : memref<1x144x64xf32, #tpu.memory_space<vmem>>, vector<1x1x64xf32>
    %609 = vector.shape_cast %608 : vector<1x1x64xf32> to vector<1x64xf32>
    %610 = vector.broadcast %609 : vector<1x64xf32> to vector<2x64xf32>
    %611 = arith.mulf %597, %610 : vector<2x64xf32>
    %612 = arith.addf %590, %611 : vector<2x64xf32>
    %c0_315 = arith.constant 0 : index
    %c135 = arith.constant 135 : index
    %c0_316 = arith.constant 0 : index
    %613 = vector.load %arg3[%c0_315, %c135, %c0_316] : memref<1x144x64xf32, #tpu.memory_space<vmem>>, vector<1x1x64xf32>
    %614 = vector.shape_cast %613 : vector<1x1x64xf32> to vector<1x64xf32>
    %615 = vector.broadcast %614 : vector<1x64xf32> to vector<2x64xf32>
    %616 = arith.mulf %597, %615 : vector<2x64xf32>
    %617 = arith.addf %595, %616 : vector<2x64xf32>
    %c0_317 = arith.constant 0 : index
    %c28 = arith.constant 28 : index
    %c0_318 = arith.constant 0 : index
    %618 = vector.load %arg2[%c0_317, %c28, %c0_318] : memref<2x36x64xf32, #tpu.memory_space<vmem>>, vector<2x1x64xf32>
    %619 = vector.shape_cast %618 : vector<2x1x64xf32> to vector<2x64xf32>
    %c0_319 = arith.constant 0 : index
    %c28_320 = arith.constant 28 : index
    %c0_321 = arith.constant 0 : index
    %620 = vector.load %arg3[%c0_319, %c28_320, %c0_321] : memref<1x144x64xf32, #tpu.memory_space<vmem>>, vector<1x1x64xf32>
    %621 = vector.shape_cast %620 : vector<1x1x64xf32> to vector<1x64xf32>
    %622 = vector.broadcast %621 : vector<1x64xf32> to vector<2x64xf32>
    %623 = arith.mulf %619, %622 : vector<2x64xf32>
    %624 = arith.addf %602, %623 : vector<2x64xf32>
    %c0_322 = arith.constant 0 : index
    %c64 = arith.constant 64 : index
    %c0_323 = arith.constant 0 : index
    %625 = vector.load %arg3[%c0_322, %c64, %c0_323] : memref<1x144x64xf32, #tpu.memory_space<vmem>>, vector<1x1x64xf32>
    %626 = vector.shape_cast %625 : vector<1x1x64xf32> to vector<1x64xf32>
    %627 = vector.broadcast %626 : vector<1x64xf32> to vector<2x64xf32>
    %628 = arith.mulf %619, %627 : vector<2x64xf32>
    %629 = arith.addf %607, %628 : vector<2x64xf32>
    %c0_324 = arith.constant 0 : index
    %c100 = arith.constant 100 : index
    %c0_325 = arith.constant 0 : index
    %630 = vector.load %arg3[%c0_324, %c100, %c0_325] : memref<1x144x64xf32, #tpu.memory_space<vmem>>, vector<1x1x64xf32>
    %631 = vector.shape_cast %630 : vector<1x1x64xf32> to vector<1x64xf32>
    %632 = vector.broadcast %631 : vector<1x64xf32> to vector<2x64xf32>
    %633 = arith.mulf %619, %632 : vector<2x64xf32>
    %634 = arith.addf %612, %633 : vector<2x64xf32>
    %c0_326 = arith.constant 0 : index
    %c136 = arith.constant 136 : index
    %c0_327 = arith.constant 0 : index
    %635 = vector.load %arg3[%c0_326, %c136, %c0_327] : memref<1x144x64xf32, #tpu.memory_space<vmem>>, vector<1x1x64xf32>
    %636 = vector.shape_cast %635 : vector<1x1x64xf32> to vector<1x64xf32>
    %637 = vector.broadcast %636 : vector<1x64xf32> to vector<2x64xf32>
    %638 = arith.mulf %619, %637 : vector<2x64xf32>
    %639 = arith.addf %617, %638 : vector<2x64xf32>
    %c0_328 = arith.constant 0 : index
    %c29 = arith.constant 29 : index
    %c0_329 = arith.constant 0 : index
    %640 = vector.load %arg2[%c0_328, %c29, %c0_329] : memref<2x36x64xf32, #tpu.memory_space<vmem>>, vector<2x1x64xf32>
    %641 = vector.shape_cast %640 : vector<2x1x64xf32> to vector<2x64xf32>
    %c0_330 = arith.constant 0 : index
    %c29_331 = arith.constant 29 : index
    %c0_332 = arith.constant 0 : index
    %642 = vector.load %arg3[%c0_330, %c29_331, %c0_332] : memref<1x144x64xf32, #tpu.memory_space<vmem>>, vector<1x1x64xf32>
    %643 = vector.shape_cast %642 : vector<1x1x64xf32> to vector<1x64xf32>
    %644 = vector.broadcast %643 : vector<1x64xf32> to vector<2x64xf32>
    %645 = arith.mulf %641, %644 : vector<2x64xf32>
    %646 = arith.addf %624, %645 : vector<2x64xf32>
    %c0_333 = arith.constant 0 : index
    %c65 = arith.constant 65 : index
    %c0_334 = arith.constant 0 : index
    %647 = vector.load %arg3[%c0_333, %c65, %c0_334] : memref<1x144x64xf32, #tpu.memory_space<vmem>>, vector<1x1x64xf32>
    %648 = vector.shape_cast %647 : vector<1x1x64xf32> to vector<1x64xf32>
    %649 = vector.broadcast %648 : vector<1x64xf32> to vector<2x64xf32>
    %650 = arith.mulf %641, %649 : vector<2x64xf32>
    %651 = arith.addf %629, %650 : vector<2x64xf32>
    %c0_335 = arith.constant 0 : index
    %c101 = arith.constant 101 : index
    %c0_336 = arith.constant 0 : index
    %652 = vector.load %arg3[%c0_335, %c101, %c0_336] : memref<1x144x64xf32, #tpu.memory_space<vmem>>, vector<1x1x64xf32>
    %653 = vector.shape_cast %652 : vector<1x1x64xf32> to vector<1x64xf32>
    %654 = vector.broadcast %653 : vector<1x64xf32> to vector<2x64xf32>
    %655 = arith.mulf %641, %654 : vector<2x64xf32>
    %656 = arith.addf %634, %655 : vector<2x64xf32>
    %c0_337 = arith.constant 0 : index
    %c137 = arith.constant 137 : index
    %c0_338 = arith.constant 0 : index
    %657 = vector.load %arg3[%c0_337, %c137, %c0_338] : memref<1x144x64xf32, #tpu.memory_space<vmem>>, vector<1x1x64xf32>
    %658 = vector.shape_cast %657 : vector<1x1x64xf32> to vector<1x64xf32>
    %659 = vector.broadcast %658 : vector<1x64xf32> to vector<2x64xf32>
    %660 = arith.mulf %641, %659 : vector<2x64xf32>
    %661 = arith.addf %639, %660 : vector<2x64xf32>
    %c0_339 = arith.constant 0 : index
    %c30 = arith.constant 30 : index
    %c0_340 = arith.constant 0 : index
    %662 = vector.load %arg2[%c0_339, %c30, %c0_340] : memref<2x36x64xf32, #tpu.memory_space<vmem>>, vector<2x1x64xf32>
    %663 = vector.shape_cast %662 : vector<2x1x64xf32> to vector<2x64xf32>
    %c0_341 = arith.constant 0 : index
    %c30_342 = arith.constant 30 : index
    %c0_343 = arith.constant 0 : index
    %664 = vector.load %arg3[%c0_341, %c30_342, %c0_343] : memref<1x144x64xf32, #tpu.memory_space<vmem>>, vector<1x1x64xf32>
    %665 = vector.shape_cast %664 : vector<1x1x64xf32> to vector<1x64xf32>
    %666 = vector.broadcast %665 : vector<1x64xf32> to vector<2x64xf32>
    %667 = arith.mulf %663, %666 : vector<2x64xf32>
    %668 = arith.addf %646, %667 : vector<2x64xf32>
    %c0_344 = arith.constant 0 : index
    %c66 = arith.constant 66 : index
    %c0_345 = arith.constant 0 : index
    %669 = vector.load %arg3[%c0_344, %c66, %c0_345] : memref<1x144x64xf32, #tpu.memory_space<vmem>>, vector<1x1x64xf32>
    %670 = vector.shape_cast %669 : vector<1x1x64xf32> to vector<1x64xf32>
    %671 = vector.broadcast %670 : vector<1x64xf32> to vector<2x64xf32>
    %672 = arith.mulf %663, %671 : vector<2x64xf32>
    %673 = arith.addf %651, %672 : vector<2x64xf32>
    %c0_346 = arith.constant 0 : index
    %c102 = arith.constant 102 : index
    %c0_347 = arith.constant 0 : index
    %674 = vector.load %arg3[%c0_346, %c102, %c0_347] : memref<1x144x64xf32, #tpu.memory_space<vmem>>, vector<1x1x64xf32>
    %675 = vector.shape_cast %674 : vector<1x1x64xf32> to vector<1x64xf32>
    %676 = vector.broadcast %675 : vector<1x64xf32> to vector<2x64xf32>
    %677 = arith.mulf %663, %676 : vector<2x64xf32>
    %678 = arith.addf %656, %677 : vector<2x64xf32>
    %c0_348 = arith.constant 0 : index
    %c138 = arith.constant 138 : index
    %c0_349 = arith.constant 0 : index
    %679 = vector.load %arg3[%c0_348, %c138, %c0_349] : memref<1x144x64xf32, #tpu.memory_space<vmem>>, vector<1x1x64xf32>
    %680 = vector.shape_cast %679 : vector<1x1x64xf32> to vector<1x64xf32>
    %681 = vector.broadcast %680 : vector<1x64xf32> to vector<2x64xf32>
    %682 = arith.mulf %663, %681 : vector<2x64xf32>
    %683 = arith.addf %661, %682 : vector<2x64xf32>
    %c0_350 = arith.constant 0 : index
    %c31 = arith.constant 31 : index
    %c0_351 = arith.constant 0 : index
    %684 = vector.load %arg2[%c0_350, %c31, %c0_351] : memref<2x36x64xf32, #tpu.memory_space<vmem>>, vector<2x1x64xf32>
    %685 = vector.shape_cast %684 : vector<2x1x64xf32> to vector<2x64xf32>
    %c0_352 = arith.constant 0 : index
    %c31_353 = arith.constant 31 : index
    %c0_354 = arith.constant 0 : index
    %686 = vector.load %arg3[%c0_352, %c31_353, %c0_354] : memref<1x144x64xf32, #tpu.memory_space<vmem>>, vector<1x1x64xf32>
    %687 = vector.shape_cast %686 : vector<1x1x64xf32> to vector<1x64xf32>
    %688 = vector.broadcast %687 : vector<1x64xf32> to vector<2x64xf32>
    %689 = arith.mulf %685, %688 : vector<2x64xf32>
    %690 = arith.addf %668, %689 : vector<2x64xf32>
    %c0_355 = arith.constant 0 : index
    %c67 = arith.constant 67 : index
    %c0_356 = arith.constant 0 : index
    %691 = vector.load %arg3[%c0_355, %c67, %c0_356] : memref<1x144x64xf32, #tpu.memory_space<vmem>>, vector<1x1x64xf32>
    %692 = vector.shape_cast %691 : vector<1x1x64xf32> to vector<1x64xf32>
    %693 = vector.broadcast %692 : vector<1x64xf32> to vector<2x64xf32>
    %694 = arith.mulf %685, %693 : vector<2x64xf32>
    %695 = arith.addf %673, %694 : vector<2x64xf32>
    %c0_357 = arith.constant 0 : index
    %c103 = arith.constant 103 : index
    %c0_358 = arith.constant 0 : index
    %696 = vector.load %arg3[%c0_357, %c103, %c0_358] : memref<1x144x64xf32, #tpu.memory_space<vmem>>, vector<1x1x64xf32>
    %697 = vector.shape_cast %696 : vector<1x1x64xf32> to vector<1x64xf32>
    %698 = vector.broadcast %697 : vector<1x64xf32> to vector<2x64xf32>
    %699 = arith.mulf %685, %698 : vector<2x64xf32>
    %700 = arith.addf %678, %699 : vector<2x64xf32>
    %c0_359 = arith.constant 0 : index
    %c139 = arith.constant 139 : index
    %c0_360 = arith.constant 0 : index
    %701 = vector.load %arg3[%c0_359, %c139, %c0_360] : memref<1x144x64xf32, #tpu.memory_space<vmem>>, vector<1x1x64xf32>
    %702 = vector.shape_cast %701 : vector<1x1x64xf32> to vector<1x64xf32>
    %703 = vector.broadcast %702 : vector<1x64xf32> to vector<2x64xf32>
    %704 = arith.mulf %685, %703 : vector<2x64xf32>
    %705 = arith.addf %683, %704 : vector<2x64xf32>
    %c0_361 = arith.constant 0 : index
    %c32 = arith.constant 32 : index
    %c0_362 = arith.constant 0 : index
    %706 = vector.load %arg2[%c0_361, %c32, %c0_362] : memref<2x36x64xf32, #tpu.memory_space<vmem>>, vector<2x1x64xf32>
    %707 = vector.shape_cast %706 : vector<2x1x64xf32> to vector<2x64xf32>
    %c0_363 = arith.constant 0 : index
    %c32_364 = arith.constant 32 : index
    %c0_365 = arith.constant 0 : index
    %708 = vector.load %arg3[%c0_363, %c32_364, %c0_365] : memref<1x144x64xf32, #tpu.memory_space<vmem>>, vector<1x1x64xf32>
    %709 = vector.shape_cast %708 : vector<1x1x64xf32> to vector<1x64xf32>
    %710 = vector.broadcast %709 : vector<1x64xf32> to vector<2x64xf32>
    %711 = arith.mulf %707, %710 : vector<2x64xf32>
    %712 = arith.addf %690, %711 : vector<2x64xf32>
    %c0_366 = arith.constant 0 : index
    %c68 = arith.constant 68 : index
    %c0_367 = arith.constant 0 : index
    %713 = vector.load %arg3[%c0_366, %c68, %c0_367] : memref<1x144x64xf32, #tpu.memory_space<vmem>>, vector<1x1x64xf32>
    %714 = vector.shape_cast %713 : vector<1x1x64xf32> to vector<1x64xf32>
    %715 = vector.broadcast %714 : vector<1x64xf32> to vector<2x64xf32>
    %716 = arith.mulf %707, %715 : vector<2x64xf32>
    %717 = arith.addf %695, %716 : vector<2x64xf32>
    %c0_368 = arith.constant 0 : index
    %c104 = arith.constant 104 : index
    %c0_369 = arith.constant 0 : index
    %718 = vector.load %arg3[%c0_368, %c104, %c0_369] : memref<1x144x64xf32, #tpu.memory_space<vmem>>, vector<1x1x64xf32>
    %719 = vector.shape_cast %718 : vector<1x1x64xf32> to vector<1x64xf32>
    %720 = vector.broadcast %719 : vector<1x64xf32> to vector<2x64xf32>
    %721 = arith.mulf %707, %720 : vector<2x64xf32>
    %722 = arith.addf %700, %721 : vector<2x64xf32>
    %c0_370 = arith.constant 0 : index
    %c140 = arith.constant 140 : index
    %c0_371 = arith.constant 0 : index
    %723 = vector.load %arg3[%c0_370, %c140, %c0_371] : memref<1x144x64xf32, #tpu.memory_space<vmem>>, vector<1x1x64xf32>
    %724 = vector.shape_cast %723 : vector<1x1x64xf32> to vector<1x64xf32>
    %725 = vector.broadcast %724 : vector<1x64xf32> to vector<2x64xf32>
    %726 = arith.mulf %707, %725 : vector<2x64xf32>
    %727 = arith.addf %705, %726 : vector<2x64xf32>
    %c0_372 = arith.constant 0 : index
    %c33 = arith.constant 33 : index
    %c0_373 = arith.constant 0 : index
    %728 = vector.load %arg2[%c0_372, %c33, %c0_373] : memref<2x36x64xf32, #tpu.memory_space<vmem>>, vector<2x1x64xf32>
    %729 = vector.shape_cast %728 : vector<2x1x64xf32> to vector<2x64xf32>
    %c0_374 = arith.constant 0 : index
    %c33_375 = arith.constant 33 : index
    %c0_376 = arith.constant 0 : index
    %730 = vector.load %arg3[%c0_374, %c33_375, %c0_376] : memref<1x144x64xf32, #tpu.memory_space<vmem>>, vector<1x1x64xf32>
    %731 = vector.shape_cast %730 : vector<1x1x64xf32> to vector<1x64xf32>
    %732 = vector.broadcast %731 : vector<1x64xf32> to vector<2x64xf32>
    %733 = arith.mulf %729, %732 : vector<2x64xf32>
    %734 = arith.addf %712, %733 : vector<2x64xf32>
    %c0_377 = arith.constant 0 : index
    %c69 = arith.constant 69 : index
    %c0_378 = arith.constant 0 : index
    %735 = vector.load %arg3[%c0_377, %c69, %c0_378] : memref<1x144x64xf32, #tpu.memory_space<vmem>>, vector<1x1x64xf32>
    %736 = vector.shape_cast %735 : vector<1x1x64xf32> to vector<1x64xf32>
    %737 = vector.broadcast %736 : vector<1x64xf32> to vector<2x64xf32>
    %738 = arith.mulf %729, %737 : vector<2x64xf32>
    %739 = arith.addf %717, %738 : vector<2x64xf32>
    %c0_379 = arith.constant 0 : index
    %c105 = arith.constant 105 : index
    %c0_380 = arith.constant 0 : index
    %740 = vector.load %arg3[%c0_379, %c105, %c0_380] : memref<1x144x64xf32, #tpu.memory_space<vmem>>, vector<1x1x64xf32>
    %741 = vector.shape_cast %740 : vector<1x1x64xf32> to vector<1x64xf32>
    %742 = vector.broadcast %741 : vector<1x64xf32> to vector<2x64xf32>
    %743 = arith.mulf %729, %742 : vector<2x64xf32>
    %744 = arith.addf %722, %743 : vector<2x64xf32>
    %c0_381 = arith.constant 0 : index
    %c141 = arith.constant 141 : index
    %c0_382 = arith.constant 0 : index
    %745 = vector.load %arg3[%c0_381, %c141, %c0_382] : memref<1x144x64xf32, #tpu.memory_space<vmem>>, vector<1x1x64xf32>
    %746 = vector.shape_cast %745 : vector<1x1x64xf32> to vector<1x64xf32>
    %747 = vector.broadcast %746 : vector<1x64xf32> to vector<2x64xf32>
    %748 = arith.mulf %729, %747 : vector<2x64xf32>
    %749 = arith.addf %727, %748 : vector<2x64xf32>
    %c0_383 = arith.constant 0 : index
    %c34 = arith.constant 34 : index
    %c0_384 = arith.constant 0 : index
    %750 = vector.load %arg2[%c0_383, %c34, %c0_384] : memref<2x36x64xf32, #tpu.memory_space<vmem>>, vector<2x1x64xf32>
    %751 = vector.shape_cast %750 : vector<2x1x64xf32> to vector<2x64xf32>
    %c0_385 = arith.constant 0 : index
    %c34_386 = arith.constant 34 : index
    %c0_387 = arith.constant 0 : index
    %752 = vector.load %arg3[%c0_385, %c34_386, %c0_387] : memref<1x144x64xf32, #tpu.memory_space<vmem>>, vector<1x1x64xf32>
    %753 = vector.shape_cast %752 : vector<1x1x64xf32> to vector<1x64xf32>
    %754 = vector.broadcast %753 : vector<1x64xf32> to vector<2x64xf32>
    %755 = arith.mulf %751, %754 : vector<2x64xf32>
    %756 = arith.addf %734, %755 : vector<2x64xf32>
    %c0_388 = arith.constant 0 : index
    %c70 = arith.constant 70 : index
    %c0_389 = arith.constant 0 : index
    %757 = vector.load %arg3[%c0_388, %c70, %c0_389] : memref<1x144x64xf32, #tpu.memory_space<vmem>>, vector<1x1x64xf32>
    %758 = vector.shape_cast %757 : vector<1x1x64xf32> to vector<1x64xf32>
    %759 = vector.broadcast %758 : vector<1x64xf32> to vector<2x64xf32>
    %760 = arith.mulf %751, %759 : vector<2x64xf32>
    %761 = arith.addf %739, %760 : vector<2x64xf32>
    %c0_390 = arith.constant 0 : index
    %c106 = arith.constant 106 : index
    %c0_391 = arith.constant 0 : index
    %762 = vector.load %arg3[%c0_390, %c106, %c0_391] : memref<1x144x64xf32, #tpu.memory_space<vmem>>, vector<1x1x64xf32>
    %763 = vector.shape_cast %762 : vector<1x1x64xf32> to vector<1x64xf32>
    %764 = vector.broadcast %763 : vector<1x64xf32> to vector<2x64xf32>
    %765 = arith.mulf %751, %764 : vector<2x64xf32>
    %766 = arith.addf %744, %765 : vector<2x64xf32>
    %c0_392 = arith.constant 0 : index
    %c142 = arith.constant 142 : index
    %c0_393 = arith.constant 0 : index
    %767 = vector.load %arg3[%c0_392, %c142, %c0_393] : memref<1x144x64xf32, #tpu.memory_space<vmem>>, vector<1x1x64xf32>
    %768 = vector.shape_cast %767 : vector<1x1x64xf32> to vector<1x64xf32>
    %769 = vector.broadcast %768 : vector<1x64xf32> to vector<2x64xf32>
    %770 = arith.mulf %751, %769 : vector<2x64xf32>
    %771 = arith.addf %749, %770 : vector<2x64xf32>
    %c0_394 = arith.constant 0 : index
    %c35 = arith.constant 35 : index
    %c0_395 = arith.constant 0 : index
    %772 = vector.load %arg2[%c0_394, %c35, %c0_395] : memref<2x36x64xf32, #tpu.memory_space<vmem>>, vector<2x1x64xf32>
    %773 = vector.shape_cast %772 : vector<2x1x64xf32> to vector<2x64xf32>
    %c0_396 = arith.constant 0 : index
    %c35_397 = arith.constant 35 : index
    %c0_398 = arith.constant 0 : index
    %774 = vector.load %arg3[%c0_396, %c35_397, %c0_398] : memref<1x144x64xf32, #tpu.memory_space<vmem>>, vector<1x1x64xf32>
    %775 = vector.shape_cast %774 : vector<1x1x64xf32> to vector<1x64xf32>
    %776 = vector.broadcast %775 : vector<1x64xf32> to vector<2x64xf32>
    %777 = arith.mulf %773, %776 : vector<2x64xf32>
    %778 = arith.addf %756, %777 : vector<2x64xf32>
    %c0_399 = arith.constant 0 : index
    %c71 = arith.constant 71 : index
    %c0_400 = arith.constant 0 : index
    %779 = vector.load %arg3[%c0_399, %c71, %c0_400] : memref<1x144x64xf32, #tpu.memory_space<vmem>>, vector<1x1x64xf32>
    %780 = vector.shape_cast %779 : vector<1x1x64xf32> to vector<1x64xf32>
    %781 = vector.broadcast %780 : vector<1x64xf32> to vector<2x64xf32>
    %782 = arith.mulf %773, %781 : vector<2x64xf32>
    %783 = arith.addf %761, %782 : vector<2x64xf32>
    %c0_401 = arith.constant 0 : index
    %c107 = arith.constant 107 : index
    %c0_402 = arith.constant 0 : index
    %784 = vector.load %arg3[%c0_401, %c107, %c0_402] : memref<1x144x64xf32, #tpu.memory_space<vmem>>, vector<1x1x64xf32>
    %785 = vector.shape_cast %784 : vector<1x1x64xf32> to vector<1x64xf32>
    %786 = vector.broadcast %785 : vector<1x64xf32> to vector<2x64xf32>
    %787 = arith.mulf %773, %786 : vector<2x64xf32>
    %788 = arith.addf %766, %787 : vector<2x64xf32>
    %c0_403 = arith.constant 0 : index
    %c143 = arith.constant 143 : index
    %c0_404 = arith.constant 0 : index
    %789 = vector.load %arg3[%c0_403, %c143, %c0_404] : memref<1x144x64xf32, #tpu.memory_space<vmem>>, vector<1x1x64xf32>
    %790 = vector.shape_cast %789 : vector<1x1x64xf32> to vector<1x64xf32>
    %791 = vector.broadcast %790 : vector<1x64xf32> to vector<2x64xf32>
    %792 = arith.mulf %773, %791 : vector<2x64xf32>
    %793 = arith.addf %771, %792 : vector<2x64xf32>
    %c0_405 = arith.constant 0 : index
    %c0_406 = arith.constant 0 : index
    %c0_407 = arith.constant 0 : index
    %c0_408 = arith.constant 0 : index
    %794 = vector.load %arg4[%c0_405, %c0_406, %c0_407, %c0_408] : memref<1x2x4x64xf32, #tpu.memory_space<vmem>>, vector<1x2x1x64xf32>
    %795 = vector.shape_cast %794 : vector<1x2x1x64xf32> to vector<2x64xf32>
    %796 = vector.shape_cast %778 : vector<2x64xf32> to vector<1x2x1x64xf32>
    tpu.vector_store %arg4[%c0_405, %c0_406, %c0_407, %c0_408], %796 {strides = array<i32>} : memref<1x2x4x64xf32, #tpu.memory_space<vmem>>, vector<1x2x1x64xf32>,
    %c0_409 = arith.constant 0 : index
    %c0_410 = arith.constant 0 : index
    %c1_411 = arith.constant 1 : index
    %c0_412 = arith.constant 0 : index
    %797 = vector.load %arg4[%c0_409, %c0_410, %c1_411, %c0_412] : memref<1x2x4x64xf32, #tpu.memory_space<vmem>>, vector<1x2x1x64xf32>
    %798 = vector.shape_cast %797 : vector<1x2x1x64xf32> to vector<2x64xf32>
    %799 = vector.shape_cast %783 : vector<2x64xf32> to vector<1x2x1x64xf32>
    tpu.vector_store %arg4[%c0_409, %c0_410, %c1_411, %c0_412], %799 {strides = array<i32>} : memref<1x2x4x64xf32, #tpu.memory_space<vmem>>, vector<1x2x1x64xf32>,
    %c0_413 = arith.constant 0 : index
    %c0_414 = arith.constant 0 : index
    %c2_415 = arith.constant 2 : index
    %c0_416 = arith.constant 0 : index
    %800 = vector.load %arg4[%c0_413, %c0_414, %c2_415, %c0_416] : memref<1x2x4x64xf32, #tpu.memory_space<vmem>>, vector<1x2x1x64xf32>
    %801 = vector.shape_cast %800 : vector<1x2x1x64xf32> to vector<2x64xf32>
    %802 = vector.shape_cast %788 : vector<2x64xf32> to vector<1x2x1x64xf32>
    tpu.vector_store %arg4[%c0_413, %c0_414, %c2_415, %c0_416], %802 {strides = array<i32>} : memref<1x2x4x64xf32, #tpu.memory_space<vmem>>, vector<1x2x1x64xf32>,
    %c0_417 = arith.constant 0 : index
    %c0_418 = arith.constant 0 : index
    %c3_419 = arith.constant 3 : index
    %c0_420 = arith.constant 0 : index
    %803 = vector.load %arg4[%c0_417, %c0_418, %c3_419, %c0_420] : memref<1x2x4x64xf32, #tpu.memory_space<vmem>>, vector<1x2x1x64xf32>
    %804 = vector.shape_cast %803 : vector<1x2x1x64xf32> to vector<2x64xf32>
    %805 = vector.shape_cast %793 : vector<2x64xf32> to vector<1x2x1x64xf32>
    tpu.vector_store %arg4[%c0_417, %c0_418, %c3_419, %c0_420], %805 {strides = array<i32>} : memref<1x2x4x64xf32, #tpu.memory_space<vmem>>, vector<1x2x1x64xf32>,
    return
  }
  func.func @transform_0(%arg0: i32, %arg1: i32) -> (i32, i32, i32) {
    %c0_i32 = arith.constant 0 : i32
    %c0_i32_0 = arith.constant 0 : i32
    %c0_i32_1 = arith.constant 0 : i32
    return %c0_i32, %c0_i32_0, %arg1 : i32, i32, i32
  }
  func.func @transform_1(%arg0: i32, %arg1: i32) -> (i32, i32, i32) {
    %c0_i32 = arith.constant 0 : i32
    %c0_i32_0 = arith.constant 0 : i32
    return %arg0, %c0_i32, %arg1 : i32, i32, i32
  }
  func.func @transform_2(%arg0: i32, %arg1: i32) -> (i32, i32, i32, i32) {
    %c0_i32 = arith.constant 0 : i32
    %c0_i32_0 = arith.constant 0 : i32
    %c0_i32_1 = arith.constant 0 : i32
    return %arg0, %c0_i32, %c0_i32_0, %arg1 : i32, i32, i32, i32
  }
}

module attributes {stable_mosaic.version = 11 : i64} {
  func.func @_fuse_kernel(%arg0: i32, %arg1: memref<4x512xf32, #tpu.memory_space<vmem>>, %arg2: memref<4x512xf32, #tpu.memory_space<vmem>>, %arg3: memref<4x512xf32, #tpu.memory_space<vmem>>, %arg4: memref<4x512xf32, #tpu.memory_space<vmem>>, %arg5: memref<4x512xf32, #tpu.memory_space<vmem>>, %arg6: memref<4x512xf32, #tpu.memory_space<vmem>>, %arg7: memref<4x512xf32, #tpu.memory_space<vmem>>, %arg8: memref<4x512xf32, #tpu.memory_space<vmem>>) attributes {dimension_semantics = [#tpu.dimension_semantics<parallel>], iteration_bounds = array<i64: 1>, scalar_prefetch = 0 : i64, scratch_operands = 0 : i64, tpu.core_type = #tpu.core_type<tc>, window_params = [{transform_indices = @transform_0, window_bounds = array<i64: 4, 512>}, {transform_indices = @transform_1, window_bounds = array<i64: 4, 512>}, {transform_indices = @transform_2, window_bounds = array<i64: 4, 512>}, {transform_indices = @transform_3, window_bounds = array<i64: 4, 512>}, {transform_indices = @transform_4, window_bounds = array<i64: 4, 512>}, {transform_indices = @transform_5, window_bounds = array<i64: 4, 512>}, {transform_indices = @transform_6, window_bounds = array<i64: 4, 512>}, {transform_indices = @transform_7, window_bounds = array<i64: 4, 512>}]} {
    %c0 = arith.constant 0 : index
    %c0_0 = arith.constant 0 : index
    %0 = vector.load %arg4[%c0, %c0_0] : memref<4x512xf32, #tpu.memory_space<vmem>>, vector<4x512xf32>
    %c0_1 = arith.constant 0 : index
    %c0_2 = arith.constant 0 : index
    %1 = vector.load %arg5[%c0_1, %c0_2] : memref<4x512xf32, #tpu.memory_space<vmem>>, vector<4x512xf32>
    %c0_3 = arith.constant 0 : index
    %c0_4 = arith.constant 0 : index
    %2 = vector.load %arg1[%c0_3, %c0_4] : memref<4x512xf32, #tpu.memory_space<vmem>>, vector<4x512xf32>
    %3 = arith.addf %2, %0 : vector<4x512xf32>
    %c0_5 = arith.constant 0 : index
    %c0_6 = arith.constant 0 : index
    %4 = vector.load %arg6[%c0_5, %c0_6] : memref<4x512xf32, #tpu.memory_space<vmem>>, vector<4x512xf32>
    tpu.vector_store %arg6[%c0_5, %c0_6], %3 {strides = array<i32>} : memref<4x512xf32, #tpu.memory_space<vmem>>, vector<4x512xf32>,
    %c0_7 = arith.constant 0 : index
    %c0_8 = arith.constant 0 : index
    %5 = vector.load %arg2[%c0_7, %c0_8] : memref<4x512xf32, #tpu.memory_space<vmem>>, vector<4x512xf32>
    %6 = arith.addf %5, %1 : vector<4x512xf32>
    %c0_9 = arith.constant 0 : index
    %c0_10 = arith.constant 0 : index
    %7 = vector.load %arg7[%c0_9, %c0_10] : memref<4x512xf32, #tpu.memory_space<vmem>>, vector<4x512xf32>
    tpu.vector_store %arg7[%c0_9, %c0_10], %6 {strides = array<i32>} : memref<4x512xf32, #tpu.memory_space<vmem>>, vector<4x512xf32>,
    %8 = math.absf %0 : vector<4x512xf32>
    %9 = math.absf %1 : vector<4x512xf32>
    %10 = arith.cmpf oge, %8, %9 : vector<4x512xf32>
    %11 = arith.select %10, %0, %1 : vector<4x512xi1>, vector<4x512xf32>
    %c0_11 = arith.constant 0 : index
    %c0_12 = arith.constant 0 : index
    %12 = vector.load %arg3[%c0_11, %c0_12] : memref<4x512xf32, #tpu.memory_space<vmem>>, vector<4x512xf32>
    %13 = arith.addf %12, %11 : vector<4x512xf32>
    %c0_13 = arith.constant 0 : index
    %c0_14 = arith.constant 0 : index
    %14 = vector.load %arg8[%c0_13, %c0_14] : memref<4x512xf32, #tpu.memory_space<vmem>>, vector<4x512xf32>
    tpu.vector_store %arg8[%c0_13, %c0_14], %13 {strides = array<i32>} : memref<4x512xf32, #tpu.memory_space<vmem>>, vector<4x512xf32>,
    return
  }
  func.func @transform_0(%arg0: i32) -> (i32, i32) {
    %c0_i32 = arith.constant 0 : i32
    %c0_i32_0 = arith.constant 0 : i32
    return %arg0, %c0_i32 : i32, i32
  }
  func.func @transform_1(%arg0: i32) -> (i32, i32) {
    %c0_i32 = arith.constant 0 : i32
    %c0_i32_0 = arith.constant 0 : i32
    return %arg0, %c0_i32 : i32, i32
  }
  func.func @transform_2(%arg0: i32) -> (i32, i32) {
    %c0_i32 = arith.constant 0 : i32
    %c0_i32_0 = arith.constant 0 : i32
    return %arg0, %c0_i32 : i32, i32
  }
  func.func @transform_3(%arg0: i32) -> (i32, i32) {
    %c0_i32 = arith.constant 0 : i32
    %c0_i32_0 = arith.constant 0 : i32
    return %arg0, %c0_i32 : i32, i32
  }
  func.func @transform_4(%arg0: i32) -> (i32, i32) {
    %c0_i32 = arith.constant 0 : i32
    %c0_i32_0 = arith.constant 0 : i32
    return %arg0, %c0_i32 : i32, i32
  }
  func.func @transform_5(%arg0: i32) -> (i32, i32) {
    %c0_i32 = arith.constant 0 : i32
    %c0_i32_0 = arith.constant 0 : i32
    return %arg0, %c0_i32 : i32, i32
  }
  func.func @transform_6(%arg0: i32) -> (i32, i32) {
    %c0_i32 = arith.constant 0 : i32
    %c0_i32_0 = arith.constant 0 : i32
    return %arg0, %c0_i32 : i32, i32
  }
  func.func @transform_7(%arg0: i32) -> (i32, i32) {
    %c0_i32 = arith.constant 0 : i32
    %c0_i32_0 = arith.constant 0 : i32
    return %arg0, %c0_i32 : i32, i32
  }
}

</mosaic_0001>

<bundles_post_ra>
// kernel: rcm_forward.16
= control target key start
LH: loop header
LB: loop body
LE: loop exit
PB: predicated region body
PF: predicated region fallthrough
CT: control target
= control target key end

     0   :  { %v1339_v0 = vmov 0   ;;  %vm346_vm0 = vcmask 1042432   ;;  %vm249_vm1 = vcmask 23552   ;;  %s2405_s2 = inlined_call_operand.vmem [shape: f32[256,1], index: 2, kind: input, shape index: {}]   ;;  %s2406_s0 = inlined_call_operand.vmem [shape: f32[1,3,256], index: 0, kind: input, shape index: {}]   ;;  %s2407_s1 = inlined_call_operand.vmem [shape: f32[256,3], index: 1, kind: input, shape index: {}]   ;;  %s2408_s4 = inlined_call_operand.vmem [shape: f32[144,1], index: 4, kind: input, shape index: {}]   ;;  %s2409_s3 = inlined_call_operand.vmem [shape: f32[144,256], index: 3, kind: input, shape index: {}]   ;;  %s2410_s5 = inlined_call_operand.vmem [shape: f32[1,144,256], index: 5, kind: output, shape index: {}]  }
   0x1   :  { %1338 = vset.pattern.permute.xlu2 %v1339_v0  ;;  %1337 = vset.pattern.permute.xlu1 %v1339_v0  ;;  %v84_v1 = vld [vmem:[%s2405_s2 + $0xf8] sm:$0xff]  ;;  %v83_v2 = vld [vmem:[%s2405_s2 + $0xf0] sm:$0xff]  ;;  %v52_v4 = vld [vmem:[%s2406_s0] sm:$0x77] }
   0x2   :  { %v68_v3 = vld [vmem:[%s2405_s2 + $0x78] sm:$0xff]  ;;  %1336 = vset.pattern.permute.xlu0 %v1339_v0  ;;  %242 = vperm.xlu1 %1337, %v84_v1   ;;  %246 = vst [vmem:[#allocation1] ss:$2 sm:$0xff] %v52_v4  ;;  %v66_v5 = vld [vmem:[%s2405_s2 + $0x68] sm:$0xff]  ;;  %v67_v6 = vld [vmem:[%s2405_s2 + $0x70] sm:$0xff] }
   0x3   :  { %237 = vperm.xlu2 %1338, %v83_v2   ;;  %162 = vperm.xlu0 %1336, %v68_v3   ;;  %v65_v7 = vld [vmem:[%s2405_s2 + $0x60] sm:$0xff]  ;;  %v64_v11 = vld [vmem:[%s2405_s2 + $0x58] sm:$0xff]  ;;  %v82_v12 = vld [vmem:[%s2405_s2 + $0xe8] sm:$0xff] }
   0x4   :  { %v20_v8 = vld [vmem:[%s2407_s1] sm:$0xff]  ;;  %v21_v14 = vld [vmem:[%s2407_s1 + $0x8] sm:$0xff]  ;;  %v80_v15 = vld [vmem:[%s2405_s2 + $0xd8] sm:$0xff] }
   0x5   :  { %v81_v13 = vld [vmem:[%s2405_s2 + $0xe0] sm:$0xff]  ;;  %v63_v16 = vld [vmem:[%s2405_s2 + $0x50] sm:$0xff]  ;;  %v62_v17 = vld [vmem:[%s2405_s2 + $0x48] sm:$0xff] }
   0x6   :  { %v22_v18 = vld [vmem:[%s2407_s1 + $0x10] sm:$0xff]  ;;  %v61_v19 = vld [vmem:[%s2405_s2 + $0x40] sm:$0xff]  ;;  %v78_v21 = vld [vmem:[%s2405_s2 + $0xc8] sm:$0xff] }
   0x7   :  { %v79_v20 = vld [vmem:[%s2405_s2 + $0xd0] sm:$0xff]  ;;  %v23_v22 = vld [vmem:[%s2407_s1 + $0x18] sm:$0xff]  ;;  %v77_v23 = vld [vmem:[%s2405_s2 + $0xc0] sm:$0xff] }
   0x8   :  { %v60_v24 = vld [vmem:[%s2405_s2 + $0x38] sm:$0xff]  ;;  %v59_v25 = vld [vmem:[%s2405_s2 + $0x30] sm:$0xff]  ;;  %v24_v26 = vld [vmem:[%s2407_s1 + $0x20] sm:$0xff] }
   0x9   :  { %v247_v9 = vld.sshfl [vmem:[#allocation1] sm:$0xff pattern:$0x75316420]  ;;  %v248_v10 = vld.sshfl [vmem:[#allocation1 + $0x8] sm:$0xff pattern:$0x75316420] }
   0xa   :  { %152 = vperm.xlu1 %1337, %v66_v5   ;;  %1237 = vmatpush.msk.msra.mxu0 %vm346_vm0, %v247_v9  ;;  %v58_v27 = vld [vmem:[%s2405_s2 + $0x28] sm:$0xff]  ;;  %v76_v28 = vld [vmem:[%s2405_s2 + $0xb8] sm:$0xff]  ;;  %v75_v29 = vld [vmem:[%s2405_s2 + $0xb0] sm:$0xff] }
   0xb   :  { %157 = vperm.xlu0 %1336, %v67_v6   ;;  %147 = vperm.xlu2 %1338, %v65_v7   ;;  %v25_v30 = vld [vmem:[%s2407_s1 + $0x28] sm:$0xff]  ;;  %v57_v32 = vld [vmem:[%s2405_s2 + $0x20] sm:$0xff]  ;;  %v56_v33 = vld [vmem:[%s2405_s2 + $0x18] sm:$0xff] }
   0xc   :  { %1270 = vmatpush.msk.msra.mxu1 %vm346_vm0, %v248_v10  ;;  %1238 = vmatmul.msk.f32.vlgmr.msra.gmra.mxu0 %vm249_vm1, %v20_v8  ;;  %v74_v31 = vld [vmem:[%s2405_s2 + $0xa8] sm:$0xff]  ;;  %v26_v34 = vld [vmem:[%s2407_s1 + $0x30] sm:$0xff]  ;;  %v73_v36 = vld [vmem:[%s2405_s2 + $0xa0] sm:$0xff] }
   0xd   :  { %1271 = vmatmul.msk.f32.vlgmr.msra.gmra.mxu1 %vm249_vm1, %v20_v8  ;;  %v55_v35 = vld [vmem:[%s2405_s2 + $0x10] sm:$0xff]  ;;  %v72_v37 = vld [vmem:[%s2405_s2 + $0x98] sm:$0xff]  ;;  %v54_v39 = vld [vmem:[%s2405_s2 + $0x8] sm:$0xff] }
   0xe   :  { %v27_v38 = vld [vmem:[%s2407_s1 + $0x38] sm:$0xff]  ;;  %v53_v40 = vld [vmem:[%s2405_s2] sm:$0xff]  ;;  %v29_v42 = vld [vmem:[%s2407_s1 + $0x48] sm:$0xff] }
   0xf   :  { %v28_v41 = vld [vmem:[%s2407_s1 + $0x40] sm:$0xff]  ;;  %v30_v43 = vld [vmem:[%s2407_s1 + $0x50] sm:$0xff]  ;;  %v31_v44 = vld [vmem:[%s2407_s1 + $0x58] sm:$0xff] }
  0x10   :  { %v32_v45 = vld [vmem:[%s2407_s1 + $0x60] sm:$0xff]  ;;  %v71_v46 = vld [vmem:[%s2405_s2 + $0x90] sm:$0xff]  ;;  %v33_v47 = vld [vmem:[%s2407_s1 + $0x68] sm:$0xff] }
  0x11   :  { %v69_v48 = vld [vmem:[%s2405_s2 + $0x80] sm:$0xff]  ;;  %v34_v49 = vld [vmem:[%s2407_s1 + $0x70] sm:$0xff]  ;;  %v70_v50 = vld [vmem:[%s2405_s2 + $0x88] sm:$0xff] }
  0x12   :  { %142 = vperm.xlu1 %1337, %v64_v11   ;;  %v35_v51 = vld [vmem:[%s2407_s1 + $0x78] sm:$0xff]  ;;  %v36_v54 = vld [vmem:[%s2407_s1 + $0x80] sm:$0xff]  ;;  %v37_v57 = vld [vmem:[%s2407_s1 + $0x88] sm:$0xff] }
  0x13   :  { %232 = vperm.xlu0 %1336, %v82_v12   ;;  %227 = vperm.xlu2 %1338, %v81_v13   ;;  %v806_v58 = vld [vmem:[%s2408_s4 + $0x8] sm:$0xff]  ;;  %v807_v59 = vld [vmem:[%s2408_s4 + $0x10] sm:$0xff]  ;;  %v809_v63 = vld [vmem:[%s2408_s4 + $0x20] sm:$0xff] }
  0x14   :  { %1239 = vmatmul.msk.f32.gmra.mxu0 %vm249_vm1, %v21_v14  ;;  %v38_v62 = vld [vmem:[%s2407_s1 + $0x90] sm:$0xff]  ;;  %v810_v0 = vld [vmem:[%s2408_s4 + $0x28] sm:$0xff]  ;;  %v39_v3 = vld [vmem:[%s2407_s1 + $0x98] sm:$0xff] }
  0x15   :  { %1272 = vmatmul.msk.f32.gmra.mxu1 %vm249_vm1, %v21_v14  ;;  %v812_v4 = vld [vmem:[%s2408_s4 + $0x38] sm:$0xff]  ;;  %v813_v5 = vld [vmem:[%s2408_s4 + $0x40] sm:$0xff]  ;;  %v815_v9 = vld [vmem:[%s2408_s4 + $0x50] sm:$0xff] }
  0x16   :  { %v40_v8 = vld [vmem:[%s2407_s1 + $0xa0] sm:$0xff]  ;;  %v816_v10 = vld [vmem:[%s2408_s4 + $0x58] sm:$0xff]  ;;  %v41_v13 = vld [vmem:[%s2407_s1 + $0xa8] sm:$0xff] }
  0x17   :  { %v818_v14 = vld [vmem:[%s2408_s4 + $0x68] sm:$0xff] }
  0x1a   :  { %222 = vperm.xlu1 %1337, %v80_v15   ;;  %v805_v15 = vld [vmem:[%s2408_s4] sm:$0xff] }
  0x1b   :  { %137 = vperm.xlu0 %1336, %v63_v16   ;;  %132 = vperm.xlu2 %1338, %v62_v17   ;;  %v819_v16 = vld [vmem:[%s2408_s4 + $0x70] sm:$0xff] }
  0x1c   :  { %1240 = vmatmul.msk.f32.gmra.mxu0 %vm249_vm1, %v22_v18 }
  0x1d   :  { %1273 = vmatmul.msk.f32.gmra.mxu1 %vm249_vm1, %v22_v18 }
  0x22   :  { %127 = vperm.xlu1 %1337, %v61_v19   ;;  %v42_v19 = vld [vmem:[%s2407_s1 + $0xb0] sm:$0xff] }
  0x23   :  { %217 = vperm.xlu0 %1336, %v79_v20   ;;  %212 = vperm.xlu2 %1338, %v78_v21   ;;  %v821_v20 = vld [vmem:[%s2408_s4 + $0x80] sm:$0xff]  ;;  %v808_v21 = vld [vmem:[%s2408_s4 + $0x18] sm:$0xff] }
  0x24   :  { %1241 = vmatmul.msk.f32.gmra.mxu0 %vm249_vm1, %v23_v22 }
  0x25   :  { %1274 = vmatmul.msk.f32.gmra.mxu1 %vm249_vm1, %v23_v22 }
  0x2a   :  { %207 = vperm.xlu1 %1337, %v77_v23   ;;  %v822_v23 = vld [vmem:[%s2408_s4 + $0x88] sm:$0xff] }
  0x2b   :  { %122 = vperm.xlu0 %1336, %v60_v24   ;;  %117 = vperm.xlu2 %1338, %v59_v25  }
  0x2c   :  { %1242 = vmatmul.msk.f32.gmra.mxu0 %vm249_vm1, %v24_v26 }
  0x2d   :  { %1275 = vmatmul.msk.f32.gmra.mxu1 %vm249_vm1, %v24_v26 }
  0x32   :  { %112 = vperm.xlu1 %1337, %v58_v27   ;;  %v43_v27 = vld [vmem:[%s2407_s1 + $0xb8] sm:$0xff] }
  0x33   :  { %202 = vperm.xlu0 %1336, %v76_v28   ;;  %197 = vperm.xlu2 %1338, %v75_v29   ;;  %v811_v28 = vld [vmem:[%s2408_s4 + $0x30] sm:$0xff] }
  0x34   :  { %1243 = vmatmul.msk.f32.gmra.mxu0 %vm249_vm1, %v25_v30 }
  0x35   :  { %1276 = vmatmul.msk.f32.gmra.mxu1 %vm249_vm1, %v25_v30 }
  0x3a   :  { %192 = vperm.xlu1 %1337, %v74_v31  }
  0x3b   :  { %107 = vperm.xlu0 %1336, %v57_v32   ;;  %102 = vperm.xlu2 %1338, %v56_v33  }
  0x3c   :  { %1244 = vmatmul.msk.f32.gmra.mxu0 %vm249_vm1, %v26_v34 }
  0x3d   :  { %1277 = vmatmul.msk.f32.gmra.mxu1 %vm249_vm1, %v26_v34  ;;  %v44_v34 = vld [vmem:[%s2407_s1 + $0xc0] sm:$0xff] }
  0x42   :  { %97 = vperm.xlu1 %1337, %v55_v35   ;;  %v814_v35 = vld [vmem:[%s2408_s4 + $0x48] sm:$0xff] }
  0x43   :  { %187 = vperm.xlu0 %1336, %v73_v36   ;;  %182 = vperm.xlu2 %1338, %v72_v37  }
  0x44   :  { %1245 = vmatmul.msk.f32.gmra.mxu0 %vm249_vm1, %v27_v38 }
  0x45   :  { %1278 = vmatmul.msk.f32.gmra.mxu1 %vm249_vm1, %v27_v38 }
  0x4a   :  { %177 = vperm.xlu1 %1337, %v71_v46   ;;  %v46_v46 = vld [vmem:[%s2407_s1 + $0xd0] sm:$0xff] }
  0x4b   :  { %92 = vperm.xlu0 %1336, %v54_v39   ;;  %87 = vperm.xlu2 %1338, %v53_v40   ;;  %v45_v40 = vld [vmem:[%s2407_s1 + $0xc8] sm:$0xff] }
  0x4c   :  { %1246 = vmatmul.msk.f32.gmra.mxu0 %vm249_vm1, %v28_v41 }
  0x4d   :  { %1279 = vmatmul.msk.f32.gmra.mxu1 %vm249_vm1, %v28_v41 }
  0x52   :  { %167 = vperm.xlu1 %1337, %v69_v48   ;;  %v820_v48 = vld [vmem:[%s2408_s4 + $0x78] sm:$0xff] }
  0x53   :  { %172 = vperm.xlu0 %1336, %v70_v50   ;;  %825 = vperm.xlu2 %1338, %v805_v15  }
  0x54   :  { %1247 = vmatmul.msk.f32.gmra.mxu0 %vm249_vm1, %v29_v42 }
  0x55   :  { %1280 = vmatmul.msk.f32.gmra.mxu1 %vm249_vm1, %v29_v42  ;;  %v817_v42 = vld [vmem:[%s2408_s4 + $0x60] sm:$0xff] }
  0x5a   :  { %835 = vperm.xlu1 %1337, %v807_v59  }
  0x5b   :  { %830 = vperm.xlu0 %1336, %v806_v58   ;;  %840 = vperm.xlu2 %1338, %v808_v21  }
  0x5c   :  { %1248 = vmatmul.msk.f32.gmra.mxu0 %vm249_vm1, %v30_v43 }
  0x5d   :  { %1281 = vmatmul.msk.f32.gmra.mxu1 %vm249_vm1, %v30_v43  ;;  %v1656_v24 = vpop.permute.xlu2 %237 }
  0x62   :  { %850 = vperm.xlu1 %1337, %v810_v0   ;;  %v48_v0 = vld [vmem:[%s2407_s1 + $0xe0] sm:$0xff] }
  0x63   :  { %845 = vperm.xlu0 %1336, %v809_v63   ;;  %855 = vperm.xlu2 %1338, %v811_v28  }
  0x64   :  { %1249 = vmatmul.msk.f32.gmra.mxu0 %vm249_vm1, %v31_v44 }
  0x65   :  { %1282 = vmatmul.msk.f32.gmra.mxu1 %vm249_vm1, %v31_v44  ;;  %v1674_v31 = vpop.permute.xlu2 %147 }
  0x6a   :  { %865 = vperm.xlu1 %1337, %v813_v5  }
  0x6b   :  { %860 = vperm.xlu0 %1336, %v812_v4   ;;  %870 = vperm.xlu2 %1338, %v814_v35  }
  0x6c   :  { %1250 = vmatmul.msk.f32.gmra.mxu0 %vm249_vm1, %v32_v45 }
  0x6d   :  { %1283 = vmatmul.msk.f32.gmra.mxu1 %vm249_vm1, %v32_v45  ;;  %v1699_v41 = vpop.permute.xlu2 %227 }
  0x72   :  { %880 = vperm.xlu1 %1337, %v816_v10   ;;  %v49_v10 = vld [vmem:[%s2407_s1 + $0xe8] sm:$0xff] }
  0x73   :  { %875 = vperm.xlu0 %1336, %v815_v9   ;;  %885 = vperm.xlu2 %1338, %v817_v42  }
  0x74   :  { %1251 = vmatmul.msk.f32.gmra.mxu0 %vm249_vm1, %v33_v47  ;;  %v1668_v29 = vpop.permute.xlu1 %242 }
  0x75   :  { %1284 = vmatmul.msk.f32.gmra.mxu1 %vm249_vm1, %v33_v47  ;;  %v1649_v22 = vpop.permute.xlu0 %162 }
  0x7a   :  { %895 = vperm.xlu1 %1337, %v819_v16  }
  0x7b   :  { %890 = vperm.xlu0 %1336, %v818_v14   ;;  %900 = vperm.xlu2 %1338, %v820_v48  }
  0x7c   :  { %1252 = vmatmul.msk.f32.gmra.mxu0 %vm249_vm1, %v34_v49  ;;  %v1688_v36 = vpop.permute.xlu1 %152 }
  0x7d   :  { %1285 = vmatmul.msk.f32.gmra.mxu1 %vm249_vm1, %v34_v49  ;;  %v1672_v30 = vpop.permute.xlu0 %157  ;;  %v1718_v49 = vpop.permute.xlu2 %132 }
  0x82   :  { %910 = vperm.xlu1 %1337, %v822_v23  }
  0x83   :  { %905 = vperm.xlu0 %1336, %v821_v20  }
  0x84   :  { %1253 = vmatmul.msk.f32.gmra.mxu0 %vm249_vm1, %v35_v51  ;;  %v1706_v43 = vpop.permute.xlu1 %142 }
  0x85   :  { %1286 = vmatmul.msk.f32.gmra.mxu1 %vm249_vm1, %v35_v51  ;;  %v1690_v37 = vpop.permute.xlu0 %232  ;;  %v1733_v59 = vpop.permute.xlu2 %212 }
  0x89   :  { %v1549_v52 = vpop.f32.mrf.mxu0 }
  0x8a   :  { %v1551_v53 = vpop.f32.mrf.mxu1 }
  0x8c   :  { %1254 = vmatmul.msk.f32.gmra.mxu0 %vm249_vm1, %v36_v54 }
  0x8d   :  { %1287 = vmatmul.msk.f32.gmra.mxu1 %vm249_vm1, %v36_v54  ;;  %v1713_v47 = vpop.permute.xlu0 %137  ;;  %v47_v54 = vld [vmem:[%s2407_s1 + $0xd8] sm:$0xff]  ;;  %v1746_v5 = vpop.permute.xlu2 %117 }
  0x91   :  { %v1558_v55 = vpop.f32.mrf.mxu0 }
  0x92   :  { %v1560_v56 = vpop.f32.mrf.mxu1 }
  0x94   :  { %1255 = vmatmul.msk.f32.gmra.mxu0 %vm249_vm1, %v37_v57 }
  0x95   :  { %1288 = vmatmul.msk.f32.gmra.mxu1 %vm249_vm1, %v37_v57  ;;  %v1727_v57 = vpop.permute.xlu1 %222  ;;  %v1729_v58 = vpop.permute.xlu0 %217 }
  0x96   :  { %v1764_v20 = vpop.permute.xlu2 %197 }
  0x97   :  { %2415 = vst [vmem:[#allocation3_spill] sm:$0xff] %v1764_v20 }
  0x99   :  { %v1573_v60 = vpop.f32.mrf.mxu0 }
  0x9a   :  { %v1575_v61 = vpop.f32.mrf.mxu1 }
  0x9c   :  { %1256 = vmatmul.msk.f32.gmra.mxu0 %vm249_vm1, %v38_v62 }
  0x9d   :  { %1289 = vmatmul.msk.f32.gmra.mxu1 %vm249_vm1, %v38_v62  ;;  %v1744_v4 = vpop.permute.xlu0 %122 }
  0xa1   :  { %v1588_v1 = vpop.f32.mrf.mxu0 }
  0xa2   :  { %v1590_v2 = vpop.f32.mrf.mxu1 }
  0xa4   :  { %1257 = vmatmul.msk.f32.gmra.mxu0 %vm249_vm1, %v39_v3 }
  0xa5   :  { %1290 = vmatmul.msk.f32.gmra.mxu1 %vm249_vm1, %v39_v3  ;;  %v1740_v3 = vpop.permute.xlu1 %127  ;;  %v1757_v14 = vpop.permute.xlu0 %202 }
  0xa6   :  { %2414 = vst [vmem:[#allocation2_spill] sm:$0xff] %v1757_v14 }
  0xa9   :  { %v1603_v6 = vpop.f32.mrf.mxu0 }
  0xaa   :  { %v1605_v7 = vpop.f32.mrf.mxu1 }
  0xac   :  { %1258 = vmatmul.msk.f32.gmra.mxu0 %vm249_vm1, %v40_v8 }
  0xad   :  { %1291 = vmatmul.msk.f32.gmra.mxu1 %vm249_vm1, %v40_v8  ;;  %v1778_v42 = vpop.permute.xlu0 %107 }
  0xb1   :  { %v1618_v11 = vpop.f32.mrf.mxu0 }
  0xb2   :  { %v1620_v12 = vpop.f32.mrf.mxu1 }
  0xb4   :  { %1259 = vmatmul.msk.f32.gmra.mxu0 %vm249_vm1, %v41_v13 }
  0xb5   :  { %1292 = vmatmul.msk.f32.gmra.mxu1 %vm249_vm1, %v41_v13  ;;  %v1755_v13 = vpop.permute.xlu1 %207 }
  0xb9   :  { %v1636_v17 = vpop.f32.mrf.mxu0 }
  0xba   :  { %v1638_v18 = vpop.f32.mrf.mxu1 }
  0xbc   :  { %1260 = vmatmul.msk.f32.gmra.mxu0 %vm249_vm1, %v42_v19 }
  0xbd   :  { %1293 = vmatmul.msk.f32.gmra.mxu1 %vm249_vm1, %v42_v19  ;;  %v50_v19 = vld [vmem:[%s2407_s1 + $0xf0] sm:$0xff]  ;;  %v1768_v21 = vpop.permute.xlu1 %112 }
  0xc1   :  { %v1658_v25 = vpop.f32.mrf.mxu0 }
  0xc2   :  { %v1660_v26 = vpop.f32.mrf.mxu1 }
  0xc4   :  { %1261 = vmatmul.msk.f32.gmra.mxu0 %vm249_vm1, %v43_v27 }
  0xc5   :  { %1294 = vmatmul.msk.f32.gmra.mxu1 %vm249_vm1, %v43_v27 }
  0xc9   :  { %v1676_v32 = vpop.f32.mrf.mxu0 }
  0xca   :  { %v1678_v33 = vpop.f32.mrf.mxu1 }
  0xcc   :  { %1262 = vmatmul.msk.f32.gmra.mxu0 %vm249_vm1, %v44_v34 }
  0xcd   :  { %1295 = vmatmul.msk.f32.gmra.mxu1 %vm249_vm1, %v44_v34  ;;  %v51_v34 = vld [vmem:[%s2407_s1 + $0xf8] sm:$0xff] }
  0xd1   :  { %v1692_v38 = vpop.f32.mrf.mxu0 }
  0xd2   :  { %v1694_v39 = vpop.f32.mrf.mxu1 }
  0xd4   :  { %1263 = vmatmul.msk.f32.gmra.mxu0 %vm249_vm1, %v45_v40 }
  0xd5   :  { %1296 = vmatmul.msk.f32.gmra.mxu1 %vm249_vm1, %v45_v40 }
  0xd9   :  { %v398_v44 = vpop.f32.mrf.mxu0 }
  0xda   :  { %v1708_v45 = vpop.f32.mrf.mxu1 }
  0xdc   :  { %1264 = vmatmul.msk.f32.gmra.mxu0 %vm249_vm1, %v46_v46 }
  0xdd   :  { %1297 = vmatmul.msk.f32.gmra.mxu1 %vm249_vm1, %v46_v46  ;;  %v1780_v46 = vpop.permute.xlu2 %102 }
  0xe1   :  { %v401_v50 = vpop.f32.mrf.mxu0 }
  0xe2   :  { %v1722_v51 = vpop.f32.mrf.mxu1 }
  0xe4   :  { %1265 = vmatmul.msk.f32.gmra.mxu0 %vm249_vm1, %v47_v54 }
  0xe5   :  { %1298 = vmatmul.msk.f32.gmra.mxu1 %vm249_vm1, %v47_v54 }
  0xe9   :  { %v404_v62 = vpop.f32.mrf.mxu0 }
  0xea   :  { %v1735_v63 = vpop.f32.mrf.mxu1  ;;  %v405_v48 = vadd.f32 %v404_v62, %v1674_v31 }
  0xec   :  { %1266 = vmatmul.msk.f32.gmra.mxu0 %vm249_vm1, %v48_v0  ;;  %v665_v20 = vmul.f32 0.2, %v405_v48  ;;  %vm601_vm5 = vcmp.gt.f32.partialorder %v405_v48, 0.0 }
  0xed   :  { %1299 = vmatmul.msk.f32.gmra.mxu1 %vm249_vm1, %v48_v0 }
  0xf1   :  { %v407_v8 = vpop.f32.mrf.mxu0 }
  0xf2   :  { %v1748_v9 = vpop.f32.mrf.mxu1  ;;  %v408_v35 = vadd.f32 %v407_v8, %v1688_v36 }
  0xf4   :  { %1267 = vmatmul.msk.f32.gmra.mxu0 %vm249_vm1, %v49_v10  ;;  %v667_v8 = vmul.f32 0.2, %v408_v35  ;;  %vm603_vm4 = vcmp.gt.f32.partialorder %v408_v35, 0.0 }
  0xf5   :  { %1300 = vmatmul.msk.f32.gmra.mxu1 %vm249_vm1, %v49_v10  ;;  %v402_v10 = vadd.f32 %v401_v50, %v1706_v43 }
  0xf6   :  { %v731_v50 = vsel %vm603_vm4, %v408_v35, %v667_v8 }
  0xf7   :  { %vm599_vm6 = vcmp.gt.f32.partialorder %v402_v10, 0.0 }
  0xf9   :  { %v410_v15 = vpop.f32.mrf.mxu0 }
  0xfa   :  { %v1759_v16 = vpop.f32.mrf.mxu1  ;;  %v411_v23 = vadd.f32 %v410_v15, %v1672_v30 }
  0xfc   :  { %1268 = vmatmul.msk.f32.gmra.mxu0 %vm249_vm1, %v50_v19  ;;  %v669_v0 = vmul.f32 0.2, %v411_v23  ;;  %vm605_vm3 = vcmp.gt.f32.partialorder %v411_v23, 0.0 }
  0xfd   :  { %1301 = vmatmul.msk.f32.gmra.mxu1 %vm249_vm1, %v50_v19  ;;  %v399_v19 = vadd.f32 %v398_v44, %v1713_v47  ;;  %v393_v44 = vadd.f32 %v1676_v32, %v1740_v3  ;;  %v387_v32 = vadd.f32 %v1636_v17, %v1746_v5  ;;  %v381_v17 = vadd.f32 %v1603_v6, %v1778_v42 }
  0xff   :  { %vm597_vm7 = vcmp.gt.f32.partialorder %v399_v19, 0.0  ;;  %vm593_vm9 = vcmp.gt.f32.partialorder %v393_v44, 0.0  ;;  %vm589_vm11 = vcmp.gt.f32.partialorder %v387_v32, 0.0  ;;  %vm585_vm13 = vcmp.gt.f32.partialorder %v381_v17, 0.0 }
 0x101   :  { %v413_v27 = vpop.f32.mrf.mxu0 }
 0x102   :  { %v1771_v28 = vpop.f32.mrf.mxu1  ;;  %v414_v40 = vadd.f32 %v413_v27, %v1649_v22  ;;  %v733_v27 = vsel %vm605_vm3, %v411_v23, %v669_v0  ;;  %v729_v23 = vsel %vm601_vm5, %v405_v48, %v665_v20  ;;  %v661_v0 = vmul.f32 0.2, %v399_v19 }
 0x103   :  { %v657_v48 = vmul.f32 0.2, %v393_v44 }
 0x104   :  { %1269 = vmatmul.msk.f32.gmra.mxu0 %vm249_vm1, %v51_v34  ;;  %vm607_vm2 = vcmp.gt.f32.partialorder %v414_v40, 0.0  ;;  %v671_v54 = vmul.f32 0.2, %v414_v40  ;;  %v725_v20 = vsel %vm597_vm7, %v399_v19, %v661_v0 }
 0x105   :  { %1302 = vmatmul.msk.f32.gmra.mxu1 %vm249_vm1, %v51_v34  ;;  %v396_v34 = vadd.f32 %v1692_v38, %v1718_v49  ;;  %v390_v38 = vadd.f32 %v1658_v25, %v1744_v4  ;;  %v384_v25 = vadd.f32 %v1618_v11, %v1768_v21  ;;  %v721_v19 = vsel %vm593_vm9, %v393_v44, %v657_v48 }
 0x106   :  { %v735_v15 = vsel %vm607_vm2, %v414_v40, %v671_v54  ;;  %v663_v40 = vmul.f32 0.2, %v402_v10  ;;  %v1793_v54 = vpop.permute.xlu1 %192  ;;  %v649_v48 = vmul.f32 0.2, %v381_v17 }
 0x107   :  { %913 = vmatpush.msrb.mxu0 %v735_v15  ;;  %1303 = vmatpush.msra.mxu2 %v735_v15  ;;  %v1797_v15 = vpop.permute.xlu0 %187  ;;  %v659_v8 = vmul.f32 0.2, %v396_v34  ;;  %vm595_vm8 = vcmp.gt.f32.partialorder %v396_v34, 0.0  ;;  %vm591_vm10 = vcmp.gt.f32.partialorder %v390_v38, 0.0  ;;  %v651_v11 = vmul.f32 0.2, %v384_v25 }
 0x108   :  { %v727_v35 = vsel %vm599_vm6, %v402_v10, %v663_v40  ;;  %v655_v40 = vmul.f32 0.2, %v390_v38  ;;  %vm587_vm12 = vcmp.gt.f32.partialorder %v384_v25, 0.0 }
 0x109   :  { %v1787_v62 = vpop.f32.mrf.mxu0  ;;  %914 = vmatpush.msrb.mxu0 %v733_v27  ;;  %1304 = vmatpush.msra.mxu2 %v733_v27  ;;  %v1799_v27 = vpop.permute.xlu2 %182  ;;  %v723_v10 = vsel %vm595_vm8, %v396_v34, %v659_v8 }
 0x10a   :  { %v1789_v14 = vpop.f32.mrf.mxu1 }
 0x10b   :  { %2416 = vst [vmem:[#allocation4_spill] sm:$0xff] %v1789_v14  ;;  %915 = vmatpush.msrb.mxu0 %v731_v50  ;;  %1305 = vmatpush.msra.mxu2 %v731_v50 }
 0x10d   :  { %916 = vmatpush.msrb.mxu0 %v729_v23  ;;  %1306 = vmatpush.msra.mxu2 %v729_v23  ;;  %v653_v23 = vmul.f32 0.2, %v387_v32 }
 0x10e   :  { %v1813_v0 = vpop.permute.xlu1 %97 }
 0x10f   :  { %917 = vmatpush.msrb.mxu0 %v727_v35  ;;  %1307 = vmatpush.msra.mxu2 %v727_v35  ;;  %v378_v35 = vadd.f32 %v1588_v1, %v1780_v46  ;;  %v1817_v34 = vpop.permute.xlu0 %92  ;;  %v375_v6 = vadd.f32 %v1573_v60, %v1813_v0  ;;  %v717_v44 = vsel %vm589_vm11, %v387_v32, %v653_v23 }
 0x110   :  { %v372_v1 = vadd.f32 %v1558_v55, %v1817_v34  ;;  %v527_v32 = vadd.f32 %v1771_v28, %v1649_v22  ;;  %v713_v23 = vsel %vm585_vm13, %v381_v17, %v649_v48  ;;  %v512_v48 = vadd.f32 %v1708_v45, %v1713_v47 }
 0x111   :  { %v1805_v50 = vpop.f32.mrf.mxu0  ;;  %918 = vmatpush.msrb.mxu0 %v725_v20  ;;  %1308 = vmatpush.msra.mxu2 %v725_v20  ;;  %v719_v20 = vsel %vm591_vm10, %v390_v38, %v655_v40  ;;  %v1819_v8 = vpop.permute.xlu2 %87  ;;  %v715_v38 = vsel %vm587_vm12, %v384_v25, %v651_v11  ;;  %v647_v40 = vmul.f32 0.2, %v378_v35  ;;  %vm583_vm14 = vcmp.gt.f32.partialorder %v378_v35, 0.0 }
 0x112   :  { %v1807_v14 = vpop.f32.mrf.mxu1  ;;  %v369_v60 = vadd.f32 %v1549_v52, %v1819_v8  ;;  %vm581_vm15 = vcmp.gt.f32.partialorder %v375_v6, 0.0  ;;  %v643_v25 = vmul.f32 0.2, %v372_v1  ;;  %vm579_vm0 = vcmp.gt.f32.partialorder %v372_v1, 0.0 }
 0x113   :  { %2417 = vst [vmem:[#allocation5_spill] sm:$0xff] %v1807_v14  ;;  %919 = vmatpush.msrb.mxu0 %v723_v10  ;;  %1309 = vmatpush.msra.mxu2 %v723_v10  ;;  %v711_v55 = vsel %vm583_vm14, %v378_v35, %v647_v40  ;;  %v521_v11 = vadd.f32 %v1748_v9, %v1688_v36  ;;  %v672_v14 = vmul.f32 0.2, %v527_v32  ;;  %vm608_vm2 = vcmp.gt.f32.partialorder %v527_v32, 0.0  ;;  %v1846_v36 = vld [vmem:[%s2409_s3] sm:$0xff]  ;;  %v1851_v9 = vld [vmem:[%s2409_s3 + $0x30] sm:$0xff] }
 0x114   :  { %vm577_vm1 = vcmp.gt.f32.partialorder %v369_v60, 0.0  ;;  %v506_v45 = vadd.f32 %v1678_v33, %v1740_v3  ;;  %vm598_vm7 = vcmp.gt.f32.partialorder %v512_v48, 0.0 }
 0x115   :  { %920 = vmatpush.msrb.mxu0 %v721_v19  ;;  %1310 = vmatpush.msra.mxu2 %v721_v19  ;;  %v736_v35 = vsel %vm608_vm2, %v527_v32, %v672_v14  ;;  %vm604_vm4 = vcmp.gt.f32.partialorder %v521_v11, 0.0  ;;  %v662_v32 = vmul.f32 0.2, %v512_v48 }
 0x116   :  { %vm594_vm9 = vcmp.gt.f32.partialorder %v506_v45, 0.0 }
 0x117   :  { %921 = vmatpush.msrb.mxu0 %v719_v20  ;;  %1311 = vmatpush.msra.mxu2 %v719_v20  ;;  %v645_v20 = vmul.f32 0.2, %v375_v6  ;;  %v726_v3 = vsel %vm598_vm7, %v512_v48, %v662_v32  ;;  %v1914_v48 = vld [vmem:[%s2409_s3 + $0x60] sm:$0xff] }
 0x119   :  { %v1823_v10 = vpop.f32.mrf.mxu0  ;;  %922 = vmatpush.msrb.mxu0 %v717_v44  ;;  %1312 = vmatpush.msra.mxu2 %v717_v44  ;;  %v524_v44 = vadd.f32 %v1759_v16, %v1672_v30  ;;  %v709_v52 = vsel %vm581_vm15, %v375_v6, %v645_v20  ;;  %v518_v30 = vadd.f32 %v1735_v63, %v1674_v31  ;;  %v668_v6 = vmul.f32 0.2, %v521_v11 }
 0x11a   :  { %v1825_v19 = vpop.f32.mrf.mxu1  ;;  %v707_v16 = vsel %vm579_vm0, %v372_v1, %v643_v25  ;;  %v515_v31 = vadd.f32 %v1722_v51, %v1706_v43  ;;  %v509_v43 = vadd.f32 %v1694_v39, %v1718_v49  ;;  %v1873_v39 = vld [vmem:[%s2409_s3 + $0x40] sm:$0xff]  ;;  %v503_v49 = vadd.f32 %v1660_v26, %v1744_v4 }
 0x11b   :  { %923 = vmatpush.msrb.mxu0 %v715_v38  ;;  %1313 = vmatpush.msra.mxu2 %v715_v38  ;;  %v641_v38 = vmul.f32 0.2, %v369_v60  ;;  %v670_v28 = vmul.f32 0.2, %v524_v44  ;;  %vm606_vm3 = vcmp.gt.f32.partialorder %v524_v44, 0.0  ;;  %vm602_vm5 = vcmp.gt.f32.partialorder %v518_v30, 0.0 }
 0x11c   :  { %v666_v40 = vmul.f32 0.2, %v518_v30  ;;  %v732_v51 = vsel %vm604_vm4, %v521_v11, %v668_v6  ;;  %v664_v14 = vmul.f32 0.2, %v515_v31  ;;  %vm600_vm6 = vcmp.gt.f32.partialorder %v515_v31, 0.0 }
 0x11d   :  { %924 = vmatpush.msrb.mxu0 %v713_v23  ;;  %1314 = vmatpush.msra.mxu2 %v713_v23  ;;  %v705_v63 = vsel %vm577_vm1, %v369_v60, %v641_v38  ;;  %v734_v1 = vsel %vm606_vm3, %v524_v44, %v670_v28  ;;  %v1868_v23 = vld [vmem:[%s2409_s3 + $0x10] sm:$0xff]  ;;  %v660_v44 = vmul.f32 0.2, %v509_v43  ;;  %vm596_vm8 = vcmp.gt.f32.partialorder %v509_v43, 0.0 }
 0x11e   :  { %v730_v47 = vsel %vm602_vm5, %v518_v30, %v666_v40  ;;  %v728_v20 = vsel %vm600_vm6, %v515_v31, %v664_v14  ;;  %v500_v25 = vadd.f32 %v1638_v18, %v1746_v5  ;;  %vm592_vm10 = vcmp.gt.f32.partialorder %v503_v49, 0.0  ;;  %v1890_v30 = vld [vmem:[%s2409_s3 + $0x20] sm:$0xff]  ;;  %v1895_v18 = vld [vmem:[%s2409_s3 + $0x50] sm:$0xff] }
 0x11f   :  { %925 = vmatpush.msrb.mxu0 %v711_v55  ;;  %1315 = vmatpush.msra.mxu2 %v711_v55  ;;  %v658_v55 = vmul.f32 0.2, %v506_v45  ;;  %v724_v11 = vsel %vm596_vm8, %v509_v43, %v660_v44  ;;  %v497_v4 = vadd.f32 %v1620_v12, %v1768_v21  ;;  %v494_v5 = vadd.f32 %v1605_v7, %v1778_v42  ;;  %v1940_v44 = vld [vmem:[%s2409_s3 + $0x90] sm:$0xff] }
 0x120   :  { %v654_v28 = vmul.f32 0.2, %v500_v25  ;;  %vm590_vm11 = vcmp.gt.f32.partialorder %v500_v25, 0.0  ;;  %v491_v12 = vadd.f32 %v1590_v2, %v1780_v46  ;;  %v485_v2 = vadd.f32 %v1560_v56, %v1817_v34 }
 0x121   :  { %v1837_v22 = vpop.f32.mrf.mxu0  ;;  %926 = vmatpush.msrb.mxu0 %v709_v52  ;;  %1316 = vmatpush.msra.mxu2 %v709_v52  ;;  %v656_v52 = vmul.f32 0.2, %v503_v49  ;;  %v722_v38 = vsel %vm594_vm9, %v506_v45, %v658_v55  ;;  %v652_v21 = vmul.f32 0.2, %v497_v4  ;;  %vm588_vm12 = vcmp.gt.f32.partialorder %v497_v4, 0.0 }
 0x122   :  { %v1841_v17 = vpop.f32.mrf.mxu1  ;;  %v718_v7 = vsel %vm590_vm11, %v500_v25, %v654_v28  ;;  %v650_v42 = vmul.f32 0.2, %v494_v5  ;;  %vm586_vm13 = vcmp.gt.f32.partialorder %v494_v5, 0.0  ;;  %v648_v6 = vmul.f32 0.2, %v491_v12  ;;  %v1948_v25 = vld [vmem:[%s2409_s3 + $0xa0] sm:$0xff] }
 0x123   :  { %927 = vmatpush.msrb.mxu0 %v707_v16  ;;  %1317 = vmatpush.msra.mxu2 %v707_v16  ;;  %v720_v16 = vsel %vm592_vm10, %v503_v49, %v656_v52  ;;  %v716_v46 = vsel %vm588_vm12, %v497_v4, %v652_v21  ;;  %vm584_vm14 = vcmp.gt.f32.partialorder %v491_v12, 0.0  ;;  %v644_v56 = vmul.f32 0.2, %v485_v2  ;;  %v1934_v49 = vld [vmem:[%s2409_s3 + $0x80] sm:$0xff]  ;;  %v1956_v4 = vld [vmem:[%s2409_s3 + $0xb0] sm:$0xff] }
 0x124   :  { %v712_v40 = vsel %vm584_vm14, %v491_v12, %v648_v6  ;;  %vm580_vm0 = vcmp.gt.f32.partialorder %v485_v2, 0.0  ;;  %v1972_v21 = vld [vmem:[%s2409_s3 + $0xd0] sm:$0xff] }
 0x125   :  { %928 = vmatpush.msrb.mxu0 %v705_v63  ;;  %1318 = vmatpush.msra.mxu2 %v705_v63  ;;  %v488_v63 = vadd.f32 %v1575_v61, %v1813_v0  ;;  %v482_v61 = vadd.f32 %v1551_v53, %v1819_v8  ;;  %v714_v0 = vsel %vm586_vm13, %v494_v5, %v650_v42  ;;  %v1926_v53 = vld [vmem:[%s2409_s3 + $0x70] sm:$0xff] }
 0x126   :  { %929 = vmatmul.f32.vlgmr.msrb.gmra.mxu0 %v1846_v36  ;;  %938 = vmatmul.f32.vlgmr.msra.gmra.mxu2 %v1851_v9  ;;  %v708_v45 = vsel %vm580_vm0, %v485_v2, %v644_v56 }
 0x127   :  { %1055 = vmatpush.msrb.mxu2 %v736_v35  ;;  %vm582_vm15 = vcmp.gt.f32.partialorder %v488_v63, 0.0  ;;  %v642_v43 = vmul.f32 0.2, %v482_v61  ;;  %vm578_vm1 = vcmp.gt.f32.partialorder %v482_v61, 0.0 }
 0x129   :  { %1056 = vmatpush.msrb.mxu2 %v734_v1  ;;  %v1861_v60 = vpop.f32.mrf.mxu0  ;;  %v646_v1 = vmul.f32 0.2, %v488_v63  ;;  %v706_v8 = vsel %vm578_vm1, %v482_v61, %v642_v43 }
 0x12a   :  { %v1877_v33 = vpop.f32.mrf.mxu1 }
 0x12b   :  { %1057 = vmatpush.msrb.mxu2 %v732_v51  ;;  %v710_v34 = vsel %vm582_vm15, %v488_v63, %v646_v1 }
 0x12d   :  { %1058 = vmatpush.msrb.mxu2 %v730_v47 }
 0x12e   :  { %932 = vmatmul.f32.gmra.mxu0 %v1868_v23  ;;  %941 = vmatmul.f32.gmra.mxu2 %v1873_v39 }
 0x12f   :  { %1059 = vmatpush.msrb.mxu2 %v728_v20 }
 0x131   :  { %1060 = vmatpush.msrb.mxu2 %v726_v3  ;;  %v1883_v26 = vpop.f32.mrf.mxu0 }
 0x132   :  { %v1903_v31 = vpop.f32.mrf.mxu1 }
 0x133   :  { %1061 = vmatpush.msrb.mxu2 %v724_v11 }
 0x135   :  { %1062 = vmatpush.msrb.mxu2 %v722_v38 }
 0x136   :  { %935 = vmatmul.f32.gmra.mxu0 %v1890_v30  ;;  %944 = vmatmul.f32.gmra.mxu2 %v1895_v18 }
 0x137   :  { %1063 = vmatpush.msrb.mxu2 %v720_v16  ;;  %v1964_v16 = vld [vmem:[%s2409_s3 + $0xc0] sm:$0xff] }
 0x139   :  { %1064 = vmatpush.msrb.mxu2 %v718_v7  ;;  %v1907_v35 = vpop.f32.mrf.mxu0  ;;  %v1978_v7 = vld [vmem:[%s2409_s3 + $0xe0] sm:$0xff] }
 0x13a   :  { %v1919_v51 = vpop.f32.mrf.mxu1  ;;  %2418 = vst [vmem:[#allocation6_spill] sm:$0xff] %v1978_v7 }
 0x13b   :  { %1065 = vmatpush.msrb.mxu2 %v716_v46 }
 0x13d   :  { %1066 = vmatpush.msrb.mxu2 %v714_v0  ;;  %v1989_v0 = vld [vmem:[%s2409_s3 + $0xf0] sm:$0xff] }
 0x13e   :  { %947 = vmatmul.f32.gmra.mxu2 %v1914_v48 }
 0x13f   :  { %1067 = vmatpush.msrb.mxu2 %v712_v40 }
 0x141   :  { %1068 = vmatpush.msrb.mxu2 %v710_v34  ;;  %v1921_v14 = vpop.f32.mrf.mxu0 }
 0x142   :  { %v1929_v32 = vpop.f32.mrf.mxu1 }
 0x143   :  { %1069 = vmatpush.msrb.mxu2 %v708_v45 }
 0x145   :  { %1070 = vmatpush.msrb.mxu2 %v706_v8 }
 0x146   :  { %950 = vmatmul.f32.gmra.mxu2 %v1926_v53 }
 0x149   :  { %v440_v47 = vpop.f32.mrf.mxu0 }
 0x14a   :  { %v1942_v3 = vpop.f32.mrf.mxu1 }
 0x14e   :  { %953 = vmatmul.f32.gmra.mxu2 %v1934_v49 }
 0x151   :  { %v443_v20 = vpop.f32.mrf.mxu0 }
 0x152   :  { %v1951_v11 = vpop.f32.mrf.mxu1 }
 0x156   :  { %956 = vmatmul.f32.gmra.mxu2 %v1940_v44 }
 0x159   :  { %v446_v55 = vpop.f32.mrf.mxu0 }
 0x15a   :  { %v1959_v38 = vpop.f32.mrf.mxu1 }
 0x15e   :  { %959 = vmatmul.f32.gmra.mxu2 %v1948_v25 }
 0x161   :  { %v449_v52 = vpop.f32.mrf.mxu0 }
 0x162   :  { %v1967_v12 = vpop.f32.mrf.mxu1  ;;  %v450_v34 = vadd.f32 %v449_v52, %v1727_v57 }
 0x164   :  { %v695_v52 = vmul.f32 0.2, %v450_v34  ;;  %vm631_vm6 = vcmp.gt.f32.partialorder %v450_v34, 0.0 }
 0x166   :  { %962 = vmatmul.f32.gmra.mxu2 %v1956_v4 }
 0x169   :  { %v452_v5 = vpop.f32.mrf.mxu0 }
 0x16a   :  { %v1980_v42 = vpop.f32.mrf.mxu1  ;;  %v453_v1 = vadd.f32 %v452_v5, %v1699_v41  ;;  %v444_v5 = vadd.f32 %v443_v20, %v1733_v59 }
 0x16c   :  { %vm633_vm5 = vcmp.gt.f32.partialorder %v453_v1, 0.0  ;;  %vm627_vm8 = vcmp.gt.f32.partialorder %v444_v5, 0.0 }
 0x16e   :  { %965 = vmatmul.f32.gmra.mxu2 %v1964_v16 }
 0x171   :  { %v455_v28 = vpop.f32.mrf.mxu0 }
 0x172   :  { %v456_v6 = vadd.f32 %v455_v28, %v1690_v37  ;;  %v1994_v8 = vpop.f32.mrf.mxu1  ;;  %v447_v28 = vadd.f32 %v446_v55, %v1729_v58 }
 0x174   :  { %v699_v45 = vmul.f32 0.2, %v456_v6  ;;  %vm635_vm4 = vcmp.gt.f32.partialorder %v456_v6, 0.0  ;;  %vm629_vm7 = vcmp.gt.f32.partialorder %v447_v28, 0.0 }
 0x176   :  { %968 = vmatmul.f32.gmra.mxu2 %v1972_v21 }
 0x179   :  { %v458_v63 = vpop.f32.mrf.mxu0 }
 0x17a   :  { %v459_v2 = vadd.f32 %v458_v63, %v1656_v24 }
 0x17c   :  { %v701_v56 = vmul.f32 0.2, %v459_v2  ;;  %vm637_vm3 = vcmp.gt.f32.partialorder %v459_v2, 0.0 }
 0x17e   :  { %971 = vmatmul.f32.gmra.mxu2 %v1978_v7  ;;  %v765_v63 = vsel %vm637_vm3, %v459_v2, %v701_v56  ;;  %v763_v7 = vsel %vm635_vm4, %v456_v6, %v699_v45  ;;  %v693_v2 = vmul.f32 0.2, %v447_v28  ;;  %v2419_v56 = vld [vmem:[#allocation2_spill] sm:$0xff]  ;;  %v759_v6 = vsel %vm631_vm6, %v450_v34, %v695_v52  ;;  %v2420_v45 = vld [vmem:[#allocation3_spill] sm:$0xff] }
 0x17f   :  { %v438_v20 = vadd.f32 %v1921_v14, %v2419_v56  ;;  %v432_v14 = vadd.f32 %v1883_v26, %v1793_v54  ;;  %v2016_v52 = vld [vmem:[%s2409_s3 + $0x110] sm:$0xff]  ;;  %v426_v26 = vadd.f32 %v1837_v22, %v1799_v27 }
 0x181   :  { %v461_v46 = vpop.f32.mrf.mxu0  ;;  %v687_v34 = vmul.f32 0.2, %v438_v20  ;;  %vm623_vm10 = vcmp.gt.f32.partialorder %v438_v20, 0.0  ;;  %vm619_vm12 = vcmp.gt.f32.partialorder %v432_v14, 0.0  ;;  %vm615_vm14 = vcmp.gt.f32.partialorder %v426_v26, 0.0 }
 0x182   :  { %v462_v61 = vadd.f32 %v461_v46, %v1668_v29  ;;  %v697_v46 = vmul.f32 0.2, %v453_v1 }
 0x184   :  { %vm639_vm2 = vcmp.gt.f32.partialorder %v462_v61, 0.0  ;;  %v703_v40 = vmul.f32 0.2, %v462_v61  ;;  %v761_v55 = vsel %vm633_vm5, %v453_v1, %v697_v46  ;;  %v757_v1 = vsel %vm629_vm7, %v447_v28, %v693_v2  ;;  %v571_v46 = vpop.f32.mrf.mxu1 }
 0x186   :  { %974 = vmatmul.f32.gmra.mxu2 %v1989_v0  ;;  %v767_v43 = vsel %vm639_vm2, %v462_v61, %v703_v40  ;;  %v2001_v61 = vld [vmem:[%s2409_s3 + $0x100] sm:$0xff]  ;;  %v441_v40 = vadd.f32 %v440_v47, %v1755_v13  ;;  %v435_v47 = vadd.f32 %v1907_v35, %v2420_v45  ;;  %v429_v35 = vadd.f32 %v1861_v60, %v1797_v15 }
 0x187   :  { %984 = vmatpush.msrb.mxu1 %v767_v43  ;;  %1319 = vmatpush.msra.mxu3 %v767_v43  ;;  %v2007_v43 = vpop.permute.xlu1 %177 }
 0x188   :  { %vm625_vm9 = vcmp.gt.f32.partialorder %v441_v40, 0.0  ;;  %v685_v2 = vmul.f32 0.2, %v435_v47  ;;  %vm621_vm11 = vcmp.gt.f32.partialorder %v435_v47, 0.0  ;;  %v423_v60 = vadd.f32 %v1823_v10, %v2007_v43 }
 0x189   :  { %985 = vmatpush.msrb.mxu1 %v765_v63  ;;  %1320 = vmatpush.msra.mxu3 %v765_v63  ;;  %v689_v63 = vmul.f32 0.2, %v441_v40  ;;  %vm617_vm13 = vcmp.gt.f32.partialorder %v429_v35, 0.0 }
 0x18a   :  { %vm613_vm15 = vcmp.gt.f32.partialorder %v423_v60, 0.0 }
 0x18b   :  { %986 = vmatpush.msrb.mxu1 %v763_v7  ;;  %1321 = vmatpush.msra.mxu3 %v763_v7  ;;  %v691_v7 = vmul.f32 0.2, %v444_v5  ;;  %v753_v28 = vsel %vm625_vm9, %v441_v40, %v689_v63  ;;  %v749_v40 = vsel %vm621_vm11, %v435_v47, %v685_v2  ;;  %v677_v47 = vmul.f32 0.2, %v423_v60 }
 0x18d   :  { %987 = vmatpush.msrb.mxu1 %v761_v55  ;;  %1322 = vmatpush.msra.mxu3 %v761_v55  ;;  %v755_v55 = vsel %vm627_vm8, %v444_v5, %v691_v7  ;;  %v751_v5 = vsel %vm623_vm10, %v438_v20, %v687_v34  ;;  %v2023_v7 = vpop.permute.xlu0 %172  ;;  %v574_v34 = vpop.f32.mrf.mxu1 }
 0x18e   :  { %977 = vmatmul.f32.gmra.mxu2 %v2001_v61  ;;  %v420_v22 = vadd.f32 %v1805_v50, %v2023_v7  ;;  %v575_v2 = vadd.f32 %v574_v34, %v1668_v29  ;;  %v2041_v29 = vld [vmem:[%s2409_s3 + $0x8] sm:$0xff] }
 0x18f   :  { %988 = vmatpush.msrb.mxu1 %v759_v6  ;;  %1323 = vmatpush.msra.mxu3 %v759_v6  ;;  %v683_v6 = vmul.f32 0.2, %v432_v14  ;;  %v2027_v63 = vpop.permute.xlu1 %167 }
 0x190   :  { %v675_v50 = vmul.f32 0.2, %v420_v22  ;;  %vm611_vm0 = vcmp.gt.f32.partialorder %v420_v22, 0.0  ;;  %vm640_vm2 = vcmp.gt.f32.partialorder %v575_v2, 0.0 }
 0x191   :  { %989 = vmatpush.msrb.mxu1 %v757_v1  ;;  %1324 = vmatpush.msra.mxu3 %v757_v1  ;;  %v681_v1 = vmul.f32 0.2, %v429_v35  ;;  %v747_v20 = vsel %vm619_vm12, %v432_v14, %v683_v6  ;;  %v572_v14 = vadd.f32 %v571_v46, %v1656_v24  ;;  %v741_v6 = vsel %vm613_vm15, %v423_v60, %v677_v47  ;;  %v2046_v24 = vld [vmem:[%s2409_s3 + $0x38] sm:$0xff] }
 0x193   :  { %990 = vmatpush.msrb.mxu1 %v755_v55  ;;  %1325 = vmatpush.msra.mxu3 %v755_v55  ;;  %v679_v55 = vmul.f32 0.2, %v426_v26  ;;  %v745_v10 = vsel %vm617_vm13, %v429_v35, %v681_v1  ;;  %v739_v35 = vsel %vm611_vm0, %v420_v22, %v675_v50  ;;  %v704_v1 = vmul.f32 0.2, %v575_v2 }
 0x194   :  { %vm638_vm3 = vcmp.gt.f32.partialorder %v572_v14, 0.0 }
 0x195   :  { %991 = vmatpush.msrb.mxu1 %v753_v28  ;;  %1326 = vmatpush.msra.mxu3 %v753_v28  ;;  %v417_v28 = vadd.f32 %v1787_v62, %v2027_v63  ;;  %v569_v62 = vadd.f32 %v1994_v8, %v1690_v37  ;;  %v702_v37 = vmul.f32 0.2, %v572_v14  ;;  %v563_v8 = vadd.f32 %v1967_v12, %v1727_v57 }
 0x196   :  { %980 = vmatmul.f32.gmra.mxu2 %v2016_v52  ;;  %v557_v57 = vadd.f32 %v1951_v11, %v1733_v59  ;;  %v551_v59 = vadd.f32 %v1929_v32, %v2419_v56  ;;  %v545_v32 = vadd.f32 %v1903_v31, %v1793_v54  ;;  %v539_v54 = vadd.f32 %v1841_v17, %v1799_v27 }
 0x197   :  { %992 = vmatpush.msrb.mxu1 %v751_v5  ;;  %1327 = vmatpush.msra.mxu3 %v751_v5  ;;  %v743_v5 = vsel %vm615_vm14, %v426_v26, %v679_v55  ;;  %vm609_vm1 = vcmp.gt.f32.partialorder %v417_v28, 0.0  ;;  %v768_v26 = vsel %vm640_vm2, %v575_v2, %v704_v1  ;;  %v700_v60 = vmul.f32 0.2, %v569_v62  ;;  %v2062_v55 = vld [vmem:[%s2409_s3 + $0x18] sm:$0xff]  ;;  %v2083_v2 = vld [vmem:[%s2409_s3 + $0x28] sm:$0xff] }
 0x198   :  { %vm636_vm4 = vcmp.gt.f32.partialorder %v569_v62, 0.0  ;;  %vm632_vm6 = vcmp.gt.f32.partialorder %v563_v8, 0.0  ;;  %vm628_vm8 = vcmp.gt.f32.partialorder %v557_v57, 0.0  ;;  %v688_v47 = vmul.f32 0.2, %v551_v59 }
 0x199   :  { %993 = vmatpush.msrb.mxu1 %v749_v40  ;;  %1328 = vmatpush.msra.mxu3 %v749_v40  ;;  %v673_v40 = vmul.f32 0.2, %v417_v28  ;;  %v764_v12 = vsel %vm636_vm4, %v569_v62, %v700_v60  ;;  %vm624_vm10 = vcmp.gt.f32.partialorder %v551_v59, 0.0  ;;  %v684_v50 = vmul.f32 0.2, %v545_v32  ;;  %v2104_v62 = vld [vmem:[%s2409_s3 + $0x68] sm:$0xff] }
 0x19a   :  { %v752_v31 = vsel %vm624_vm10, %v551_v59, %v688_v47  ;;  %vm620_vm12 = vcmp.gt.f32.partialorder %v545_v32, 0.0  ;;  %vm616_vm14 = vcmp.gt.f32.partialorder %v539_v54, 0.0 }
 0x19b   :  { %994 = vmatpush.msrb.mxu1 %v747_v20  ;;  %1329 = vmatpush.msra.mxu3 %v747_v20  ;;  %v737_v46 = vsel %vm609_vm1, %v417_v28, %v673_v40  ;;  %v696_v20 = vmul.f32 0.2, %v563_v8  ;;  %v692_v28 = vmul.f32 0.2, %v557_v57  ;;  %v748_v17 = vsel %vm620_vm12, %v545_v32, %v684_v50 }
 0x19c   :  { %v680_v40 = vmul.f32 0.2, %v539_v54 }
 0x19d   :  { %995 = vmatpush.msrb.mxu1 %v745_v10  ;;  %1330 = vmatpush.msra.mxu3 %v745_v10  ;;  %v760_v11 = vsel %vm632_vm6, %v563_v8, %v696_v20  ;;  %v756_v56 = vsel %vm628_vm8, %v557_v57, %v692_v28  ;;  %v2423_v20 = vld [vmem:[#allocation6_spill] sm:$0xff] }
 0x19e   :  { %1071 = vmatmul.f32.vlgmr.msrb.gmra.mxu2 %v1846_v36  ;;  %v566_v36 = vadd.f32 %v1980_v42, %v1699_v41  ;;  %v560_v41 = vadd.f32 %v1959_v38, %v1729_v58  ;;  %v766_v42 = vsel %vm638_vm3, %v572_v14, %v702_v37  ;;  %v554_v58 = vadd.f32 %v1942_v3, %v1755_v13 }
 0x19f   :  { %996 = vmatpush.msrb.mxu1 %v743_v5  ;;  %1331 = vmatpush.msra.mxu3 %v743_v5  ;;  %v548_v13 = vadd.f32 %v1919_v51, %v2420_v45  ;;  %v542_v51 = vadd.f32 %v1877_v33, %v1797_v15  ;;  %v536_v15 = vadd.f32 %v1825_v19, %v2007_v43 }
 0x1a0   :  { %v698_v22 = vmul.f32 0.2, %v566_v36  ;;  %vm634_vm5 = vcmp.gt.f32.partialorder %v566_v36, 0.0  ;;  %v694_v34 = vmul.f32 0.2, %v560_v41  ;;  %vm630_vm7 = vcmp.gt.f32.partialorder %v560_v41, 0.0 }
 0x1a1   :  { %997 = vmatpush.msrb.mxu1 %v741_v6  ;;  %1332 = vmatpush.msra.mxu3 %v741_v6  ;;  %v690_v10 = vmul.f32 0.2, %v554_v58  ;;  %vm626_vm9 = vcmp.gt.f32.partialorder %v554_v58, 0.0  ;;  %v686_v5 = vmul.f32 0.2, %v548_v13  ;;  %vm622_vm11 = vcmp.gt.f32.partialorder %v548_v13, 0.0 }
 0x1a2   :  { %v762_v38 = vsel %vm634_vm5, %v566_v36, %v698_v22  ;;  %v758_v3 = vsel %vm630_vm7, %v560_v41, %v694_v34  ;;  %v682_v14 = vmul.f32 0.2, %v542_v51  ;;  %vm618_vm13 = vcmp.gt.f32.partialorder %v542_v51, 0.0  ;;  %v2421_v6 = vld [vmem:[#allocation5_spill] sm:$0xff]  ;;  %v2141_v41 = vld [vmem:[%s2409_s3 + $0xb8] sm:$0xff] }
 0x1a3   :  { %998 = vmatpush.msrb.mxu1 %v739_v35  ;;  %1333 = vmatpush.msra.mxu3 %v739_v35  ;;  %v754_v45 = vsel %vm626_vm9, %v554_v58, %v690_v10  ;;  %v750_v33 = vsel %vm622_vm11, %v548_v13, %v686_v5  ;;  %v533_v27 = vadd.f32 %v2421_v6, %v2023_v7  ;;  %v678_v43 = vmul.f32 0.2, %v536_v15  ;;  %v2191_v58 = vld [vmem:[%s2409_s3 + $0x118] sm:$0xff]  ;;  %v2202_v13 = vpop.permute.xlu0 %830 }
 0x1a4   :  { %v746_v19 = vsel %vm618_vm13, %v542_v51, %v682_v14  ;;  %vm614_vm15 = vcmp.gt.f32.partialorder %v536_v15, 0.0  ;;  %v744_v1 = vsel %vm616_vm14, %v539_v54, %v680_v40 }
 0x1a5   :  { %999 = vmatpush.msrb.mxu1 %v737_v46  ;;  %1334 = vmatpush.msra.mxu3 %v737_v46  ;;  %v676_v7 = vmul.f32 0.2, %v533_v27  ;;  %vm612_vm0 = vcmp.gt.f32.partialorder %v533_v27, 0.0  ;;  %v742_v36 = vsel %vm614_vm15, %v536_v15, %v678_v43 }
 0x1a6   :  { %1000 = vmatmul.f32.vlgmr.msrb.gmra.mxu1 %v2041_v29  ;;  %1009 = vmatmul.f32.vlgmr.msra.gmra.mxu3 %v2046_v24 }
 0x1a7   :  { %1074 = vmatmul.f32.gmra.mxu2 %v1868_v23  ;;  %1126 = vmatpush.msrb.mxu3 %v768_v26  ;;  %v2067_v23 = vld [vmem:[%s2409_s3 + $0x48] sm:$0xff]  ;;  %v740_v37 = vsel %vm612_vm0, %v533_v27, %v676_v7  ;;  %v2127_v26 = vld [vmem:[%s2409_s3 + $0x98] sm:$0xff] }
 0x1a9   :  { %1127 = vmatpush.msrb.mxu3 %v766_v42  ;;  %v939_v60 = vpop.f32.mrf.mxu2  ;;  %v2148_v42 = vld [vmem:[%s2409_s3 + $0xc8] sm:$0xff] }
 0x1ab   :  { %1128 = vmatpush.msrb.mxu3 %v764_v12  ;;  %v2182_v12 = vld [vmem:[%s2409_s3 + $0x108] sm:$0xff] }
 0x1ad   :  { %1129 = vmatpush.msrb.mxu3 %v762_v38  ;;  %v2195_v38 = vpop.permute.xlu2 %825 }
 0x1ae   :  { %1003 = vmatmul.f32.gmra.mxu1 %v2062_v55  ;;  %1012 = vmatmul.f32.gmra.mxu3 %v2067_v23 }
 0x1af   :  { %1077 = vmatmul.f32.gmra.mxu2 %v1890_v30  ;;  %1130 = vmatpush.msrb.mxu3 %v760_v11  ;;  %v2088_v30 = vld [vmem:[%s2409_s3 + $0x58] sm:$0xff] }
 0x1b1   :  { %1131 = vmatpush.msrb.mxu3 %v758_v3 }
 0x1b3   :  { %1132 = vmatpush.msrb.mxu3 %v756_v56 }
 0x1b5   :  { %1133 = vmatpush.msrb.mxu3 %v754_v45  ;;  %v2218_v45 = vpop.permute.xlu1 %835 }
 0x1b6   :  { %1006 = vmatmul.f32.gmra.mxu1 %v2083_v2  ;;  %1015 = vmatmul.f32.gmra.mxu3 %v2088_v30 }
 0x1b7   :  { %1080 = vmatmul.f32.gmra.mxu2 %v1851_v9  ;;  %1134 = vmatpush.msrb.mxu3 %v752_v31  ;;  %v2422_v9 = vld [vmem:[#allocation4_spill] sm:$0xff] }
 0x1b8   :  { %v530_v35 = vadd.f32 %v2422_v9, %v2027_v63  ;;  %v2113_v63 = vld [vmem:[%s2409_s3 + $0x78] sm:$0xff] }
 0x1b9   :  { %1135 = vmatpush.msrb.mxu3 %v750_v33 }
 0x1ba   :  { %v674_v46 = vmul.f32 0.2, %v530_v35  ;;  %vm610_vm1 = vcmp.gt.f32.partialorder %v530_v35, 0.0 }
 0x1bb   :  { %1136 = vmatpush.msrb.mxu3 %v748_v17 }
 0x1bc   :  { %v738_v8 = vsel %vm610_vm1, %v530_v35, %v674_v46 }
 0x1bd   :  { %1137 = vmatpush.msrb.mxu3 %v746_v19 }
 0x1be   :  { %1018 = vmatmul.f32.gmra.mxu3 %v2104_v62 }
 0x1bf   :  { %1083 = vmatmul.f32.gmra.mxu2 %v1873_v39  ;;  %1138 = vmatpush.msrb.mxu3 %v744_v1  ;;  %v2120_v39 = vld [vmem:[%s2409_s3 + $0x88] sm:$0xff] }
 0x1c1   :  { %1139 = vmatpush.msrb.mxu3 %v742_v36 }
 0x1c3   :  { %1140 = vmatpush.msrb.mxu3 %v740_v37 }
 0x1c5   :  { %1141 = vmatpush.msrb.mxu3 %v738_v8 }
 0x1c6   :  { %1021 = vmatmul.f32.gmra.mxu3 %v2113_v63 }
 0x1c7   :  { %1086 = vmatmul.f32.gmra.mxu2 %v1895_v18  ;;  %v2134_v18 = vld [vmem:[%s2409_s3 + $0xa8] sm:$0xff] }
 0x1ce   :  { %1024 = vmatmul.f32.gmra.mxu3 %v2120_v39 }
 0x1cf   :  { %1089 = vmatmul.f32.gmra.mxu2 %v1914_v48  ;;  %v942_v48 = vpop.f32.mrf.mxu2 }
 0x1d6   :  { %1027 = vmatmul.f32.gmra.mxu3 %v2127_v26 }
 0x1d7   :  { %1092 = vmatmul.f32.gmra.mxu2 %v1926_v53  ;;  %v945_v53 = vpop.f32.mrf.mxu2 }
 0x1de   :  { %1030 = vmatmul.f32.gmra.mxu3 %v2134_v18 }
 0x1df   :  { %1095 = vmatmul.f32.gmra.mxu2 %v1934_v49  ;;  %v2155_v49 = vld [vmem:[%s2409_s3 + $0xd8] sm:$0xff]  ;;  %v2157_v22 = vpop.f32.mrf.mxu2 }
 0x1e6   :  { %1033 = vmatmul.f32.gmra.mxu3 %v2141_v41 }
 0x1e7   :  { %1098 = vmatmul.f32.gmra.mxu2 %v1940_v44  ;;  %v2164_v44 = vld [vmem:[%s2409_s3 + $0xe8] sm:$0xff]  ;;  %v2167_v57 = vpop.f32.mrf.mxu2 }
 0x1ee   :  { %1036 = vmatmul.f32.gmra.mxu3 %v2148_v42 }
 0x1ef   :  { %1101 = vmatmul.f32.gmra.mxu2 %v1948_v25  ;;  %v2173_v25 = vld [vmem:[%s2409_s3 + $0xf8] sm:$0xff] }
 0x1f6   :  { %1039 = vmatmul.f32.gmra.mxu3 %v2155_v49 }
 0x1f7   :  { %1104 = vmatmul.f32.gmra.mxu2 %v1956_v4  ;;  %v2177_v4 = vpop.f32.mrf.mxu2 }
 0x1fe   :  { %1042 = vmatmul.f32.gmra.mxu3 %v2164_v44 }
 0x1ff   :  { %1107 = vmatmul.f32.gmra.mxu2 %v1964_v16  ;;  %v2186_v16 = vpop.f32.mrf.mxu2 }
 0x206   :  { %1045 = vmatmul.f32.gmra.mxu3 %v2173_v25 }
 0x207   :  { %1110 = vmatmul.f32.gmra.mxu2 %v1972_v21  ;;  %v930_v21 = vpop.f32.mrf.mxu0  ;;  %v2197_v34 = vpop.f32.mrf.mxu2 }
 0x208   :  { %v931_v59 = vadd.f32 %v930_v21, %v2195_v38 }
 0x20e   :  { %1048 = vmatmul.f32.gmra.mxu3 %v2182_v12 }
 0x20f   :  { %1113 = vmatmul.f32.gmra.mxu2 %v2423_v20  ;;  %v933_v3 = vpop.f32.mrf.mxu0  ;;  %v2210_v10 = vpop.f32.mrf.mxu2 }
 0x210   :  { %v934_v32 = vadd.f32 %v933_v3, %v2202_v13 }
 0x216   :  { %1051 = vmatmul.f32.gmra.mxu3 %v2191_v58 }
 0x217   :  { %1116 = vmatmul.f32.gmra.mxu2 %v1989_v0  ;;  %v2208_v0 = vpop.permute.xlu2 %840  ;;  %v966_v40 = vpop.f32.mrf.mxu2 }
 0x21e   :  { %1142 = vmatmul.f32.vlgmr.msrb.gmra.mxu3 %v2041_v29 }
 0x21f   :  { %1119 = vmatmul.f32.gmra.mxu2 %v2001_v61  ;;  %v940_v61 = vadd.f32 %v939_v60, %v2208_v0  ;;  %v2242_v17 = vpop.permute.xlu2 %855 }
 0x220   :  { %v949_v9 = vadd.f32 %v2157_v22, %v2242_v17 }
 0x223   :  { %v1001_v11 = vpop.f32.mrf.mxu1 }
 0x224   :  { %v1002_v28 = vadd.f32 %v1001_v11, %v931_v59 }
 0x226   :  { %1197 = vst [vmem:[%s2410_s5] sm:$0xff] %v1002_v28  ;;  %1145 = vmatmul.f32.gmra.mxu3 %v2062_v55  ;;  %v936_v55 = vpop.f32.mrf.mxu0 }
 0x227   :  { %1122 = vmatmul.f32.gmra.mxu2 %v2016_v52  ;;  %v2224_v52 = vpop.permute.xlu0 %845  ;;  %v937_v31 = vadd.f32 %v936_v55, %v2218_v45  ;;  %v2266_v60 = vpop.permute.xlu2 %870 }
 0x228   :  { %v943_v5 = vadd.f32 %v942_v48, %v2224_v52  ;;  %v958_v48 = vadd.f32 %v2186_v16, %v2266_v60 }
 0x229   :  { %v1010_v29 = vpop.f32.mrf.mxu3 }
 0x22a   :  { %v1011_v56 = vadd.f32 %v1010_v29, %v940_v61 }
 0x22b   :  { %v1004_v47 = vpop.f32.mrf.mxu1 }
 0x22c   :  { %1203 = vst [vmem:[%s2410_s5 + $0x30] sm:$0xff] %v1011_v56  ;;  %v1005_v51 = vadd.f32 %v1004_v47, %v934_v32 }
 0x22e   :  { %1199 = vst [vmem:[%s2410_s5 + $0x10] sm:$0xff] %v1005_v51  ;;  %1148 = vmatmul.f32.gmra.mxu3 %v2083_v2  ;;  %v2235_v2 = vpop.permute.xlu1 %850 }
 0x22f   :  { %v946_v14 = vadd.f32 %v945_v53, %v2235_v2  ;;  %v2250_v19 = vpop.permute.xlu0 %860 }
 0x230   :  { %v952_v43 = vadd.f32 %v2167_v57, %v2250_v19 }
 0x231   :  { %v1013_v54 = vpop.f32.mrf.mxu3 }
 0x232   :  { %v1014_v50 = vadd.f32 %v1013_v54, %v943_v5 }
 0x233   :  { %v1007_v15 = vpop.f32.mrf.mxu1 }
 0x234   :  { %1205 = vst [vmem:[%s2410_s5 + $0x40] sm:$0xff] %v1014_v50  ;;  %v1008_v33 = vadd.f32 %v1007_v15, %v937_v31 }
 0x236   :  { %1201 = vst [vmem:[%s2410_s5 + $0x20] sm:$0xff] %v1008_v33  ;;  %1151 = vmatmul.f32.gmra.mxu3 %v2046_v24  ;;  %v2258_v36 = vpop.permute.xlu1 %865 }
 0x237   :  { %v955_v46 = vadd.f32 %v2177_v4, %v2258_v36  ;;  %v2274_v57 = vpop.permute.xlu0 %875 }
 0x238   :  { %v961_v4 = vadd.f32 %v2197_v34, %v2274_v57  ;;  %v2290_v34 = vpop.permute.xlu2 %885 }
 0x239   :  { %v1016_v6 = vpop.f32.mrf.mxu3  ;;  %v967_v28 = vadd.f32 %v966_v40, %v2290_v34 }
 0x23a   :  { %v1017_v27 = vadd.f32 %v1016_v6, %v946_v14 }
 0x23c   :  { %1207 = vst [vmem:[%s2410_s5 + $0x50] sm:$0xff] %v1017_v27 }
 0x23e   :  { %1154 = vmatmul.f32.gmra.mxu3 %v2067_v23  ;;  %v969_v23 = vpop.f32.mrf.mxu2  ;;  %v2282_v16 = vpop.permute.xlu1 %880 }
 0x23f   :  { %v964_v59 = vadd.f32 %v2210_v10, %v2282_v16  ;;  %v2297_v10 = vpop.permute.xlu0 %890 }
 0x240   :  { %v970_v29 = vadd.f32 %v969_v23, %v2297_v10  ;;  %v2311_v54 = vpop.permute.xlu2 %900 }
 0x241   :  { %v1019_v35 = vpop.f32.mrf.mxu3 }
 0x242   :  { %v1020_v24 = vadd.f32 %v1019_v35, %v949_v9 }
 0x244   :  { %1209 = vst [vmem:[%s2410_s5 + $0x60] sm:$0xff] %v1020_v24 }
 0x246   :  { %1157 = vmatmul.f32.gmra.mxu3 %v2088_v30  ;;  %v972_v8 = vpop.f32.mrf.mxu2  ;;  %v2304_v47 = vpop.permute.xlu1 %895 }
 0x247   :  { %v973_v51 = vadd.f32 %v972_v8, %v2304_v47 }
 0x249   :  { %v1022_v1 = vpop.f32.mrf.mxu3 }
 0x24a   :  { %v1023_v7 = vadd.f32 %v1022_v1, %v952_v43 }
 0x24c   :  { %1211 = vst [vmem:[%s2410_s5 + $0x70] sm:$0xff] %v1023_v7 }
 0x24e   :  { %1160 = vmatmul.f32.gmra.mxu3 %v2104_v62  ;;  %v975_v22 = vpop.f32.mrf.mxu2 }
 0x24f   :  { %v976_v31 = vadd.f32 %v975_v22, %v2311_v54 }
 0x251   :  { %v1025_v30 = vpop.f32.mrf.mxu3 }
 0x252   :  { %v1026_v37 = vadd.f32 %v1025_v30, %v955_v46 }
 0x254   :  { %1213 = vst [vmem:[%s2410_s5 + $0x80] sm:$0xff] %v1026_v37 }
 0x256   :  { %1163 = vmatmul.f32.gmra.mxu3 %v2113_v63  ;;  %v978_v21 = vpop.f32.mrf.mxu2 }
 0x259   :  { %v1028_v62 = vpop.f32.mrf.mxu3 }
 0x25a   :  { %v1029_v53 = vadd.f32 %v1028_v62, %v958_v48 }
 0x25c   :  { %1215 = vst [vmem:[%s2410_s5 + $0x90] sm:$0xff] %v1029_v53 }
 0x25e   :  { %1166 = vmatmul.f32.gmra.mxu3 %v2120_v39  ;;  %v981_v3 = vpop.f32.mrf.mxu2 }
 0x261   :  { %v1031_v63 = vpop.f32.mrf.mxu3 }
 0x262   :  { %v1032_v20 = vadd.f32 %v1031_v63, %v961_v4 }
 0x264   :  { %1217 = vst [vmem:[%s2410_s5 + $0xa0] sm:$0xff] %v1032_v20 }
 0x266   :  { %1169 = vmatmul.f32.gmra.mxu3 %v2127_v26 }
 0x269   :  { %v1034_v39 = vpop.f32.mrf.mxu3 }
 0x26a   :  { %v1035_v11 = vadd.f32 %v1034_v39, %v964_v59 }
 0x26c   :  { %1219 = vst [vmem:[%s2410_s5 + $0xb0] sm:$0xff] %v1035_v11 }
 0x26e   :  { %1172 = vmatmul.f32.gmra.mxu3 %v2134_v18  ;;  %v1072_v18 = vpop.f32.mrf.mxu2 }
 0x26f   :  { %v1073_v24 = vadd.f32 %v1072_v18, %v2195_v38 }
 0x271   :  { %v1037_v26 = vpop.f32.mrf.mxu3 }
 0x272   :  { %v1038_v61 = vadd.f32 %v1037_v26, %v967_v28 }
 0x274   :  { %1221 = vst [vmem:[%s2410_s5 + $0xc0] sm:$0xff] %v1038_v61 }
 0x276   :  { %1175 = vmatmul.f32.gmra.mxu3 %v2141_v41  ;;  %v1075_v41 = vpop.f32.mrf.mxu2 }
 0x279   :  { %v1040_v32 = vpop.f32.mrf.mxu3 }
 0x27a   :  { %v1041_v56 = vadd.f32 %v1040_v32, %v970_v29 }
 0x27c   :  { %1223 = vst [vmem:[%s2410_s5 + $0xd0] sm:$0xff] %v1041_v56 }
 0x27e   :  { %1178 = vmatmul.f32.gmra.mxu3 %v2148_v42  ;;  %v2318_v42 = vpop.permute.xlu0 %905  ;;  %v1078_v33 = vpop.f32.mrf.mxu2 }
 0x27f   :  { %v979_v14 = vadd.f32 %v978_v21, %v2318_v42  ;;  %v1079_v38 = vadd.f32 %v1078_v33, %v2218_v45 }
 0x281   :  { %v1043_v55 = vpop.f32.mrf.mxu3 }
 0x282   :  { %v1044_v5 = vadd.f32 %v1043_v55, %v973_v51 }
 0x284   :  { %1225 = vst [vmem:[%s2410_s5 + $0xe0] sm:$0xff] %v1044_v5 }
 0x286   :  { %1181 = vmatmul.f32.gmra.mxu3 %v2155_v49  ;;  %v2325_v49 = vpop.permute.xlu1 %910  ;;  %v1081_v9 = vpop.f32.mrf.mxu2 }
 0x287   :  { %v982_v40 = vadd.f32 %v981_v3, %v2325_v49 }
 0x289   :  { %v1046_v50 = vpop.f32.mrf.mxu3 }
 0x28a   :  { %v1047_v15 = vadd.f32 %v1046_v50, %v976_v31 }
 0x28c   :  { %1227 = vst [vmem:[%s2410_s5 + $0xf0] sm:$0xff] %v1047_v15 }
 0x28e   :  { %1184 = vmatmul.f32.gmra.mxu3 %v2164_v44  ;;  %v1084_v1 = vpop.f32.mrf.mxu2 }
 0x28f   :  { %v1085_v62 = vadd.f32 %v1084_v1, %v2224_v52 }
 0x291   :  { %v1049_v6 = vpop.f32.mrf.mxu3 }
 0x292   :  { %v1050_v27 = vadd.f32 %v1049_v6, %v979_v14 }
 0x294   :  { %1229 = vst [vmem:[%s2410_s5 + $0x100] sm:$0xff] %v1050_v27 }
 0x296   :  { %1187 = vmatmul.f32.gmra.mxu3 %v2173_v25  ;;  %v1076_v25 = vadd.f32 %v1075_v41, %v2202_v13 }
 0x299   :  { %v1052_v35 = vpop.f32.mrf.mxu3 }
 0x29a   :  { %v1053_v44 = vadd.f32 %v1052_v35, %v982_v40 }
 0x29c   :  { %1231 = vst [vmem:[%s2410_s5 + $0x110] sm:$0xff] %v1053_v44 }
 0x29e   :  { %1190 = vmatmul.f32.gmra.mxu3 %v2182_v12  ;;  %v1087_v12 = vpop.f32.mrf.mxu2 }
 0x29f   :  { %v1088_v4 = vadd.f32 %v1087_v12, %v2235_v2 }
 0x2a1   :  { %v1143_v43 = vpop.f32.mrf.mxu3 }
 0x2a2   :  { %v1144_v23 = vadd.f32 %v1143_v43, %v1073_v24 }
 0x2a4   :  { %1198 = vst [vmem:[%s2410_s5 + $0x8] sm:$0xff] %v1144_v23 }
 0x2a6   :  { %1193 = vmatmul.f32.gmra.mxu3 %v2191_v58  ;;  %v1090_v8 = vpop.f32.mrf.mxu2  ;;  %v1082_v58 = vadd.f32 %v1081_v9, %v2208_v0 }
 0x2a7   :  { %v1091_v21 = vadd.f32 %v1090_v8, %v2242_v17 }
 0x2a9   :  { %v1146_v7 = vpop.f32.mrf.mxu3 }
 0x2aa   :  { %v1147_v46 = vadd.f32 %v1146_v7, %v1076_v25 }
 0x2ac   :  { %1200 = vst [vmem:[%s2410_s5 + $0x18] sm:$0xff] %v1147_v46 }
 0x2ae   :  { %v1093_v53 = vpop.f32.mrf.mxu2 }
 0x2af   :  { %v1094_v11 = vadd.f32 %v1093_v53, %v2250_v19 }
 0x2b1   :  { %v1149_v30 = vpop.f32.mrf.mxu3 }
 0x2b2   :  { %v1150_v37 = vadd.f32 %v1149_v30, %v1079_v38 }
 0x2b4   :  { %1202 = vst [vmem:[%s2410_s5 + $0x28] sm:$0xff] %v1150_v37 }
 0x2b6   :  { %v1096_v0 = vpop.f32.mrf.mxu2 }
 0x2b7   :  { %v1097_v26 = vadd.f32 %v1096_v0, %v2258_v36 }
 0x2b9   :  { %v1152_v48 = vpop.f32.mrf.mxu3 }
 0x2ba   :  { %v1153_v13 = vadd.f32 %v1152_v48, %v1082_v58 }
 0x2bc   :  { %1204 = vst [vmem:[%s2410_s5 + $0x38] sm:$0xff] %v1153_v13 }
 0x2be   :  { %v1099_v39 = vpop.f32.mrf.mxu2 }
 0x2bf   :  { %v1100_v29 = vadd.f32 %v1099_v39, %v2266_v60 }
 0x2c1   :  { %v1155_v22 = vpop.f32.mrf.mxu3 }
 0x2c2   :  { %v1156_v45 = vadd.f32 %v1155_v22, %v1085_v62 }
 0x2c4   :  { %1206 = vst [vmem:[%s2410_s5 + $0x48] sm:$0xff] %v1156_v45 }
 0x2c6   :  { %v1102_v3 = vpop.f32.mrf.mxu2 }
 0x2c7   :  { %v1103_v18 = vadd.f32 %v1102_v3, %v2274_v57 }
 0x2c9   :  { %v1158_v63 = vpop.f32.mrf.mxu3 }
 0x2ca   :  { %v1159_v20 = vadd.f32 %v1158_v63, %v1088_v4 }
 0x2cc   :  { %1208 = vst [vmem:[%s2410_s5 + $0x58] sm:$0xff] %v1159_v20 }
 0x2ce   :  { %v1105_v32 = vpop.f32.mrf.mxu2 }
 0x2cf   :  { %v1106_v5 = vadd.f32 %v1105_v32, %v2282_v16 }
 0x2d1   :  { %v1161_v59 = vpop.f32.mrf.mxu3 }
 0x2d2   :  { %v1162_v52 = vadd.f32 %v1161_v59, %v1091_v21 }
 0x2d4   :  { %1210 = vst [vmem:[%s2410_s5 + $0x68] sm:$0xff] %v1162_v52 }
 0x2d6   :  { %v1108_v36 = vpop.f32.mrf.mxu2 }
 0x2d7   :  { %v1109_v50 = vadd.f32 %v1108_v36, %v2290_v34 }
 0x2d9   :  { %v1164_v28 = vpop.f32.mrf.mxu3 }
 0x2da   :  { %v1165_v2 = vadd.f32 %v1164_v28, %v1094_v11 }
 0x2dc   :  { %1212 = vst [vmem:[%s2410_s5 + $0x78] sm:$0xff] %v1165_v2 }
 0x2de   :  { %v1111_v31 = vpop.f32.mrf.mxu2 }
 0x2df   :  { %v1112_v14 = vadd.f32 %v1111_v31, %v2297_v10 }
 0x2e1   :  { %v1167_v61 = vpop.f32.mrf.mxu3 }
 0x2e2   :  { %v1168_v17 = vadd.f32 %v1167_v61, %v1097_v26 }
 0x2e4   :  { %1214 = vst [vmem:[%s2410_s5 + $0x88] sm:$0xff] %v1168_v17 }
 0x2e6   :  { %v1114_v33 = vpop.f32.mrf.mxu2 }
 0x2e7   :  { %v1115_v27 = vadd.f32 %v1114_v33, %v2304_v47 }
 0x2e9   :  { %v1170_v56 = vpop.f32.mrf.mxu3 }
 0x2ea   :  { %v1171_v19 = vadd.f32 %v1170_v56, %v1100_v29 }
 0x2ec   :  { %1216 = vst [vmem:[%s2410_s5 + $0x98] sm:$0xff] %v1171_v19 }
 0x2ee   :  { %v1117_v40 = vpop.f32.mrf.mxu2 }
 0x2ef   :  { %v1118_v35 = vadd.f32 %v1117_v40, %v2311_v54 }
 0x2f1   :  { %v1173_v51 = vpop.f32.mrf.mxu3 }
 0x2f2   :  { %v1174_v55 = vadd.f32 %v1173_v51, %v1103_v18 }
 0x2f4   :  { %1218 = vst [vmem:[%s2410_s5 + $0xa8] sm:$0xff] %v1174_v55 }
 0x2f6   :  { %v1120_v10 = vpop.f32.mrf.mxu2 }
 0x2f7   :  { %v1121_v43 = vadd.f32 %v1120_v10, %v2318_v42 }
 0x2f9   :  { %v1176_v41 = vpop.f32.mrf.mxu3 }
 0x2fa   :  { %v1177_v60 = vadd.f32 %v1176_v41, %v1106_v5 }
 0x2fc   :  { %1220 = vst [vmem:[%s2410_s5 + $0xb8] sm:$0xff] %v1177_v60 }
 0x2fe   :  { %v1123_v1 = vpop.f32.mrf.mxu2 }
 0x2ff   :  { %v1124_v25 = vadd.f32 %v1123_v1, %v2325_v49 }
 0x301   :  { %v1179_v15 = vpop.f32.mrf.mxu3 }
 0x302   :  { %v1180_v57 = vadd.f32 %v1179_v15, %v1109_v50 }
 0x304   :  { %1222 = vst [vmem:[%s2410_s5 + $0xc8] sm:$0xff] %v1180_v57 }
 0x309   :  { %v1182_v6 = vpop.f32.mrf.mxu3 }
 0x30a   :  { %v1183_v16 = vadd.f32 %v1182_v6, %v1112_v14 }
 0x30c   :  { %1224 = vst [vmem:[%s2410_s5 + $0xd8] sm:$0xff] %v1183_v16 }
 0x311   :  { %v1185_v9 = vpop.f32.mrf.mxu3 }
 0x312   :  { %v1186_v34 = vadd.f32 %v1185_v9, %v1115_v27 }
 0x314   :  { %1226 = vst [vmem:[%s2410_s5 + $0xe8] sm:$0xff] %v1186_v34 }
 0x319   :  { %v1188_v44 = vpop.f32.mrf.mxu3 }
 0x31a   :  { %v1189_v24 = vadd.f32 %v1188_v44, %v1118_v35 }
 0x31c   :  { %1228 = vst [vmem:[%s2410_s5 + $0xf8] sm:$0xff] %v1189_v24 }
 0x321   :  { %v1191_v23 = vpop.f32.mrf.mxu3 }
 0x322   :  { %v1192_v47 = vadd.f32 %v1191_v23, %v1121_v43 }
 0x324   :  { %1230 = vst [vmem:[%s2410_s5 + $0x108] sm:$0xff] %v1192_v47 }
 0x329   :  { %v1194_v7 = vpop.f32.mrf.mxu3 }
 0x32a   :  { %v1195_v54 = vadd.f32 %v1194_v7, %v1124_v25 }
 0x32c   :  { %1232 = vst [vmem:[%s2410_s5 + $0x118] sm:$0xff] %v1195_v54 }

// kernel: rcm_forward.18
= control target key start
LH: loop header
LB: loop body
LE: loop exit
PB: predicated region body
PF: predicated region fallthrough
CT: control target
= control target key end

     0   :  { %v14_v0 = vlaneseq  ;;  %s47_s0 = inlined_call_operand.vmem [shape: f32[1,512], index: 0, kind: input, shape index: {}]   ;;  %s48_s1 = inlined_call_operand.vmem [shape: f32[1,512], index: 1, kind: input, shape index: {}]   ;;  %s49_s2 = inlined_call_operand.vmem [shape: f32[1,512], index: 2, kind: output, shape index: {}]  }
   0x1   :  { %v11_v1 = vld [vmem:[%s47_s0] sm:$0xf] }
   0x2   :  { %v12_v2 = vld [vmem:[%s48_s1] sm:$0xf]  ;;  %vm16_vm0 = vcmp.lt.s32.totalorder %v14_v0, 512 }
   0x3   :  { %v13_v3 = vsub.f32 %v11_v1, %v12_v2 }
   0x5   :  { %18 = vst.msk [vmem:[%s49_s2] sm:$0xf] %vm16_vm0, %v13_v3 }

// kernel: rcm_forward.19
= control target key start
LH: loop header
LB: loop body
LE: loop exit
PB: predicated region body
PF: predicated region fallthrough
CT: control target
= control target key end

     0   :  { %s1332_s18 = smov 0   ;;  %s1334_s19 = smov 0   ;;  %s1948_s0 = inlined_call_operand.vmem [shape: f32[4,3,64], index: 0, kind: input, shape index: {}]   ;;  %s1949_s1 = inlined_call_operand.vmem [shape: f32[256,3], index: 1, kind: input, shape index: {}]   ;;  %s1950_s2 = inlined_call_operand.vmem [shape: f32[256,1], index: 2, kind: input, shape index: {}]   ;;  %s1951_s3 = inlined_call_operand.vmem [shape: f32[144,256], index: 3, kind: input, shape index: {}]   ;;  %s1952_s4 = inlined_call_operand.vmem [shape: f32[144,1], index: 4, kind: input, shape index: {}]   ;;  %s1953_s5 = inlined_call_operand.vmem [shape: f32[4,144,64], index: 5, kind: output, shape index: {}]  }
   0x1   :  { %s1336_s20 = smov 0  }
   0x2 LB: > { %s27_s21 = sadd.s32 1, %s1295_s19  ;;  %p1177_p0 = scmp.ge.s32.totalorder %s1299_s20, 1  ;;  %s1299_s20 = sphi %s1336_s20, %s15_s20   ;;  %s1295_s19 = sphi %s1334_s19, %s1955_s19   ;;  %s1291_s18 = sphi %s1332_s18, %s1954_s18  }
   0x3   : > { %p29_p1 = scmp.ge.s32.totalorder %s27_s21, 4  ;;  %p205_p2 = scmp.lt.s32.totalorder %s1299_s20, 5 }
   0x5   : > { %s1957_s21 = smov (%p29_p1, %s27_s21), 0  ;;  %p206_p3 = pnand %p1177_p0, %p205_p2 }
   0x6   : > { %p238_p4 = scmp.lt.s32.totalorder (!%p206_p3), %s1291_s18, 3 }
   0x7   : > { %209 = sbr.rel (%p206_p3) target bundleno = 552 (0x228), region = 40 }
   0xc   : > { %v317_v0 = vld [vmem:[%s1950_s2 + $0xf8] sm:$0xff]  ;;  %v300_v2 = vld [vmem:[%s1950_s2 + $0x70] sm:$0xff]  ;;  %v1301_v3 = vmov 0   ;;  %s1959_s18 = smov (!%p238_p4, %s1291_s18), 3  ;;  %vm575_vm0 = vcmask 1042432   ;;  %v253_v4 = vld [vmem:[%s1949_s1] sm:$0xff] }
   0xd   : > { %v301_v1 = vld [vmem:[%s1950_s2 + $0x78] sm:$0xff]  ;;  %1276 = vset.pattern.permute.xlu2 %v1301_v3  ;;  %1275 = vset.pattern.permute.xlu1 %v1301_v3  ;;  %s1178_s28 = sshll.u32 %s1959_s18, 2  ;;  %vm478_vm1 = vcmask 23552   ;;  %v315_v7 = vld [vmem:[%s1950_s2 + $0xe8] sm:$0xff]  ;;  %v316_v8 = vld [vmem:[%s1950_s2 + $0xf0] sm:$0xff] }
   0xe   : > { %1274 = vset.pattern.permute.xlu0 %v1301_v3  ;;  %395 = vperm.xlu1 %1275, %v301_v1   ;;  %s244_s6 = scalar_lea.vmem %s1948_s0, %s1178_s28  ;;  %v272_v5 = vld [vmem:[%s1949_s1 + $0x98] sm:$0xff]  ;;  %v314_v9 = vld [vmem:[%s1950_s2 + $0xe0] sm:$0xff]  ;;  %v254_v10 = vld [vmem:[%s1949_s1 + $0x8] sm:$0xff] }
   0xf   : > { %475 = vperm.xlu0 %1274, %v317_v0   ;;  %390 = vperm.xlu2 %1276, %v300_v2   ;;  %v285_v6 = vld [vmem:[%s244_s6] sm:$0x7]  ;;  %v313_v12 = vld [vmem:[%s1950_s2 + $0xd8] sm:$0xff]  ;;  %v299_v13 = vld [vmem:[%s1950_s2 + $0x68] sm:$0xff]  ;;  %s1248_s6 = smul.u32 144, %s1959_s18 }
  0x10   : > { %1180 = vmatpush.msk.msra.mxu0 %vm575_vm0, %v285_v6  ;;  %1215 = vmatpush.msk.msra.mxu3 %vm575_vm0, %v285_v6  ;;  %v273_v11 = vld [vmem:[%s1949_s1 + $0xa0] sm:$0xff]  ;;  %v255_v15 = vld [vmem:[%s1949_s1 + $0x10] sm:$0xff]  ;;  %v274_v16 = vld [vmem:[%s1949_s1 + $0xa8] sm:$0xff] }
  0x11   : > { %1181 = vmatmul.msk.f32.vlgmr.msra.gmra.mxu0 %vm478_vm1, %v253_v4  ;;  %1200 = vmatmul.msk.f32.vlgmr.msra.gmra.mxu3 %vm478_vm1, %v272_v5  ;;  %v298_v14 = vld [vmem:[%s1950_s2 + $0x60] sm:$0xff]  ;;  %v297_v17 = vld [vmem:[%s1950_s2 + $0x58] sm:$0xff]  ;;  %v312_v18 = vld [vmem:[%s1950_s2 + $0xd0] sm:$0xff]  ;;  %s1895_s9 = scalar_lea.vmem %s1953_s5, %s1248_s6 }
  0x12   : > { %v311_v19 = vld [vmem:[%s1950_s2 + $0xc8] sm:$0xff]  ;;  %v256_v20 = vld [vmem:[%s1949_s1 + $0x18] sm:$0xff]  ;;  %v275_v21 = vld [vmem:[%s1949_s1 + $0xb0] sm:$0xff] }
  0x13   : > { %v310_v22 = vld [vmem:[%s1950_s2 + $0xc0] sm:$0xff]  ;;  %v296_v23 = vld [vmem:[%s1950_s2 + $0x50] sm:$0xff]  ;;  %v295_v24 = vld [vmem:[%s1950_s2 + $0x48] sm:$0xff] }
  0x14   : > { %v257_v25 = vld [vmem:[%s1949_s1 + $0x20] sm:$0xff]  ;;  %v276_v26 = vld [vmem:[%s1949_s1 + $0xb8] sm:$0xff]  ;;  %v308_v29 = vld [vmem:[%s1950_s2 + $0xb0] sm:$0xff] }
  0x15   : > { %v294_v27 = vld [vmem:[%s1950_s2 + $0x40] sm:$0xff]  ;;  %v309_v28 = vld [vmem:[%s1950_s2 + $0xb8] sm:$0xff]  ;;  %v258_v30 = vld [vmem:[%s1949_s1 + $0x28] sm:$0xff] }
  0x16   : > { %465 = vperm.xlu1 %1275, %v315_v7   ;;  %v277_v31 = vld [vmem:[%s1949_s1 + $0xc0] sm:$0xff]  ;;  %v307_v32 = vld [vmem:[%s1950_s2 + $0xa8] sm:$0xff]  ;;  %v293_v33 = vld [vmem:[%s1950_s2 + $0x38] sm:$0xff] }
  0x17   : > { %470 = vperm.xlu0 %1274, %v316_v8   ;;  %460 = vperm.xlu2 %1276, %v314_v9   ;;  %v292_v34 = vld [vmem:[%s1950_s2 + $0x30] sm:$0xff]  ;;  %v278_v36 = vld [vmem:[%s1949_s1 + $0xc8] sm:$0xff]  ;;  %v306_v38 = vld [vmem:[%s1950_s2 + $0xa0] sm:$0xff] }
  0x18   : > { %v259_v35 = vld [vmem:[%s1949_s1 + $0x30] sm:$0xff]  ;;  %v291_v37 = vld [vmem:[%s1950_s2 + $0x28] sm:$0xff]  ;;  %v305_v39 = vld [vmem:[%s1950_s2 + $0x98] sm:$0xff] }
  0x19   : > { %1182 = vmatmul.msk.f32.gmra.mxu0 %vm478_vm1, %v254_v10  ;;  %1201 = vmatmul.msk.f32.gmra.mxu3 %vm478_vm1, %v273_v11  ;;  %v260_v40 = vld [vmem:[%s1949_s1 + $0x38] sm:$0xff]  ;;  %v279_v41 = vld [vmem:[%s1949_s1 + $0xd0] sm:$0xff]  ;;  %v290_v43 = vld [vmem:[%s1950_s2 + $0x20] sm:$0xff] }
  0x1a   : > { %v304_v42 = vld [vmem:[%s1950_s2 + $0x90] sm:$0xff]  ;;  %v289_v44 = vld [vmem:[%s1950_s2 + $0x18] sm:$0xff]  ;;  %v261_v45 = vld [vmem:[%s1949_s1 + $0x40] sm:$0xff] }
  0x1b   : > { %v280_v46 = vld [vmem:[%s1949_s1 + $0xd8] sm:$0xff]  ;;  %v288_v47 = vld [vmem:[%s1950_s2 + $0x10] sm:$0xff]  ;;  %v303_v48 = vld [vmem:[%s1950_s2 + $0x88] sm:$0xff] }
  0x1c   : > { %v302_v49 = vld [vmem:[%s1950_s2 + $0x80] sm:$0xff]  ;;  %v262_v50 = vld [vmem:[%s1949_s1 + $0x48] sm:$0xff]  ;;  %v263_v55 = vld [vmem:[%s1949_s1 + $0x50] sm:$0xff] }
  0x1d   : > { %v281_v51 = vld [vmem:[%s1949_s1 + $0xe0] sm:$0xff]  ;;  %v287_v54 = vld [vmem:[%s1950_s2 + $0x8] sm:$0xff]  ;;  %v826_v57 = vld [vmem:[%s1952_s4 + $0x10] sm:$0xff] }
  0x1e   : > { %455 = vperm.xlu1 %1275, %v313_v12   ;;  %v286_v52 = vld [vmem:[%s1950_s2] sm:$0xff]  ;;  %v282_v56 = vld [vmem:[%s1949_s1 + $0xe8] sm:$0xff]  ;;  %v827_v58 = vld [vmem:[%s1952_s4 + $0x18] sm:$0xff] }
  0x1f   : > { %385 = vperm.xlu0 %1274, %v299_v13   ;;  %380 = vperm.xlu2 %1276, %v298_v14   ;;  %v824_v53 = vld [vmem:[%s1952_s4] sm:$0xff]  ;;  %v825_v59 = vld [vmem:[%s1952_s4 + $0x8] sm:$0xff]  ;;  %v264_v60 = vld [vmem:[%s1949_s1 + $0x58] sm:$0xff] }
  0x20   : > { %v283_v61 = vld [vmem:[%s1949_s1 + $0xf0] sm:$0xff]  ;;  %v829_v62 = vld [vmem:[%s1952_s4 + $0x28] sm:$0xff]  ;;  %v828_v0 = vld [vmem:[%s1952_s4 + $0x20] sm:$0xff] }
  0x21   : > { %1183 = vmatmul.msk.f32.gmra.mxu0 %vm478_vm1, %v255_v15  ;;  %1202 = vmatmul.msk.f32.gmra.mxu3 %vm478_vm1, %v274_v16  ;;  %v830_v63 = vld [vmem:[%s1952_s4 + $0x30] sm:$0xff]  ;;  %v265_v1 = vld [vmem:[%s1949_s1 + $0x60] sm:$0xff]  ;;  %v284_v2 = vld [vmem:[%s1949_s1 + $0xf8] sm:$0xff] }
  0x22   : > { %v832_v3 = vld [vmem:[%s1952_s4 + $0x40] sm:$0xff]  ;;  %v833_v4 = vld [vmem:[%s1952_s4 + $0x48] sm:$0xff]  ;;  %v831_v5 = vld [vmem:[%s1952_s4 + $0x38] sm:$0xff] }
  0x23   : > { %v266_v6 = vld [vmem:[%s1949_s1 + $0x68] sm:$0xff]  ;;  %v835_v7 = vld [vmem:[%s1952_s4 + $0x58] sm:$0xff]  ;;  %v836_v8 = vld [vmem:[%s1952_s4 + $0x60] sm:$0xff] }
  0x24   : > { %v834_v9 = vld [vmem:[%s1952_s4 + $0x50] sm:$0xff]  ;;  %v839_v12 = vld [vmem:[%s1952_s4 + $0x78] sm:$0xff]  ;;  %v837_v13 = vld [vmem:[%s1952_s4 + $0x68] sm:$0xff] }
  0x25   : > { %v267_v10 = vld [vmem:[%s1949_s1 + $0x70] sm:$0xff]  ;;  %v268_v14 = vld [vmem:[%s1949_s1 + $0x78] sm:$0xff]  ;;  %v841_v15 = vld [vmem:[%s1952_s4 + $0x88] sm:$0xff] }
  0x26   : > { %375 = vperm.xlu1 %1275, %v297_v17   ;;  %v838_v11 = vld [vmem:[%s1952_s4 + $0x70] sm:$0xff]  ;;  %v840_v16 = vld [vmem:[%s1952_s4 + $0x80] sm:$0xff] }
  0x27   : > { %450 = vperm.xlu0 %1274, %v312_v18   ;;  %445 = vperm.xlu2 %1276, %v311_v19   ;;  %v269_v17 = vld [vmem:[%s1949_s1 + $0x80] sm:$0xff] }
  0x29   : > { %1184 = vmatmul.msk.f32.gmra.mxu0 %vm478_vm1, %v256_v20  ;;  %1203 = vmatmul.msk.f32.gmra.mxu3 %vm478_vm1, %v275_v21  ;;  %v270_v20 = vld [vmem:[%s1949_s1 + $0x88] sm:$0xff] }
  0x2e   : > { %440 = vperm.xlu1 %1275, %v310_v22  }
  0x2f   : > { %370 = vperm.xlu0 %1274, %v296_v23   ;;  %365 = vperm.xlu2 %1276, %v295_v24   ;;  %v271_v23 = vld [vmem:[%s1949_s1 + $0x90] sm:$0xff] }
  0x31   : > { %1185 = vmatmul.msk.f32.gmra.mxu0 %vm478_vm1, %v257_v25  ;;  %1204 = vmatmul.msk.f32.gmra.mxu3 %vm478_vm1, %v276_v26 }
  0x36   : > { %360 = vperm.xlu1 %1275, %v294_v27  }
  0x37   : > { %435 = vperm.xlu0 %1274, %v309_v28   ;;  %430 = vperm.xlu2 %1276, %v308_v29  }
  0x39   : > { %1186 = vmatmul.msk.f32.gmra.mxu0 %vm478_vm1, %v258_v30  ;;  %1205 = vmatmul.msk.f32.gmra.mxu3 %vm478_vm1, %v277_v31 }
  0x3e   : > { %425 = vperm.xlu1 %1275, %v307_v32  }
  0x3f   : > { %355 = vperm.xlu0 %1274, %v293_v33   ;;  %350 = vperm.xlu2 %1276, %v292_v34  }
  0x41   : > { %1187 = vmatmul.msk.f32.gmra.mxu0 %vm478_vm1, %v259_v35  ;;  %1206 = vmatmul.msk.f32.gmra.mxu3 %vm478_vm1, %v278_v36 }
  0x46   : > { %345 = vperm.xlu1 %1275, %v291_v37  }
  0x47   : > { %420 = vperm.xlu0 %1274, %v306_v38   ;;  %415 = vperm.xlu2 %1276, %v305_v39  }
  0x49   : > { %1188 = vmatmul.msk.f32.gmra.mxu0 %vm478_vm1, %v260_v40  ;;  %1207 = vmatmul.msk.f32.gmra.mxu3 %vm478_vm1, %v279_v41 }
  0x4e   : > { %410 = vperm.xlu1 %1275, %v304_v42  }
  0x4f   : > { %340 = vperm.xlu0 %1274, %v290_v43   ;;  %335 = vperm.xlu2 %1276, %v289_v44  }
  0x51   : > { %1189 = vmatmul.msk.f32.gmra.mxu0 %vm478_vm1, %v261_v45  ;;  %1208 = vmatmul.msk.f32.gmra.mxu3 %vm478_vm1, %v280_v46 }
  0x56   : > { %330 = vperm.xlu1 %1275, %v288_v47  }
  0x57   : > { %405 = vperm.xlu0 %1274, %v303_v48   ;;  %400 = vperm.xlu2 %1276, %v302_v49  }
  0x59   : > { %1190 = vmatmul.msk.f32.gmra.mxu0 %vm478_vm1, %v262_v50  ;;  %1209 = vmatmul.msk.f32.gmra.mxu3 %vm478_vm1, %v281_v51 }
  0x5e   : > { %320 = vperm.xlu1 %1275, %v286_v52  }
  0x5f   : > { %844 = vperm.xlu2 %1276, %v824_v53   ;;  %325 = vperm.xlu0 %1274, %v287_v54  }
  0x61   : > { %1191 = vmatmul.msk.f32.gmra.mxu0 %vm478_vm1, %v263_v55  ;;  %1210 = vmatmul.msk.f32.gmra.mxu3 %vm478_vm1, %v282_v56 }
  0x66   : > { %854 = vperm.xlu1 %1275, %v826_v57  }
  0x67   : > { %859 = vperm.xlu2 %1276, %v827_v58   ;;  %849 = vperm.xlu0 %1274, %v825_v59  }
  0x69   : > { %1192 = vmatmul.msk.f32.gmra.mxu0 %vm478_vm1, %v264_v60  ;;  %1211 = vmatmul.msk.f32.gmra.mxu3 %vm478_vm1, %v283_v61  ;;  %v1660_v35 = vpop.permute.xlu2 %390 }
  0x6e   : > { %869 = vperm.xlu1 %1275, %v829_v62  }
  0x6f   : > { %874 = vperm.xlu2 %1276, %v830_v63   ;;  %864 = vperm.xlu0 %1274, %v828_v0  }
  0x71   : > { %1193 = vmatmul.msk.f32.gmra.mxu0 %vm478_vm1, %v265_v1  ;;  %1212 = vmatmul.msk.f32.gmra.mxu3 %vm478_vm1, %v284_v2  ;;  %v461_v40 = vpop.permute.xlu2 %460 }
  0x76   : > { %884 = vperm.xlu1 %1275, %v832_v3  }
  0x77   : > { %889 = vperm.xlu2 %1276, %v833_v4   ;;  %879 = vperm.xlu0 %1274, %v831_v5  }
  0x79   : > { %1194 = vmatmul.msk.f32.gmra.mxu0 %vm478_vm1, %v266_v6  ;;  %v1668_v46 = vpop.permute.xlu2 %380 }
  0x7e   : > { %899 = vperm.xlu1 %1275, %v835_v7  }
  0x7f   : > { %904 = vperm.xlu2 %1276, %v836_v8   ;;  %894 = vperm.xlu0 %1274, %v834_v9  }
  0x80   : > { %v1656_v32 = vpop.permute.xlu1 %395 }
  0x81   : > { %1195 = vmatmul.msk.f32.gmra.mxu0 %vm478_vm1, %v267_v10  ;;  %v476_v31 = vpop.permute.xlu0 %475  ;;  %v446_v52 = vpop.permute.xlu2 %445 }
  0x86   : > { %914 = vperm.xlu1 %1275, %v838_v11  }
  0x87   : > { %919 = vperm.xlu2 %1276, %v839_v12   ;;  %909 = vperm.xlu0 %1274, %v837_v13  }
  0x88   : > { %v466_v38 = vpop.permute.xlu1 %465 }
  0x89   : > { %1196 = vmatmul.msk.f32.gmra.mxu0 %vm478_vm1, %v268_v14  ;;  %v471_v36 = vpop.permute.xlu0 %470  ;;  %v1680_v57 = vpop.permute.xlu2 %365 }
  0x8e   : > { %929 = vperm.xlu1 %1275, %v841_v15   ;;  %v1625_v18 = vpop.f32.mrf.mxu0 }
  0x8f   : > { %924 = vperm.xlu0 %1274, %v840_v16  }
  0x90   : > { %v456_v43 = vpop.permute.xlu1 %455 }
  0x91   : > { %1197 = vmatmul.msk.f32.gmra.mxu0 %vm478_vm1, %v269_v17  ;;  %v1664_v42 = vpop.permute.xlu0 %385  ;;  %v431_v63 = vpop.permute.xlu2 %430 }
  0x94   : > { %v1628_v19 = vpop.f32.mrf.mxu3 }
  0x96   : > { %v1633_v21 = vpop.f32.mrf.mxu0 }
  0x98   : > { %v1672_v49 = vpop.permute.xlu1 %375 }
  0x99   : > { %1198 = vmatmul.msk.f32.gmra.mxu0 %vm478_vm1, %v270_v20  ;;  %v451_v47 = vpop.permute.xlu0 %450  ;;  %v1696_v20 = vpop.permute.xlu2 %350 }
  0x9c   : > { %v1636_v22 = vpop.f32.mrf.mxu3 }
  0x9e   : > { %v1641_v24 = vpop.f32.mrf.mxu0 }
  0xa0   : > { %v441_v54 = vpop.permute.xlu1 %440 }
  0xa1   : > { %1199 = vmatmul.msk.f32.gmra.mxu0 %vm478_vm1, %v271_v23  ;;  %v1676_v53 = vpop.permute.xlu0 %370 }
  0xa4   : > { %v1644_v25 = vpop.f32.mrf.mxu3 }
  0xa6   : > { %v1646_v26 = vpop.f32.mrf.mxu0 }
  0xa8   : > { %v1682_v60 = vpop.permute.xlu1 %360 }
  0xa9   : > { %v436_v58 = vpop.permute.xlu0 %435 }
  0xac   : > { %v1648_v27 = vpop.f32.mrf.mxu3 }
  0xae   : > { %v1650_v28 = vpop.f32.mrf.mxu0 }
  0xb0   : > { %v426_v4 = vpop.permute.xlu1 %425 }
  0xb1   : > { %v1686_v1 = vpop.permute.xlu0 %355 }
  0xb4   : > { %v1652_v29 = vpop.f32.mrf.mxu3 }
  0xb6   : > { %v1654_v30 = vpop.f32.mrf.mxu0 }
  0xb9   : > { %v421_v23 = vpop.permute.xlu0 %420 }
  0xbc   : > { %v668_v33 = vpop.f32.mrf.mxu3 }
  0xbe   : > { %v1658_v34 = vpop.f32.mrf.mxu0 }
  0xc4   : > { %v671_v37 = vpop.f32.mrf.mxu3 }
  0xc5   : > { %v672_v15 = vadd.f32 %v671_v37, %v446_v52  ;;  %v1703_v37 = vpop.permute.xlu1 %345  ;;  %v660_v52 = vadd.f32 %v1644_v25, %v426_v4 }
  0xc6   : > { %v1662_v39 = vpop.f32.mrf.mxu0 }
  0xc7   : > { %vm717_vm8 = vcmp.gt.f32.partialorder %v672_v15, 0.0  ;;  %vm713_vm12 = vcmp.gt.f32.partialorder %v660_v52, 0.0 }
  0xcc   : > { %v674_v41 = vpop.f32.mrf.mxu3 }
  0xcd   : > { %v675_v12 = vadd.f32 %v674_v41, %v451_v47  ;;  %v666_v41 = vadd.f32 %v1652_v29, %v436_v58  ;;  %v663_v47 = vadd.f32 %v1648_v27, %v431_v63  ;;  %v657_v58 = vadd.f32 %v1636_v22, %v421_v23  ;;  %v416_v63 = vpop.permute.xlu2 %415 }
  0xce   : > { %v1666_v44 = vpop.f32.mrf.mxu0  ;;  %v654_v25 = vadd.f32 %v1628_v19, %v416_v63  ;;  %v745_v22 = vmul.f32 0.2, %v660_v52 }
  0xcf   : > { %vm718_vm7 = vcmp.gt.f32.partialorder %v675_v12, 0.0  ;;  %v747_v29 = vmul.f32 0.2, %v666_v41  ;;  %vm715_vm10 = vcmp.gt.f32.partialorder %v666_v41, 0.0  ;;  %vm714_vm11 = vcmp.gt.f32.partialorder %v663_v47, 0.0 }
  0xd0   : > { %v744_v19 = vmul.f32 0.2, %v657_v58  ;;  %vm712_vm15 = vcmp.gt.f32.partialorder %v657_v58, 0.0  ;;  %vm711_vm1 = vcmp.gt.f32.partialorder %v654_v25, 0.0 }
  0xd4   : > { %v677_v45 = vpop.f32.mrf.mxu3 }
  0xd5   : > { %v678_v9 = vadd.f32 %v677_v45, %v456_v43  ;;  %v749_v45 = vmul.f32 0.2, %v672_v15 }
  0xd6   : > { %v1670_v48 = vpop.f32.mrf.mxu0 }
  0xd7   : > { %v751_v17 = vmul.f32 0.2, %v678_v9  ;;  %vm719_vm6 = vcmp.gt.f32.partialorder %v678_v9, 0.0 }
  0xd9   : > { %v1705_v43 = vsel %vm719_vm6, %v678_v9, %v751_v17 }
  0xdc   : > { %v680_v50 = vpop.f32.mrf.mxu3 }
  0xdd   : > { %v681_v5 = vadd.f32 %v680_v50, %v461_v40  ;;  %v750_v40 = vmul.f32 0.2, %v675_v12 }
  0xde   : > { %v1674_v51 = vpop.f32.mrf.mxu0 }
  0xdf   : > { %v752_v14 = vmul.f32 0.2, %v681_v5  ;;  %vm720_vm5 = vcmp.gt.f32.partialorder %v681_v5, 0.0 }
  0xe4   : > { %v683_v55 = vpop.f32.mrf.mxu3 }
  0xe5   : > { %v684_v2 = vadd.f32 %v683_v55, %v466_v38  ;;  %v1699_v38 = vsel %vm720_vm5, %v681_v5, %v752_v14 }
  0xe6   : > { %v1678_v56 = vpop.f32.mrf.mxu0 }
  0xe7   : > { %v753_v11 = vmul.f32 0.2, %v684_v2  ;;  %vm721_vm4 = vcmp.gt.f32.partialorder %v684_v2, 0.0 }
  0xe9   : > { %v1694_v16 = vsel %vm721_vm4, %v684_v2, %v753_v11  ;;  %v627_v11 = vadd.f32 %v1674_v51, %v1676_v53  ;;  %v621_v53 = vadd.f32 %v1666_v44, %v1682_v60  ;;  %v615_v44 = vadd.f32 %v1658_v34, %v1696_v20 }
  0xeb   : > { %vm702_vm4 = vcmp.gt.f32.partialorder %v627_v11, 0.0  ;;  %vm700_vm6 = vcmp.gt.f32.partialorder %v621_v53, 0.0 }
  0xec   : > { %v686_v59 = vpop.f32.mrf.mxu3 }
  0xed   : > { %v687_v62 = vadd.f32 %v686_v59, %v471_v36 }
  0xee   : > { %v1684_v61 = vpop.f32.mrf.mxu0 }
  0xef   : > { %v754_v8 = vmul.f32 0.2, %v687_v62  ;;  %vm722_vm3 = vcmp.gt.f32.partialorder %v687_v62, 0.0  ;;  %v633_v4 = vadd.f32 %v1684_v61, %v1668_v46  ;;  %v1739_v46 = vsel %vm713_vm12, %v660_v52, %v745_v22 }
  0xf0   : > { %v743_v61 = vmul.f32 0.2, %v654_v25 }
  0xf1   : > { %v1691_v13 = vsel %vm722_vm3, %v687_v62, %v754_v8  ;;  %v746_v62 = vmul.f32 0.2, %v663_v47  ;;  %v736_v14 = vmul.f32 0.2, %v633_v4 }
  0xf2   : > { %v1751_v51 = vsel %vm711_vm1, %v654_v25, %v743_v61 }
  0xf4   : > { %v689_v0 = vpop.f32.mrf.mxu3 }
  0xf5   : > { %v690_v3 = vadd.f32 %v689_v0, %v476_v31  ;;  %v669_v31 = vadd.f32 %v668_v33, %v441_v54  ;;  %v1709_v33 = vsel %vm718_vm7, %v675_v12, %v750_v40  ;;  %v1713_v54 = vsel %vm717_vm8, %v672_v15, %v749_v45 }
  0xf6   : > { %v635_v6 = vpop.f32.mrf.mxu0  ;;  %v624_v15 = vadd.f32 %v1670_v48, %v1680_v57  ;;  %v618_v48 = vadd.f32 %v1662_v39, %v1686_v1  ;;  %vm698_vm8 = vcmp.gt.f32.partialorder %v615_v44, 0.0 }
  0xf7   : > { %vm723_vm2 = vcmp.gt.f32.partialorder %v690_v3, 0.0  ;;  %v755_v7 = vmul.f32 0.2, %v690_v3  ;;  %v748_v50 = vmul.f32 0.2, %v669_v31  ;;  %vm716_vm9 = vcmp.gt.f32.partialorder %v669_v31, 0.0 }
  0xf8   : > { %v636_v0 = vadd.f32 %v635_v6, %v1664_v42  ;;  %v1733_v6 = vsel %vm714_vm11, %v663_v47, %v746_v62  ;;  %vm701_vm5 = vcmp.gt.f32.partialorder %v624_v15, 0.0  ;;  %v336_v47 = vpop.permute.xlu2 %335  ;;  %v731_v1 = vmul.f32 0.2, %v618_v48 }
  0xf9   : > { %v1688_v10 = vsel %vm723_vm2, %v690_v3, %v755_v7  ;;  %v1718_v27 = vsel %vm716_vm9, %v669_v31, %v748_v50  ;;  %v1726_v3 = vsel %vm715_vm10, %v666_v41, %v747_v29  ;;  %v630_v7 = vadd.f32 %v1678_v56, %v1672_v49 }
  0xfa   : > { %1003 = vmatpush.msra.mxu2 %v1688_v10  ;;  %v737_v9 = vmul.f32 0.2, %v636_v0  ;;  %vm705_vm0 = vcmp.gt.f32.partialorder %v636_v0, 0.0  ;;  %v1746_v56 = vsel %vm712_vm15, %v657_v58, %v744_v19  ;;  %vm704_vm2 = vcmp.gt.f32.partialorder %v633_v4, 0.0 }
  0xfb   : > { %v735_v23 = vmul.f32 0.2, %v630_v7  ;;  %vm703_vm3 = vcmp.gt.f32.partialorder %v630_v7, 0.0  ;;  %v768_v31 = vsel %vm704_vm2, %v633_v4, %v736_v14  ;;  %v733_v41 = vmul.f32 0.2, %v624_v15 }
  0xfc   : > { %1004 = vmatpush.msra.mxu2 %v1691_v13  ;;  %v769_v17 = vsel %vm705_vm0, %v636_v0, %v737_v9  ;;  %v732_v50 = vmul.f32 0.2, %v621_v53  ;;  %v612_v29 = vadd.f32 %v1654_v30, %v1703_v37  ;;  %vm699_vm7 = vcmp.gt.f32.partialorder %v618_v48, 0.0 }
  0xfd   : > { %v767_v57 = vsel %vm703_vm3, %v630_v7, %v735_v23  ;;  %v765_v39 = vsel %vm701_vm5, %v624_v15, %v733_v41  ;;  %v606_v34 = vadd.f32 %v1646_v26, %v336_v47  ;;  %v763_v20 = vsel %vm699_vm7, %v618_v48, %v731_v1  ;;  %v789_v15 = vld [vmem:[%s1951_s3 + $0x8] sm:$0xff]  ;;  %v788_v23 = vld [vmem:[%s1951_s3] sm:$0xff]  ;;  %v822_v48 = vld [vmem:[%s1951_s3 + $0x110] sm:$0xff] }
  0xfe   : > { %1005 = vmatpush.msra.mxu2 %v1694_v16  ;;  %v638_v36 = vpop.f32.mrf.mxu0  ;;  %v764_v58 = vsel %vm700_vm6, %v621_v53, %v732_v50  ;;  %v729_v62 = vmul.f32 0.2, %v612_v29  ;;  %vm697_vm9 = vcmp.gt.f32.partialorder %v612_v29, 0.0  ;;  %v805_v41 = vld [vmem:[%s1951_s3 + $0x88] sm:$0xff]  ;;  %v807_v47 = vld [vmem:[%s1951_s3 + $0x98] sm:$0xff]  ;;  %v808_v50 = vld [vmem:[%s1951_s3 + $0xa0] sm:$0xff] }
  0xff   : > { %v639_v55 = vadd.f32 %v638_v36, %v1660_v35  ;;  %v1724_v35 = vpop.permute.xlu0 %340  ;;  %v734_v36 = vmul.f32 0.2, %v627_v11  ;;  %vm695_vm11 = vcmp.gt.f32.partialorder %v606_v34, 0.0  ;;  %v812_v1 = vld [vmem:[%s1951_s3 + $0xc0] sm:$0xff]  ;;  %vm1074_vm2 = vcmask 523264  }
 0x100   : > { %1006 = vmatpush.msra.mxu2 %v1699_v38  ;;  %v761_v4 = vsel %vm697_vm9, %v612_v29, %v729_v62  ;;  %v810_v29 = vld [vmem:[%s1951_s3 + $0xb0] sm:$0xff]  ;;  %v819_v62 = vld [vmem:[%s1951_s3 + $0xf8] sm:$0xff] }
 0x101   : > { %v738_v5 = vmul.f32 0.2, %v639_v55  ;;  %vm706_vm14 = vcmp.gt.f32.partialorder %v639_v55, 0.0  ;;  %v766_v60 = vsel %vm702_vm4, %v627_v11, %v734_v36  ;;  %v791_v36 = vld [vmem:[%s1951_s3 + $0x18] sm:$0xff] }
 0x102   : > { %1007 = vmatpush.msra.mxu2 %v1705_v43 }
 0x103   : > { %v770_v12 = vsel %vm706_vm14, %v639_v55, %v738_v5  ;;  %v609_v55 = vadd.f32 %v1650_v28, %v1724_v35  ;;  %v401_v35 = vpop.permute.xlu2 %400 }
 0x104   : > { %1008 = vmatpush.msra.mxu2 %v1709_v33 }
 0x105   : > { %v728_v30 = vmul.f32 0.2, %v609_v55  ;;  %vm696_vm10 = vcmp.gt.f32.partialorder %v609_v55, 0.0 }
 0x106   : > { %1009 = vmatpush.msra.mxu2 %v1713_v54  ;;  %v641_v59 = vpop.f32.mrf.mxu0 }
 0x107   : > { %v642_v2 = vadd.f32 %v641_v59, %v1656_v32  ;;  %v1731_v32 = vpop.permute.xlu1 %410  ;;  %v406_v40 = vpop.permute.xlu0 %405  ;;  %v730_v59 = vmul.f32 0.2, %v615_v44  ;;  %v760_v19 = vsel %vm696_vm10, %v609_v55, %v728_v30  ;;  %v815_v55 = vld [vmem:[%s1951_s3 + $0xd8] sm:$0xff] }
 0x108   : > { %1010 = vmatpush.msra.mxu2 %v1718_v27 }
 0x109   : > { %vm707_vm13 = vcmp.gt.f32.partialorder %v642_v2, 0.0  ;;  %v739_v42 = vmul.f32 0.2, %v642_v2  ;;  %v762_v28 = vsel %vm698_vm8, %v615_v44, %v730_v59  ;;  %v806_v44 = vld [vmem:[%s1951_s3 + $0x90] sm:$0xff]  ;;  %v817_v59 = vld [vmem:[%s1951_s3 + $0xe8] sm:$0xff] }
 0x10a   : > { %1011 = vmatpush.msra.mxu2 %v1726_v3 }
 0x10b   : > { %v771_v8 = vsel %vm707_vm13, %v642_v2, %v739_v42  ;;  %v727_v42 = vmul.f32 0.2, %v606_v34 }
 0x10c   : > { %1012 = vmatpush.msra.mxu2 %v1733_v6  ;;  %932 = vmatpush.msra.mxu1 %v771_v8 }
 0x10d   : > { %1216 = vmatpush.msrb.mxu3 %v771_v8 }
 0x10e   : > { %1013 = vmatpush.msra.mxu2 %v1739_v46  ;;  %v1744_v49 = vpop.f32.mrf.mxu0  ;;  %933 = vmatpush.msra.mxu1 %v770_v12 }
 0x10f   : > { %1217 = vmatpush.msrb.mxu3 %v770_v12  ;;  %v331_v45 = vpop.permute.xlu1 %330  ;;  %v326_v63 = vpop.permute.xlu0 %325  ;;  %v645_v5 = vadd.f32 %v1744_v49, %v401_v35 }
 0x110   : > { %1014 = vmatpush.msra.mxu2 %v1746_v56  ;;  %934 = vmatpush.msra.mxu1 %v769_v17  ;;  %v603_v37 = vadd.f32 %v1641_v24, %v331_v45  ;;  %v600_v22 = vadd.f32 %v1633_v21, %v326_v63  ;;  %v759_v21 = vsel %vm695_vm11, %v606_v34, %v727_v42  ;;  %v804_v45 = vld [vmem:[%s1951_s3 + $0x80] sm:$0xff]  ;;  %v818_v63 = vld [vmem:[%s1951_s3 + $0xf0] sm:$0xff] }
 0x111   : > { %1218 = vmatpush.msrb.mxu3 %v769_v17  ;;  %v740_v11 = vmul.f32 0.2, %v645_v5  ;;  %vm708_vm0 = vcmp.gt.f32.partialorder %v645_v5, 0.0  ;;  %v816_v34 = vld [vmem:[%s1951_s3 + $0xe0] sm:$0xff] }
 0x112   : > { %1015 = vmatpush.msra.mxu2 %v1751_v51  ;;  %935 = vmatpush.msra.mxu1 %v768_v31  ;;  %v726_v8 = vmul.f32 0.2, %v603_v37  ;;  %vm694_vm13 = vcmp.gt.f32.partialorder %v603_v37, 0.0  ;;  %vm693_vm15 = vcmp.gt.f32.partialorder %v600_v22, 0.0 }
 0x113   : > { %1219 = vmatpush.msrb.mxu3 %v768_v31  ;;  %v772_v17 = vsel %vm708_vm0, %v645_v5, %v740_v11  ;;  %v820_v31 = vld [vmem:[%s1951_s3 + $0x100] sm:$0xff] }
 0x114   : > { %936 = vmatpush.msra.mxu1 %v767_v57  ;;  %v758_v12 = vsel %vm694_vm13, %v603_v37, %v726_v8 }
 0x115   : > { %1220 = vmatpush.msrb.mxu3 %v767_v57  ;;  %v802_v57 = vld [vmem:[%s1951_s3 + $0x70] sm:$0xff] }
 0x116   : > { %v647_v52 = vpop.f32.mrf.mxu0  ;;  %937 = vmatpush.msra.mxu1 %v766_v60 }
 0x117   : > { %1221 = vmatpush.msrb.mxu3 %v766_v60  ;;  %v321_v0 = vpop.permute.xlu1 %320  ;;  %v648_v2 = vadd.f32 %v647_v52, %v406_v40  ;;  %v790_v40 = vld [vmem:[%s1951_s3 + $0x10] sm:$0xff]  ;;  %v809_v60 = vld [vmem:[%s1951_s3 + $0xa8] sm:$0xff]  ;;  %v811_v52 = vld [vmem:[%s1951_s3 + $0xb8] sm:$0xff] }
 0x118   : > { %938 = vmatpush.msra.mxu1 %v765_v39  ;;  %v597_v24 = vadd.f32 %v1625_v18, %v321_v0  ;;  %v845_v0 = vpop.permute.xlu2 %844 }
 0x119   : > { %1222 = vmatpush.msrb.mxu3 %v765_v39  ;;  %v741_v9 = vmul.f32 0.2, %v648_v2  ;;  %vm709_vm14 = vcmp.gt.f32.partialorder %v648_v2, 0.0  ;;  %v813_v39 = vld [vmem:[%s1951_s3 + $0xc8] sm:$0xff] }
 0x11a   : > { %939 = vmatpush.msra.mxu1 %v764_v58  ;;  %v724_v14 = vmul.f32 0.2, %v597_v24  ;;  %vm692_vm1 = vcmp.gt.f32.partialorder %v597_v24, 0.0 }
 0x11b   : > { %1223 = vmatpush.msrb.mxu3 %v764_v58  ;;  %v773_v18 = vsel %vm709_vm14, %v648_v2, %v741_v9  ;;  %v814_v58 = vld [vmem:[%s1951_s3 + $0xd0] sm:$0xff] }
 0x11c   : > { %940 = vmatpush.msra.mxu1 %v763_v20  ;;  %v756_v53 = vsel %vm692_vm1, %v597_v24, %v724_v14 }
 0x11d   : > { %1224 = vmatpush.msrb.mxu3 %v763_v20  ;;  %v850_v20 = vpop.permute.xlu0 %849 }
 0x11e   : > { %v650_v25 = vpop.f32.mrf.mxu0  ;;  %941 = vmatpush.msra.mxu1 %v762_v28 }
 0x11f   : > { %1225 = vmatpush.msrb.mxu3 %v762_v28  ;;  %v651_v26 = vadd.f32 %v650_v25, %v1731_v32  ;;  %v725_v32 = vmul.f32 0.2, %v600_v22  ;;  %v855_v30 = vpop.permute.xlu1 %854 }
 0x120   : > { %942 = vmatpush.msra.mxu1 %v761_v4  ;;  %v860_v14 = vpop.permute.xlu2 %859 }
 0x121   : > { %1226 = vmatpush.msrb.mxu3 %v761_v4  ;;  %vm710_vm12 = vcmp.gt.f32.partialorder %v651_v26, 0.0  ;;  %v742_v7 = vmul.f32 0.2, %v651_v26  ;;  %v757_v49 = vsel %vm693_vm15, %v600_v22, %v725_v32 }
 0x122   : > { %943 = vmatpush.msra.mxu1 %v760_v19 }
 0x123   : > { %1227 = vmatpush.msrb.mxu3 %v760_v19  ;;  %v774_v61 = vsel %vm710_vm12, %v651_v26, %v742_v7 }
 0x124   : > { %944 = vmatpush.msra.mxu1 %v759_v21  ;;  %1016 = vmatpush.msra.mxu2 %v774_v61 }
 0x125   : > { %1228 = vmatpush.msrb.mxu3 %v759_v21  ;;  %v865_v37 = vpop.permute.xlu0 %864 }
 0x126   : > { %945 = vmatpush.msra.mxu1 %v758_v12  ;;  %1017 = vmatpush.msra.mxu2 %v773_v18 }
 0x127   : > { %1229 = vmatpush.msrb.mxu3 %v758_v12  ;;  %v870_v25 = vpop.permute.xlu1 %869 }
 0x128   : > { %946 = vmatpush.msra.mxu1 %v757_v49  ;;  %1018 = vmatpush.msra.mxu2 %v772_v17 }
 0x129   : > { %1230 = vmatpush.msrb.mxu3 %v757_v49  ;;  %1019 = vmatmul.f32.vlgmr.msra.gmra.mxu2 %v789_v15 }
 0x12a   : > { %947 = vmatpush.msra.mxu1 %v756_v53 }
 0x12b   : > { %1231 = vmatpush.msrb.mxu3 %v756_v53  ;;  %948 = vmatmul.f32.vlgmr.msra.gmra.mxu1 %v788_v23 }
 0x12c   : > { %996 = vmatmul.f32.vlgmr.msrb.gmra.mxu3 %v820_v31 }
 0x12d   : > { %1232 = vmatpush.msra.mxu3 %v1688_v10  ;;  %v793_v10 = vld [vmem:[%s1951_s3 + $0x28] sm:$0xff]  ;;  %v880_v26 = vpop.permute.xlu0 %879 }
 0x12f   : > { %1233 = vmatpush.msra.mxu3 %v1691_v13  ;;  %v792_v13 = vld [vmem:[%s1951_s3 + $0x20] sm:$0xff]  ;;  %v885_v24 = vpop.permute.xlu1 %884 }
 0x131   : > { %1234 = vmatpush.msra.mxu3 %v1694_v16  ;;  %1022 = vmatmul.f32.gmra.mxu2 %v791_v36  ;;  %v795_v16 = vld [vmem:[%s1951_s3 + $0x38] sm:$0xff] }
 0x133   : > { %1235 = vmatpush.msra.mxu3 %v1699_v38  ;;  %951 = vmatmul.f32.gmra.mxu1 %v790_v40  ;;  %v794_v38 = vld [vmem:[%s1951_s3 + $0x30] sm:$0xff] }
 0x134   : > { %999 = vmatmul.f32.gmra.mxu3 %v822_v48 }
 0x135   : > { %1236 = vmatpush.msra.mxu3 %v1705_v43  ;;  %v797_v43 = vld [vmem:[%s1951_s3 + $0x48] sm:$0xff]  ;;  %v895_v8 = vpop.permute.xlu0 %894 }
 0x137   : > { %1237 = vmatpush.msra.mxu3 %v1709_v33  ;;  %v796_v33 = vld [vmem:[%s1951_s3 + $0x40] sm:$0xff]  ;;  %v900_v12 = vpop.permute.xlu1 %899 }
 0x139   : > { %1238 = vmatpush.msra.mxu3 %v1713_v54  ;;  %1025 = vmatmul.f32.gmra.mxu2 %v793_v10  ;;  %v821_v54 = vld [vmem:[%s1951_s3 + $0x108] sm:$0xff] }
 0x13b   : > { %1239 = vmatpush.msra.mxu3 %v1718_v27  ;;  %954 = vmatmul.f32.gmra.mxu1 %v792_v13  ;;  %v799_v27 = vld [vmem:[%s1951_s3 + $0x58] sm:$0xff] }
 0x13d   : > { %1240 = vmatpush.msra.mxu3 %v1726_v3  ;;  %v798_v3 = vld [vmem:[%s1951_s3 + $0x50] sm:$0xff] }
 0x13f   : > { %1241 = vmatpush.msra.mxu3 %v1733_v6  ;;  %v823_v6 = vld [vmem:[%s1951_s3 + $0x118] sm:$0xff]  ;;  %v1907_v31 = vpop.permute.xlu1 %914 }
 0x141   : > { %1242 = vmatpush.msra.mxu3 %v1739_v46  ;;  %1028 = vmatmul.f32.gmra.mxu2 %v795_v16  ;;  %v801_v46 = vld [vmem:[%s1951_s3 + $0x68] sm:$0xff] }
 0x143   : > { %1243 = vmatpush.msra.mxu3 %v1746_v56  ;;  %957 = vmatmul.f32.gmra.mxu1 %v794_v38  ;;  %v800_v56 = vld [vmem:[%s1951_s3 + $0x60] sm:$0xff] }
 0x145   : > { %1244 = vmatpush.msra.mxu3 %v1751_v51  ;;  %v803_v51 = vld [vmem:[%s1951_s3 + $0x78] sm:$0xff] }
 0x147   : > { %1245 = vmatpush.msra.mxu3 %v774_v61 }
 0x149   : > { %1246 = vmatpush.msra.mxu3 %v773_v18  ;;  %1031 = vmatmul.f32.gmra.mxu2 %v797_v43  ;;  %v1903_v18 = vpop.permute.xlu0 %909 }
 0x14b   : > { %1247 = vmatpush.msra.mxu3 %v772_v17  ;;  %960 = vmatmul.f32.gmra.mxu1 %v796_v33 }
 0x14c   : > { %1067 = vmatmul.f32.vlgmr.msra.gmra.mxu3 %v821_v54  ;;  %v930_v54 = vpop.permute.xlu1 %929 }
 0x151   : > { %1034 = vmatmul.f32.gmra.mxu2 %v799_v27  ;;  %v925_v40 = vpop.permute.xlu0 %924 }
 0x153   : > { %963 = vmatmul.f32.gmra.mxu1 %v798_v3 }
 0x154   : > { %1070 = vmatmul.f32.gmra.mxu3 %v823_v6 }
 0x159   : > { %1037 = vmatmul.f32.gmra.mxu2 %v801_v46 }
 0x15b   : > { %966 = vmatmul.f32.gmra.mxu1 %v800_v56 }
 0x161   : > { %1040 = vmatmul.f32.gmra.mxu2 %v803_v51 }
 0x163   : > { %969 = vmatmul.f32.gmra.mxu1 %v802_v57  ;;  %v875_v57 = vpop.permute.xlu2 %874 }
 0x169   : > { %1043 = vmatmul.f32.gmra.mxu2 %v805_v41 }
 0x16b   : > { %972 = vmatmul.f32.gmra.mxu1 %v804_v45 }
 0x171   : > { %1046 = vmatmul.f32.gmra.mxu2 %v807_v47 }
 0x173   : > { %975 = vmatmul.f32.gmra.mxu1 %v806_v44 }
 0x179   : > { %1049 = vmatmul.f32.gmra.mxu2 %v809_v60 }
 0x17b   : > { %978 = vmatmul.f32.gmra.mxu1 %v808_v50 }
 0x181   : > { %1052 = vmatmul.f32.gmra.mxu2 %v811_v52 }
 0x183   : > { %981 = vmatmul.f32.gmra.mxu1 %v810_v29 }
 0x189   : > { %1055 = vmatmul.f32.gmra.mxu2 %v813_v39 }
 0x18b   : > { %984 = vmatmul.f32.gmra.mxu1 %v812_v1 }
 0x191   : > { %1058 = vmatmul.f32.gmra.mxu2 %v815_v55 }
 0x193   : > { %987 = vmatmul.f32.gmra.mxu1 %v814_v58 }
 0x199   : > { %1061 = vmatmul.f32.gmra.mxu2 %v817_v59  ;;  %v890_v59 = vpop.permute.xlu2 %889 }
 0x19b   : > { %990 = vmatmul.f32.gmra.mxu1 %v816_v34 }
 0x1a1   : > { %1064 = vmatmul.f32.gmra.mxu2 %v819_v62 }
 0x1a3   : > { %993 = vmatmul.f32.gmra.mxu1 %v818_v63 }
 0x1a8   : > { %v949_v28 = vpop.f32.mrf.mxu1 }
 0x1a9   : > { %v950_v2 = vadd.f32 %v949_v28, %v845_v0 }
 0x1ac   : > { %v1020_v35 = vpop.f32.mrf.mxu2 }
 0x1ad   : > { %v1021_v22 = vadd.f32 %v1020_v35, %v950_v2 }
 0x1af   : > { %1075 = vst.msk [vmem:[%s1895_s9] sm:$0xff] %vm1074_vm2, %v1021_v22  ;;  %v997_v21 = vpop.f32.mrf.mxu3 }
 0x1b0   : > { %v952_v4 = vpop.f32.mrf.mxu1  ;;  %v998_v10 = vadd.f32 %v997_v21, %v925_v40 }
 0x1b1   : > { %v953_v42 = vadd.f32 %v952_v4, %v850_v20 }
 0x1b4   : > { %v1023_v5 = vpop.f32.mrf.mxu2 }
 0x1b5   : > { %v1024_v19 = vadd.f32 %v1023_v5, %v953_v42 }
 0x1b7   : > { %1076 = vst.msk [vmem:[%s1895_s9 + $0x8] sm:$0xff] %vm1074_vm2, %v1024_v19  ;;  %v1000_v23 = vpop.f32.mrf.mxu3 }
 0x1b8   : > { %v955_v7 = vpop.f32.mrf.mxu1  ;;  %v1001_v3 = vadd.f32 %v1000_v23, %v930_v54 }
 0x1b9   : > { %v956_v9 = vadd.f32 %v955_v7, %v855_v30 }
 0x1bc   : > { %v1026_v61 = vpop.f32.mrf.mxu2 }
 0x1bd   : > { %v1027_v32 = vadd.f32 %v1026_v61, %v956_v9 }
 0x1bf   : > { %1077 = vst.msk [vmem:[%s1895_s9 + $0x10] sm:$0xff] %vm1074_vm2, %v1027_v32 }
 0x1c0   : > { %v958_v11 = vpop.f32.mrf.mxu1 }
 0x1c1   : > { %v959_v49 = vadd.f32 %v958_v11, %v860_v14 }
 0x1c4   : > { %v1029_v15 = vpop.f32.mrf.mxu2 }
 0x1c5   : > { %v1030_v17 = vadd.f32 %v1029_v15, %v959_v49 }
 0x1c7   : > { %1078 = vst.msk [vmem:[%s1895_s9 + $0x18] sm:$0xff] %vm1074_vm2, %v1030_v17 }
 0x1c8   : > { %v961_v53 = vpop.f32.mrf.mxu1 }
 0x1c9   : > { %v962_v36 = vadd.f32 %v961_v53, %v865_v37 }
 0x1cc   : > { %v1032_v48 = vpop.f32.mrf.mxu2 }
 0x1cd   : > { %v1033_v13 = vadd.f32 %v1032_v48, %v962_v36 }
 0x1cf   : > { %v1068_v16 = vpop.f32.mrf.mxu3  ;;  %1079 = vst.msk [vmem:[%s1895_s9 + $0x20] sm:$0xff] %vm1074_vm2, %v1033_v13 }
 0x1d0   : > { %v1069_v38 = vadd.f32 %v1068_v16, %v998_v10  ;;  %v964_v43 = vpop.f32.mrf.mxu1 }
 0x1d1   : > { %v965_v33 = vadd.f32 %v964_v43, %v870_v25 }
 0x1d2   : > { %1091 = vst.msk [vmem:[%s1895_s9 + $0x80] sm:$0xff] %vm1074_vm2, %v1069_v38 }
 0x1d4   : > { %v1035_v27 = vpop.f32.mrf.mxu2 }
 0x1d5   : > { %v1036_v6 = vadd.f32 %v1035_v27, %v965_v33 }
 0x1d7   : > { %v1071_v46 = vpop.f32.mrf.mxu3  ;;  %1080 = vst.msk [vmem:[%s1895_s9 + $0x28] sm:$0xff] %vm1074_vm2, %v1036_v6 }
 0x1d8   : > { %v1072_v56 = vadd.f32 %v1071_v46, %v1001_v3  ;;  %v967_v51 = vpop.f32.mrf.mxu1 }
 0x1d9   : > { %v968_v41 = vadd.f32 %v967_v51, %v875_v57 }
 0x1da   : > { %1092 = vst.msk [vmem:[%s1895_s9 + $0x88] sm:$0xff] %vm1074_vm2, %v1072_v56 }
 0x1dc   : > { %v1038_v45 = vpop.f32.mrf.mxu2 }
 0x1dd   : > { %v1039_v47 = vadd.f32 %v1038_v45, %v968_v41 }
 0x1df   : > { %1081 = vst.msk [vmem:[%s1895_s9 + $0x30] sm:$0xff] %vm1074_vm2, %v1039_v47 }
 0x1e0   : > { %v970_v44 = vpop.f32.mrf.mxu1 }
 0x1e1   : > { %v971_v60 = vadd.f32 %v970_v44, %v880_v26  ;;  %v905_v26 = vpop.permute.xlu2 %904 }
 0x1e4   : > { %v1041_v50 = vpop.f32.mrf.mxu2 }
 0x1e5   : > { %v1042_v52 = vadd.f32 %v1041_v50, %v971_v60 }
 0x1e7   : > { %1082 = vst.msk [vmem:[%s1895_s9 + $0x38] sm:$0xff] %vm1074_vm2, %v1042_v52 }
 0x1e8   : > { %v973_v29 = vpop.f32.mrf.mxu1 }
 0x1e9   : > { %v974_v39 = vadd.f32 %v973_v29, %v885_v24 }
 0x1ec   : > { %v1044_v1 = vpop.f32.mrf.mxu2 }
 0x1ed   : > { %v1045_v55 = vadd.f32 %v1044_v1, %v974_v39 }
 0x1ef   : > { %1083 = vst.msk [vmem:[%s1895_s9 + $0x40] sm:$0xff] %vm1074_vm2, %v1045_v55 }
 0x1f0   : > { %v976_v58 = vpop.f32.mrf.mxu1 }
 0x1f1   : > { %v977_v34 = vadd.f32 %v976_v58, %v890_v59 }
 0x1f4   : > { %v1047_v20 = vpop.f32.mrf.mxu2 }
 0x1f5   : > { %v1048_v62 = vadd.f32 %v1047_v20, %v977_v34 }
 0x1f7   : > { %1084 = vst.msk [vmem:[%s1895_s9 + $0x48] sm:$0xff] %vm1074_vm2, %v1048_v62 }
 0x1f8   : > { %v979_v63 = vpop.f32.mrf.mxu1 }
 0x1f9   : > { %v980_v30 = vadd.f32 %v979_v63, %v895_v8 }
 0x1fc   : > { %v1050_v37 = vpop.f32.mrf.mxu2 }
 0x1fd   : > { %v1051_v28 = vadd.f32 %v1050_v37, %v980_v30 }
 0x1ff   : > { %1085 = vst.msk [vmem:[%s1895_s9 + $0x50] sm:$0xff] %vm1074_vm2, %v1051_v28 }
 0x200   : > { %v982_v0 = vpop.f32.mrf.mxu1 }
 0x201   : > { %v983_v2 = vadd.f32 %v982_v0, %v900_v12  ;;  %v920_v12 = vpop.permute.xlu2 %919 }
 0x204   : > { %v1053_v25 = vpop.f32.mrf.mxu2 }
 0x205   : > { %v1054_v35 = vadd.f32 %v1053_v25, %v983_v2 }
 0x207   : > { %1086 = vst.msk [vmem:[%s1895_s9 + $0x58] sm:$0xff] %vm1074_vm2, %v1054_v35 }
 0x208   : > { %v985_v22 = vpop.f32.mrf.mxu1 }
 0x209   : > { %v986_v4 = vadd.f32 %v985_v22, %v905_v26 }
 0x20c   : > { %v1056_v42 = vpop.f32.mrf.mxu2 }
 0x20d   : > { %v1057_v5 = vadd.f32 %v1056_v42, %v986_v4 }
 0x20f   : > { %1087 = vst.msk [vmem:[%s1895_s9 + $0x60] sm:$0xff] %vm1074_vm2, %v1057_v5 }
 0x210   : > { %v988_v19 = vpop.f32.mrf.mxu1 }
 0x211   : > { %v989_v24 = vadd.f32 %v988_v19, %v1903_v18 }
 0x214   : > { %v1059_v7 = vpop.f32.mrf.mxu2 }
 0x215   : > { %v1060_v8 = vadd.f32 %v1059_v7, %v989_v24 }
 0x217   : > { %1088 = vst.msk [vmem:[%s1895_s9 + $0x68] sm:$0xff] %vm1074_vm2, %v1060_v8 }
 0x218   : > { %v991_v9 = vpop.f32.mrf.mxu1 }
 0x219   : > { %v992_v21 = vadd.f32 %v991_v9, %v1907_v31 }
 0x21c   : > { %v1062_v61 = vpop.f32.mrf.mxu2 }
 0x21d   : > { %v1063_v32 = vadd.f32 %v1062_v61, %v992_v21 }
 0x21f   : > { %1089 = vst.msk [vmem:[%s1895_s9 + $0x70] sm:$0xff] %vm1074_vm2, %v1063_v32 }
 0x220   : > { %v994_v11 = vpop.f32.mrf.mxu1 }
 0x221   : > { %v995_v14 = vadd.f32 %v994_v11, %v920_v12 }
 0x224   : > { %v1065_v49 = vpop.f32.mrf.mxu2 }
 0x225   : > { %v1066_v15 = vadd.f32 %v1065_v49, %v995_v14 }
 0x227   : > { %1090 = vst.msk [vmem:[%s1895_s9 + $0x78] sm:$0xff] %vm1074_vm2, %v1066_v15 }
 0x228 PF: > { %s15_s20 = sadd.s32 1, %s1299_s20   ;;  %s1954_s18 = smov %s1295_s19 }
 0x229   : > { %p12_p5 = scmp.ge.s32.totalorder %s15_s20, 6   ;;  %s1955_s19 = smov %s1957_s21 }
 0x22b   :  { %14 = sbr.rel (!%p12_p5) target bundleno = 2 (0x2), region = 70 }

// kernel: rcm_forward.17
= control target key start
LH: loop header
LB: loop body
LE: loop exit
PB: predicated region body
PF: predicated region fallthrough
CT: control target
= control target key end

     0   :  { %vm19_vm0 = vcmask 1040384   ;;  %vm21_vm1 = vcmask 1041409   ;;  %s3526_s1 = inlined_call_operand.vmem [shape: f32[1,144,256], index: 1, kind: input, shape index: {}]   ;;  %s3527_s0 = inlined_call_operand.vmem [shape: f32[2,36,256], index: 0, kind: input, shape index: {}]   ;;  %s3528_s2 = inlined_call_operand.vmem [shape: f32[1,2,4,256], index: 2, kind: output, shape index: {}]  }
   0x1   :  { %v14_v0 = vld [vmem:[%s3526_s1] ss:$8 sm:$0x3]  ;;  %v2331_v1 = vld [vmem:[%s3526_s1 + $0x44] ss:$8 sm:$0x3] }
   0x2   :  { %v16_v2 = vperm.slane %v14_v0, 0  ;;  %v17_v3 = vperm.slane %v14_v0, 1  ;;  %v31_v4 = vperm.slane %v2331_v1, 0  ;;  %v32_v5 = vperm.slane %v2331_v1, 1 }
   0x3   :  { %v2332_v6 = vld [vmem:[%s3526_s1 + $0x90] ss:$8 sm:$0x3]  ;;  %v2333_v7 = vld [vmem:[%s3526_s1 + $0xd4] ss:$8 sm:$0x3] }
   0x4   :  { %v18_v8 = vrot.slane %v17_v3, 7  ;;  %v33_v9 = vrot.slane %v32_v5, 7  ;;  %v45_v10 = vperm.slane %v2332_v6, 1  ;;  %v11_v11 = vld [vmem:[%s3527_s0] ss:$8 sm:$0x3] }
   0x5   :  { %v44_v12 = vperm.slane %v2332_v6, 0  ;;  %v57_v13 = vperm.slane %v2333_v7, 0  ;;  %v58_v14 = vperm.slane %v2333_v7, 1  ;;  %v2336_v19 = vld [vmem:[%s3526_s1 + $0x1] ss:$8 sm:$0x3] }
   0x6   :  { %v20_v15 = vsel %vm19_vm0, %v16_v2, %v18_v8  ;;  %v22_v16 = vsel %vm21_vm1, %v16_v2, %v18_v8  ;;  %v34_v17 = vsel %vm19_vm0, %v31_v4, %v33_v9  ;;  %v35_v18 = vsel %vm21_vm1, %v31_v4, %v33_v9  ;;  %v2337_v22 = vld [vmem:[%s3526_s1 + $0x45] ss:$8 sm:$0x3]  ;;  %v2330_v23 = vld [vmem:[%s3527_s0 + $0x50] ss:$8 sm:$0x3] }
   0x7   :  { %v23_v20 = vrot.slane %v22_v16, 1  ;;  %v36_v21 = vrot.slane %v35_v18, 1  ;;  %v26_v24 = vmul.f32 %v20_v15, %v11_v11  ;;  %v46_v25 = vrot.slane %v45_v10, 7  ;;  %v2338_v32 = vld [vmem:[%s3526_s1 + $0x91] ss:$8 sm:$0x3] }
   0x8   :  { %v59_v26 = vrot.slane %v58_v14, 7  ;;  %v75_v27 = vperm.slane %v2336_v19, 1  ;;  %v39_v28 = vmul.f32 %v34_v17, %v11_v11  ;;  %v74_v29 = vperm.slane %v2336_v19, 0  ;;  %v2339_v37 = vld [vmem:[%s3526_s1 + $0xd5] ss:$8 sm:$0x3] }
   0x9   :  { %v89_v30 = vperm.slane %v2337_v22, 0  ;;  %v90_v31 = vperm.slane %v2337_v22, 1  ;;  %v47_v33 = vsel %vm19_vm0, %v44_v12, %v46_v25  ;;  %v48_v34 = vsel %vm21_vm1, %v44_v12, %v46_v25  ;;  %v2334_v42 = vld [vmem:[%s3527_s0 + $0x1] ss:$8 sm:$0x3] }
   0xa   :  { %v60_v35 = vsel %vm19_vm0, %v57_v13, %v59_v26  ;;  %v61_v36 = vsel %vm21_vm1, %v57_v13, %v59_v26  ;;  %v27_v38 = vmul.f32 %v2330_v23, %v23_v20  ;;  %v40_v39 = vmul.f32 %v2330_v23, %v36_v21  ;;  %v2342_v51 = vld [vmem:[%s3526_s1 + $0x2] ss:$8 sm:$0x3]  ;;  %v2335_v52 = vld [vmem:[%s3527_s0 + $0x51] ss:$8 sm:$0x3] }
   0xb   :  { %v49_v40 = vrot.slane %v48_v34, 1  ;;  %v52_v41 = vmul.f32 %v47_v33, %v11_v11  ;;  %v62_v43 = vrot.slane %v61_v36, 1  ;;  %v76_v44 = vrot.slane %v75_v27, 7  ;;  %v2343_v9 = vld [vmem:[%s3526_s1 + $0x46] ss:$8 sm:$0x3] }
   0xc   :  { %v91_v45 = vrot.slane %v90_v31, 7  ;;  %v105_v46 = vperm.slane %v2338_v32, 1  ;;  %v65_v47 = vmul.f32 %v60_v35, %v11_v11  ;;  %v104_v48 = vperm.slane %v2338_v32, 0  ;;  %v2340_v14 = vld [vmem:[%s3527_s0 + $0x2] ss:$8 sm:$0x3] }
   0xd   :  { %v119_v49 = vperm.slane %v2339_v37, 0  ;;  %v120_v50 = vperm.slane %v2339_v37, 1  ;;  %v77_v53 = vsel %vm19_vm0, %v74_v29, %v76_v44  ;;  %v78_v54 = vsel %vm21_vm1, %v74_v29, %v76_v44  ;;  %v2344_v19 = vld [vmem:[%s3526_s1 + $0x92] ss:$8 sm:$0x3] }
   0xe   :  { %v92_v55 = vsel %vm19_vm0, %v89_v30, %v91_v45  ;;  %v93_v56 = vsel %vm21_vm1, %v89_v30, %v91_v45  ;;  %v79_v57 = vrot.slane %v78_v54, 1  ;;  %v82_v58 = vmul.f32 %v2334_v42, %v77_v53  ;;  %v2341_v27 = vld [vmem:[%s3527_s0 + $0x52] ss:$8 sm:$0x3] }
   0xf   :  { %v94_v59 = vrot.slane %v93_v56, 1  ;;  %v97_v60 = vmul.f32 %v2334_v42, %v92_v55  ;;  %v53_v61 = vmul.f32 %v2330_v23, %v49_v40  ;;  %v106_v62 = vrot.slane %v105_v46, 7  ;;  %v2349_v55 = vld [vmem:[%s3526_s1 + $0x47] ss:$8 sm:$0x3] }
  0x10   :  { %v121_v63 = vrot.slane %v120_v50, 7  ;;  %v139_v0 = vperm.slane %v2342_v51, 1  ;;  %v66_v1 = vmul.f32 %v2330_v23, %v62_v43  ;;  %v83_v2 = vmul.f32 %v2335_v52, %v79_v57 }
  0x11   :  { %v98_v3 = vmul.f32 %v2335_v52, %v94_v59  ;;  %v138_v4 = vperm.slane %v2342_v51, 0  ;;  %v107_v5 = vsel %vm19_vm0, %v104_v48, %v106_v62  ;;  %v108_v6 = vsel %vm21_vm1, %v104_v48, %v106_v62 }
  0x12   :  { %v122_v7 = vsel %vm19_vm0, %v119_v49, %v121_v63  ;;  %v123_v8 = vsel %vm21_vm1, %v119_v49, %v121_v63  ;;  %v84_v10 = vadd.f32 %v82_v58, %v26_v24  ;;  %v99_v11 = vadd.f32 %v97_v60, %v39_v28  ;;  %v2345_v24 = vld [vmem:[%s3526_s1 + $0xd6] ss:$8 sm:$0x3]  ;;  %v2346_v60 = vld [vmem:[%s3527_s0 + $0x3] ss:$8 sm:$0x3] }
  0x13   :  { %v109_v12 = vrot.slane %v108_v6, 1  ;;  %v112_v13 = vmul.f32 %v2334_v42, %v107_v5  ;;  %v85_v15 = vadd.f32 %v83_v2, %v27_v38  ;;  %v124_v16 = vrot.slane %v123_v8, 1  ;;  %v2348_v38 = vld [vmem:[%s3526_s1 + $0x3] ss:$8 sm:$0x3] }
  0x14   :  { %v127_v17 = vmul.f32 %v2334_v42, %v122_v7  ;;  %v140_v18 = vrot.slane %v139_v0, 7  ;;  %v100_v20 = vadd.f32 %v98_v3, %v40_v39  ;;  %v153_v22 = vperm.slane %v2343_v9, 0  ;;  %v2351_v6 = vld [vmem:[%s3526_s1 + $0xd7] ss:$8 sm:$0x3] }
  0x15   :  { %v113_v21 = vmul.f32 %v2335_v52, %v109_v12  ;;  %v154_v23 = vperm.slane %v2343_v9, 1  ;;  %v114_v25 = vadd.f32 %v112_v13, %v52_v41  ;;  %v128_v26 = vmul.f32 %v2335_v52, %v124_v16  ;;  %v2347_v9 = vld [vmem:[%s3527_s0 + $0x53] ss:$8 sm:$0x3] }
  0x16   :  { %v141_v28 = vsel %vm19_vm0, %v138_v4, %v140_v18  ;;  %v142_v29 = vsel %vm21_vm1, %v138_v4, %v140_v18  ;;  %v168_v33 = vperm.slane %v2344_v19, 0  ;;  %v129_v35 = vadd.f32 %v127_v17, %v65_v47 }
  0x17   :  { %v143_v30 = vrot.slane %v142_v29, 1  ;;  %v146_v31 = vmul.f32 %v2340_v14, %v141_v28  ;;  %v155_v32 = vrot.slane %v154_v23, 7  ;;  %v115_v34 = vadd.f32 %v113_v21, %v53_v61 }
  0x18   :  { %v169_v36 = vperm.slane %v2344_v19, 1  ;;  %v184_v37 = vperm.slane %v2345_v24, 1  ;;  %v183_v42 = vperm.slane %v2345_v24, 0  ;;  %v130_v43 = vadd.f32 %v128_v26, %v66_v1  ;;  %v2350_v1 = vld [vmem:[%s3526_s1 + $0x93] ss:$8 sm:$0x3] }
  0x19   :  { %v147_v39 = vmul.f32 %v2341_v27, %v143_v30  ;;  %v156_v40 = vsel %vm19_vm0, %v153_v22, %v155_v32  ;;  %v157_v41 = vsel %vm21_vm1, %v153_v22, %v155_v32  ;;  %v148_v48 = vadd.f32 %v146_v31, %v84_v10 }
  0x1a   :  { %v158_v44 = vrot.slane %v157_v41, 1  ;;  %v170_v45 = vrot.slane %v169_v36, 7  ;;  %v185_v46 = vrot.slane %v184_v37, 7  ;;  %v161_v50 = vmul.f32 %v2340_v14, %v156_v40  ;;  %v2355_v37 = vld [vmem:[%s3526_s1 + $0x50] ss:$8 sm:$0x3] }
  0x1b   :  { %v149_v49 = vadd.f32 %v147_v39, %v85_v15  ;;  %v203_v47 = vperm.slane %v2348_v38, 1  ;;  %v202_v54 = vperm.slane %v2348_v38, 0  ;;  %v217_v0 = vperm.slane %v2349_v55, 0 }
  0x1c   :  { %v162_v51 = vmul.f32 %v2341_v27, %v158_v44  ;;  %v171_v52 = vsel %vm19_vm0, %v168_v33, %v170_v45  ;;  %v172_v53 = vsel %vm21_vm1, %v168_v33, %v170_v45  ;;  %v186_v58 = vsel %vm19_vm0, %v183_v42, %v185_v46 }
  0x1d   :  { %v173_v56 = vrot.slane %v172_v53, 1  ;;  %v176_v57 = vmul.f32 %v2340_v14, %v171_v52  ;;  %v187_v59 = vsel %vm21_vm1, %v183_v42, %v185_v46  ;;  %v191_v62 = vmul.f32 %v2340_v14, %v186_v58  ;;  %v2352_v42 = vld [vmem:[%s3527_s0 + $0x4] ss:$8 sm:$0x3] }
  0x1e   :  { %v188_v61 = vrot.slane %v187_v59, 1  ;;  %v204_v63 = vrot.slane %v203_v47, 7  ;;  %v163_v2 = vadd.f32 %v161_v50, %v99_v11  ;;  %v164_v3 = vadd.f32 %v162_v51, %v100_v20  ;;  %v2354_v20 = vld [vmem:[%s3526_s1 + $0x4] ss:$8 sm:$0x3] }
  0x1f   :  { %v177_v4 = vmul.f32 %v2341_v27, %v173_v56  ;;  %v218_v5 = vperm.slane %v2349_v55, 1  ;;  %v178_v7 = vadd.f32 %v176_v57, %v114_v25  ;;  %v232_v15 = vperm.slane %v2350_v1, 0  ;;  %v2357_v52 = vld [vmem:[%s3526_s1 + $0xe0] ss:$8 sm:$0x3] }
  0x20   :  { %v192_v8 = vmul.f32 %v2341_v27, %v188_v61  ;;  %v205_v10 = vsel %vm19_vm0, %v202_v54, %v204_v63  ;;  %v206_v12 = vsel %vm21_vm1, %v202_v54, %v204_v63  ;;  %v193_v17 = vadd.f32 %v191_v62, %v129_v35  ;;  %v2353_v55 = vld [vmem:[%s3527_s0 + $0x54] ss:$8 sm:$0x3] }
  0x21   :  { %v207_v13 = vrot.slane %v206_v12, 1  ;;  %v210_v14 = vmul.f32 %v2346_v60, %v205_v10  ;;  %v219_v11 = vrot.slane %v218_v5, 7  ;;  %v179_v16 = vadd.f32 %v177_v4, %v115_v34 }
  0x22   :  { %v233_v18 = vperm.slane %v2350_v1, 1  ;;  %v248_v19 = vperm.slane %v2351_v6, 1  ;;  %v247_v24 = vperm.slane %v2351_v6, 0  ;;  %v194_v25 = vadd.f32 %v192_v8, %v130_v43 }
  0x23   :  { %v211_v21 = vmul.f32 %v2347_v9, %v207_v13  ;;  %v220_v22 = vsel %vm19_vm0, %v217_v0, %v219_v11  ;;  %v221_v23 = vsel %vm21_vm1, %v217_v0, %v219_v11  ;;  %v212_v29 = vadd.f32 %v210_v14, %v148_v48  ;;  %v2356_v48 = vld [vmem:[%s3526_s1 + $0x94] ss:$8 sm:$0x3] }
  0x24   :  { %v222_v26 = vrot.slane %v221_v23, 1  ;;  %v234_v27 = vrot.slane %v233_v18, 7  ;;  %v249_v28 = vrot.slane %v248_v19, 7  ;;  %v225_v31 = vmul.f32 %v2346_v60, %v220_v22  ;;  %v2361_v19 = vld [vmem:[%s3526_s1 + $0x51] ss:$8 sm:$0x3] }
  0x25   :  { %v213_v30 = vadd.f32 %v211_v21, %v149_v49  ;;  %v267_v32 = vperm.slane %v2354_v20, 1  ;;  %v266_v36 = vperm.slane %v2354_v20, 0  ;;  %v281_v46 = vperm.slane %v2355_v37, 0 }
  0x26   :  { %v226_v33 = vmul.f32 %v2347_v9, %v222_v26  ;;  %v235_v34 = vsel %vm19_vm0, %v232_v15, %v234_v27  ;;  %v236_v35 = vsel %vm21_vm1, %v232_v15, %v234_v27  ;;  %v250_v40 = vsel %vm19_vm0, %v247_v24, %v249_v28 }
  0x27   :  { %v237_v38 = vrot.slane %v236_v35, 1  ;;  %v240_v39 = vmul.f32 %v2346_v60, %v235_v34  ;;  %v251_v41 = vsel %vm21_vm1, %v247_v24, %v249_v28  ;;  %v255_v44 = vmul.f32 %v2346_v60, %v250_v40  ;;  %v2358_v24 = vld [vmem:[%s3527_s0 + $0x5] ss:$8 sm:$0x3] }
  0x28   :  { %v252_v43 = vrot.slane %v251_v41, 1  ;;  %v268_v45 = vrot.slane %v267_v32, 7  ;;  %v227_v49 = vadd.f32 %v225_v31, %v163_v2  ;;  %v228_v50 = vadd.f32 %v226_v33, %v164_v3  ;;  %v2360_v2 = vld [vmem:[%s3526_s1 + $0x5] ss:$8 sm:$0x3] }
  0x29   :  { %v241_v47 = vmul.f32 %v2347_v9, %v237_v38  ;;  %v282_v51 = vperm.slane %v2355_v37, 1  ;;  %v242_v53 = vadd.f32 %v240_v39, %v178_v7  ;;  %v296_v61 = vperm.slane %v2356_v48, 0  ;;  %v2363_v34 = vld [vmem:[%s3526_s1 + $0xe1] ss:$8 sm:$0x3] }
  0x2a   :  { %v256_v54 = vmul.f32 %v2347_v9, %v252_v43  ;;  %v269_v56 = vsel %vm19_vm0, %v266_v36, %v268_v45  ;;  %v270_v57 = vsel %vm21_vm1, %v266_v36, %v268_v45  ;;  %v257_v63 = vadd.f32 %v255_v44, %v193_v17  ;;  %v2359_v37 = vld [vmem:[%s3527_s0 + $0x55] ss:$8 sm:$0x3] }
  0x2b   :  { %v271_v58 = vrot.slane %v270_v57, 1  ;;  %v274_v59 = vmul.f32 %v2352_v42, %v269_v56  ;;  %v283_v60 = vrot.slane %v282_v51, 7  ;;  %v243_v62 = vadd.f32 %v241_v47, %v179_v16 }
  0x2c   :  { %v297_v0 = vperm.slane %v2356_v48, 1  ;;  %v312_v1 = vperm.slane %v2357_v52, 1  ;;  %v311_v6 = vperm.slane %v2357_v52, 0  ;;  %v258_v7 = vadd.f32 %v256_v54, %v194_v25 }
  0x2d   :  { %v275_v3 = vmul.f32 %v2353_v55, %v271_v58  ;;  %v284_v4 = vsel %vm19_vm0, %v281_v46, %v283_v60  ;;  %v285_v5 = vsel %vm21_vm1, %v281_v46, %v283_v60  ;;  %v276_v12 = vadd.f32 %v274_v59, %v212_v29  ;;  %v2362_v29 = vld [vmem:[%s3526_s1 + $0x95] ss:$8 sm:$0x3] }
  0x2e   :  { %v286_v8 = vrot.slane %v285_v5, 1  ;;  %v298_v9 = vrot.slane %v297_v0, 7  ;;  %v313_v10 = vrot.slane %v312_v1, 7  ;;  %v289_v14 = vmul.f32 %v2352_v42, %v284_v4  ;;  %v2367_v1 = vld [vmem:[%s3526_s1 + $0x52] ss:$8 sm:$0x3] }
  0x2f   :  { %v277_v13 = vadd.f32 %v275_v3, %v213_v30  ;;  %v331_v11 = vperm.slane %v2360_v2, 1  ;;  %v330_v18 = vperm.slane %v2360_v2, 0  ;;  %v345_v28 = vperm.slane %v2361_v19, 0 }
  0x30   :  { %v290_v15 = vmul.f32 %v2353_v55, %v286_v8  ;;  %v299_v16 = vsel %vm19_vm0, %v296_v61, %v298_v9  ;;  %v300_v17 = vsel %vm21_vm1, %v296_v61, %v298_v9  ;;  %v314_v22 = vsel %vm19_vm0, %v311_v6, %v313_v10 }
  0x31   :  { %v301_v20 = vrot.slane %v300_v17, 1  ;;  %v304_v21 = vmul.f32 %v2352_v42, %v299_v16  ;;  %v315_v23 = vsel %vm21_vm1, %v311_v6, %v313_v10  ;;  %v319_v26 = vmul.f32 %v2352_v42, %v314_v22  ;;  %v2364_v6 = vld [vmem:[%s3527_s0 + $0x6] ss:$8 sm:$0x3] }
  0x32   :  { %v316_v25 = vrot.slane %v315_v23, 1  ;;  %v332_v27 = vrot.slane %v331_v11, 7  ;;  %v291_v30 = vadd.f32 %v289_v14, %v227_v49  ;;  %v292_v31 = vadd.f32 %v290_v15, %v228_v50  ;;  %v2366_v49 = vld [vmem:[%s3526_s1 + $0x6] ss:$8 sm:$0x3] }
  0x33   :  { %v305_v32 = vmul.f32 %v2353_v55, %v301_v20  ;;  %v346_v33 = vperm.slane %v2361_v19, 1  ;;  %v306_v35 = vadd.f32 %v304_v21, %v242_v53  ;;  %v360_v43 = vperm.slane %v2362_v29, 0  ;;  %v2369_v16 = vld [vmem:[%s3526_s1 + $0xe2] ss:$8 sm:$0x3] }
  0x34   :  { %v320_v36 = vmul.f32 %v2353_v55, %v316_v25  ;;  %v333_v38 = vsel %vm19_vm0, %v330_v18, %v332_v27  ;;  %v334_v39 = vsel %vm21_vm1, %v330_v18, %v332_v27  ;;  %v321_v45 = vadd.f32 %v319_v26, %v257_v63  ;;  %v2365_v19 = vld [vmem:[%s3527_s0 + $0x56] ss:$8 sm:$0x3] }
  0x35   :  { %v335_v40 = vrot.slane %v334_v39, 1  ;;  %v338_v41 = vmul.f32 %v2358_v24, %v333_v38  ;;  %v347_v42 = vrot.slane %v346_v33, 7  ;;  %v307_v44 = vadd.f32 %v305_v32, %v243_v62 }
  0x36   :  { %v361_v46 = vperm.slane %v2362_v29, 1  ;;  %v376_v48 = vperm.slane %v2363_v34, 1  ;;  %v375_v52 = vperm.slane %v2363_v34, 0  ;;  %v322_v53 = vadd.f32 %v320_v36, %v258_v7 }
  0x37   :  { %v339_v50 = vmul.f32 %v2359_v37, %v335_v40  ;;  %v348_v47 = vsel %vm19_vm0, %v345_v28, %v347_v42  ;;  %v349_v51 = vsel %vm21_vm1, %v345_v28, %v347_v42  ;;  %v340_v57 = vadd.f32 %v338_v41, %v276_v12  ;;  %v2368_v12 = vld [vmem:[%s3526_s1 + $0x96] ss:$8 sm:$0x3] }
  0x38   :  { %v350_v54 = vrot.slane %v349_v51, 1  ;;  %v362_v55 = vrot.slane %v361_v46, 7  ;;  %v377_v56 = vrot.slane %v376_v48, 7  ;;  %v353_v59 = vmul.f32 %v2358_v24, %v348_v47  ;;  %v2373_v48 = vld [vmem:[%s3526_s1 + $0x53] ss:$8 sm:$0x3] }
  0x39   :  { %v341_v58 = vadd.f32 %v339_v50, %v277_v13  ;;  %v395_v60 = vperm.slane %v2366_v49, 1  ;;  %v394_v0 = vperm.slane %v2366_v49, 0  ;;  %v409_v10 = vperm.slane %v2367_v1, 0 }
  0x3a   :  { %v354_v61 = vmul.f32 %v2359_v37, %v350_v54  ;;  %v363_v62 = vsel %vm19_vm0, %v360_v43, %v362_v55  ;;  %v364_v63 = vsel %vm21_vm1, %v360_v43, %v362_v55  ;;  %v378_v4 = vsel %vm19_vm0, %v375_v52, %v377_v56  ;;  %v2370_v55 = vld [vmem:[%s3527_s0 + $0x7] ss:$8 sm:$0x3] }
  0x3b   :  { %v365_v2 = vrot.slane %v364_v63, 1  ;;  %v368_v3 = vmul.f32 %v2358_v24, %v363_v62  ;;  %v379_v5 = vsel %vm21_vm1, %v375_v52, %v377_v56  ;;  %v383_v8 = vmul.f32 %v2358_v24, %v378_v4  ;;  %v2374_v52 = vld [vmem:[%s3526_s1 + $0x97] ss:$8 sm:$0x3] }
  0x3c   :  { %v380_v7 = vrot.slane %v379_v5, 1  ;;  %v396_v9 = vrot.slane %v395_v60, 7  ;;  %v355_v13 = vadd.f32 %v353_v59, %v291_v30  ;;  %v356_v14 = vadd.f32 %v354_v61, %v292_v31  ;;  %v2372_v30 = vld [vmem:[%s3526_s1 + $0x7] ss:$8 sm:$0x3] }
  0x3d   :  { %v369_v11 = vmul.f32 %v2359_v37, %v365_v2  ;;  %v410_v15 = vperm.slane %v2367_v1, 1  ;;  %v370_v17 = vadd.f32 %v368_v3, %v306_v35  ;;  %v424_v25 = vperm.slane %v2368_v12, 0  ;;  %v2375_v62 = vld [vmem:[%s3526_s1 + $0xe3] ss:$8 sm:$0x3] }
  0x3e   :  { %v384_v18 = vmul.f32 %v2359_v37, %v380_v7  ;;  %v397_v20 = vsel %vm19_vm0, %v394_v0, %v396_v9  ;;  %v398_v21 = vsel %vm21_vm1, %v394_v0, %v396_v9  ;;  %v385_v27 = vadd.f32 %v383_v8, %v321_v45  ;;  %v2371_v1 = vld [vmem:[%s3527_s0 + $0x57] ss:$8 sm:$0x3] }
  0x3f   :  { %v399_v22 = vrot.slane %v398_v21, 1  ;;  %v402_v23 = vmul.f32 %v2364_v6, %v397_v20  ;;  %v411_v24 = vrot.slane %v410_v15, 7  ;;  %v371_v26 = vadd.f32 %v369_v11, %v307_v44 }
  0x40   :  { %v425_v28 = vperm.slane %v2368_v12, 1  ;;  %v440_v29 = vperm.slane %v2369_v16, 1  ;;  %v439_v34 = vperm.slane %v2369_v16, 0  ;;  %v386_v35 = vadd.f32 %v384_v18, %v322_v53 }
  0x41   :  { %v403_v31 = vmul.f32 %v2365_v19, %v399_v22  ;;  %v412_v32 = vsel %vm19_vm0, %v409_v10, %v411_v24  ;;  %v413_v33 = vsel %vm21_vm1, %v409_v10, %v411_v24  ;;  %v404_v39 = vadd.f32 %v402_v23, %v340_v57 }
  0x42   :  { %v414_v36 = vrot.slane %v413_v33, 1  ;;  %v426_v37 = vrot.slane %v425_v28, 7  ;;  %v441_v38 = vrot.slane %v440_v29, 7  ;;  %v417_v41 = vmul.f32 %v2364_v6, %v412_v32  ;;  %v2379_v29 = vld [vmem:[%s3526_s1 + $0x54] ss:$8 sm:$0x3] }
  0x43   :  { %v405_v40 = vadd.f32 %v403_v31, %v341_v58  ;;  %v459_v42 = vperm.slane %v2372_v30, 1  ;;  %v458_v46 = vperm.slane %v2372_v30, 0  ;;  %v473_v57 = vperm.slane %v2373_v48, 0 }
  0x44   :  { %v418_v43 = vmul.f32 %v2365_v19, %v414_v36  ;;  %v427_v44 = vsel %vm19_vm0, %v424_v25, %v426_v37  ;;  %v428_v45 = vsel %vm21_vm1, %v424_v25, %v426_v37  ;;  %v442_v47 = vsel %vm19_vm0, %v439_v34, %v441_v38  ;;  %v2376_v37 = vld [vmem:[%s3527_s0 + $0x10] ss:$8 sm:$0x3] }
  0x45   :  { %v429_v49 = vrot.slane %v428_v45, 1  ;;  %v432_v50 = vmul.f32 %v2364_v6, %v427_v44  ;;  %v443_v51 = vsel %vm21_vm1, %v439_v34, %v441_v38  ;;  %v447_v54 = vmul.f32 %v2364_v6, %v442_v47  ;;  %v2380_v34 = vld [vmem:[%s3526_s1 + $0xa0] ss:$8 sm:$0x3] }
  0x46   :  { %v444_v53 = vrot.slane %v443_v51, 1  ;;  %v460_v56 = vrot.slane %v459_v42, 7  ;;  %v419_v58 = vadd.f32 %v417_v41, %v355_v13  ;;  %v420_v59 = vadd.f32 %v418_v43, %v356_v14  ;;  %v2378_v13 = vld [vmem:[%s3526_s1 + $0x10] ss:$8 sm:$0x3] }
  0x47   :  { %v433_v60 = vmul.f32 %v2365_v19, %v429_v49  ;;  %v474_v61 = vperm.slane %v2373_v48, 1  ;;  %v434_v63 = vadd.f32 %v432_v50, %v370_v17  ;;  %v488_v7 = vperm.slane %v2374_v52, 0  ;;  %v2381_v44 = vld [vmem:[%s3526_s1 + $0xe4] ss:$8 sm:$0x3] }
  0x48   :  { %v448_v0 = vmul.f32 %v2365_v19, %v444_v53  ;;  %v461_v2 = vsel %vm19_vm0, %v458_v46, %v460_v56  ;;  %v462_v3 = vsel %vm21_vm1, %v458_v46, %v460_v56  ;;  %v449_v9 = vadd.f32 %v447_v54, %v385_v27  ;;  %v2377_v48 = vld [vmem:[%s3527_s0 + $0x60] ss:$8 sm:$0x3] }
  0x49   :  { %v463_v4 = vrot.slane %v462_v3, 1  ;;  %v466_v5 = vmul.f32 %v2370_v55, %v461_v2  ;;  %v475_v6 = vrot.slane %v474_v61, 7  ;;  %v435_v8 = vadd.f32 %v433_v60, %v371_v26 }
  0x4a   :  { %v489_v10 = vperm.slane %v2374_v52, 1  ;;  %v504_v12 = vperm.slane %v2375_v62, 1  ;;  %v503_v16 = vperm.slane %v2375_v62, 0  ;;  %v450_v17 = vadd.f32 %v448_v0, %v386_v35 }
  0x4b   :  { %v467_v14 = vmul.f32 %v2371_v1, %v463_v4  ;;  %v476_v11 = vsel %vm19_vm0, %v473_v57, %v475_v6  ;;  %v477_v15 = vsel %vm21_vm1, %v473_v57, %v475_v6  ;;  %v468_v21 = vadd.f32 %v466_v5, %v404_v39 }
  0x4c   :  { %v478_v18 = vrot.slane %v477_v15, 1  ;;  %v490_v19 = vrot.slane %v489_v10, 7  ;;  %v505_v20 = vrot.slane %v504_v12, 7  ;;  %v481_v23 = vmul.f32 %v2370_v55, %v476_v11  ;;  %v2385_v12 = vld [vmem:[%s3526_s1 + $0x55] ss:$8 sm:$0x3] }
  0x4d   :  { %v469_v22 = vadd.f32 %v467_v14, %v405_v40  ;;  %v523_v24 = vperm.slane %v2378_v13, 1  ;;  %v522_v28 = vperm.slane %v2378_v13, 0  ;;  %v537_v39 = vperm.slane %v2379_v29, 0 }
  0x4e   :  { %v482_v25 = vmul.f32 %v2371_v1, %v478_v18  ;;  %v491_v26 = vsel %vm19_vm0, %v488_v7, %v490_v19  ;;  %v492_v27 = vsel %vm21_vm1, %v488_v7, %v490_v19  ;;  %v506_v32 = vsel %vm19_vm0, %v503_v16, %v505_v20  ;;  %v2382_v19 = vld [vmem:[%s3527_s0 + $0x11] ss:$8 sm:$0x3] }
  0x4f   :  { %v493_v30 = vrot.slane %v492_v27, 1  ;;  %v496_v31 = vmul.f32 %v2370_v55, %v491_v26  ;;  %v507_v33 = vsel %vm21_vm1, %v503_v16, %v505_v20  ;;  %v511_v36 = vmul.f32 %v2370_v55, %v506_v32  ;;  %v2386_v16 = vld [vmem:[%s3526_s1 + $0xa1] ss:$8 sm:$0x3] }
  0x50   :  { %v508_v35 = vrot.slane %v507_v33, 1  ;;  %v524_v38 = vrot.slane %v523_v24, 7  ;;  %v483_v40 = vadd.f32 %v481_v23, %v419_v58  ;;  %v484_v41 = vadd.f32 %v482_v25, %v420_v59  ;;  %v2384_v58 = vld [vmem:[%s3526_s1 + $0x11] ss:$8 sm:$0x3] }
  0x51   :  { %v497_v42 = vmul.f32 %v2371_v1, %v493_v30  ;;  %v538_v43 = vperm.slane %v2379_v29, 1  ;;  %v498_v45 = vadd.f32 %v496_v31, %v434_v63  ;;  %v552_v53 = vperm.slane %v2380_v34, 0  ;;  %v2387_v26 = vld [vmem:[%s3526_s1 + $0xe5] ss:$8 sm:$0x3] }
  0x52   :  { %v512_v46 = vmul.f32 %v2371_v1, %v508_v35  ;;  %v525_v49 = vsel %vm19_vm0, %v522_v28, %v524_v38  ;;  %v526_v50 = vsel %vm21_vm1, %v522_v28, %v524_v38  ;;  %v513_v55 = vadd.f32 %v511_v36, %v449_v9  ;;  %v2383_v29 = vld [vmem:[%s3527_s0 + $0x61] ss:$8 sm:$0x3] }
  0x53   :  { %v527_v47 = vrot.slane %v526_v50, 1  ;;  %v530_v51 = vmul.f32 %v2376_v37, %v525_v49  ;;  %v539_v52 = vrot.slane %v538_v43, 7  ;;  %v499_v54 = vadd.f32 %v497_v42, %v435_v8 }
  0x54   :  { %v553_v56 = vperm.slane %v2380_v34, 1  ;;  %v568_v57 = vperm.slane %v2381_v44, 1  ;;  %v567_v62 = vperm.slane %v2381_v44, 0  ;;  %v514_v63 = vadd.f32 %v512_v46, %v450_v17 }
  0x55   :  { %v531_v59 = vmul.f32 %v2377_v48, %v527_v47  ;;  %v540_v60 = vsel %vm19_vm0, %v537_v39, %v539_v52  ;;  %v541_v61 = vsel %vm21_vm1, %v537_v39, %v539_v52  ;;  %v532_v3 = vadd.f32 %v530_v51, %v468_v21 }
  0x56   :  { %v542_v0 = vrot.slane %v541_v61, 1  ;;  %v554_v1 = vrot.slane %v553_v56, 7  ;;  %v569_v2 = vrot.slane %v568_v57, 7  ;;  %v545_v5 = vmul.f32 %v2376_v37, %v540_v60  ;;  %v2391_v57 = vld [vmem:[%s3526_s1 + $0x56] ss:$8 sm:$0x3] }
  0x57   :  { %v533_v4 = vadd.f32 %v531_v59, %v469_v22  ;;  %v587_v6 = vperm.slane %v2384_v58, 1  ;;  %v586_v10 = vperm.slane %v2384_v58, 0  ;;  %v601_v21 = vperm.slane %v2385_v12, 0 }
  0x58   :  { %v546_v7 = vmul.f32 %v2377_v48, %v542_v0  ;;  %v555_v8 = vsel %vm19_vm0, %v552_v53, %v554_v1  ;;  %v556_v9 = vsel %vm21_vm1, %v552_v53, %v554_v1  ;;  %v570_v11 = vsel %vm19_vm0, %v567_v62, %v569_v2  ;;  %v2388_v1 = vld [vmem:[%s3527_s0 + $0x12] ss:$8 sm:$0x3] }
  0x59   :  { %v557_v13 = vrot.slane %v556_v9, 1  ;;  %v560_v14 = vmul.f32 %v2376_v37, %v555_v8  ;;  %v571_v15 = vsel %vm21_vm1, %v567_v62, %v569_v2  ;;  %v575_v18 = vmul.f32 %v2376_v37, %v570_v11  ;;  %v2392_v62 = vld [vmem:[%s3526_s1 + $0xa2] ss:$8 sm:$0x3] }
  0x5a   :  { %v572_v17 = vrot.slane %v571_v15, 1  ;;  %v588_v20 = vrot.slane %v587_v6, 7  ;;  %v547_v22 = vadd.f32 %v545_v5, %v483_v40  ;;  %v548_v23 = vadd.f32 %v546_v7, %v484_v41  ;;  %v2390_v40 = vld [vmem:[%s3526_s1 + $0x12] ss:$8 sm:$0x3] }
  0x5b   :  { %v561_v24 = vmul.f32 %v2377_v48, %v557_v13  ;;  %v602_v25 = vperm.slane %v2385_v12, 1  ;;  %v562_v27 = vadd.f32 %v560_v14, %v498_v45  ;;  %v616_v35 = vperm.slane %v2386_v16, 0  ;;  %v2393_v8 = vld [vmem:[%s3526_s1 + $0xe6] ss:$8 sm:$0x3] }
  0x5c   :  { %v576_v28 = vmul.f32 %v2377_v48, %v572_v17  ;;  %v589_v30 = vsel %vm19_vm0, %v586_v10, %v588_v20  ;;  %v590_v31 = vsel %vm21_vm1, %v586_v10, %v588_v20  ;;  %v577_v37 = vadd.f32 %v575_v18, %v513_v55  ;;  %v2389_v12 = vld [vmem:[%s3527_s0 + $0x62] ss:$8 sm:$0x3] }
  0x5d   :  { %v591_v32 = vrot.slane %v590_v31, 1  ;;  %v594_v33 = vmul.f32 %v2382_v19, %v589_v30  ;;  %v603_v34 = vrot.slane %v602_v25, 7  ;;  %v563_v36 = vadd.f32 %v561_v24, %v499_v54 }
  0x5e   :  { %v617_v38 = vperm.slane %v2386_v16, 1  ;;  %v632_v39 = vperm.slane %v2387_v26, 1  ;;  %v631_v44 = vperm.slane %v2387_v26, 0  ;;  %v578_v45 = vadd.f32 %v576_v28, %v514_v63 }
  0x5f   :  { %v595_v41 = vmul.f32 %v2383_v29, %v591_v32  ;;  %v604_v42 = vsel %vm19_vm0, %v601_v21, %v603_v34  ;;  %v605_v43 = vsel %vm21_vm1, %v601_v21, %v603_v34  ;;  %v596_v50 = vadd.f32 %v594_v33, %v532_v3 }
  0x60   :  { %v606_v46 = vrot.slane %v605_v43, 1  ;;  %v618_v48 = vrot.slane %v617_v38, 7  ;;  %v633_v49 = vrot.slane %v632_v39, 7  ;;  %v609_v51 = vmul.f32 %v2382_v19, %v604_v42  ;;  %v2397_v39 = vld [vmem:[%s3526_s1 + $0x57] ss:$8 sm:$0x3] }
  0x61   :  { %v597_v47 = vadd.f32 %v595_v41, %v533_v4  ;;  %v651_v52 = vperm.slane %v2390_v40, 1  ;;  %v650_v56 = vperm.slane %v2390_v40, 0  ;;  %v665_v3 = vperm.slane %v2391_v57, 0 }
  0x62   :  { %v610_v53 = vmul.f32 %v2383_v29, %v606_v46  ;;  %v619_v54 = vsel %vm19_vm0, %v616_v35, %v618_v48  ;;  %v620_v55 = vsel %vm21_vm1, %v616_v35, %v618_v48  ;;  %v634_v60 = vsel %vm19_vm0, %v631_v44, %v633_v49  ;;  %v2394_v48 = vld [vmem:[%s3527_s0 + $0x13] ss:$8 sm:$0x3] }
  0x63   :  { %v621_v58 = vrot.slane %v620_v55, 1  ;;  %v624_v59 = vmul.f32 %v2382_v19, %v619_v54  ;;  %v635_v61 = vsel %vm21_vm1, %v631_v44, %v633_v49  ;;  %v639_v0 = vmul.f32 %v2382_v19, %v634_v60  ;;  %v2398_v44 = vld [vmem:[%s3526_s1 + $0xa3] ss:$8 sm:$0x3] }
  0x64   :  { %v636_v63 = vrot.slane %v635_v61, 1  ;;  %v652_v2 = vrot.slane %v651_v52, 7  ;;  %v611_v4 = vadd.f32 %v609_v51, %v547_v22  ;;  %v612_v5 = vadd.f32 %v610_v53, %v548_v23  ;;  %v2396_v22 = vld [vmem:[%s3526_s1 + $0x13] ss:$8 sm:$0x3] }
  0x65   :  { %v625_v6 = vmul.f32 %v2383_v29, %v621_v58  ;;  %v666_v7 = vperm.slane %v2391_v57, 1  ;;  %v626_v9 = vadd.f32 %v624_v59, %v562_v27  ;;  %v680_v17 = vperm.slane %v2392_v62, 0  ;;  %v2399_v54 = vld [vmem:[%s3526_s1 + $0xe7] ss:$8 sm:$0x3] }
  0x66   :  { %v640_v10 = vmul.f32 %v2383_v29, %v636_v63  ;;  %v653_v13 = vsel %vm19_vm0, %v650_v56, %v652_v2  ;;  %v654_v14 = vsel %vm21_vm1, %v650_v56, %v652_v2  ;;  %v641_v19 = vadd.f32 %v639_v0, %v577_v37  ;;  %v2395_v57 = vld [vmem:[%s3527_s0 + $0x63] ss:$8 sm:$0x3] }
  0x67   :  { %v655_v11 = vrot.slane %v654_v14, 1  ;;  %v658_v15 = vmul.f32 %v2388_v1, %v653_v13  ;;  %v667_v16 = vrot.slane %v666_v7, 7  ;;  %v627_v18 = vadd.f32 %v625_v6, %v563_v36 }
  0x68   :  { %v681_v20 = vperm.slane %v2392_v62, 1  ;;  %v696_v21 = vperm.slane %v2393_v8, 1  ;;  %v695_v26 = vperm.slane %v2393_v8, 0  ;;  %v642_v27 = vadd.f32 %v640_v10, %v578_v45 }
  0x69   :  { %v659_v23 = vmul.f32 %v2389_v12, %v655_v11  ;;  %v668_v24 = vsel %vm19_vm0, %v665_v3, %v667_v16  ;;  %v669_v25 = vsel %vm21_vm1, %v665_v3, %v667_v16  ;;  %v660_v31 = vadd.f32 %v658_v15, %v596_v50 }
  0x6a   :  { %v670_v28 = vrot.slane %v669_v25, 1  ;;  %v682_v29 = vrot.slane %v681_v20, 7  ;;  %v697_v30 = vrot.slane %v696_v21, 7  ;;  %v673_v33 = vmul.f32 %v2388_v1, %v668_v24  ;;  %v2403_v21 = vld [vmem:[%s3526_s1 + $0x60] ss:$8 sm:$0x3] }
  0x6b   :  { %v661_v32 = vadd.f32 %v659_v23, %v597_v47  ;;  %v715_v34 = vperm.slane %v2396_v22, 1  ;;  %v714_v38 = vperm.slane %v2396_v22, 0  ;;  %v729_v50 = vperm.slane %v2397_v39, 0 }
  0x6c   :  { %v674_v35 = vmul.f32 %v2389_v12, %v670_v28  ;;  %v683_v36 = vsel %vm19_vm0, %v680_v17, %v682_v29  ;;  %v684_v37 = vsel %vm21_vm1, %v680_v17, %v682_v29  ;;  %v698_v42 = vsel %vm19_vm0, %v695_v26, %v697_v30  ;;  %v2400_v29 = vld [vmem:[%s3527_s0 + $0x14] ss:$8 sm:$0x3] }
  0x6d   :  { %v685_v40 = vrot.slane %v684_v37, 1  ;;  %v688_v41 = vmul.f32 %v2388_v1, %v683_v36  ;;  %v699_v43 = vsel %vm21_vm1, %v695_v26, %v697_v30  ;;  %v703_v46 = vmul.f32 %v2388_v1, %v698_v42  ;;  %v2404_v26 = vld [vmem:[%s3526_s1 + $0xa4] ss:$8 sm:$0x3] }
  0x6e   :  { %v700_v45 = vrot.slane %v699_v43, 1  ;;  %v716_v49 = vrot.slane %v715_v34, 7  ;;  %v675_v47 = vadd.f32 %v673_v33, %v611_v4  ;;  %v676_v51 = vadd.f32 %v674_v35, %v612_v5  ;;  %v2402_v4 = vld [vmem:[%s3526_s1 + $0x14] ss:$8 sm:$0x3] }
  0x6f   :  { %v689_v52 = vmul.f32 %v2389_v12, %v685_v40  ;;  %v730_v53 = vperm.slane %v2397_v39, 1  ;;  %v690_v55 = vadd.f32 %v688_v41, %v626_v9  ;;  %v744_v63 = vperm.slane %v2398_v44, 0  ;;  %v2405_v36 = vld [vmem:[%s3526_s1 + $0xf0] ss:$8 sm:$0x3] }
  0x70   :  { %v704_v56 = vmul.f32 %v2389_v12, %v700_v45  ;;  %v717_v58 = vsel %vm19_vm0, %v714_v38, %v716_v49  ;;  %v718_v59 = vsel %vm21_vm1, %v714_v38, %v716_v49  ;;  %v705_v1 = vadd.f32 %v703_v46, %v641_v19  ;;  %v2401_v39 = vld [vmem:[%s3527_s0 + $0x64] ss:$8 sm:$0x3] }
  0x71   :  { %v719_v60 = vrot.slane %v718_v59, 1  ;;  %v722_v61 = vmul.f32 %v2394_v48, %v717_v58  ;;  %v731_v62 = vrot.slane %v730_v53, 7  ;;  %v691_v0 = vadd.f32 %v689_v52, %v627_v18 }
  0x72   :  { %v745_v2 = vperm.slane %v2398_v44, 1  ;;  %v760_v3 = vperm.slane %v2399_v54, 1  ;;  %v759_v8 = vperm.slane %v2399_v54, 0  ;;  %v706_v9 = vadd.f32 %v704_v56, %v642_v27 }
  0x73   :  { %v723_v5 = vmul.f32 %v2395_v57, %v719_v60  ;;  %v732_v6 = vsel %vm19_vm0, %v729_v50, %v731_v62  ;;  %v733_v7 = vsel %vm21_vm1, %v729_v50, %v731_v62  ;;  %v724_v14 = vadd.f32 %v722_v61, %v660_v31 }
  0x74   :  { %v734_v10 = vrot.slane %v733_v7, 1  ;;  %v746_v12 = vrot.slane %v745_v2, 7  ;;  %v761_v13 = vrot.slane %v760_v3, 7  ;;  %v737_v15 = vmul.f32 %v2394_v48, %v732_v6  ;;  %v2409_v3 = vld [vmem:[%s3526_s1 + $0x61] ss:$8 sm:$0x3] }
  0x75   :  { %v725_v11 = vadd.f32 %v723_v5, %v661_v32  ;;  %v779_v16 = vperm.slane %v2402_v4, 1  ;;  %v778_v20 = vperm.slane %v2402_v4, 0  ;;  %v793_v31 = vperm.slane %v2403_v21, 0 }
  0x76   :  { %v738_v17 = vmul.f32 %v2395_v57, %v734_v10  ;;  %v747_v18 = vsel %vm19_vm0, %v744_v63, %v746_v12  ;;  %v748_v19 = vsel %vm21_vm1, %v744_v63, %v746_v12  ;;  %v762_v24 = vsel %vm19_vm0, %v759_v8, %v761_v13  ;;  %v2406_v12 = vld [vmem:[%s3527_s0 + $0x15] ss:$8 sm:$0x3] }
  0x77   :  { %v749_v22 = vrot.slane %v748_v19, 1  ;;  %v752_v23 = vmul.f32 %v2394_v48, %v747_v18  ;;  %v763_v25 = vsel %vm21_vm1, %v759_v8, %v761_v13  ;;  %v767_v28 = vmul.f32 %v2394_v48, %v762_v24  ;;  %v2410_v8 = vld [vmem:[%s3526_s1 + $0xa5] ss:$8 sm:$0x3] }
  0x78   :  { %v764_v27 = vrot.slane %v763_v25, 1  ;;  %v780_v30 = vrot.slane %v779_v16, 7  ;;  %v739_v32 = vadd.f32 %v737_v15, %v675_v47  ;;  %v740_v33 = vadd.f32 %v738_v17, %v676_v51  ;;  %v2408_v47 = vld [vmem:[%s3526_s1 + $0x15] ss:$8 sm:$0x3] }
  0x79   :  { %v753_v34 = vmul.f32 %v2395_v57, %v749_v22  ;;  %v794_v35 = vperm.slane %v2403_v21, 1  ;;  %v754_v37 = vadd.f32 %v752_v23, %v690_v55  ;;  %v808_v45 = vperm.slane %v2404_v26, 0  ;;  %v2411_v18 = vld [vmem:[%s3526_s1 + $0xf1] ss:$8 sm:$0x3] }
  0x7a   :  { %v768_v38 = vmul.f32 %v2395_v57, %v764_v27  ;;  %v781_v40 = vsel %vm19_vm0, %v778_v20, %v780_v30  ;;  %v782_v41 = vsel %vm21_vm1, %v778_v20, %v780_v30  ;;  %v769_v48 = vadd.f32 %v767_v28, %v705_v1  ;;  %v2407_v21 = vld [vmem:[%s3527_s0 + $0x65] ss:$8 sm:$0x3] }
  0x7b   :  { %v783_v42 = vrot.slane %v782_v41, 1  ;;  %v786_v43 = vmul.f32 %v2400_v29, %v781_v40  ;;  %v795_v44 = vrot.slane %v794_v35, 7  ;;  %v755_v46 = vadd.f32 %v753_v34, %v691_v0 }
  0x7c   :  { %v809_v49 = vperm.slane %v2404_v26, 1  ;;  %v824_v50 = vperm.slane %v2405_v36, 1  ;;  %v823_v54 = vperm.slane %v2405_v36, 0  ;;  %v770_v55 = vadd.f32 %v768_v38, %v706_v9 }
  0x7d   :  { %v787_v51 = vmul.f32 %v2401_v39, %v783_v42  ;;  %v796_v52 = vsel %vm19_vm0, %v793_v31, %v795_v44  ;;  %v797_v53 = vsel %vm21_vm1, %v793_v31, %v795_v44  ;;  %v788_v59 = vadd.f32 %v786_v43, %v724_v14 }
  0x7e   :  { %v798_v56 = vrot.slane %v797_v53, 1  ;;  %v810_v57 = vrot.slane %v809_v49, 7  ;;  %v825_v58 = vrot.slane %v824_v50, 7  ;;  %v801_v61 = vmul.f32 %v2400_v29, %v796_v52  ;;  %v2415_v50 = vld [vmem:[%s3526_s1 + $0x62] ss:$8 sm:$0x3] }
  0x7f   :  { %v789_v60 = vadd.f32 %v787_v51, %v725_v11  ;;  %v843_v62 = vperm.slane %v2408_v47, 1  ;;  %v842_v2 = vperm.slane %v2408_v47, 0  ;;  %v857_v14 = vperm.slane %v2409_v3, 0 }
  0x80   :  { %v802_v63 = vmul.f32 %v2401_v39, %v798_v56  ;;  %v811_v0 = vsel %vm19_vm0, %v808_v45, %v810_v57  ;;  %v812_v1 = vsel %vm21_vm1, %v808_v45, %v810_v57  ;;  %v826_v6 = vsel %vm19_vm0, %v823_v54, %v825_v58  ;;  %v2412_v57 = vld [vmem:[%s3527_s0 + $0x16] ss:$8 sm:$0x3] }
  0x81   :  { %v813_v4 = vrot.slane %v812_v1, 1  ;;  %v816_v5 = vmul.f32 %v2400_v29, %v811_v0  ;;  %v827_v7 = vsel %vm21_vm1, %v823_v54, %v825_v58  ;;  %v831_v10 = vmul.f32 %v2400_v29, %v826_v6  ;;  %v2416_v54 = vld [vmem:[%s3526_s1 + $0xa6] ss:$8 sm:$0x3] }
  0x82   :  { %v828_v9 = vrot.slane %v827_v7, 1  ;;  %v844_v13 = vrot.slane %v843_v62, 7  ;;  %v803_v11 = vadd.f32 %v801_v61, %v739_v32  ;;  %v804_v15 = vadd.f32 %v802_v63, %v740_v33  ;;  %v2414_v32 = vld [vmem:[%s3526_s1 + $0x16] ss:$8 sm:$0x3] }
  0x83   :  { %v817_v16 = vmul.f32 %v2401_v39, %v813_v4  ;;  %v858_v17 = vperm.slane %v2409_v3, 1  ;;  %v818_v19 = vadd.f32 %v816_v5, %v754_v37  ;;  %v872_v27 = vperm.slane %v2410_v8, 0  ;;  %v2417_v0 = vld [vmem:[%s3526_s1 + $0xf2] ss:$8 sm:$0x3] }
  0x84   :  { %v832_v20 = vmul.f32 %v2401_v39, %v828_v9  ;;  %v845_v22 = vsel %vm19_vm0, %v842_v2, %v844_v13  ;;  %v846_v23 = vsel %vm21_vm1, %v842_v2, %v844_v13  ;;  %v833_v29 = vadd.f32 %v831_v10, %v769_v48  ;;  %v2413_v3 = vld [vmem:[%s3527_s0 + $0x66] ss:$8 sm:$0x3] }
  0x85   :  { %v847_v24 = vrot.slane %v846_v23, 1  ;;  %v850_v25 = vmul.f32 %v2406_v12, %v845_v22  ;;  %v859_v26 = vrot.slane %v858_v17, 7  ;;  %v819_v28 = vadd.f32 %v817_v16, %v755_v46 }
  0x86   :  { %v873_v30 = vperm.slane %v2410_v8, 1  ;;  %v888_v31 = vperm.slane %v2411_v18, 1  ;;  %v887_v36 = vperm.slane %v2411_v18, 0  ;;  %v834_v37 = vadd.f32 %v832_v20, %v770_v55 }
  0x87   :  { %v851_v33 = vmul.f32 %v2407_v21, %v847_v24  ;;  %v860_v34 = vsel %vm19_vm0, %v857_v14, %v859_v26  ;;  %v861_v35 = vsel %vm21_vm1, %v857_v14, %v859_v26  ;;  %v852_v41 = vadd.f32 %v850_v25, %v788_v59 }
  0x88   :  { %v862_v38 = vrot.slane %v861_v35, 1  ;;  %v874_v39 = vrot.slane %v873_v30, 7  ;;  %v889_v40 = vrot.slane %v888_v31, 7  ;;  %v865_v43 = vmul.f32 %v2406_v12, %v860_v34  ;;  %v2421_v31 = vld [vmem:[%s3526_s1 + $0x63] ss:$8 sm:$0x3] }
  0x89   :  { %v853_v42 = vadd.f32 %v851_v33, %v789_v60  ;;  %v907_v44 = vperm.slane %v2414_v32, 1  ;;  %v906_v49 = vperm.slane %v2414_v32, 0  ;;  %v921_v59 = vperm.slane %v2415_v50, 0 }
  0x8a   :  { %v866_v45 = vmul.f32 %v2407_v21, %v862_v38  ;;  %v875_v46 = vsel %vm19_vm0, %v872_v27, %v874_v39  ;;  %v876_v48 = vsel %vm21_vm1, %v872_v27, %v874_v39  ;;  %v890_v52 = vsel %vm19_vm0, %v887_v36, %v889_v40  ;;  %v2418_v39 = vld [vmem:[%s3527_s0 + $0x17] ss:$8 sm:$0x3] }
  0x8b   :  { %v877_v47 = vrot.slane %v876_v48, 1  ;;  %v880_v51 = vmul.f32 %v2406_v12, %v875_v46  ;;  %v891_v53 = vsel %vm21_vm1, %v887_v36, %v889_v40  ;;  %v895_v56 = vmul.f32 %v2406_v12, %v890_v52  ;;  %v2422_v36 = vld [vmem:[%s3526_s1 + $0xa7] ss:$8 sm:$0x3] }
  0x8c   :  { %v892_v55 = vrot.slane %v891_v53, 1  ;;  %v908_v58 = vrot.slane %v907_v44, 7  ;;  %v867_v60 = vadd.f32 %v865_v43, %v803_v11  ;;  %v868_v61 = vadd.f32 %v866_v45, %v804_v15  ;;  %v2420_v11 = vld [vmem:[%s3526_s1 + $0x17] ss:$8 sm:$0x3] }
  0x8d   :  { %v881_v62 = vmul.f32 %v2407_v21, %v877_v47  ;;  %v922_v63 = vperm.slane %v2415_v50, 1  ;;  %v882_v1 = vadd.f32 %v880_v51, %v818_v19  ;;  %v936_v9 = vperm.slane %v2416_v54, 0  ;;  %v2423_v46 = vld [vmem:[%s3526_s1 + $0xf3] ss:$8 sm:$0x3] }
  0x8e   :  { %v896_v2 = vmul.f32 %v2407_v21, %v892_v55  ;;  %v909_v4 = vsel %vm19_vm0, %v906_v49, %v908_v58  ;;  %v910_v5 = vsel %vm21_vm1, %v906_v49, %v908_v58  ;;  %v897_v12 = vadd.f32 %v895_v56, %v833_v29  ;;  %v2419_v50 = vld [vmem:[%s3527_s0 + $0x67] ss:$8 sm:$0x3] }
  0x8f   :  { %v911_v6 = vrot.slane %v910_v5, 1  ;;  %v914_v7 = vmul.f32 %v2412_v57, %v909_v4  ;;  %v923_v8 = vrot.slane %v922_v63, 7  ;;  %v883_v10 = vadd.f32 %v881_v62, %v819_v28 }
  0x90   :  { %v937_v13 = vperm.slane %v2416_v54, 1  ;;  %v952_v14 = vperm.slane %v2417_v0, 1  ;;  %v951_v18 = vperm.slane %v2417_v0, 0  ;;  %v898_v19 = vadd.f32 %v896_v2, %v834_v37 }
  0x91   :  { %v915_v15 = vmul.f32 %v2413_v3, %v911_v6  ;;  %v924_v16 = vsel %vm19_vm0, %v921_v59, %v923_v8  ;;  %v925_v17 = vsel %vm21_vm1, %v921_v59, %v923_v8  ;;  %v916_v23 = vadd.f32 %v914_v7, %v852_v41 }
  0x92   :  { %v926_v20 = vrot.slane %v925_v17, 1  ;;  %v938_v21 = vrot.slane %v937_v13, 7  ;;  %v953_v22 = vrot.slane %v952_v14, 7  ;;  %v929_v25 = vmul.f32 %v2412_v57, %v924_v16  ;;  %v2427_v14 = vld [vmem:[%s3526_s1 + $0x64] ss:$8 sm:$0x3] }
  0x93   :  { %v917_v24 = vadd.f32 %v915_v15, %v853_v42  ;;  %v971_v26 = vperm.slane %v2420_v11, 1  ;;  %v970_v30 = vperm.slane %v2420_v11, 0  ;;  %v985_v41 = vperm.slane %v2421_v31, 0 }
  0x94   :  { %v930_v27 = vmul.f32 %v2413_v3, %v926_v20  ;;  %v939_v28 = vsel %vm19_vm0, %v936_v9, %v938_v21  ;;  %v940_v29 = vsel %vm21_vm1, %v936_v9, %v938_v21  ;;  %v954_v34 = vsel %vm19_vm0, %v951_v18, %v953_v22  ;;  %v2424_v21 = vld [vmem:[%s3527_s0 + $0x20] ss:$8 sm:$0x3] }
  0x95   :  { %v941_v32 = vrot.slane %v940_v29, 1  ;;  %v944_v33 = vmul.f32 %v2412_v57, %v939_v28  ;;  %v955_v35 = vsel %vm21_vm1, %v951_v18, %v953_v22  ;;  %v959_v38 = vmul.f32 %v2412_v57, %v954_v34  ;;  %v2428_v18 = vld [vmem:[%s3526_s1 + $0xb0] ss:$8 sm:$0x3] }
  0x96   :  { %v956_v37 = vrot.slane %v955_v35, 1  ;;  %v972_v40 = vrot.slane %v971_v26, 7  ;;  %v931_v42 = vadd.f32 %v929_v25, %v867_v60  ;;  %v932_v43 = vadd.f32 %v930_v27, %v868_v61  ;;  %v2426_v60 = vld [vmem:[%s3526_s1 + $0x20] ss:$8 sm:$0x3] }
  0x97   :  { %v945_v44 = vmul.f32 %v2413_v3, %v941_v32  ;;  %v986_v45 = vperm.slane %v2421_v31, 1  ;;  %v946_v48 = vadd.f32 %v944_v33, %v882_v1  ;;  %v1000_v55 = vperm.slane %v2422_v36, 0  ;;  %v2429_v28 = vld [vmem:[%s3526_s1 + $0xf4] ss:$8 sm:$0x3] }
  0x98   :  { %v960_v49 = vmul.f32 %v2413_v3, %v956_v37  ;;  %v973_v47 = vsel %vm19_vm0, %v970_v30, %v972_v40  ;;  %v974_v51 = vsel %vm21_vm1, %v970_v30, %v972_v40  ;;  %v961_v57 = vadd.f32 %v959_v38, %v897_v12  ;;  %v2425_v31 = vld [vmem:[%s3527_s0 + $0x70] ss:$8 sm:$0x3] }
  0x99   :  { %v975_v52 = vrot.slane %v974_v51, 1  ;;  %v978_v53 = vmul.f32 %v2418_v39, %v973_v47  ;;  %v987_v54 = vrot.slane %v986_v45, 7  ;;  %v947_v56 = vadd.f32 %v945_v44, %v883_v10 }
  0x9a   :  { %v1001_v58 = vperm.slane %v2422_v36, 1  ;;  %v1016_v59 = vperm.slane %v2423_v46, 1  ;;  %v1015_v0 = vperm.slane %v2423_v46, 0  ;;  %v962_v1 = vadd.f32 %v960_v49, %v898_v19 }
  0x9b   :  { %v979_v61 = vmul.f32 %v2419_v50, %v975_v52  ;;  %v988_v62 = vsel %vm19_vm0, %v985_v41, %v987_v54  ;;  %v989_v63 = vsel %vm21_vm1, %v985_v41, %v987_v54  ;;  %v980_v5 = vadd.f32 %v978_v53, %v916_v23 }
  0x9c   :  { %v990_v2 = vrot.slane %v989_v63, 1  ;;  %v1002_v3 = vrot.slane %v1001_v58, 7  ;;  %v1017_v4 = vrot.slane %v1016_v59, 7  ;;  %v993_v7 = vmul.f32 %v2418_v39, %v988_v62  ;;  %v2433_v59 = vld [vmem:[%s3526_s1 + $0x65] ss:$8 sm:$0x3] }
  0x9d   :  { %v981_v6 = vadd.f32 %v979_v61, %v917_v24  ;;  %v1035_v8 = vperm.slane %v2426_v60, 1  ;;  %v1034_v13 = vperm.slane %v2426_v60, 0  ;;  %v1049_v23 = vperm.slane %v2427_v14, 0 }
  0x9e   :  { %v994_v9 = vmul.f32 %v2419_v50, %v990_v2  ;;  %v1003_v10 = vsel %vm19_vm0, %v1000_v55, %v1002_v3  ;;  %v1004_v12 = vsel %vm21_vm1, %v1000_v55, %v1002_v3  ;;  %v1018_v16 = vsel %vm19_vm0, %v1015_v0, %v1017_v4  ;;  %v2430_v3 = vld [vmem:[%s3527_s0 + $0x21] ss:$8 sm:$0x3] }
  0x9f   :  { %v1005_v11 = vrot.slane %v1004_v12, 1  ;;  %v1008_v15 = vmul.f32 %v2418_v39, %v1003_v10  ;;  %v1019_v17 = vsel %vm21_vm1, %v1015_v0, %v1017_v4  ;;  %v1023_v20 = vmul.f32 %v2418_v39, %v1018_v16  ;;  %v2434_v0 = vld [vmem:[%s3526_s1 + $0xb1] ss:$8 sm:$0x3] }
  0xa0   :  { %v1020_v19 = vrot.slane %v1019_v17, 1  ;;  %v1036_v22 = vrot.slane %v1035_v8, 7  ;;  %v995_v24 = vadd.f32 %v993_v7, %v931_v42  ;;  %v996_v25 = vadd.f32 %v994_v9, %v932_v43  ;;  %v2432_v42 = vld [vmem:[%s3526_s1 + $0x21] ss:$8 sm:$0x3] }
  0xa1   :  { %v1009_v26 = vmul.f32 %v2419_v50, %v1005_v11  ;;  %v1050_v27 = vperm.slane %v2427_v14, 1  ;;  %v1010_v29 = vadd.f32 %v1008_v15, %v946_v48  ;;  %v1064_v37 = vperm.slane %v2428_v18, 0  ;;  %v2435_v10 = vld [vmem:[%s3526_s1 + $0xf5] ss:$8 sm:$0x3] }
  0xa2   :  { %v1024_v30 = vmul.f32 %v2419_v50, %v1020_v19  ;;  %v1037_v32 = vsel %vm19_vm0, %v1034_v13, %v1036_v22  ;;  %v1038_v33 = vsel %vm21_vm1, %v1034_v13, %v1036_v22  ;;  %v1025_v39 = vadd.f32 %v1023_v20, %v961_v57  ;;  %v2431_v14 = vld [vmem:[%s3527_s0 + $0x71] ss:$8 sm:$0x3] }
  0xa3   :  { %v1039_v34 = vrot.slane %v1038_v33, 1  ;;  %v1042_v35 = vmul.f32 %v2424_v21, %v1037_v32  ;;  %v1051_v36 = vrot.slane %v1050_v27, 7  ;;  %v1011_v38 = vadd.f32 %v1009_v26, %v947_v56 }
  0xa4   :  { %v1065_v40 = vperm.slane %v2428_v18, 1  ;;  %v1080_v41 = vperm.slane %v2429_v28, 1  ;;  %v1079_v46 = vperm.slane %v2429_v28, 0  ;;  %v1026_v48 = vadd.f32 %v1024_v30, %v962_v1 }
  0xa5   :  { %v1043_v43 = vmul.f32 %v2425_v31, %v1039_v34  ;;  %v1052_v44 = vsel %vm19_vm0, %v1049_v23, %v1051_v36  ;;  %v1053_v45 = vsel %vm21_vm1, %v1049_v23, %v1051_v36  ;;  %v1044_v51 = vadd.f32 %v1042_v35, %v980_v5 }
  0xa6   :  { %v1054_v49 = vrot.slane %v1053_v45, 1  ;;  %v1066_v50 = vrot.slane %v1065_v40, 7  ;;  %v1081_v47 = vrot.slane %v1080_v41, 7  ;;  %v1057_v53 = vmul.f32 %v2424_v21, %v1052_v44  ;;  %v2439_v41 = vld [vmem:[%s3526_s1 + $0x66] ss:$8 sm:$0x3] }
  0xa7   :  { %v1045_v52 = vadd.f32 %v1043_v43, %v981_v6  ;;  %v1099_v54 = vperm.slane %v2432_v42, 1  ;;  %v1098_v58 = vperm.slane %v2432_v42, 0  ;;  %v1113_v5 = vperm.slane %v2433_v59, 0 }
  0xa8   :  { %v1058_v55 = vmul.f32 %v2425_v31, %v1054_v49  ;;  %v1067_v56 = vsel %vm19_vm0, %v1064_v37, %v1066_v50  ;;  %v1068_v57 = vsel %vm21_vm1, %v1064_v37, %v1066_v50  ;;  %v1082_v62 = vsel %vm19_vm0, %v1079_v46, %v1081_v47  ;;  %v2436_v50 = vld [vmem:[%s3527_s0 + $0x22] ss:$8 sm:$0x3] }
  0xa9   :  { %v1069_v60 = vrot.slane %v1068_v57, 1  ;;  %v1072_v61 = vmul.f32 %v2424_v21, %v1067_v56  ;;  %v1083_v63 = vsel %vm21_vm1, %v1079_v46, %v1081_v47  ;;  %v1087_v2 = vmul.f32 %v2424_v21, %v1082_v62  ;;  %v2440_v46 = vld [vmem:[%s3526_s1 + $0xb2] ss:$8 sm:$0x3] }
  0xaa   :  { %v1084_v1 = vrot.slane %v1083_v63, 1  ;;  %v1100_v4 = vrot.slane %v1099_v54, 7  ;;  %v1059_v6 = vadd.f32 %v1057_v53, %v995_v24  ;;  %v1060_v7 = vadd.f32 %v1058_v55, %v996_v25  ;;  %v2438_v24 = vld [vmem:[%s3526_s1 + $0x22] ss:$8 sm:$0x3] }
  0xab   :  { %v1073_v8 = vmul.f32 %v2425_v31, %v1069_v60  ;;  %v1114_v9 = vperm.slane %v2433_v59, 1  ;;  %v1074_v12 = vadd.f32 %v1072_v61, %v1010_v29  ;;  %v1128_v19 = vperm.slane %v2434_v0, 0  ;;  %v2441_v56 = vld [vmem:[%s3526_s1 + $0xf6] ss:$8 sm:$0x3] }
  0xac   :  { %v1088_v13 = vmul.f32 %v2425_v31, %v1084_v1  ;;  %v1101_v11 = vsel %vm19_vm0, %v1098_v58, %v1100_v4  ;;  %v1102_v15 = vsel %vm21_vm1, %v1098_v58, %v1100_v4  ;;  %v1089_v21 = vadd.f32 %v1087_v2, %v1025_v39  ;;  %v2437_v59 = vld [vmem:[%s3527_s0 + $0x72] ss:$8 sm:$0x3] }
  0xad   :  { %v1103_v16 = vrot.slane %v1102_v15, 1  ;;  %v1106_v17 = vmul.f32 %v2430_v3, %v1101_v11  ;;  %v1115_v18 = vrot.slane %v1114_v9, 7  ;;  %v1075_v20 = vadd.f32 %v1073_v8, %v1011_v38 }
  0xae   :  { %v1129_v22 = vperm.slane %v2434_v0, 1  ;;  %v1144_v23 = vperm.slane %v2435_v10, 1  ;;  %v1143_v28 = vperm.slane %v2435_v10, 0  ;;  %v1090_v29 = vadd.f32 %v1088_v13, %v1026_v48 }
  0xaf   :  { %v1107_v25 = vmul.f32 %v2431_v14, %v1103_v16  ;;  %v1116_v26 = vsel %vm19_vm0, %v1113_v5, %v1115_v18  ;;  %v1117_v27 = vsel %vm21_vm1, %v1113_v5, %v1115_v18  ;;  %v1108_v33 = vadd.f32 %v1106_v17, %v1044_v51 }
  0xb0   :  { %v1118_v30 = vrot.slane %v1117_v27, 1  ;;  %v1130_v31 = vrot.slane %v1129_v22, 7  ;;  %v1145_v32 = vrot.slane %v1144_v23, 7  ;;  %v1121_v35 = vmul.f32 %v2430_v3, %v1116_v26  ;;  %v2445_v23 = vld [vmem:[%s3526_s1 + $0x67] ss:$8 sm:$0x3] }
  0xb1   :  { %v1109_v34 = vadd.f32 %v1107_v25, %v1045_v52  ;;  %v1163_v36 = vperm.slane %v2438_v24, 1  ;;  %v1162_v40 = vperm.slane %v2438_v24, 0  ;;  %v1177_v51 = vperm.slane %v2439_v41, 0 }
  0xb2   :  { %v1122_v37 = vmul.f32 %v2431_v14, %v1118_v30  ;;  %v1131_v38 = vsel %vm19_vm0, %v1128_v19, %v1130_v31  ;;  %v1132_v39 = vsel %vm21_vm1, %v1128_v19, %v1130_v31  ;;  %v1146_v44 = vsel %vm19_vm0, %v1143_v28, %v1145_v32  ;;  %v2442_v31 = vld [vmem:[%s3527_s0 + $0x23] ss:$8 sm:$0x3] }
  0xb3   :  { %v1133_v42 = vrot.slane %v1132_v39, 1  ;;  %v1136_v43 = vmul.f32 %v2430_v3, %v1131_v38  ;;  %v1147_v45 = vsel %vm21_vm1, %v1143_v28, %v1145_v32  ;;  %v1151_v49 = vmul.f32 %v2430_v3, %v1146_v44  ;;  %v2446_v28 = vld [vmem:[%s3526_s1 + $0xb3] ss:$8 sm:$0x3] }
  0xb4   :  { %v1148_v48 = vrot.slane %v1147_v45, 1  ;;  %v1164_v47 = vrot.slane %v1163_v36, 7  ;;  %v1123_v52 = vadd.f32 %v1121_v35, %v1059_v6  ;;  %v1124_v53 = vadd.f32 %v1122_v37, %v1060_v7  ;;  %v2444_v6 = vld [vmem:[%s3526_s1 + $0x23] ss:$8 sm:$0x3] }
  0xb5   :  { %v1137_v54 = vmul.f32 %v2431_v14, %v1133_v42  ;;  %v1178_v55 = vperm.slane %v2439_v41, 1  ;;  %v1138_v57 = vadd.f32 %v1136_v43, %v1074_v12  ;;  %v1192_v1 = vperm.slane %v2440_v46, 0  ;;  %v2447_v38 = vld [vmem:[%s3526_s1 + $0xf7] ss:$8 sm:$0x3] }
  0xb6   :  { %v1152_v58 = vmul.f32 %v2431_v14, %v1148_v48  ;;  %v1165_v60 = vsel %vm19_vm0, %v1162_v40, %v1164_v47  ;;  %v1166_v61 = vsel %vm21_vm1, %v1162_v40, %v1164_v47  ;;  %v1153_v3 = vadd.f32 %v1151_v49, %v1089_v21  ;;  %v2443_v41 = vld [vmem:[%s3527_s0 + $0x73] ss:$8 sm:$0x3] }
  0xb7   :  { %v1167_v62 = vrot.slane %v1166_v61, 1  ;;  %v1170_v63 = vmul.f32 %v2436_v50, %v1165_v60  ;;  %v1179_v0 = vrot.slane %v1178_v55, 7  ;;  %v1139_v2 = vadd.f32 %v1137_v54, %v1075_v20 }
  0xb8   :  { %v1193_v4 = vperm.slane %v2440_v46, 1  ;;  %v1208_v5 = vperm.slane %v2441_v56, 1  ;;  %v1207_v10 = vperm.slane %v2441_v56, 0  ;;  %v1154_v12 = vadd.f32 %v1152_v58, %v1090_v29 }
  0xb9   :  { %v1171_v7 = vmul.f32 %v2437_v59, %v1167_v62  ;;  %v1180_v8 = vsel %vm19_vm0, %v1177_v51, %v1179_v0  ;;  %v1181_v9 = vsel %vm21_vm1, %v1177_v51, %v1179_v0  ;;  %v1172_v15 = vadd.f32 %v1170_v63, %v1108_v33 }
  0xba   :  { %v1182_v13 = vrot.slane %v1181_v9, 1  ;;  %v1194_v14 = vrot.slane %v1193_v4, 7  ;;  %v1209_v11 = vrot.slane %v1208_v5, 7  ;;  %v1185_v17 = vmul.f32 %v2436_v50, %v1180_v8  ;;  %v2451_v5 = vld [vmem:[%s3526_s1 + $0x70] ss:$8 sm:$0x3] }
  0xbb   :  { %v1173_v16 = vadd.f32 %v1171_v7, %v1109_v34  ;;  %v1227_v18 = vperm.slane %v2444_v6, 1  ;;  %v1226_v22 = vperm.slane %v2444_v6, 0  ;;  %v1241_v33 = vperm.slane %v2445_v23, 0 }
  0xbc   :  { %v1186_v19 = vmul.f32 %v2437_v59, %v1182_v13  ;;  %v1195_v20 = vsel %vm19_vm0, %v1192_v1, %v1194_v14  ;;  %v1196_v21 = vsel %vm21_vm1, %v1192_v1, %v1194_v14  ;;  %v1210_v26 = vsel %vm19_vm0, %v1207_v10, %v1209_v11  ;;  %v2448_v14 = vld [vmem:[%s3527_s0 + $0x24] ss:$8 sm:$0x3] }
  0xbd   :  { %v1197_v24 = vrot.slane %v1196_v21, 1  ;;  %v1200_v25 = vmul.f32 %v2436_v50, %v1195_v20  ;;  %v1211_v27 = vsel %vm21_vm1, %v1207_v10, %v1209_v11  ;;  %v1215_v30 = vmul.f32 %v2436_v50, %v1210_v26  ;;  %v2452_v10 = vld [vmem:[%s3526_s1 + $0xb4] ss:$8 sm:$0x3] }
  0xbe   :  { %v1212_v29 = vrot.slane %v1211_v27, 1  ;;  %v1228_v32 = vrot.slane %v1227_v18, 7  ;;  %v1187_v34 = vadd.f32 %v1185_v17, %v1123_v52  ;;  %v1188_v35 = vadd.f32 %v1186_v19, %v1124_v53  ;;  %v2450_v52 = vld [vmem:[%s3526_s1 + $0x24] ss:$8 sm:$0x3] }
  0xbf   :  { %v1201_v36 = vmul.f32 %v2437_v59, %v1197_v24  ;;  %v1242_v37 = vperm.slane %v2445_v23, 1  ;;  %v1202_v39 = vadd.f32 %v1200_v25, %v1138_v57  ;;  %v1256_v48 = vperm.slane %v2446_v28, 0  ;;  %v2453_v20 = vld [vmem:[%s3526_s1 + $0x100] ss:$8 sm:$0x3] }
  0xc0   :  { %v1216_v40 = vmul.f32 %v2437_v59, %v1212_v29  ;;  %v1229_v42 = vsel %vm19_vm0, %v1226_v22, %v1228_v32  ;;  %v1230_v43 = vsel %vm21_vm1, %v1226_v22, %v1228_v32  ;;  %v1217_v50 = vadd.f32 %v1215_v30, %v1153_v3  ;;  %v2449_v23 = vld [vmem:[%s3527_s0 + $0x74] ss:$8 sm:$0x3] }
  0xc1   :  { %v1231_v44 = vrot.slane %v1230_v43, 1  ;;  %v1234_v45 = vmul.f32 %v2442_v31, %v1229_v42  ;;  %v1243_v46 = vrot.slane %v1242_v37, 7  ;;  %v1203_v49 = vadd.f32 %v1201_v36, %v1139_v2 }
  0xc2   :  { %v1257_v47 = vperm.slane %v2446_v28, 1  ;;  %v1272_v51 = vperm.slane %v2447_v38, 1  ;;  %v1271_v56 = vperm.slane %v2447_v38, 0  ;;  %v1218_v57 = vadd.f32 %v1216_v40, %v1154_v12 }
  0xc3   :  { %v1235_v53 = vmul.f32 %v2443_v41, %v1231_v44  ;;  %v1244_v54 = vsel %vm19_vm0, %v1241_v33, %v1243_v46  ;;  %v1245_v55 = vsel %vm21_vm1, %v1241_v33, %v1243_v46  ;;  %v1236_v61 = vadd.f32 %v1234_v45, %v1172_v15 }
  0xc4   :  { %v1246_v58 = vrot.slane %v1245_v55, 1  ;;  %v1258_v59 = vrot.slane %v1257_v47, 7  ;;  %v1273_v60 = vrot.slane %v1272_v51, 7  ;;  %v1249_v63 = vmul.f32 %v2442_v31, %v1244_v54  ;;  %v2457_v51 = vld [vmem:[%s3526_s1 + $0x71] ss:$8 sm:$0x3] }
  0xc5   :  { %v1237_v62 = vadd.f32 %v1235_v53, %v1173_v16  ;;  %v1291_v0 = vperm.slane %v2450_v52, 1  ;;  %v1290_v4 = vperm.slane %v2450_v52, 0  ;;  %v1305_v15 = vperm.slane %v2451_v5, 0 }
  0xc6   :  { %v1250_v1 = vmul.f32 %v2443_v41, %v1246_v58  ;;  %v1259_v2 = vsel %vm19_vm0, %v1256_v48, %v1258_v59  ;;  %v1260_v3 = vsel %vm21_vm1, %v1256_v48, %v1258_v59  ;;  %v1274_v8 = vsel %vm19_vm0, %v1271_v56, %v1273_v60  ;;  %v2454_v59 = vld [vmem:[%s3527_s0 + $0x25] ss:$8 sm:$0x3] }
  0xc7   :  { %v1261_v6 = vrot.slane %v1260_v3, 1  ;;  %v1264_v7 = vmul.f32 %v2442_v31, %v1259_v2  ;;  %v1275_v9 = vsel %vm21_vm1, %v1271_v56, %v1273_v60  ;;  %v1279_v13 = vmul.f32 %v2442_v31, %v1274_v8  ;;  %v2458_v56 = vld [vmem:[%s3526_s1 + $0xb5] ss:$8 sm:$0x3] }
  0xc8   :  { %v1276_v12 = vrot.slane %v1275_v9, 1  ;;  %v1292_v11 = vrot.slane %v1291_v0, 7  ;;  %v1251_v16 = vadd.f32 %v1249_v63, %v1187_v34  ;;  %v1252_v17 = vadd.f32 %v1250_v1, %v1188_v35  ;;  %v2456_v34 = vld [vmem:[%s3526_s1 + $0x25] ss:$8 sm:$0x3] }
  0xc9   :  { %v1265_v18 = vmul.f32 %v2443_v41, %v1261_v6  ;;  %v1306_v19 = vperm.slane %v2451_v5, 1  ;;  %v1266_v21 = vadd.f32 %v1264_v7, %v1202_v39  ;;  %v1320_v29 = vperm.slane %v2452_v10, 0  ;;  %v2459_v2 = vld [vmem:[%s3526_s1 + $0x101] ss:$8 sm:$0x3] }
  0xca   :  { %v1280_v22 = vmul.f32 %v2443_v41, %v1276_v12  ;;  %v1293_v24 = vsel %vm19_vm0, %v1290_v4, %v1292_v11  ;;  %v1294_v25 = vsel %vm21_vm1, %v1290_v4, %v1292_v11  ;;  %v1281_v31 = vadd.f32 %v1279_v13, %v1217_v50  ;;  %v2455_v5 = vld [vmem:[%s3527_s0 + $0x75] ss:$8 sm:$0x3] }
  0xcb   :  { %v1295_v26 = vrot.slane %v1294_v25, 1  ;;  %v1298_v27 = vmul.f32 %v2448_v14, %v1293_v24  ;;  %v1307_v28 = vrot.slane %v1306_v19, 7  ;;  %v1267_v30 = vadd.f32 %v1265_v18, %v1203_v49 }
  0xcc   :  { %v1321_v32 = vperm.slane %v2452_v10, 1  ;;  %v1336_v33 = vperm.slane %v2453_v20, 1  ;;  %v1335_v38 = vperm.slane %v2453_v20, 0  ;;  %v1282_v39 = vadd.f32 %v1280_v22, %v1218_v57 }
  0xcd   :  { %v1299_v35 = vmul.f32 %v2449_v23, %v1295_v26  ;;  %v1308_v36 = vsel %vm19_vm0, %v1305_v15, %v1307_v28  ;;  %v1309_v37 = vsel %vm21_vm1, %v1305_v15, %v1307_v28  ;;  %v1300_v43 = vadd.f32 %v1298_v27, %v1236_v61 }
  0xce   :  { %v1310_v40 = vrot.slane %v1309_v37, 1  ;;  %v1322_v41 = vrot.slane %v1321_v32, 7  ;;  %v1337_v42 = vrot.slane %v1336_v33, 7  ;;  %v1313_v45 = vmul.f32 %v2448_v14, %v1308_v36  ;;  %v2463_v33 = vld [vmem:[%s3526_s1 + $0x72] ss:$8 sm:$0x3] }
  0xcf   :  { %v1301_v44 = vadd.f32 %v1299_v35, %v1237_v62  ;;  %v1355_v46 = vperm.slane %v2456_v34, 1  ;;  %v1354_v47 = vperm.slane %v2456_v34, 0  ;;  %v1369_v61 = vperm.slane %v2457_v51, 0 }
  0xd0   :  { %v1314_v48 = vmul.f32 %v2449_v23, %v1310_v40  ;;  %v1323_v49 = vsel %vm19_vm0, %v1320_v29, %v1322_v41  ;;  %v1324_v50 = vsel %vm21_vm1, %v1320_v29, %v1322_v41  ;;  %v1338_v54 = vsel %vm19_vm0, %v1335_v38, %v1337_v42  ;;  %v2460_v41 = vld [vmem:[%s3527_s0 + $0x26] ss:$8 sm:$0x3] }
  0xd1   :  { %v1325_v52 = vrot.slane %v1324_v50, 1  ;;  %v1328_v53 = vmul.f32 %v2448_v14, %v1323_v49  ;;  %v1339_v55 = vsel %vm21_vm1, %v1335_v38, %v1337_v42  ;;  %v1343_v58 = vmul.f32 %v2448_v14, %v1338_v54  ;;  %v2464_v38 = vld [vmem:[%s3526_s1 + $0xb6] ss:$8 sm:$0x3] }
  0xd2   :  { %v1340_v57 = vrot.slane %v1339_v55, 1  ;;  %v1356_v60 = vrot.slane %v1355_v46, 7  ;;  %v1315_v62 = vadd.f32 %v1313_v45, %v1251_v16  ;;  %v1316_v63 = vadd.f32 %v1314_v48, %v1252_v17  ;;  %v2462_v16 = vld [vmem:[%s3526_s1 + $0x26] ss:$8 sm:$0x3] }
  0xd3   :  { %v1329_v0 = vmul.f32 %v2449_v23, %v1325_v52  ;;  %v1370_v1 = vperm.slane %v2457_v51, 1  ;;  %v1330_v3 = vadd.f32 %v1328_v53, %v1266_v21  ;;  %v1384_v12 = vperm.slane %v2458_v56, 0  ;;  %v2465_v49 = vld [vmem:[%s3526_s1 + $0x102] ss:$8 sm:$0x3] }
  0xd4   :  { %v1344_v4 = vmul.f32 %v2449_v23, %v1340_v57  ;;  %v1357_v6 = vsel %vm19_vm0, %v1354_v47, %v1356_v60  ;;  %v1358_v7 = vsel %vm21_vm1, %v1354_v47, %v1356_v60  ;;  %v1345_v14 = vadd.f32 %v1343_v58, %v1281_v31  ;;  %v2461_v51 = vld [vmem:[%s3527_s0 + $0x76] ss:$8 sm:$0x3] }
  0xd5   :  { %v1359_v8 = vrot.slane %v1358_v7, 1  ;;  %v1362_v9 = vmul.f32 %v2454_v59, %v1357_v6  ;;  %v1371_v10 = vrot.slane %v1370_v1, 7  ;;  %v1331_v13 = vadd.f32 %v1329_v0, %v1267_v30 }
  0xd6   :  { %v1385_v11 = vperm.slane %v2458_v56, 1  ;;  %v1400_v15 = vperm.slane %v2459_v2, 1  ;;  %v1399_v20 = vperm.slane %v2459_v2, 0  ;;  %v1346_v21 = vadd.f32 %v1344_v4, %v1282_v39 }
  0xd7   :  { %v1363_v17 = vmul.f32 %v2455_v5, %v1359_v8  ;;  %v1372_v18 = vsel %vm19_vm0, %v1369_v61, %v1371_v10  ;;  %v1373_v19 = vsel %vm21_vm1, %v1369_v61, %v1371_v10  ;;  %v1364_v25 = vadd.f32 %v1362_v9, %v1300_v43 }
  0xd8   :  { %v1374_v22 = vrot.slane %v1373_v19, 1  ;;  %v1386_v23 = vrot.slane %v1385_v11, 7  ;;  %v1401_v24 = vrot.slane %v1400_v15, 7  ;;  %v1377_v27 = vmul.f32 %v2454_v59, %v1372_v18  ;;  %v2469_v15 = vld [vmem:[%s3526_s1 + $0x73] ss:$8 sm:$0x3] }
  0xd9   :  { %v1365_v26 = vadd.f32 %v1363_v17, %v1301_v44  ;;  %v1419_v28 = vperm.slane %v2462_v16, 1  ;;  %v1418_v32 = vperm.slane %v2462_v16, 0  ;;  %v1433_v43 = vperm.slane %v2463_v33, 0 }
  0xda   :  { %v1378_v29 = vmul.f32 %v2455_v5, %v1374_v22  ;;  %v1387_v30 = vsel %vm19_vm0, %v1384_v12, %v1386_v23  ;;  %v1388_v31 = vsel %vm21_vm1, %v1384_v12, %v1386_v23  ;;  %v1402_v36 = vsel %vm19_vm0, %v1399_v20, %v1401_v24  ;;  %v2466_v23 = vld [vmem:[%s3527_s0 + $0x27] ss:$8 sm:$0x3] }
  0xdb   :  { %v1389_v34 = vrot.slane %v1388_v31, 1  ;;  %v1392_v35 = vmul.f32 %v2454_v59, %v1387_v30  ;;  %v1403_v37 = vsel %vm21_vm1, %v1399_v20, %v1401_v24  ;;  %v1407_v40 = vmul.f32 %v2454_v59, %v1402_v36  ;;  %v2470_v20 = vld [vmem:[%s3526_s1 + $0xb7] ss:$8 sm:$0x3] }
  0xdc   :  { %v1404_v39 = vrot.slane %v1403_v37, 1  ;;  %v1420_v42 = vrot.slane %v1419_v28, 7  ;;  %v1379_v44 = vadd.f32 %v1377_v27, %v1315_v62  ;;  %v1380_v45 = vadd.f32 %v1378_v29, %v1316_v63  ;;  %v2468_v62 = vld [vmem:[%s3526_s1 + $0x27] ss:$8 sm:$0x3] }
  0xdd   :  { %v1393_v46 = vmul.f32 %v2455_v5, %v1389_v34  ;;  %v1434_v48 = vperm.slane %v2463_v33, 1  ;;  %v1394_v50 = vadd.f32 %v1392_v35, %v1330_v3  ;;  %v1448_v57 = vperm.slane %v2464_v38, 0  ;;  %v2471_v30 = vld [vmem:[%s3526_s1 + $0x103] ss:$8 sm:$0x3] }
  0xde   :  { %v1408_v47 = vmul.f32 %v2455_v5, %v1404_v39  ;;  %v1421_v52 = vsel %vm19_vm0, %v1418_v32, %v1420_v42  ;;  %v1422_v53 = vsel %vm21_vm1, %v1418_v32, %v1420_v42  ;;  %v1409_v59 = vadd.f32 %v1407_v40, %v1345_v14  ;;  %v2467_v33 = vld [vmem:[%s3527_s0 + $0x77] ss:$8 sm:$0x3] }
  0xdf   :  { %v1423_v54 = vrot.slane %v1422_v53, 1  ;;  %v1426_v55 = vmul.f32 %v2460_v41, %v1421_v52  ;;  %v1435_v56 = vrot.slane %v1434_v48, 7  ;;  %v1395_v58 = vadd.f32 %v1393_v46, %v1331_v13 }
  0xe0   :  { %v1449_v60 = vperm.slane %v2464_v38, 1  ;;  %v1464_v61 = vperm.slane %v2465_v49, 1  ;;  %v1463_v2 = vperm.slane %v2465_v49, 0  ;;  %v1410_v3 = vadd.f32 %v1408_v47, %v1346_v21 }
  0xe1   :  { %v1427_v63 = vmul.f32 %v2461_v51, %v1423_v54  ;;  %v1436_v0 = vsel %vm19_vm0, %v1433_v43, %v1435_v56  ;;  %v1437_v1 = vsel %vm21_vm1, %v1433_v43, %v1435_v56  ;;  %v1428_v7 = vadd.f32 %v1426_v55, %v1364_v25 }
  0xe2   :  { %v1438_v4 = vrot.slane %v1437_v1, 1  ;;  %v1450_v5 = vrot.slane %v1449_v60, 7  ;;  %v1465_v6 = vrot.slane %v1464_v61, 7  ;;  %v1441_v9 = vmul.f32 %v2460_v41, %v1436_v0  ;;  %v2475_v61 = vld [vmem:[%s3526_s1 + $0x74] ss:$8 sm:$0x3] }
  0xe3   :  { %v1429_v8 = vadd.f32 %v1427_v63, %v1365_v26  ;;  %v1483_v10 = vperm.slane %v2468_v62, 1  ;;  %v1482_v11 = vperm.slane %v2468_v62, 0  ;;  %v1497_v25 = vperm.slane %v2469_v15, 0 }
  0xe4   :  { %v1442_v12 = vmul.f32 %v2461_v51, %v1438_v4  ;;  %v1451_v13 = vsel %vm19_vm0, %v1448_v57, %v1450_v5  ;;  %v1452_v14 = vsel %vm21_vm1, %v1448_v57, %v1450_v5  ;;  %v1466_v18 = vsel %vm19_vm0, %v1463_v2, %v1465_v6  ;;  %v2472_v5 = vld [vmem:[%s3527_s0 + $0x30] ss:$8 sm:$0x3] }
  0xe5   :  { %v1453_v16 = vrot.slane %v1452_v14, 1  ;;  %v1456_v17 = vmul.f32 %v2460_v41, %v1451_v13  ;;  %v1467_v19 = vsel %vm21_vm1, %v1463_v2, %v1465_v6  ;;  %v1471_v22 = vmul.f32 %v2460_v41, %v1466_v18  ;;  %v2476_v2 = vld [vmem:[%s3526_s1 + $0xc0] ss:$8 sm:$0x3] }
  0xe6   :  { %v1468_v21 = vrot.slane %v1467_v19, 1  ;;  %v1484_v24 = vrot.slane %v1483_v10, 7  ;;  %v1443_v26 = vadd.f32 %v1441_v9, %v1379_v44  ;;  %v1444_v27 = vadd.f32 %v1442_v12, %v1380_v45  ;;  %v2474_v44 = vld [vmem:[%s3526_s1 + $0x30] ss:$8 sm:$0x3] }
  0xe7   :  { %v1457_v28 = vmul.f32 %v2461_v51, %v1453_v16  ;;  %v1498_v29 = vperm.slane %v2469_v15, 1  ;;  %v1458_v31 = vadd.f32 %v1456_v17, %v1394_v50  ;;  %v1512_v39 = vperm.slane %v2470_v20, 0  ;;  %v2477_v13 = vld [vmem:[%s3526_s1 + $0x104] ss:$8 sm:$0x3] }
  0xe8   :  { %v1472_v32 = vmul.f32 %v2461_v51, %v1468_v21  ;;  %v1485_v34 = vsel %vm19_vm0, %v1482_v11, %v1484_v24  ;;  %v1486_v35 = vsel %vm21_vm1, %v1482_v11, %v1484_v24  ;;  %v1473_v41 = vadd.f32 %v1471_v22, %v1409_v59  ;;  %v2473_v15 = vld [vmem:[%s3527_s0 + $0x80] ss:$8 sm:$0x3] }
  0xe9   :  { %v1487_v36 = vrot.slane %v1486_v35, 1  ;;  %v1490_v37 = vmul.f32 %v2466_v23, %v1485_v34  ;;  %v1499_v38 = vrot.slane %v1498_v29, 7  ;;  %v1459_v40 = vadd.f32 %v1457_v28, %v1395_v58 }
  0xea   :  { %v1513_v42 = vperm.slane %v2470_v20, 1  ;;  %v1528_v43 = vperm.slane %v2471_v30, 1  ;;  %v1527_v49 = vperm.slane %v2471_v30, 0  ;;  %v1474_v50 = vadd.f32 %v1472_v32, %v1410_v3 }
  0xeb   :  { %v1491_v45 = vmul.f32 %v2467_v33, %v1487_v36  ;;  %v1500_v46 = vsel %vm19_vm0, %v1497_v25, %v1499_v38  ;;  %v1501_v48 = vsel %vm21_vm1, %v1497_v25, %v1499_v38  ;;  %v1492_v53 = vadd.f32 %v1490_v37, %v1428_v7 }
  0xec   :  { %v1502_v47 = vrot.slane %v1501_v48, 1  ;;  %v1514_v51 = vrot.slane %v1513_v42, 7  ;;  %v1529_v52 = vrot.slane %v1528_v43, 7  ;;  %v1505_v55 = vmul.f32 %v2466_v23, %v1500_v46  ;;  %v2481_v43 = vld [vmem:[%s3526_s1 + $0x75] ss:$8 sm:$0x3] }
  0xed   :  { %v1493_v54 = vadd.f32 %v1491_v45, %v1429_v8  ;;  %v1547_v56 = vperm.slane %v2474_v44, 1  ;;  %v1546_v60 = vperm.slane %v2474_v44, 0  ;;  %v1561_v7 = vperm.slane %v2475_v61, 0 }
  0xee   :  { %v1506_v57 = vmul.f32 %v2467_v33, %v1502_v47  ;;  %v1515_v58 = vsel %vm19_vm0, %v1512_v39, %v1514_v51  ;;  %v1516_v59 = vsel %vm21_vm1, %v1512_v39, %v1514_v51  ;;  %v1530_v0 = vsel %vm19_vm0, %v1527_v49, %v1529_v52  ;;  %v2478_v51 = vld [vmem:[%s3527_s0 + $0x31] ss:$8 sm:$0x3] }
  0xef   :  { %v1517_v62 = vrot.slane %v1516_v59, 1  ;;  %v1520_v63 = vmul.f32 %v2466_v23, %v1515_v58  ;;  %v1531_v1 = vsel %vm21_vm1, %v1527_v49, %v1529_v52  ;;  %v1535_v4 = vmul.f32 %v2466_v23, %v1530_v0  ;;  %v2482_v49 = vld [vmem:[%s3526_s1 + $0xc1] ss:$8 sm:$0x3] }
  0xf0   :  { %v1532_v3 = vrot.slane %v1531_v1, 1  ;;  %v1548_v6 = vrot.slane %v1547_v56, 7  ;;  %v1507_v8 = vadd.f32 %v1505_v55, %v1443_v26  ;;  %v1508_v9 = vadd.f32 %v1506_v57, %v1444_v27  ;;  %v2480_v26 = vld [vmem:[%s3526_s1 + $0x31] ss:$8 sm:$0x3] }
  0xf1   :  { %v1521_v10 = vmul.f32 %v2467_v33, %v1517_v62  ;;  %v1562_v12 = vperm.slane %v2475_v61, 1  ;;  %v1522_v14 = vadd.f32 %v1520_v63, %v1458_v31  ;;  %v1576_v21 = vperm.slane %v2476_v2, 0  ;;  %v2483_v58 = vld [vmem:[%s3526_s1 + $0x105] ss:$8 sm:$0x3] }
  0xf2   :  { %v1536_v11 = vmul.f32 %v2467_v33, %v1532_v3  ;;  %v1549_v16 = vsel %vm19_vm0, %v1546_v60, %v1548_v6  ;;  %v1550_v17 = vsel %vm21_vm1, %v1546_v60, %v1548_v6  ;;  %v1537_v23 = vadd.f32 %v1535_v4, %v1473_v41  ;;  %v2479_v61 = vld [vmem:[%s3527_s0 + $0x81] ss:$8 sm:$0x3] }
  0xf3   :  { %v1551_v18 = vrot.slane %v1550_v17, 1  ;;  %v1554_v19 = vmul.f32 %v2472_v5, %v1549_v16  ;;  %v1563_v20 = vrot.slane %v1562_v12, 7  ;;  %v1523_v22 = vadd.f32 %v1521_v10, %v1459_v40 }
  0xf4   :  { %v1577_v24 = vperm.slane %v2476_v2, 1  ;;  %v1592_v25 = vperm.slane %v2477_v13, 1  ;;  %v1591_v30 = vperm.slane %v2477_v13, 0  ;;  %v1538_v31 = vadd.f32 %v1536_v11, %v1474_v50 }
  0xf5   :  { %v1555_v27 = vmul.f32 %v2473_v15, %v1551_v18  ;;  %v1564_v28 = vsel %vm19_vm0, %v1561_v7, %v1563_v20  ;;  %v1565_v29 = vsel %vm21_vm1, %v1561_v7, %v1563_v20  ;;  %v1556_v35 = vadd.f32 %v1554_v19, %v1492_v53 }
  0xf6   :  { %v1566_v32 = vrot.slane %v1565_v29, 1  ;;  %v1578_v33 = vrot.slane %v1577_v24, 7  ;;  %v1593_v34 = vrot.slane %v1592_v25, 7  ;;  %v1569_v37 = vmul.f32 %v2472_v5, %v1564_v28  ;;  %v2487_v25 = vld [vmem:[%s3526_s1 + $0x76] ss:$8 sm:$0x3] }
  0xf7   :  { %v1557_v36 = vadd.f32 %v1555_v27, %v1493_v54  ;;  %v1611_v38 = vperm.slane %v2480_v26, 1  ;;  %v1610_v42 = vperm.slane %v2480_v26, 0  ;;  %v1625_v53 = vperm.slane %v2481_v43, 0 }
  0xf8   :  { %v1570_v39 = vmul.f32 %v2473_v15, %v1566_v32  ;;  %v1579_v40 = vsel %vm19_vm0, %v1576_v21, %v1578_v33  ;;  %v1580_v41 = vsel %vm21_vm1, %v1576_v21, %v1578_v33  ;;  %v1594_v46 = vsel %vm19_vm0, %v1591_v30, %v1593_v34  ;;  %v2484_v33 = vld [vmem:[%s3527_s0 + $0x32] ss:$8 sm:$0x3] }
  0xf9   :  { %v1581_v44 = vrot.slane %v1580_v41, 1  ;;  %v1584_v45 = vmul.f32 %v2472_v5, %v1579_v40  ;;  %v1595_v48 = vsel %vm21_vm1, %v1591_v30, %v1593_v34  ;;  %v1599_v47 = vmul.f32 %v2472_v5, %v1594_v46  ;;  %v2488_v30 = vld [vmem:[%s3526_s1 + $0xc2] ss:$8 sm:$0x3] }
  0xfa   :  { %v1596_v50 = vrot.slane %v1595_v48, 1  ;;  %v1612_v52 = vrot.slane %v1611_v38, 7  ;;  %v1571_v54 = vadd.f32 %v1569_v37, %v1507_v8  ;;  %v1572_v55 = vadd.f32 %v1570_v39, %v1508_v9  ;;  %v2486_v8 = vld [vmem:[%s3526_s1 + $0x32] ss:$8 sm:$0x3] }
  0xfb   :  { %v1585_v56 = vmul.f32 %v2473_v15, %v1581_v44  ;;  %v1626_v57 = vperm.slane %v2481_v43, 1  ;;  %v1586_v59 = vadd.f32 %v1584_v45, %v1522_v14  ;;  %v1640_v3 = vperm.slane %v2482_v49, 0  ;;  %v2489_v40 = vld [vmem:[%s3526_s1 + $0x106] ss:$8 sm:$0x3] }
  0xfc   :  { %v1600_v60 = vmul.f32 %v2473_v15, %v1596_v50  ;;  %v1613_v62 = vsel %vm19_vm0, %v1610_v42, %v1612_v52  ;;  %v1614_v63 = vsel %vm21_vm1, %v1610_v42, %v1612_v52  ;;  %v1601_v5 = vadd.f32 %v1599_v47, %v1537_v23  ;;  %v2485_v43 = vld [vmem:[%s3527_s0 + $0x82] ss:$8 sm:$0x3] }
  0xfd   :  { %v1615_v0 = vrot.slane %v1614_v63, 1  ;;  %v1618_v1 = vmul.f32 %v2478_v51, %v1613_v62  ;;  %v1627_v2 = vrot.slane %v1626_v57, 7  ;;  %v1587_v4 = vadd.f32 %v1585_v56, %v1523_v22 }
  0xfe   :  { %v1641_v6 = vperm.slane %v2482_v49, 1  ;;  %v1656_v7 = vperm.slane %v2483_v58, 1  ;;  %v1655_v13 = vperm.slane %v2483_v58, 0  ;;  %v1602_v14 = vadd.f32 %v1600_v60, %v1538_v31 }
  0xff   :  { %v1619_v9 = vmul.f32 %v2479_v61, %v1615_v0  ;;  %v1628_v10 = vsel %vm19_vm0, %v1625_v53, %v1627_v2  ;;  %v1629_v12 = vsel %vm21_vm1, %v1625_v53, %v1627_v2  ;;  %v1620_v17 = vadd.f32 %v1618_v1, %v1556_v35 }
 0x100   :  { %v1630_v11 = vrot.slane %v1629_v12, 1  ;;  %v1642_v15 = vrot.slane %v1641_v6, 7  ;;  %v1657_v16 = vrot.slane %v1656_v7, 7  ;;  %v1633_v19 = vmul.f32 %v2478_v51, %v1628_v10  ;;  %v2493_v7 = vld [vmem:[%s3526_s1 + $0x77] ss:$8 sm:$0x3] }
 0x101   :  { %v1621_v18 = vadd.f32 %v1619_v9, %v1557_v36  ;;  %v1675_v20 = vperm.slane %v2486_v8, 1  ;;  %v1674_v24 = vperm.slane %v2486_v8, 0  ;;  %v1689_v35 = vperm.slane %v2487_v25, 0 }
 0x102   :  { %v1634_v21 = vmul.f32 %v2479_v61, %v1630_v11  ;;  %v1643_v22 = vsel %vm19_vm0, %v1640_v3, %v1642_v15  ;;  %v1644_v23 = vsel %vm21_vm1, %v1640_v3, %v1642_v15  ;;  %v1658_v28 = vsel %vm19_vm0, %v1655_v13, %v1657_v16  ;;  %v2490_v15 = vld [vmem:[%s3527_s0 + $0x33] ss:$8 sm:$0x3] }
 0x103   :  { %v1645_v26 = vrot.slane %v1644_v23, 1  ;;  %v1648_v27 = vmul.f32 %v2478_v51, %v1643_v22  ;;  %v1659_v29 = vsel %vm21_vm1, %v1655_v13, %v1657_v16  ;;  %v1663_v32 = vmul.f32 %v2478_v51, %v1658_v28  ;;  %v2494_v13 = vld [vmem:[%s3526_s1 + $0xc3] ss:$8 sm:$0x3] }
 0x104   :  { %v1660_v31 = vrot.slane %v1659_v29, 1  ;;  %v1676_v34 = vrot.slane %v1675_v20, 7  ;;  %v1635_v36 = vadd.f32 %v1633_v19, %v1571_v54  ;;  %v1636_v37 = vadd.f32 %v1634_v21, %v1572_v55  ;;  %v2492_v54 = vld [vmem:[%s3526_s1 + $0x33] ss:$8 sm:$0x3] }
 0x105   :  { %v1649_v38 = vmul.f32 %v2479_v61, %v1645_v26  ;;  %v1690_v39 = vperm.slane %v2487_v25, 1  ;;  %v1650_v41 = vadd.f32 %v1648_v27, %v1586_v59  ;;  %v1704_v50 = vperm.slane %v2488_v30, 0  ;;  %v2495_v22 = vld [vmem:[%s3526_s1 + $0x107] ss:$8 sm:$0x3] }
 0x106   :  { %v1664_v42 = vmul.f32 %v2479_v61, %v1660_v31  ;;  %v1677_v44 = vsel %vm19_vm0, %v1674_v24, %v1676_v34  ;;  %v1678_v45 = vsel %vm21_vm1, %v1674_v24, %v1676_v34  ;;  %v1665_v51 = vadd.f32 %v1663_v32, %v1601_v5  ;;  %v2491_v25 = vld [vmem:[%s3527_s0 + $0x83] ss:$8 sm:$0x3] }
 0x107   :  { %v1679_v46 = vrot.slane %v1678_v45, 1  ;;  %v1682_v48 = vmul.f32 %v2484_v33, %v1677_v44  ;;  %v1691_v49 = vrot.slane %v1690_v39, 7  ;;  %v1651_v47 = vadd.f32 %v1649_v38, %v1587_v4 }
 0x108   :  { %v1705_v52 = vperm.slane %v2488_v30, 1  ;;  %v1720_v53 = vperm.slane %v2489_v40, 1  ;;  %v1719_v58 = vperm.slane %v2489_v40, 0  ;;  %v1666_v59 = vadd.f32 %v1664_v42, %v1602_v14 }
 0x109   :  { %v1683_v55 = vmul.f32 %v2485_v43, %v1679_v46  ;;  %v1692_v56 = vsel %vm19_vm0, %v1689_v35, %v1691_v49  ;;  %v1693_v57 = vsel %vm21_vm1, %v1689_v35, %v1691_v49  ;;  %v1684_v63 = vadd.f32 %v1682_v48, %v1620_v17 }
 0x10a   :  { %v1694_v60 = vrot.slane %v1693_v57, 1  ;;  %v1706_v61 = vrot.slane %v1705_v52, 7  ;;  %v1721_v62 = vrot.slane %v1720_v53, 7  ;;  %v1697_v1 = vmul.f32 %v2484_v33, %v1692_v56  ;;  %v2499_v53 = vld [vmem:[%s3526_s1 + $0x80] ss:$8 sm:$0x3] }
 0x10b   :  { %v1685_v0 = vadd.f32 %v1683_v55, %v1621_v18  ;;  %v1739_v2 = vperm.slane %v2492_v54, 1  ;;  %v1738_v6 = vperm.slane %v2492_v54, 0  ;;  %v1753_v17 = vperm.slane %v2493_v7, 0 }
 0x10c   :  { %v1698_v3 = vmul.f32 %v2485_v43, %v1694_v60  ;;  %v1707_v4 = vsel %vm19_vm0, %v1704_v50, %v1706_v61  ;;  %v1708_v5 = vsel %vm21_vm1, %v1704_v50, %v1706_v61  ;;  %v1722_v10 = vsel %vm19_vm0, %v1719_v58, %v1721_v62  ;;  %v2496_v61 = vld [vmem:[%s3527_s0 + $0x34] ss:$8 sm:$0x3] }
 0x10d   :  { %v1709_v8 = vrot.slane %v1708_v5, 1  ;;  %v1712_v9 = vmul.f32 %v2484_v33, %v1707_v4  ;;  %v1723_v12 = vsel %vm21_vm1, %v1719_v58, %v1721_v62  ;;  %v1727_v11 = vmul.f32 %v2484_v33, %v1722_v10  ;;  %v2500_v58 = vld [vmem:[%s3526_s1 + $0xc4] ss:$8 sm:$0x3] }
 0x10e   :  { %v1724_v14 = vrot.slane %v1723_v12, 1  ;;  %v1740_v16 = vrot.slane %v1739_v2, 7  ;;  %v1699_v18 = vadd.f32 %v1697_v1, %v1635_v36  ;;  %v1700_v19 = vadd.f32 %v1698_v3, %v1636_v37  ;;  %v2498_v36 = vld [vmem:[%s3526_s1 + $0x34] ss:$8 sm:$0x3] }
 0x10f   :  { %v1713_v20 = vmul.f32 %v2485_v43, %v1709_v8  ;;  %v1754_v21 = vperm.slane %v2493_v7, 1  ;;  %v1714_v23 = vadd.f32 %v1712_v9, %v1650_v41  ;;  %v1768_v31 = vperm.slane %v2494_v13, 0  ;;  %v2501_v4 = vld [vmem:[%s3526_s1 + $0x110] ss:$8 sm:$0x3] }
 0x110   :  { %v1728_v24 = vmul.f32 %v2485_v43, %v1724_v14  ;;  %v1741_v26 = vsel %vm19_vm0, %v1738_v6, %v1740_v16  ;;  %v1742_v27 = vsel %vm21_vm1, %v1738_v6, %v1740_v16  ;;  %v1729_v33 = vadd.f32 %v1727_v11, %v1665_v51  ;;  %v2497_v7 = vld [vmem:[%s3527_s0 + $0x84] ss:$8 sm:$0x3] }
 0x111   :  { %v1743_v28 = vrot.slane %v1742_v27, 1  ;;  %v1746_v29 = vmul.f32 %v2490_v15, %v1741_v26  ;;  %v1755_v30 = vrot.slane %v1754_v21, 7  ;;  %v1715_v32 = vadd.f32 %v1713_v20, %v1651_v47 }
 0x112   :  { %v1769_v34 = vperm.slane %v2494_v13, 1  ;;  %v1784_v35 = vperm.slane %v2495_v22, 1  ;;  %v1783_v40 = vperm.slane %v2495_v22, 0  ;;  %v1730_v41 = vadd.f32 %v1728_v24, %v1666_v59 }
 0x113   :  { %v1747_v37 = vmul.f32 %v2491_v25, %v1743_v28  ;;  %v1756_v38 = vsel %vm19_vm0, %v1753_v17, %v1755_v30  ;;  %v1757_v39 = vsel %vm21_vm1, %v1753_v17, %v1755_v30  ;;  %v1748_v45 = vadd.f32 %v1746_v29, %v1684_v63 }
 0x114   :  { %v1758_v42 = vrot.slane %v1757_v39, 1  ;;  %v1770_v43 = vrot.slane %v1769_v34, 7  ;;  %v1785_v44 = vrot.slane %v1784_v35, 7  ;;  %v1761_v48 = vmul.f32 %v2490_v15, %v1756_v38  ;;  %v2505_v35 = vld [vmem:[%s3526_s1 + $0x81] ss:$8 sm:$0x3] }
 0x115   :  { %v1749_v46 = vadd.f32 %v1747_v37, %v1685_v0  ;;  %v1803_v49 = vperm.slane %v2498_v36, 1  ;;  %v1802_v52 = vperm.slane %v2498_v36, 0  ;;  %v1817_v63 = vperm.slane %v2499_v53, 0 }
 0x116   :  { %v1762_v50 = vmul.f32 %v2491_v25, %v1758_v42  ;;  %v1771_v47 = vsel %vm19_vm0, %v1768_v31, %v1770_v43  ;;  %v1772_v51 = vsel %vm21_vm1, %v1768_v31, %v1770_v43  ;;  %v1786_v56 = vsel %vm19_vm0, %v1783_v40, %v1785_v44  ;;  %v2502_v43 = vld [vmem:[%s3527_s0 + $0x35] ss:$8 sm:$0x3] }
 0x117   :  { %v1773_v54 = vrot.slane %v1772_v51, 1  ;;  %v1776_v55 = vmul.f32 %v2490_v15, %v1771_v47  ;;  %v1787_v57 = vsel %vm21_vm1, %v1783_v40, %v1785_v44  ;;  %v1791_v60 = vmul.f32 %v2490_v15, %v1786_v56  ;;  %v2506_v40 = vld [vmem:[%s3526_s1 + $0xc5] ss:$8 sm:$0x3] }
 0x118   :  { %v1788_v59 = vrot.slane %v1787_v57, 1  ;;  %v1804_v62 = vrot.slane %v1803_v49, 7  ;;  %v1763_v0 = vadd.f32 %v1761_v48, %v1699_v18  ;;  %v1764_v1 = vadd.f32 %v1762_v50, %v1700_v19  ;;  %v2504_v18 = vld [vmem:[%s3526_s1 + $0x35] ss:$8 sm:$0x3] }
 0x119   :  { %v1777_v2 = vmul.f32 %v2491_v25, %v1773_v54  ;;  %v1818_v3 = vperm.slane %v2499_v53, 1  ;;  %v1778_v5 = vadd.f32 %v1776_v55, %v1714_v23  ;;  %v1832_v14 = vperm.slane %v2500_v58, 0  ;;  %v2507_v47 = vld [vmem:[%s3526_s1 + $0x111] ss:$8 sm:$0x3] }
 0x11a   :  { %v1792_v6 = vmul.f32 %v2491_v25, %v1788_v59  ;;  %v1805_v8 = vsel %vm19_vm0, %v1802_v52, %v1804_v62  ;;  %v1806_v9 = vsel %vm21_vm1, %v1802_v52, %v1804_v62  ;;  %v1793_v15 = vadd.f32 %v1791_v60, %v1729_v33  ;;  %v2503_v53 = vld [vmem:[%s3527_s0 + $0x85] ss:$8 sm:$0x3] }
 0x11b   :  { %v1807_v10 = vrot.slane %v1806_v9, 1  ;;  %v1810_v12 = vmul.f32 %v2496_v61, %v1805_v8  ;;  %v1819_v13 = vrot.slane %v1818_v3, 7  ;;  %v1779_v11 = vadd.f32 %v1777_v2, %v1715_v32 }
 0x11c   :  { %v1833_v16 = vperm.slane %v2500_v58, 1  ;;  %v1848_v17 = vperm.slane %v2501_v4, 1  ;;  %v1847_v22 = vperm.slane %v2501_v4, 0  ;;  %v1794_v23 = vadd.f32 %v1792_v6, %v1730_v41 }
 0x11d   :  { %v1811_v19 = vmul.f32 %v2497_v7, %v1807_v10  ;;  %v1820_v20 = vsel %vm19_vm0, %v1817_v63, %v1819_v13  ;;  %v1821_v21 = vsel %vm21_vm1, %v1817_v63, %v1819_v13  ;;  %v1812_v27 = vadd.f32 %v1810_v12, %v1748_v45 }
 0x11e   :  { %v1822_v24 = vrot.slane %v1821_v21, 1  ;;  %v1834_v25 = vrot.slane %v1833_v16, 7  ;;  %v1849_v26 = vrot.slane %v1848_v17, 7  ;;  %v1825_v29 = vmul.f32 %v2496_v61, %v1820_v20  ;;  %v2511_v17 = vld [vmem:[%s3526_s1 + $0x82] ss:$8 sm:$0x3] }
 0x11f   :  { %v1813_v28 = vadd.f32 %v1811_v19, %v1749_v46  ;;  %v1867_v30 = vperm.slane %v2504_v18, 1  ;;  %v1866_v34 = vperm.slane %v2504_v18, 0  ;;  %v1881_v45 = vperm.slane %v2505_v35, 0 }
 0x120   :  { %v1826_v31 = vmul.f32 %v2497_v7, %v1822_v24  ;;  %v1835_v32 = vsel %vm19_vm0, %v1832_v14, %v1834_v25  ;;  %v1836_v33 = vsel %vm21_vm1, %v1832_v14, %v1834_v25  ;;  %v1850_v38 = vsel %vm19_vm0, %v1847_v22, %v1849_v26  ;;  %v2508_v25 = vld [vmem:[%s3527_s0 + $0x36] ss:$8 sm:$0x3] }
 0x121   :  { %v1837_v36 = vrot.slane %v1836_v33, 1  ;;  %v1840_v37 = vmul.f32 %v2496_v61, %v1835_v32  ;;  %v1851_v39 = vsel %vm21_vm1, %v1847_v22, %v1849_v26  ;;  %v1855_v42 = vmul.f32 %v2496_v61, %v1850_v38  ;;  %v2512_v22 = vld [vmem:[%s3526_s1 + $0xc6] ss:$8 sm:$0x3] }
 0x122   :  { %v1852_v41 = vrot.slane %v1851_v39, 1  ;;  %v1868_v44 = vrot.slane %v1867_v30, 7  ;;  %v1827_v46 = vadd.f32 %v1825_v29, %v1763_v0  ;;  %v1828_v48 = vadd.f32 %v1826_v31, %v1764_v1  ;;  %v2510_v0 = vld [vmem:[%s3526_s1 + $0x36] ss:$8 sm:$0x3] }
 0x123   :  { %v1841_v49 = vmul.f32 %v2497_v7, %v1837_v36  ;;  %v1882_v50 = vperm.slane %v2505_v35, 1  ;;  %v1842_v51 = vadd.f32 %v1840_v37, %v1778_v5  ;;  %v1896_v59 = vperm.slane %v2506_v40, 0  ;;  %v2513_v32 = vld [vmem:[%s3526_s1 + $0x112] ss:$8 sm:$0x3] }
 0x124   :  { %v1856_v52 = vmul.f32 %v2497_v7, %v1852_v41  ;;  %v1869_v54 = vsel %vm19_vm0, %v1866_v34, %v1868_v44  ;;  %v1870_v55 = vsel %vm21_vm1, %v1866_v34, %v1868_v44  ;;  %v1857_v61 = vadd.f32 %v1855_v42, %v1793_v15  ;;  %v2509_v35 = vld [vmem:[%s3527_s0 + $0x86] ss:$8 sm:$0x3] }
 0x125   :  { %v1871_v56 = vrot.slane %v1870_v55, 1  ;;  %v1874_v57 = vmul.f32 %v2502_v43, %v1869_v54  ;;  %v1883_v58 = vrot.slane %v1882_v50, 7  ;;  %v1843_v60 = vadd.f32 %v1841_v49, %v1779_v11 }
 0x126   :  { %v1897_v62 = vperm.slane %v2506_v40, 1  ;;  %v1912_v63 = vperm.slane %v2507_v47, 1  ;;  %v1911_v4 = vperm.slane %v2507_v47, 0  ;;  %v1858_v5 = vadd.f32 %v1856_v52, %v1794_v23 }
 0x127   :  { %v1875_v1 = vmul.f32 %v2503_v53, %v1871_v56  ;;  %v1884_v2 = vsel %vm19_vm0, %v1881_v45, %v1883_v58  ;;  %v1885_v3 = vsel %vm21_vm1, %v1881_v45, %v1883_v58  ;;  %v1876_v9 = vadd.f32 %v1874_v57, %v1812_v27 }
 0x128   :  { %v1886_v6 = vrot.slane %v1885_v3, 1  ;;  %v1898_v7 = vrot.slane %v1897_v62, 7  ;;  %v1913_v8 = vrot.slane %v1912_v63, 7  ;;  %v1889_v12 = vmul.f32 %v2502_v43, %v1884_v2  ;;  %v2517_v63 = vld [vmem:[%s3526_s1 + $0x83] ss:$8 sm:$0x3] }
 0x129   :  { %v1877_v10 = vadd.f32 %v1875_v1, %v1813_v28  ;;  %v1931_v13 = vperm.slane %v2510_v0, 1  ;;  %v1930_v16 = vperm.slane %v2510_v0, 0  ;;  %v1945_v27 = vperm.slane %v2511_v17, 0 }
 0x12a   :  { %v1890_v14 = vmul.f32 %v2503_v53, %v1886_v6  ;;  %v1899_v11 = vsel %vm19_vm0, %v1896_v59, %v1898_v7  ;;  %v1900_v15 = vsel %vm21_vm1, %v1896_v59, %v1898_v7  ;;  %v1914_v20 = vsel %vm19_vm0, %v1911_v4, %v1913_v8  ;;  %v2514_v7 = vld [vmem:[%s3527_s0 + $0x37] ss:$8 sm:$0x3] }
 0x12b   :  { %v1901_v18 = vrot.slane %v1900_v15, 1  ;;  %v1904_v19 = vmul.f32 %v2502_v43, %v1899_v11  ;;  %v1915_v21 = vsel %vm21_vm1, %v1911_v4, %v1913_v8  ;;  %v1919_v24 = vmul.f32 %v2502_v43, %v1914_v20  ;;  %v2518_v4 = vld [vmem:[%s3526_s1 + $0xc7] ss:$8 sm:$0x3] }
 0x12c   :  { %v1916_v23 = vrot.slane %v1915_v21, 1  ;;  %v1932_v26 = vrot.slane %v1931_v13, 7  ;;  %v1891_v28 = vadd.f32 %v1889_v12, %v1827_v46  ;;  %v1892_v29 = vadd.f32 %v1890_v14, %v1828_v48  ;;  %v2516_v46 = vld [vmem:[%s3526_s1 + $0x37] ss:$8 sm:$0x3] }
 0x12d   :  { %v1905_v30 = vmul.f32 %v2503_v53, %v1901_v18  ;;  %v1946_v31 = vperm.slane %v2511_v17, 1  ;;  %v1906_v33 = vadd.f32 %v1904_v19, %v1842_v51  ;;  %v1960_v41 = vperm.slane %v2512_v22, 0  ;;  %v2519_v11 = vld [vmem:[%s3526_s1 + $0x113] ss:$8 sm:$0x3] }
 0x12e   :  { %v1920_v34 = vmul.f32 %v2503_v53, %v1916_v23  ;;  %v1933_v36 = vsel %vm19_vm0, %v1930_v16, %v1932_v26  ;;  %v1934_v37 = vsel %vm21_vm1, %v1930_v16, %v1932_v26  ;;  %v1921_v43 = vadd.f32 %v1919_v24, %v1857_v61  ;;  %v2515_v17 = vld [vmem:[%s3527_s0 + $0x87] ss:$8 sm:$0x3] }
 0x12f   :  { %v1935_v38 = vrot.slane %v1934_v37, 1  ;;  %v1938_v39 = vmul.f32 %v2508_v25, %v1933_v36  ;;  %v1947_v40 = vrot.slane %v1946_v31, 7  ;;  %v1907_v42 = vadd.f32 %v1905_v30, %v1843_v60 }
 0x130   :  { %v1961_v44 = vperm.slane %v2512_v22, 1  ;;  %v1976_v45 = vperm.slane %v2513_v32, 1  ;;  %v1975_v47 = vperm.slane %v2513_v32, 0  ;;  %v1922_v51 = vadd.f32 %v1920_v34, %v1858_v5 }
 0x131   :  { %v1939_v48 = vmul.f32 %v2509_v35, %v1935_v38  ;;  %v1948_v49 = vsel %vm19_vm0, %v1945_v27, %v1947_v40  ;;  %v1949_v50 = vsel %vm21_vm1, %v1945_v27, %v1947_v40  ;;  %v1940_v55 = vadd.f32 %v1938_v39, %v1876_v9 }
 0x132   :  { %v1950_v52 = vrot.slane %v1949_v50, 1  ;;  %v1962_v53 = vrot.slane %v1961_v44, 7  ;;  %v1977_v54 = vrot.slane %v1976_v45, 7  ;;  %v1953_v57 = vmul.f32 %v2508_v25, %v1948_v49  ;;  %v2523_v45 = vld [vmem:[%s3526_s1 + $0x84] ss:$8 sm:$0x3] }
 0x133   :  { %v1941_v56 = vadd.f32 %v1939_v48, %v1877_v10  ;;  %v1995_v58 = vperm.slane %v2516_v46, 1  ;;  %v1994_v62 = vperm.slane %v2516_v46, 0  ;;  %v2009_v9 = vperm.slane %v2517_v63, 0 }
 0x134   :  { %v1954_v59 = vmul.f32 %v2509_v35, %v1950_v52  ;;  %v1963_v60 = vsel %vm19_vm0, %v1960_v41, %v1962_v53  ;;  %v1964_v61 = vsel %vm21_vm1, %v1960_v41, %v1962_v53  ;;  %v1978_v2 = vsel %vm19_vm0, %v1975_v47, %v1977_v54  ;;  %v2520_v53 = vld [vmem:[%s3527_s0 + $0x40] ss:$8 sm:$0x3] }
 0x135   :  { %v1965_v0 = vrot.slane %v1964_v61, 1  ;;  %v1968_v1 = vmul.f32 %v2508_v25, %v1963_v60  ;;  %v1979_v3 = vsel %vm21_vm1, %v1975_v47, %v1977_v54  ;;  %v1983_v6 = vmul.f32 %v2508_v25, %v1978_v2  ;;  %v2524_v47 = vld [vmem:[%s3526_s1 + $0xd0] ss:$8 sm:$0x3] }
 0x136   :  { %v1980_v5 = vrot.slane %v1979_v3, 1  ;;  %v1996_v8 = vrot.slane %v1995_v58, 7  ;;  %v1955_v10 = vadd.f32 %v1953_v57, %v1891_v28  ;;  %v1956_v12 = vadd.f32 %v1954_v59, %v1892_v29  ;;  %v2522_v28 = vld [vmem:[%s3526_s1 + $0x40] ss:$8 sm:$0x3] }
 0x137   :  { %v1969_v13 = vmul.f32 %v2509_v35, %v1965_v0  ;;  %v2010_v14 = vperm.slane %v2517_v63, 1  ;;  %v1970_v15 = vadd.f32 %v1968_v1, %v1906_v33  ;;  %v2024_v23 = vperm.slane %v2518_v4, 0  ;;  %v2525_v60 = vld [vmem:[%s3526_s1 + $0x114] ss:$8 sm:$0x3] }
 0x138   :  { %v1984_v16 = vmul.f32 %v2509_v35, %v1980_v5  ;;  %v1997_v18 = vsel %vm19_vm0, %v1994_v62, %v1996_v8  ;;  %v1998_v19 = vsel %vm21_vm1, %v1994_v62, %v1996_v8  ;;  %v1985_v25 = vadd.f32 %v1983_v6, %v1921_v43  ;;  %v2521_v63 = vld [vmem:[%s3527_s0 + $0x90] ss:$8 sm:$0x3] }
 0x139   :  { %v1999_v20 = vrot.slane %v1998_v19, 1  ;;  %v2002_v21 = vmul.f32 %v2514_v7, %v1997_v18  ;;  %v2011_v22 = vrot.slane %v2010_v14, 7  ;;  %v1971_v24 = vadd.f32 %v1969_v13, %v1907_v42 }
 0x13a   :  { %v2025_v26 = vperm.slane %v2518_v4, 1  ;;  %v2040_v27 = vperm.slane %v2519_v11, 1  ;;  %v2039_v32 = vperm.slane %v2519_v11, 0  ;;  %v1986_v33 = vadd.f32 %v1984_v16, %v1922_v51 }
 0x13b   :  { %v2003_v29 = vmul.f32 %v2515_v17, %v1999_v20  ;;  %v2012_v30 = vsel %vm19_vm0, %v2009_v9, %v2011_v22  ;;  %v2013_v31 = vsel %vm21_vm1, %v2009_v9, %v2011_v22  ;;  %v2004_v37 = vadd.f32 %v2002_v21, %v1940_v55 }
 0x13c   :  { %v2014_v34 = vrot.slane %v2013_v31, 1  ;;  %v2026_v35 = vrot.slane %v2025_v26, 7  ;;  %v2041_v36 = vrot.slane %v2040_v27, 7  ;;  %v2017_v39 = vmul.f32 %v2514_v7, %v2012_v30  ;;  %v2529_v27 = vld [vmem:[%s3526_s1 + $0x85] ss:$8 sm:$0x3] }
 0x13d   :  { %v2005_v38 = vadd.f32 %v2003_v29, %v1941_v56  ;;  %v2059_v40 = vperm.slane %v2522_v28, 1  ;;  %v2058_v44 = vperm.slane %v2522_v28, 0  ;;  %v2073_v55 = vperm.slane %v2523_v45, 0 }
 0x13e   :  { %v2018_v41 = vmul.f32 %v2515_v17, %v2014_v34  ;;  %v2027_v42 = vsel %vm19_vm0, %v2024_v23, %v2026_v35  ;;  %v2028_v43 = vsel %vm21_vm1, %v2024_v23, %v2026_v35  ;;  %v2042_v49 = vsel %vm19_vm0, %v2039_v32, %v2041_v36  ;;  %v2526_v35 = vld [vmem:[%s3527_s0 + $0x41] ss:$8 sm:$0x3] }
 0x13f   :  { %v2029_v46 = vrot.slane %v2028_v43, 1  ;;  %v2032_v48 = vmul.f32 %v2514_v7, %v2027_v42  ;;  %v2043_v50 = vsel %vm21_vm1, %v2039_v32, %v2041_v36  ;;  %v2047_v52 = vmul.f32 %v2514_v7, %v2042_v49  ;;  %v2530_v32 = vld [vmem:[%s3526_s1 + $0xd1] ss:$8 sm:$0x3] }
 0x140   :  { %v2044_v51 = vrot.slane %v2043_v50, 1  ;;  %v2060_v54 = vrot.slane %v2059_v40, 7  ;;  %v2019_v56 = vadd.f32 %v2017_v39, %v1955_v10  ;;  %v2020_v57 = vadd.f32 %v2018_v41, %v1956_v12  ;;  %v2528_v10 = vld [vmem:[%s3526_s1 + $0x41] ss:$8 sm:$0x3] }
 0x141   :  { %v2033_v58 = vmul.f32 %v2515_v17, %v2029_v46  ;;  %v2074_v59 = vperm.slane %v2523_v45, 1  ;;  %v2034_v61 = vadd.f32 %v2032_v48, %v1970_v15  ;;  %v2088_v5 = vperm.slane %v2524_v47, 0  ;;  %v2531_v42 = vld [vmem:[%s3526_s1 + $0x115] ss:$8 sm:$0x3] }
 0x142   :  { %v2048_v62 = vmul.f32 %v2515_v17, %v2044_v51  ;;  %v2061_v0 = vsel %vm19_vm0, %v2058_v44, %v2060_v54  ;;  %v2062_v1 = vsel %vm21_vm1, %v2058_v44, %v2060_v54  ;;  %v2049_v7 = vadd.f32 %v2047_v52, %v1985_v25  ;;  %v2527_v45 = vld [vmem:[%s3527_s0 + $0x91] ss:$8 sm:$0x3] }
 0x143   :  { %v2063_v2 = vrot.slane %v2062_v1, 1  ;;  %v2066_v3 = vmul.f32 %v2520_v53, %v2061_v0  ;;  %v2075_v4 = vrot.slane %v2074_v59, 7  ;;  %v2035_v6 = vadd.f32 %v2033_v58, %v1971_v24 }
 0x144   :  { %v2089_v8 = vperm.slane %v2524_v47, 1  ;;  %v2104_v9 = vperm.slane %v2525_v60, 1  ;;  %v2103_v11 = vperm.slane %v2525_v60, 0  ;;  %v2050_v15 = vadd.f32 %v2048_v62, %v1986_v33 }
 0x145   :  { %v2067_v12 = vmul.f32 %v2521_v63, %v2063_v2  ;;  %v2076_v13 = vsel %vm19_vm0, %v2073_v55, %v2075_v4  ;;  %v2077_v14 = vsel %vm21_vm1, %v2073_v55, %v2075_v4  ;;  %v2068_v19 = vadd.f32 %v2066_v3, %v2004_v37 }
 0x146   :  { %v2078_v16 = vrot.slane %v2077_v14, 1  ;;  %v2090_v17 = vrot.slane %v2089_v8, 7  ;;  %v2105_v18 = vrot.slane %v2104_v9, 7  ;;  %v2081_v21 = vmul.f32 %v2520_v53, %v2076_v13  ;;  %v2535_v9 = vld [vmem:[%s3526_s1 + $0x86] ss:$8 sm:$0x3] }
 0x147   :  { %v2069_v20 = vadd.f32 %v2067_v12, %v2005_v38  ;;  %v2123_v22 = vperm.slane %v2528_v10, 1  ;;  %v2122_v26 = vperm.slane %v2528_v10, 0  ;;  %v2137_v37 = vperm.slane %v2529_v27, 0 }
 0x148   :  { %v2082_v23 = vmul.f32 %v2521_v63, %v2078_v16  ;;  %v2091_v24 = vsel %vm19_vm0, %v2088_v5, %v2090_v17  ;;  %v2092_v25 = vsel %vm21_vm1, %v2088_v5, %v2090_v17  ;;  %v2106_v30 = vsel %vm19_vm0, %v2103_v11, %v2105_v18  ;;  %v2532_v17 = vld [vmem:[%s3527_s0 + $0x42] ss:$8 sm:$0x3] }
 0x149   :  { %v2093_v28 = vrot.slane %v2092_v25, 1  ;;  %v2096_v29 = vmul.f32 %v2520_v53, %v2091_v24  ;;  %v2107_v31 = vsel %vm21_vm1, %v2103_v11, %v2105_v18  ;;  %v2111_v34 = vmul.f32 %v2520_v53, %v2106_v30  ;;  %v2536_v11 = vld [vmem:[%s3526_s1 + $0xd2] ss:$8 sm:$0x3] }
 0x14a   :  { %v2108_v33 = vrot.slane %v2107_v31, 1  ;;  %v2124_v36 = vrot.slane %v2123_v22, 7  ;;  %v2083_v38 = vadd.f32 %v2081_v21, %v2019_v56  ;;  %v2084_v39 = vadd.f32 %v2082_v23, %v2020_v57  ;;  %v2534_v56 = vld [vmem:[%s3526_s1 + $0x42] ss:$8 sm:$0x3] }
 0x14b   :  { %v2097_v40 = vmul.f32 %v2521_v63, %v2093_v28  ;;  %v2138_v41 = vperm.slane %v2529_v27, 1  ;;  %v2098_v43 = vadd.f32 %v2096_v29, %v2034_v61  ;;  %v2152_v51 = vperm.slane %v2530_v32, 0  ;;  %v2537_v24 = vld [vmem:[%s3526_s1 + $0x116] ss:$8 sm:$0x3] }
 0x14c   :  { %v2112_v44 = vmul.f32 %v2521_v63, %v2108_v33  ;;  %v2125_v46 = vsel %vm19_vm0, %v2122_v26, %v2124_v36  ;;  %v2126_v48 = vsel %vm21_vm1, %v2122_v26, %v2124_v36  ;;  %v2113_v53 = vadd.f32 %v2111_v34, %v2049_v7  ;;  %v2533_v27 = vld [vmem:[%s3527_s0 + $0x92] ss:$8 sm:$0x3] }
 0x14d   :  { %v2127_v49 = vrot.slane %v2126_v48, 1  ;;  %v2130_v50 = vmul.f32 %v2526_v35, %v2125_v46  ;;  %v2139_v47 = vrot.slane %v2138_v41, 7  ;;  %v2099_v52 = vadd.f32 %v2097_v40, %v2035_v6 }
 0x14e   :  { %v2153_v54 = vperm.slane %v2530_v32, 1  ;;  %v2168_v55 = vperm.slane %v2531_v42, 1  ;;  %v2167_v60 = vperm.slane %v2531_v42, 0  ;;  %v2114_v61 = vadd.f32 %v2112_v44, %v2050_v15 }
 0x14f   :  { %v2131_v57 = vmul.f32 %v2527_v45, %v2127_v49  ;;  %v2140_v58 = vsel %vm19_vm0, %v2137_v37, %v2139_v47  ;;  %v2141_v59 = vsel %vm21_vm1, %v2137_v37, %v2139_v47  ;;  %v2132_v1 = vadd.f32 %v2130_v50, %v2068_v19 }
 0x150   :  { %v2142_v62 = vrot.slane %v2141_v59, 1  ;;  %v2154_v63 = vrot.slane %v2153_v54, 7  ;;  %v2169_v0 = vrot.slane %v2168_v55, 7  ;;  %v2145_v3 = vmul.f32 %v2526_v35, %v2140_v58  ;;  %v2541_v55 = vld [vmem:[%s3526_s1 + $0x87] ss:$8 sm:$0x3] }
 0x151   :  { %v2133_v2 = vadd.f32 %v2131_v57, %v2069_v20  ;;  %v2187_v4 = vperm.slane %v2534_v56, 1  ;;  %v2186_v8 = vperm.slane %v2534_v56, 0  ;;  %v2201_v19 = vperm.slane %v2535_v9, 0 }
 0x152   :  { %v2146_v5 = vmul.f32 %v2527_v45, %v2142_v62  ;;  %v2155_v6 = vsel %vm19_vm0, %v2152_v51, %v2154_v63  ;;  %v2156_v7 = vsel %vm21_vm1, %v2152_v51, %v2154_v63  ;;  %v2170_v13 = vsel %vm19_vm0, %v2167_v60, %v2169_v0  ;;  %v2538_v63 = vld [vmem:[%s3527_s0 + $0x43] ss:$8 sm:$0x3] }
 0x153   :  { %v2157_v10 = vrot.slane %v2156_v7, 1  ;;  %v2160_v12 = vmul.f32 %v2526_v35, %v2155_v6  ;;  %v2171_v14 = vsel %vm21_vm1, %v2167_v60, %v2169_v0  ;;  %v2175_v16 = vmul.f32 %v2526_v35, %v2170_v13  ;;  %v2542_v60 = vld [vmem:[%s3526_s1 + $0xd3] ss:$8 sm:$0x3] }
 0x154   :  { %v2172_v15 = vrot.slane %v2171_v14, 1  ;;  %v2188_v18 = vrot.slane %v2187_v4, 7  ;;  %v2147_v20 = vadd.f32 %v2145_v3, %v2083_v38  ;;  %v2148_v21 = vadd.f32 %v2146_v5, %v2084_v39  ;;  %v2540_v38 = vld [vmem:[%s3526_s1 + $0x43] ss:$8 sm:$0x3] }
 0x155   :  { %v2161_v22 = vmul.f32 %v2527_v45, %v2157_v10  ;;  %v2202_v23 = vperm.slane %v2535_v9, 1  ;;  %v2162_v25 = vadd.f32 %v2160_v12, %v2098_v43  ;;  %v2216_v33 = vperm.slane %v2536_v11, 0  ;;  %v2543_v6 = vld [vmem:[%s3526_s1 + $0x117] ss:$8 sm:$0x3] }
 0x156   :  { %v2176_v26 = vmul.f32 %v2527_v45, %v2172_v15  ;;  %v2189_v28 = vsel %vm19_vm0, %v2186_v8, %v2188_v18  ;;  %v2190_v29 = vsel %vm21_vm1, %v2186_v8, %v2188_v18  ;;  %v2177_v35 = vadd.f32 %v2175_v16, %v2113_v53  ;;  %v2539_v8 = vld [vmem:[%s3527_s0 + $0x93] ss:$8 sm:$0x3] }
 0x157   :  { %v2191_v30 = vrot.slane %v2190_v29, 1  ;;  %v2194_v31 = vmul.f32 %v2532_v17, %v2189_v28  ;;  %v2203_v32 = vrot.slane %v2202_v23, 7  ;;  %v2163_v34 = vadd.f32 %v2161_v22, %v2099_v52 }
 0x158   :  { %v2217_v36 = vperm.slane %v2536_v11, 1  ;;  %v2232_v37 = vperm.slane %v2537_v24, 1  ;;  %v2231_v42 = vperm.slane %v2537_v24, 0  ;;  %v2178_v43 = vadd.f32 %v2176_v26, %v2114_v61 }
 0x159   :  { %v2195_v39 = vmul.f32 %v2533_v27, %v2191_v30  ;;  %v2204_v40 = vsel %vm19_vm0, %v2201_v19, %v2203_v32  ;;  %v2205_v41 = vsel %vm21_vm1, %v2201_v19, %v2203_v32  ;;  %v2196_v48 = vadd.f32 %v2194_v31, %v2132_v1 }
 0x15a   :  { %v2206_v44 = vrot.slane %v2205_v41, 1  ;;  %v2218_v45 = vrot.slane %v2217_v36, 7  ;;  %v2233_v46 = vrot.slane %v2232_v37, 7  ;;  %v2209_v50 = vmul.f32 %v2532_v17, %v2204_v40 }
 0x15b   :  { %v2197_v49 = vadd.f32 %v2195_v39, %v2133_v2  ;;  %v2251_v47 = vperm.slane %v2540_v38, 1  ;;  %v2250_v54 = vperm.slane %v2540_v38, 0  ;;  %v2265_v1 = vperm.slane %v2541_v55, 0 }
 0x15c   :  { %v2210_v51 = vmul.f32 %v2533_v27, %v2206_v44  ;;  %v2219_v52 = vsel %vm19_vm0, %v2216_v33, %v2218_v45  ;;  %v2220_v53 = vsel %vm21_vm1, %v2216_v33, %v2218_v45  ;;  %v2234_v58 = vsel %vm19_vm0, %v2231_v42, %v2233_v46 }
 0x15d   :  { %v2221_v56 = vrot.slane %v2220_v53, 1  ;;  %v2224_v57 = vmul.f32 %v2532_v17, %v2219_v52  ;;  %v2235_v59 = vsel %vm21_vm1, %v2231_v42, %v2233_v46  ;;  %v2239_v62 = vmul.f32 %v2532_v17, %v2234_v58 }
 0x15e   :  { %v2236_v61 = vrot.slane %v2235_v59, 1  ;;  %v2252_v0 = vrot.slane %v2251_v47, 7  ;;  %v2211_v2 = vadd.f32 %v2209_v50, %v2147_v20  ;;  %v2212_v3 = vadd.f32 %v2210_v51, %v2148_v21 }
 0x15f   :  { %v2225_v4 = vmul.f32 %v2533_v27, %v2221_v56  ;;  %v2266_v5 = vperm.slane %v2541_v55, 1  ;;  %v2226_v7 = vadd.f32 %v2224_v57, %v2162_v25  ;;  %v2280_v12 = vperm.slane %v2542_v60, 0 }
 0x160   :  { %v2253_v9 = vsel %vm19_vm0, %v2250_v54, %v2252_v0  ;;  %v2254_v10 = vsel %vm21_vm1, %v2250_v54, %v2252_v0  ;;  %v2240_v13 = vmul.f32 %v2533_v27, %v2236_v61  ;;  %v2241_v17 = vadd.f32 %v2239_v62, %v2177_v35 }
 0x161   :  { %v2255_v14 = vrot.slane %v2254_v10, 1  ;;  %v2258_v11 = vmul.f32 %v2538_v63, %v2253_v9  ;;  %v2267_v15 = vrot.slane %v2266_v5, 7  ;;  %v2227_v16 = vadd.f32 %v2225_v4, %v2163_v34 }
 0x162   :  { %v2281_v18 = vperm.slane %v2542_v60, 1  ;;  %v2296_v19 = vperm.slane %v2543_v6, 1  ;;  %v2295_v23 = vperm.slane %v2543_v6, 0  ;;  %v2242_v29 = vadd.f32 %v2240_v13, %v2178_v43 }
 0x163   :  { %v2259_v20 = vmul.f32 %v2539_v8, %v2255_v14  ;;  %v2268_v21 = vsel %vm19_vm0, %v2265_v1, %v2267_v15  ;;  %v2269_v22 = vsel %vm21_vm1, %v2265_v1, %v2267_v15  ;;  %v2260_v30 = vadd.f32 %v2258_v11, %v2196_v48 }
 0x164   :  { %v2270_v24 = vrot.slane %v2269_v22, 1  ;;  %v2273_v25 = vmul.f32 %v2538_v63, %v2268_v21  ;;  %v2282_v26 = vrot.slane %v2281_v18, 7  ;;  %v2297_v28 = vrot.slane %v2296_v19, 7 }
 0x165   :  { %v2261_v27 = vadd.f32 %v2259_v20, %v2197_v49  ;;  %v2307_v31 = vlaneseq }
 0x166   :  { %v2274_v32 = vmul.f32 %v2539_v8, %v2270_v24  ;;  %v2275_v33 = vadd.f32 %v2273_v25, %v2211_v2  ;;  %v2283_v34 = vsel %vm19_vm0, %v2280_v12, %v2282_v26  ;;  %v2284_v35 = vsel %vm21_vm1, %v2280_v12, %v2282_v26 }
 0x167   :  { %v2285_v36 = vrot.slane %v2284_v35, 1  ;;  %v2288_v37 = vmul.f32 %v2538_v63, %v2283_v34  ;;  %v2298_v38 = vsel %vm19_vm0, %v2295_v23, %v2297_v28  ;;  %v2299_v39 = vsel %vm21_vm1, %v2295_v23, %v2297_v28 }
 0x168   :  { %v2276_v40 = vadd.f32 %v2274_v32, %v2212_v3  ;;  %v2300_v41 = vrot.slane %v2299_v39, 1  ;;  %v2303_v42 = vmul.f32 %v2538_v63, %v2298_v38  ;;  %vm2309_vm2 = vcmp.lt.s32.totalorder %v2307_v31, 256 }
 0x169   :  { %v2289_v43 = vmul.f32 %v2539_v8, %v2285_v36  ;;  %v2290_v44 = vadd.f32 %v2288_v37, %v2226_v7  ;;  %2311 = vst.msk [vmem:[%s3528_s2] ss:$4 sm:$0x3] %vm2309_vm2, %v2260_v30 }
 0x16a   :  { %v2304_v45 = vmul.f32 %v2539_v8, %v2300_v41  ;;  %2544 = vst.msk [vmem:[%s3528_s2 + $0x8] ss:$4 sm:$0x3] %vm2309_vm2, %v2261_v27  ;;  %v2305_v48 = vadd.f32 %v2303_v42, %v2241_v17 }
 0x16b   :  { %v2291_v46 = vadd.f32 %v2289_v43, %v2227_v16  ;;  %2545 = vst.msk [vmem:[%s3528_s2 + $0x1] ss:$4 sm:$0x3] %vm2309_vm2, %v2275_v33 }
 0x16c   :  { %v2306_v49 = vadd.f32 %v2304_v45, %v2242_v29  ;;  %2546 = vst.msk [vmem:[%s3528_s2 + $0x9] ss:$4 sm:$0x3] %vm2309_vm2, %v2276_v40 }
 0x16d   :  { %2547 = vst.msk [vmem:[%s3528_s2 + $0x2] ss:$4 sm:$0x3] %vm2309_vm2, %v2290_v44 }
 0x16e   :  { %2548 = vst.msk [vmem:[%s3528_s2 + $0xa] ss:$4 sm:$0x3] %vm2309_vm2, %v2291_v46 }
 0x16f   :  { %2549 = vst.msk [vmem:[%s3528_s2 + $0x3] ss:$4 sm:$0x3] %vm2309_vm2, %v2305_v48 }
 0x170   :  { %2550 = vst.msk [vmem:[%s3528_s2 + $0xb] ss:$4 sm:$0x3] %vm2309_vm2, %v2306_v49 }

// kernel: rcm_forward.21
= control target key start
LH: loop header
LB: loop body
LE: loop exit
PB: predicated region body
PF: predicated region fallthrough
CT: control target
= control target key end

     0   :  { %s153_s0 = inlined_call_operand.vmem [shape: f32[4,512], index: 0, kind: input, shape index: {}]   ;;  %s154_s3 = inlined_call_operand.vmem [shape: f32[4,512], index: 3, kind: input, shape index: {}]   ;;  %s155_s1 = inlined_call_operand.vmem [shape: f32[4,512], index: 1, kind: input, shape index: {}]   ;;  %s156_s4 = inlined_call_operand.vmem [shape: f32[4,512], index: 4, kind: input, shape index: {}]   ;;  %s157_s5 = inlined_call_operand.vmem [shape: f32[4,512], index: 5, kind: output, shape index: {0}]   ;;  %s158_s2 = inlined_call_operand.vmem [shape: f32[4,512], index: 2, kind: input, shape index: {}]   ;;  %s159_s6 = inlined_call_operand.vmem [shape: f32[4,512], index: 6, kind: output, shape index: {1}]   ;;  %s160_s7 = inlined_call_operand.vmem [shape: f32[4,512], index: 7, kind: output, shape index: {2}]  }
   0x1   :  { %v23_v0 = vld [vmem:[%s154_s3] sm:$0xff]  ;;  %v24_v2 = vld [vmem:[%s154_s3 + $0x8] sm:$0xff] }
   0x2   :  { %v27_v1 = vld [vmem:[%s153_s0] sm:$0xff]  ;;  %v39_v4 = vand.u32 2147483647, %v23_v0  ;;  %v28_v5 = vld [vmem:[%s153_s0 + $0x8] sm:$0xff]  ;;  %v40_v6 = vand.u32 2147483647, %v24_v2 }
   0x3   :  { %v29_v3 = vadd.f32 %v27_v1, %v23_v0  ;;  %v25_v7 = vld [vmem:[%s156_s4] sm:$0xff]  ;;  %v30_v8 = vadd.f32 %v28_v5, %v24_v2  ;;  %v26_v11 = vld [vmem:[%s156_s4 + $0x8] sm:$0xff] }
   0x4   :  { %v33_v9 = vld [vmem:[%s155_s1] sm:$0xff]  ;;  %v41_v10 = vand.u32 2147483647, %v25_v7  ;;  %v34_v12 = vld [vmem:[%s155_s1 + $0x8] sm:$0xff]  ;;  %v42_v15 = vand.u32 2147483647, %v26_v11 }
   0x5   :  { %31 = vst [vmem:[%s157_s5] sm:$0xff] %v29_v3  ;;  %v35_v13 = vadd.f32 %v33_v9, %v25_v7  ;;  %v36_v14 = vadd.f32 %v34_v12, %v26_v11  ;;  %v47_v16 = vld [vmem:[%s158_s2] sm:$0xff]  ;;  %v48_v17 = vld [vmem:[%s158_s2 + $0x8] sm:$0xff] }
   0x6   :  { %32 = vst [vmem:[%s157_s5 + $0x8] sm:$0xff] %v30_v8  ;;  %vm43_vm0 = vcmp.ge.f32.partialorder %v39_v4, %v41_v10  ;;  %vm44_vm1 = vcmp.ge.f32.partialorder %v40_v6, %v42_v15 }
   0x7   :  { %37 = vst [vmem:[%s159_s6] sm:$0xff] %v35_v13  ;;  %v45_v18 = vsel %vm43_vm0, %v23_v0, %v25_v7  ;;  %v46_v20 = vsel %vm44_vm1, %v24_v2, %v26_v11 }
   0x8   :  { %38 = vst [vmem:[%s159_s6 + $0x8] sm:$0xff] %v36_v14  ;;  %v49_v19 = vadd.f32 %v47_v16, %v45_v18  ;;  %v50_v21 = vadd.f32 %v48_v17, %v46_v20 }
   0xa   :  { %51 = vst [vmem:[%s160_s7] sm:$0xff] %v49_v19 }
   0xb   :  { %52 = vst [vmem:[%s160_s7 + $0x8] sm:$0xff] %v50_v21 }

// kernel: rcm_forward.20
= control target key start
LH: loop header
LB: loop body
LE: loop exit
PB: predicated region body
PF: predicated region fallthrough
CT: control target
= control target key end

     0   :  { %s1448_s9 = smov 0   ;;  %s1450_s10 = smov 0   ;;  %s1847_s0 = inlined_call_operand.vmem [shape: f32[2,36,64], index: 0, kind: input, shape index: {}]   ;;  %s1848_s1 = inlined_call_operand.vmem [shape: f32[4,144,64], index: 1, kind: input, shape index: {}]   ;;  %s1849_s2 = inlined_call_operand.vmem [shape: f32[4,2,4,64], index: 2, kind: output, shape index: {}]  }
   0x1   :  { %s1452_s11 = smov 0  }
   0x2 LB: > { %s24_s12 = sadd.s32 1, %s1427_s10  ;;  %p1233_p0 = scmp.ge.s32.totalorder %s1431_s11, 1  ;;  %s1431_s11 = sphi %s1452_s11, %s12_s11   ;;  %s1427_s10 = sphi %s1450_s10, %s1851_s10   ;;  %s1423_s9 = sphi %s1448_s9, %s1850_s9  }
   0x3   : > { %p26_p1 = scmp.ge.s32.totalorder %s24_s12, 4  ;;  %p140_p2 = scmp.lt.s32.totalorder %s1431_s11, 5 }
   0x5   : > { %s1853_s12 = smov (%p26_p1, %s24_s12), 0  ;;  %p141_p3 = pnand %p1233_p0, %p140_p2 }
   0x6   : > { %p176_p4 = scmp.lt.s32.totalorder (!%p141_p3), %s1423_s9, 3 }
   0x7   : > { %144 = sbr.rel (%p141_p3) target bundleno = 166 (0xa6), region = 28 }
   0xc   : > { %s1855_s9 = smov (!%p176_p4, %s1423_s9), 3  ;;  %v192_v0 = vld [vmem:[%s1847_s0] sm:$0x1]  ;;  %v193_v1 = vld [vmem:[%s1847_s0 + $0x28] sm:$0x1]  ;;  %vm1120_vm0 = vcmask 516096  }
   0xd   : > { %s1240_s13 = smul.u32 144, %s1855_s9  ;;  %v210_v3 = vld [vmem:[%s1847_s0 + $0x1] sm:$0x1]  ;;  %v211_v4 = vld [vmem:[%s1847_s0 + $0x29] sm:$0x1]  ;;  %s1239_s23 = sshll.u32 %s1855_s9, 3 }
   0xe   : > { %v236_v16 = vld [vmem:[%s1847_s0 + $0x2] sm:$0x1]  ;;  %v237_v17 = vld [vmem:[%s1847_s0 + $0x2a] sm:$0x1]  ;;  %v262_v39 = vld [vmem:[%s1847_s0 + $0x3] sm:$0x1]  ;;  %s191_s26 = scalar_lea.vmem %s1849_s2, %s1239_s23 }
   0xf   : > { %s1472_s16 = scalar_lea.vmem %s1848_s1, %s1240_s13  ;;  %v263_v40 = vld [vmem:[%s1847_s0 + $0x2b] sm:$0x1]  ;;  %v288_v61 = vld [vmem:[%s1847_s0 + $0x4] sm:$0x1]  ;;  %v289_v62 = vld [vmem:[%s1847_s0 + $0x2c] sm:$0x1] }
  0x10   : > { %v1265_v2 = vld [vmem:[%s1472_s16] ss:$0 sm:$0xff]  ;;  %v1266_v5 = vld [vmem:[%s1472_s16 + $0x24] ss:$0 sm:$0xff]  ;;  %v1267_v6 = vld [vmem:[%s1472_s16 + $0x48] ss:$0 sm:$0xff] }
  0x11   : > { %v1268_v7 = vld [vmem:[%s1472_s16 + $0x6c] ss:$0 sm:$0xff]  ;;  %v196_v8 = vmul.f32 %v1265_v2, %v192_v0  ;;  %v197_v9 = vmul.f32 %v1265_v2, %v193_v1  ;;  %v200_v10 = vmul.f32 %v1266_v5, %v192_v0  ;;  %v1269_v11 = vld [vmem:[%s1472_s16 + $0x1] ss:$0 sm:$0xff]  ;;  %v1270_v12 = vld [vmem:[%s1472_s16 + $0x25] ss:$0 sm:$0xff]  ;;  %v201_v13 = vmul.f32 %v1266_v5, %v193_v1 }
  0x12   : > { %v204_v14 = vmul.f32 %v1267_v6, %v192_v0  ;;  %v1271_v15 = vld [vmem:[%s1472_s16 + $0x49] ss:$0 sm:$0xff]  ;;  %v214_v18 = vmul.f32 %v1269_v11, %v210_v3  ;;  %v215_v19 = vmul.f32 %v1269_v11, %v211_v4  ;;  %v220_v20 = vmul.f32 %v1270_v12, %v210_v3  ;;  %v1272_v22 = vld [vmem:[%s1472_s16 + $0x6d] ss:$0 sm:$0xff]  ;;  %v1273_v23 = vld [vmem:[%s1472_s16 + $0x2] ss:$0 sm:$0xff] }
  0x13   : > { %v221_v21 = vmul.f32 %v1270_v12, %v211_v4  ;;  %v205_v24 = vmul.f32 %v1267_v6, %v193_v1  ;;  %v208_v25 = vmul.f32 %v1268_v7, %v192_v0  ;;  %v226_v26 = vmul.f32 %v1271_v15, %v210_v3  ;;  %v1274_v28 = vld [vmem:[%s1472_s16 + $0x26] ss:$0 sm:$0xff]  ;;  %v1275_v33 = vld [vmem:[%s1472_s16 + $0x4a] ss:$0 sm:$0xff]  ;;  %v1276_v38 = vld [vmem:[%s1472_s16 + $0x6e] ss:$0 sm:$0xff] }
  0x14   : > { %v227_v27 = vmul.f32 %v1271_v15, %v211_v4  ;;  %v209_v29 = vmul.f32 %v1268_v7, %v193_v1  ;;  %v216_v30 = vadd.f32 %v214_v18, %v196_v8  ;;  %v217_v31 = vadd.f32 %v215_v19, %v197_v9  ;;  %v1277_v45 = vld [vmem:[%s1472_s16 + $0x3] ss:$0 sm:$0xff]  ;;  %v1278_v46 = vld [vmem:[%s1472_s16 + $0x27] ss:$0 sm:$0xff]  ;;  %v1279_v51 = vld [vmem:[%s1472_s16 + $0x4b] ss:$0 sm:$0xff] }
  0x15   : > { %v222_v32 = vadd.f32 %v220_v20, %v200_v10  ;;  %v223_v34 = vadd.f32 %v221_v21, %v201_v13  ;;  %v228_v35 = vadd.f32 %v226_v26, %v204_v14  ;;  %v232_v36 = vmul.f32 %v1272_v22, %v210_v3  ;;  %v1280_v60 = vld [vmem:[%s1472_s16 + $0x6f] ss:$0 sm:$0xff]  ;;  %v1281_v3 = vld [vmem:[%s1472_s16 + $0x4] ss:$0 sm:$0xff]  ;;  %v1283_v9 = vld [vmem:[%s1472_s16 + $0x4c] ss:$0 sm:$0xff] }
  0x16   : > { %v233_v37 = vmul.f32 %v1272_v22, %v211_v4  ;;  %v240_v41 = vmul.f32 %v1273_v23, %v236_v16  ;;  %v241_v42 = vmul.f32 %v1273_v23, %v237_v17  ;;  %v246_v43 = vmul.f32 %v1274_v28, %v236_v16  ;;  %v1282_v4 = vld [vmem:[%s1472_s16 + $0x28] ss:$0 sm:$0xff]  ;;  %v1284_v18 = vld [vmem:[%s1472_s16 + $0x70] ss:$0 sm:$0xff]  ;;  %v314_v19 = vld [vmem:[%s1847_s0 + $0x5] sm:$0x1] }
  0x17   : > { %v247_v44 = vmul.f32 %v1274_v28, %v237_v17  ;;  %v229_v47 = vadd.f32 %v227_v27, %v205_v24  ;;  %v234_v48 = vadd.f32 %v232_v36, %v208_v25  ;;  %v252_v49 = vmul.f32 %v1275_v33, %v236_v16  ;;  %v315_v20 = vld [vmem:[%s1847_s0 + $0x2d] sm:$0x1]  ;;  %v1285_v25 = vld [vmem:[%s1472_s16 + $0x5] ss:$0 sm:$0xff]  ;;  %v1286_v26 = vld [vmem:[%s1472_s16 + $0x29] ss:$0 sm:$0xff] }
  0x18   : > { %v253_v50 = vmul.f32 %v1275_v33, %v237_v17  ;;  %v235_v52 = vadd.f32 %v233_v37, %v209_v29  ;;  %v242_v53 = vadd.f32 %v240_v41, %v216_v30  ;;  %v243_v54 = vadd.f32 %v241_v42, %v217_v31  ;;  %v1287_v31 = vld [vmem:[%s1472_s16 + $0x4d] ss:$0 sm:$0xff]  ;;  %v340_v41 = vld [vmem:[%s1847_s0 + $0x6] sm:$0x1] }
  0x19   : > { %v248_v55 = vadd.f32 %v246_v43, %v222_v32  ;;  %v249_v56 = vadd.f32 %v247_v44, %v223_v34  ;;  %v254_v57 = vadd.f32 %v252_v49, %v228_v35  ;;  %v258_v58 = vmul.f32 %v1276_v38, %v236_v16 }
  0x1a   : > { %v259_v59 = vmul.f32 %v1276_v38, %v237_v17  ;;  %v266_v63 = vmul.f32 %v1277_v45, %v262_v39  ;;  %v267_v0 = vmul.f32 %v1277_v45, %v263_v40  ;;  %v272_v1 = vmul.f32 %v1278_v46, %v262_v39 }
  0x1b   : > { %v273_v2 = vmul.f32 %v1278_v46, %v263_v40  ;;  %v255_v5 = vadd.f32 %v253_v50, %v229_v47  ;;  %v260_v6 = vadd.f32 %v258_v58, %v234_v48  ;;  %v278_v7 = vmul.f32 %v1279_v51, %v262_v39  ;;  %v341_v46 = vld [vmem:[%s1847_s0 + $0x2e] sm:$0x1]  ;;  %v1289_v47 = vld [vmem:[%s1472_s16 + $0x6] ss:$0 sm:$0xff]  ;;  %v1290_v48 = vld [vmem:[%s1472_s16 + $0x2a] ss:$0 sm:$0xff] }
  0x1c   : > { %v279_v8 = vmul.f32 %v1279_v51, %v263_v40  ;;  %v261_v10 = vadd.f32 %v259_v59, %v235_v52  ;;  %v268_v11 = vadd.f32 %v266_v63, %v242_v53  ;;  %v269_v12 = vadd.f32 %v267_v0, %v243_v54  ;;  %v1291_v53 = vld [vmem:[%s1472_s16 + $0x4e] ss:$0 sm:$0xff]  ;;  %v366_v63 = vld [vmem:[%s1847_s0 + $0x7] sm:$0x1]  ;;  %v367_v0 = vld [vmem:[%s1847_s0 + $0x2f] sm:$0x1] }
  0x1d   : > { %v274_v13 = vadd.f32 %v272_v1, %v248_v55  ;;  %v275_v14 = vadd.f32 %v273_v2, %v249_v56  ;;  %v280_v15 = vadd.f32 %v278_v7, %v254_v57  ;;  %v284_v16 = vmul.f32 %v1280_v60, %v262_v39 }
  0x1e   : > { %v285_v17 = vmul.f32 %v1280_v60, %v263_v40  ;;  %v292_v21 = vmul.f32 %v1281_v3, %v288_v61  ;;  %v293_v22 = vmul.f32 %v1281_v3, %v289_v62  ;;  %v298_v23 = vmul.f32 %v1282_v4, %v288_v61  ;;  %v1288_v40 = vld [vmem:[%s1472_s16 + $0x71] ss:$0 sm:$0xff] }
  0x1f   : > { %v299_v24 = vmul.f32 %v1282_v4, %v289_v62  ;;  %v281_v27 = vadd.f32 %v279_v8, %v255_v5  ;;  %v286_v28 = vadd.f32 %v284_v16, %v260_v6  ;;  %v304_v29 = vmul.f32 %v1283_v9, %v288_v61  ;;  %v1293_v5 = vld [vmem:[%s1472_s16 + $0x7] ss:$0 sm:$0xff]  ;;  %v1294_v6 = vld [vmem:[%s1472_s16 + $0x2b] ss:$0 sm:$0xff]  ;;  %v1296_v16 = vld [vmem:[%s1472_s16 + $0x73] ss:$0 sm:$0xff] }
  0x20   : > { %v305_v30 = vmul.f32 %v1283_v9, %v289_v62  ;;  %v287_v32 = vadd.f32 %v285_v17, %v261_v10  ;;  %v294_v33 = vadd.f32 %v292_v21, %v268_v11  ;;  %v295_v34 = vadd.f32 %v293_v22, %v269_v12  ;;  %v1295_v11 = vld [vmem:[%s1472_s16 + $0x4f] ss:$0 sm:$0xff]  ;;  %v392_v21 = vld [vmem:[%s1847_s0 + $0x8] sm:$0x1]  ;;  %v393_v22 = vld [vmem:[%s1847_s0 + $0x30] sm:$0x1] }
  0x21   : > { %v300_v35 = vadd.f32 %v298_v23, %v274_v13  ;;  %v301_v36 = vadd.f32 %v299_v24, %v275_v14  ;;  %v306_v37 = vadd.f32 %v304_v29, %v280_v15  ;;  %v310_v38 = vmul.f32 %v1284_v18, %v288_v61 }
  0x22   : > { %v311_v39 = vmul.f32 %v1284_v18, %v289_v62  ;;  %v318_v42 = vmul.f32 %v1285_v25, %v314_v19  ;;  %v319_v43 = vmul.f32 %v1285_v25, %v315_v20  ;;  %v324_v44 = vmul.f32 %v1286_v26, %v314_v19  ;;  %v1292_v62 = vld [vmem:[%s1472_s16 + $0x72] ss:$0 sm:$0xff] }
  0x23   : > { %v325_v45 = vmul.f32 %v1286_v26, %v315_v20  ;;  %v307_v49 = vadd.f32 %v305_v30, %v281_v27  ;;  %v312_v50 = vadd.f32 %v310_v38, %v286_v28  ;;  %v330_v51 = vmul.f32 %v1287_v31, %v314_v19  ;;  %v1297_v27 = vld [vmem:[%s1472_s16 + $0x8] ss:$0 sm:$0xff]  ;;  %v1298_v28 = vld [vmem:[%s1472_s16 + $0x2c] ss:$0 sm:$0xff]  ;;  %v1300_v38 = vld [vmem:[%s1472_s16 + $0x74] ss:$0 sm:$0xff] }
  0x24   : > { %v331_v52 = vmul.f32 %v1287_v31, %v315_v20  ;;  %v313_v54 = vadd.f32 %v311_v39, %v287_v32  ;;  %v320_v55 = vadd.f32 %v318_v42, %v294_v33  ;;  %v321_v56 = vadd.f32 %v319_v43, %v295_v34  ;;  %v1299_v33 = vld [vmem:[%s1472_s16 + $0x50] ss:$0 sm:$0xff]  ;;  %v418_v43 = vld [vmem:[%s1847_s0 + $0x9] sm:$0x1] }
  0x25   : > { %v326_v57 = vadd.f32 %v324_v44, %v300_v35  ;;  %v327_v58 = vadd.f32 %v325_v45, %v301_v36  ;;  %v332_v59 = vadd.f32 %v330_v51, %v306_v37  ;;  %v336_v60 = vmul.f32 %v1288_v40, %v314_v19 }
  0x26   : > { %v337_v61 = vmul.f32 %v1288_v40, %v315_v20  ;;  %v344_v1 = vmul.f32 %v1289_v47, %v340_v41  ;;  %v345_v2 = vmul.f32 %v1289_v47, %v341_v46  ;;  %v350_v3 = vmul.f32 %v1290_v48, %v340_v41 }
  0x27   : > { %v351_v4 = vmul.f32 %v1290_v48, %v341_v46  ;;  %v333_v7 = vadd.f32 %v331_v52, %v307_v49  ;;  %v338_v8 = vadd.f32 %v336_v60, %v312_v50  ;;  %v356_v9 = vmul.f32 %v1291_v53, %v340_v41  ;;  %v1301_v48 = vld [vmem:[%s1472_s16 + $0x9] ss:$0 sm:$0xff]  ;;  %v1302_v49 = vld [vmem:[%s1472_s16 + $0x2d] ss:$0 sm:$0xff]  ;;  %v1304_v60 = vld [vmem:[%s1472_s16 + $0x75] ss:$0 sm:$0xff] }
  0x28   : > { %v357_v10 = vmul.f32 %v1291_v53, %v341_v46  ;;  %v339_v12 = vadd.f32 %v337_v61, %v313_v54  ;;  %v346_v13 = vadd.f32 %v344_v1, %v320_v55  ;;  %v347_v14 = vadd.f32 %v345_v2, %v321_v56  ;;  %v419_v54 = vld [vmem:[%s1847_s0 + $0x31] sm:$0x1]  ;;  %v444_v1 = vld [vmem:[%s1847_s0 + $0xa] sm:$0x1] }
  0x29   : > { %v352_v15 = vadd.f32 %v350_v3, %v326_v57  ;;  %v353_v17 = vadd.f32 %v351_v4, %v327_v58  ;;  %v358_v18 = vadd.f32 %v356_v9, %v332_v59  ;;  %v362_v19 = vmul.f32 %v1292_v62, %v340_v41  ;;  %v1303_v55 = vld [vmem:[%s1472_s16 + $0x51] ss:$0 sm:$0xff] }
  0x2a   : > { %v363_v20 = vmul.f32 %v1292_v62, %v341_v46  ;;  %v370_v23 = vmul.f32 %v1293_v5, %v366_v63  ;;  %v371_v24 = vmul.f32 %v1293_v5, %v367_v0  ;;  %v376_v25 = vmul.f32 %v1294_v6, %v366_v63 }
  0x2b   : > { %v377_v26 = vmul.f32 %v1294_v6, %v367_v0  ;;  %v359_v29 = vadd.f32 %v357_v10, %v333_v7  ;;  %v364_v30 = vadd.f32 %v362_v19, %v338_v8  ;;  %v382_v31 = vmul.f32 %v1295_v11, %v366_v63  ;;  %v1305_v6 = vld [vmem:[%s1472_s16 + $0xa] ss:$0 sm:$0xff]  ;;  %v1306_v7 = vld [vmem:[%s1472_s16 + $0x2e] ss:$0 sm:$0xff] }
  0x2c   : > { %v383_v32 = vmul.f32 %v1295_v11, %v367_v0  ;;  %v365_v34 = vadd.f32 %v363_v20, %v339_v12  ;;  %v372_v35 = vadd.f32 %v370_v23, %v346_v13  ;;  %v373_v36 = vadd.f32 %v371_v24, %v347_v14  ;;  %v445_v12 = vld [vmem:[%s1847_s0 + $0x32] sm:$0x1]  ;;  %v470_v23 = vld [vmem:[%s1847_s0 + $0xb] sm:$0x1] }
  0x2d   : > { %v378_v37 = vadd.f32 %v376_v25, %v352_v15  ;;  %v379_v39 = vadd.f32 %v377_v26, %v353_v17  ;;  %v384_v40 = vadd.f32 %v382_v31, %v358_v18  ;;  %v388_v41 = vmul.f32 %v1296_v16, %v366_v63  ;;  %v1307_v13 = vld [vmem:[%s1472_s16 + $0x52] ss:$0 sm:$0xff]  ;;  %v1308_v18 = vld [vmem:[%s1472_s16 + $0x76] ss:$0 sm:$0xff] }
  0x2e   : > { %v389_v42 = vmul.f32 %v1296_v16, %v367_v0  ;;  %v396_v44 = vmul.f32 %v1297_v27, %v392_v21  ;;  %v397_v45 = vmul.f32 %v1297_v27, %v393_v22  ;;  %v402_v46 = vmul.f32 %v1298_v28, %v392_v21 }
  0x2f   : > { %v403_v47 = vmul.f32 %v1298_v28, %v393_v22  ;;  %v385_v50 = vadd.f32 %v383_v32, %v359_v29  ;;  %v390_v51 = vadd.f32 %v388_v41, %v364_v30  ;;  %v408_v52 = vmul.f32 %v1299_v33, %v392_v21  ;;  %v471_v28 = vld [vmem:[%s1847_s0 + $0x33] sm:$0x1]  ;;  %v1309_v29 = vld [vmem:[%s1472_s16 + $0xb] ss:$0 sm:$0xff]  ;;  %v1310_v30 = vld [vmem:[%s1472_s16 + $0x2f] ss:$0 sm:$0xff] }
  0x30   : > { %v409_v53 = vmul.f32 %v1299_v33, %v393_v22  ;;  %v391_v56 = vadd.f32 %v389_v42, %v365_v34  ;;  %v398_v57 = vadd.f32 %v396_v44, %v372_v35  ;;  %v399_v58 = vadd.f32 %v397_v45, %v373_v36  ;;  %v1311_v35 = vld [vmem:[%s1472_s16 + $0x53] ss:$0 sm:$0xff]  ;;  %v496_v45 = vld [vmem:[%s1847_s0 + $0xc] sm:$0x1] }
  0x31   : > { %v404_v59 = vadd.f32 %v402_v46, %v378_v37  ;;  %v405_v61 = vadd.f32 %v403_v47, %v379_v39  ;;  %v410_v62 = vadd.f32 %v408_v52, %v384_v40  ;;  %v414_v63 = vmul.f32 %v1300_v38, %v392_v21  ;;  %v1312_v40 = vld [vmem:[%s1472_s16 + $0x77] ss:$0 sm:$0xff]  ;;  %v497_v46 = vld [vmem:[%s1847_s0 + $0x34] sm:$0x1]  ;;  %v1314_v52 = vld [vmem:[%s1472_s16 + $0x30] ss:$0 sm:$0xff] }
  0x32   : > { %v415_v0 = vmul.f32 %v1300_v38, %v393_v22  ;;  %v422_v2 = vmul.f32 %v1301_v48, %v418_v43  ;;  %v423_v3 = vmul.f32 %v1301_v48, %v419_v54  ;;  %v428_v4 = vmul.f32 %v1302_v49, %v418_v43 }
  0x33   : > { %v429_v5 = vmul.f32 %v1302_v49, %v419_v54  ;;  %v411_v8 = vadd.f32 %v409_v53, %v385_v50  ;;  %v416_v9 = vadd.f32 %v414_v63, %v390_v51  ;;  %v434_v10 = vmul.f32 %v1303_v55, %v418_v43  ;;  %v1313_v51 = vld [vmem:[%s1472_s16 + $0xc] ss:$0 sm:$0xff] }
  0x34   : > { %v435_v11 = vmul.f32 %v1303_v55, %v419_v54  ;;  %v417_v14 = vadd.f32 %v415_v0, %v391_v56  ;;  %v424_v15 = vadd.f32 %v422_v2, %v398_v57  ;;  %v425_v16 = vadd.f32 %v423_v3, %v399_v58  ;;  %v1315_v57 = vld [vmem:[%s1472_s16 + $0x54] ss:$0 sm:$0xff]  ;;  %v522_v3 = vld [vmem:[%s1847_s0 + $0xd] sm:$0x1] }
  0x35   : > { %v430_v17 = vadd.f32 %v428_v4, %v404_v59  ;;  %v431_v19 = vadd.f32 %v429_v5, %v405_v61  ;;  %v436_v20 = vadd.f32 %v434_v10, %v410_v62  ;;  %v440_v21 = vmul.f32 %v1304_v60, %v418_v43  ;;  %v1316_v62 = vld [vmem:[%s1472_s16 + $0x78] ss:$0 sm:$0xff]  ;;  %v523_v4 = vld [vmem:[%s1847_s0 + $0x35] sm:$0x1]  ;;  %v1318_v10 = vld [vmem:[%s1472_s16 + $0x31] ss:$0 sm:$0xff] }
  0x36   : > { %v441_v22 = vmul.f32 %v1304_v60, %v419_v54  ;;  %v448_v24 = vmul.f32 %v1305_v6, %v444_v1  ;;  %v449_v25 = vmul.f32 %v1305_v6, %v445_v12  ;;  %v454_v26 = vmul.f32 %v1306_v7, %v444_v1 }
  0x37   : > { %v455_v27 = vmul.f32 %v1306_v7, %v445_v12  ;;  %v437_v31 = vadd.f32 %v435_v11, %v411_v8  ;;  %v442_v32 = vadd.f32 %v440_v21, %v416_v9  ;;  %v460_v33 = vmul.f32 %v1307_v13, %v444_v1  ;;  %v1317_v9 = vld [vmem:[%s1472_s16 + $0xd] ss:$0 sm:$0xff] }
  0x38   : > { %v461_v34 = vmul.f32 %v1307_v13, %v445_v12  ;;  %v443_v36 = vadd.f32 %v441_v22, %v417_v14  ;;  %v450_v37 = vadd.f32 %v448_v24, %v424_v15  ;;  %v451_v38 = vadd.f32 %v449_v25, %v425_v16  ;;  %v1319_v15 = vld [vmem:[%s1472_s16 + $0x55] ss:$0 sm:$0xff]  ;;  %v548_v25 = vld [vmem:[%s1847_s0 + $0xe] sm:$0x1] }
  0x39   : > { %v456_v39 = vadd.f32 %v454_v26, %v430_v17  ;;  %v457_v41 = vadd.f32 %v455_v27, %v431_v19  ;;  %v462_v42 = vadd.f32 %v460_v33, %v436_v20  ;;  %v466_v43 = vmul.f32 %v1308_v18, %v444_v1  ;;  %v1320_v20 = vld [vmem:[%s1472_s16 + $0x79] ss:$0 sm:$0xff] }
  0x3a   : > { %v467_v44 = vmul.f32 %v1308_v18, %v445_v12  ;;  %v474_v47 = vmul.f32 %v1309_v29, %v470_v23  ;;  %v475_v48 = vmul.f32 %v1309_v29, %v471_v28  ;;  %v480_v49 = vmul.f32 %v1310_v30, %v470_v23 }
  0x3b   : > { %v481_v50 = vmul.f32 %v1310_v30, %v471_v28  ;;  %v463_v53 = vadd.f32 %v461_v34, %v437_v31  ;;  %v468_v54 = vadd.f32 %v466_v43, %v442_v32  ;;  %v486_v55 = vmul.f32 %v1311_v35, %v470_v23  ;;  %v1321_v30 = vld [vmem:[%s1472_s16 + $0xe] ss:$0 sm:$0xff]  ;;  %v1322_v31 = vld [vmem:[%s1472_s16 + $0x32] ss:$0 sm:$0xff] }
  0x3c   : > { %v487_v56 = vmul.f32 %v1311_v35, %v471_v28  ;;  %v469_v58 = vadd.f32 %v467_v44, %v443_v36  ;;  %v476_v59 = vadd.f32 %v474_v47, %v450_v37  ;;  %v477_v60 = vadd.f32 %v475_v48, %v451_v38  ;;  %v549_v36 = vld [vmem:[%s1847_s0 + $0x36] sm:$0x1]  ;;  %v574_v47 = vld [vmem:[%s1847_s0 + $0xf] sm:$0x1] }
  0x3d   : > { %v482_v61 = vadd.f32 %v480_v49, %v456_v39  ;;  %v483_v63 = vadd.f32 %v481_v50, %v457_v41  ;;  %v488_v0 = vadd.f32 %v486_v55, %v462_v42  ;;  %v492_v1 = vmul.f32 %v1312_v40, %v470_v23  ;;  %v1323_v37 = vld [vmem:[%s1472_s16 + $0x56] ss:$0 sm:$0xff]  ;;  %v1324_v42 = vld [vmem:[%s1472_s16 + $0x7a] ss:$0 sm:$0xff] }
  0x3e   : > { %v493_v2 = vmul.f32 %v1312_v40, %v471_v28  ;;  %v500_v5 = vmul.f32 %v1313_v51, %v496_v45  ;;  %v501_v6 = vmul.f32 %v1313_v51, %v497_v46  ;;  %v506_v7 = vmul.f32 %v1314_v52, %v496_v45 }
  0x3f   : > { %v507_v8 = vmul.f32 %v1314_v52, %v497_v46  ;;  %v489_v11 = vadd.f32 %v487_v56, %v463_v53  ;;  %v494_v12 = vadd.f32 %v492_v1, %v468_v54  ;;  %v512_v13 = vmul.f32 %v1315_v57, %v496_v45  ;;  %v1325_v52 = vld [vmem:[%s1472_s16 + $0xf] ss:$0 sm:$0xff]  ;;  %v1326_v53 = vld [vmem:[%s1472_s16 + $0x33] ss:$0 sm:$0xff] }
  0x40   : > { %v513_v14 = vmul.f32 %v1315_v57, %v497_v46  ;;  %v495_v16 = vadd.f32 %v493_v2, %v469_v58  ;;  %v502_v17 = vadd.f32 %v500_v5, %v476_v59  ;;  %v503_v18 = vadd.f32 %v501_v6, %v477_v60  ;;  %v575_v58 = vld [vmem:[%s1847_s0 + $0x37] sm:$0x1]  ;;  %v600_v5 = vld [vmem:[%s1847_s0 + $0x10] sm:$0x1] }
  0x41   : > { %v508_v19 = vadd.f32 %v506_v7, %v482_v61  ;;  %v509_v21 = vadd.f32 %v507_v8, %v483_v63  ;;  %v514_v22 = vadd.f32 %v512_v13, %v488_v0  ;;  %v518_v23 = vmul.f32 %v1316_v62, %v496_v45  ;;  %v1327_v59 = vld [vmem:[%s1472_s16 + $0x57] ss:$0 sm:$0xff]  ;;  %v1328_v0 = vld [vmem:[%s1472_s16 + $0x7b] ss:$0 sm:$0xff] }
  0x42   : > { %v519_v24 = vmul.f32 %v1316_v62, %v497_v46  ;;  %v526_v26 = vmul.f32 %v1317_v9, %v522_v3  ;;  %v527_v27 = vmul.f32 %v1317_v9, %v523_v4  ;;  %v532_v28 = vmul.f32 %v1318_v10, %v522_v3 }
  0x43   : > { %v533_v29 = vmul.f32 %v1318_v10, %v523_v4  ;;  %v515_v32 = vadd.f32 %v513_v14, %v489_v11  ;;  %v520_v33 = vadd.f32 %v518_v23, %v494_v12  ;;  %v538_v34 = vmul.f32 %v1319_v15, %v522_v3  ;;  %v601_v10 = vld [vmem:[%s1847_s0 + $0x38] sm:$0x1]  ;;  %v1329_v11 = vld [vmem:[%s1472_s16 + $0x10] ss:$0 sm:$0xff]  ;;  %v1330_v12 = vld [vmem:[%s1472_s16 + $0x34] ss:$0 sm:$0xff] }
  0x44   : > { %v539_v35 = vmul.f32 %v1319_v15, %v523_v4  ;;  %v521_v38 = vadd.f32 %v519_v24, %v495_v16  ;;  %v528_v39 = vadd.f32 %v526_v26, %v502_v17  ;;  %v529_v40 = vadd.f32 %v527_v27, %v503_v18  ;;  %v1331_v17 = vld [vmem:[%s1472_s16 + $0x58] ss:$0 sm:$0xff]  ;;  %v626_v27 = vld [vmem:[%s1847_s0 + $0x11] sm:$0x1] }
  0x45   : > { %v534_v41 = vadd.f32 %v532_v28, %v508_v19  ;;  %v535_v43 = vadd.f32 %v533_v29, %v509_v21  ;;  %v540_v44 = vadd.f32 %v538_v34, %v514_v22  ;;  %v544_v45 = vmul.f32 %v1320_v20, %v522_v3  ;;  %v1332_v22 = vld [vmem:[%s1472_s16 + $0x7c] ss:$0 sm:$0xff]  ;;  %v627_v28 = vld [vmem:[%s1847_s0 + $0x39] sm:$0x1]  ;;  %v1334_v34 = vld [vmem:[%s1472_s16 + $0x35] ss:$0 sm:$0xff] }
  0x46   : > { %v545_v46 = vmul.f32 %v1320_v20, %v523_v4  ;;  %v552_v48 = vmul.f32 %v1321_v30, %v548_v25  ;;  %v553_v49 = vmul.f32 %v1321_v30, %v549_v36  ;;  %v558_v50 = vmul.f32 %v1322_v31, %v548_v25 }
  0x47   : > { %v559_v51 = vmul.f32 %v1322_v31, %v549_v36  ;;  %v541_v54 = vadd.f32 %v539_v35, %v515_v32  ;;  %v546_v55 = vadd.f32 %v544_v45, %v520_v33  ;;  %v564_v56 = vmul.f32 %v1323_v37, %v548_v25  ;;  %v1333_v33 = vld [vmem:[%s1472_s16 + $0x11] ss:$0 sm:$0xff] }
  0x48   : > { %v565_v57 = vmul.f32 %v1323_v37, %v549_v36  ;;  %v547_v60 = vadd.f32 %v545_v46, %v521_v38  ;;  %v554_v61 = vadd.f32 %v552_v48, %v528_v39  ;;  %v555_v62 = vadd.f32 %v553_v49, %v529_v40  ;;  %v1335_v39 = vld [vmem:[%s1472_s16 + $0x59] ss:$0 sm:$0xff]  ;;  %v652_v49 = vld [vmem:[%s1847_s0 + $0x12] sm:$0x1] }
  0x49   : > { %v560_v63 = vadd.f32 %v558_v50, %v534_v41  ;;  %v561_v1 = vadd.f32 %v559_v51, %v535_v43  ;;  %v566_v2 = vadd.f32 %v564_v56, %v540_v44  ;;  %v570_v3 = vmul.f32 %v1324_v42, %v548_v25  ;;  %v1336_v44 = vld [vmem:[%s1472_s16 + $0x7d] ss:$0 sm:$0xff]  ;;  %v653_v50 = vld [vmem:[%s1847_s0 + $0x3a] sm:$0x1]  ;;  %v1338_v56 = vld [vmem:[%s1472_s16 + $0x36] ss:$0 sm:$0xff] }
  0x4a   : > { %v571_v4 = vmul.f32 %v1324_v42, %v549_v36  ;;  %v578_v6 = vmul.f32 %v1325_v52, %v574_v47  ;;  %v579_v7 = vmul.f32 %v1325_v52, %v575_v58  ;;  %v584_v8 = vmul.f32 %v1326_v53, %v574_v47 }
  0x4b   : > { %v585_v9 = vmul.f32 %v1326_v53, %v575_v58  ;;  %v567_v13 = vadd.f32 %v565_v57, %v541_v54  ;;  %v572_v14 = vadd.f32 %v570_v3, %v546_v55  ;;  %v590_v15 = vmul.f32 %v1327_v59, %v574_v47  ;;  %v1337_v55 = vld [vmem:[%s1472_s16 + $0x12] ss:$0 sm:$0xff] }
  0x4c   : > { %v591_v16 = vmul.f32 %v1327_v59, %v575_v58  ;;  %v573_v18 = vadd.f32 %v571_v4, %v547_v60  ;;  %v580_v19 = vadd.f32 %v578_v6, %v554_v61  ;;  %v581_v20 = vadd.f32 %v579_v7, %v555_v62  ;;  %v1339_v61 = vld [vmem:[%s1472_s16 + $0x5a] ss:$0 sm:$0xff]  ;;  %v678_v7 = vld [vmem:[%s1847_s0 + $0x13] sm:$0x1] }
  0x4d   : > { %v586_v21 = vadd.f32 %v584_v8, %v560_v63  ;;  %v587_v23 = vadd.f32 %v585_v9, %v561_v1  ;;  %v592_v24 = vadd.f32 %v590_v15, %v566_v2  ;;  %v596_v25 = vmul.f32 %v1328_v0, %v574_v47  ;;  %v1340_v2 = vld [vmem:[%s1472_s16 + $0x7e] ss:$0 sm:$0xff] }
  0x4e   : > { %v597_v26 = vmul.f32 %v1328_v0, %v575_v58  ;;  %v604_v29 = vmul.f32 %v1329_v11, %v600_v5  ;;  %v605_v30 = vmul.f32 %v1329_v11, %v601_v10  ;;  %v610_v31 = vmul.f32 %v1330_v12, %v600_v5 }
  0x4f   : > { %v611_v32 = vmul.f32 %v1330_v12, %v601_v10  ;;  %v593_v35 = vadd.f32 %v591_v16, %v567_v13  ;;  %v598_v36 = vadd.f32 %v596_v25, %v572_v14  ;;  %v616_v37 = vmul.f32 %v1331_v17, %v600_v5  ;;  %v1341_v12 = vld [vmem:[%s1472_s16 + $0x13] ss:$0 sm:$0xff]  ;;  %v1342_v13 = vld [vmem:[%s1472_s16 + $0x37] ss:$0 sm:$0xff] }
  0x50   : > { %v617_v38 = vmul.f32 %v1331_v17, %v601_v10  ;;  %v599_v40 = vadd.f32 %v597_v26, %v573_v18  ;;  %v606_v41 = vadd.f32 %v604_v29, %v580_v19  ;;  %v607_v42 = vadd.f32 %v605_v30, %v581_v20  ;;  %v679_v18 = vld [vmem:[%s1847_s0 + $0x3b] sm:$0x1]  ;;  %v704_v29 = vld [vmem:[%s1847_s0 + $0x14] sm:$0x1] }
  0x51   : > { %v612_v43 = vadd.f32 %v610_v31, %v586_v21  ;;  %v613_v45 = vadd.f32 %v611_v32, %v587_v23  ;;  %v618_v46 = vadd.f32 %v616_v37, %v592_v24  ;;  %v622_v47 = vmul.f32 %v1332_v22, %v600_v5  ;;  %v1343_v19 = vld [vmem:[%s1472_s16 + $0x5b] ss:$0 sm:$0xff]  ;;  %v1344_v24 = vld [vmem:[%s1472_s16 + $0x7f] ss:$0 sm:$0xff] }
  0x52   : > { %v623_v48 = vmul.f32 %v1332_v22, %v601_v10  ;;  %v630_v51 = vmul.f32 %v1333_v33, %v626_v27  ;;  %v631_v52 = vmul.f32 %v1333_v33, %v627_v28  ;;  %v636_v53 = vmul.f32 %v1334_v34, %v626_v27 }
  0x53   : > { %v637_v54 = vmul.f32 %v1334_v34, %v627_v28  ;;  %v619_v57 = vadd.f32 %v617_v38, %v593_v35  ;;  %v624_v58 = vadd.f32 %v622_v47, %v598_v36  ;;  %v642_v59 = vmul.f32 %v1335_v39, %v626_v27  ;;  %v1345_v34 = vld [vmem:[%s1472_s16 + $0x14] ss:$0 sm:$0xff]  ;;  %v1346_v35 = vld [vmem:[%s1472_s16 + $0x38] ss:$0 sm:$0xff] }
  0x54   : > { %v643_v60 = vmul.f32 %v1335_v39, %v627_v28  ;;  %v625_v62 = vadd.f32 %v623_v48, %v599_v40  ;;  %v632_v63 = vadd.f32 %v630_v51, %v606_v41  ;;  %v633_v0 = vadd.f32 %v631_v52, %v607_v42  ;;  %v705_v40 = vld [vmem:[%s1847_s0 + $0x3c] sm:$0x1]  ;;  %v730_v51 = vld [vmem:[%s1847_s0 + $0x15] sm:$0x1] }
  0x55   : > { %v638_v1 = vadd.f32 %v636_v53, %v612_v43  ;;  %v639_v3 = vadd.f32 %v637_v54, %v613_v45  ;;  %v644_v4 = vadd.f32 %v642_v59, %v618_v46  ;;  %v648_v5 = vmul.f32 %v1336_v44, %v626_v27  ;;  %v1347_v41 = vld [vmem:[%s1472_s16 + $0x5c] ss:$0 sm:$0xff]  ;;  %v1348_v46 = vld [vmem:[%s1472_s16 + $0x80] ss:$0 sm:$0xff] }
  0x56   : > { %v649_v6 = vmul.f32 %v1336_v44, %v627_v28  ;;  %v656_v8 = vmul.f32 %v1337_v55, %v652_v49  ;;  %v657_v9 = vmul.f32 %v1337_v55, %v653_v50  ;;  %v662_v10 = vmul.f32 %v1338_v56, %v652_v49 }
  0x57   : > { %v663_v11 = vmul.f32 %v1338_v56, %v653_v50  ;;  %v645_v14 = vadd.f32 %v643_v60, %v619_v57  ;;  %v650_v15 = vadd.f32 %v648_v5, %v624_v58  ;;  %v668_v16 = vmul.f32 %v1339_v61, %v652_v49  ;;  %v731_v56 = vld [vmem:[%s1847_s0 + $0x3d] sm:$0x1]  ;;  %v1349_v57 = vld [vmem:[%s1472_s16 + $0x15] ss:$0 sm:$0xff]  ;;  %v1350_v58 = vld [vmem:[%s1472_s16 + $0x39] ss:$0 sm:$0xff] }
  0x58   : > { %v669_v17 = vmul.f32 %v1339_v61, %v653_v50  ;;  %v651_v20 = vadd.f32 %v649_v6, %v625_v62  ;;  %v658_v21 = vadd.f32 %v656_v8, %v632_v63  ;;  %v659_v22 = vadd.f32 %v657_v9, %v633_v0  ;;  %v1351_v63 = vld [vmem:[%s1472_s16 + $0x5d] ss:$0 sm:$0xff]  ;;  %v756_v9 = vld [vmem:[%s1847_s0 + $0x16] sm:$0x1] }
  0x59   : > { %v664_v23 = vadd.f32 %v662_v10, %v638_v1  ;;  %v665_v25 = vadd.f32 %v663_v11, %v639_v3  ;;  %v670_v26 = vadd.f32 %v668_v16, %v644_v4  ;;  %v674_v27 = vmul.f32 %v1340_v2, %v652_v49  ;;  %v1352_v4 = vld [vmem:[%s1472_s16 + $0x81] ss:$0 sm:$0xff]  ;;  %v757_v10 = vld [vmem:[%s1847_s0 + $0x3e] sm:$0x1]  ;;  %v1354_v16 = vld [vmem:[%s1472_s16 + $0x3a] ss:$0 sm:$0xff] }
  0x5a   : > { %v675_v28 = vmul.f32 %v1340_v2, %v653_v50  ;;  %v682_v30 = vmul.f32 %v1341_v12, %v678_v7  ;;  %v683_v31 = vmul.f32 %v1341_v12, %v679_v18  ;;  %v688_v32 = vmul.f32 %v1342_v13, %v678_v7 }
  0x5b   : > { %v689_v33 = vmul.f32 %v1342_v13, %v679_v18  ;;  %v671_v36 = vadd.f32 %v669_v17, %v645_v14  ;;  %v676_v37 = vadd.f32 %v674_v27, %v650_v15  ;;  %v694_v38 = vmul.f32 %v1343_v19, %v678_v7  ;;  %v1353_v15 = vld [vmem:[%s1472_s16 + $0x16] ss:$0 sm:$0xff] }
  0x5c   : > { %v695_v39 = vmul.f32 %v1343_v19, %v679_v18  ;;  %v677_v42 = vadd.f32 %v675_v28, %v651_v20  ;;  %v684_v43 = vadd.f32 %v682_v30, %v658_v21  ;;  %v685_v44 = vadd.f32 %v683_v31, %v659_v22  ;;  %v1355_v21 = vld [vmem:[%s1472_s16 + $0x5e] ss:$0 sm:$0xff]  ;;  %v782_v31 = vld [vmem:[%s1847_s0 + $0x17] sm:$0x1] }
  0x5d   : > { %v690_v45 = vadd.f32 %v688_v32, %v664_v23  ;;  %v691_v47 = vadd.f32 %v689_v33, %v665_v25  ;;  %v696_v48 = vadd.f32 %v694_v38, %v670_v26  ;;  %v700_v49 = vmul.f32 %v1344_v24, %v678_v7  ;;  %v1356_v26 = vld [vmem:[%s1472_s16 + $0x82] ss:$0 sm:$0xff]  ;;  %v783_v32 = vld [vmem:[%s1847_s0 + $0x3f] sm:$0x1]  ;;  %v1358_v38 = vld [vmem:[%s1472_s16 + $0x3b] ss:$0 sm:$0xff] }
  0x5e   : > { %v701_v50 = vmul.f32 %v1344_v24, %v679_v18  ;;  %v708_v52 = vmul.f32 %v1345_v34, %v704_v29  ;;  %v709_v53 = vmul.f32 %v1345_v34, %v705_v40  ;;  %v714_v54 = vmul.f32 %v1346_v35, %v704_v29 }
  0x5f   : > { %v715_v55 = vmul.f32 %v1346_v35, %v705_v40  ;;  %v697_v59 = vadd.f32 %v695_v39, %v671_v36  ;;  %v702_v60 = vadd.f32 %v700_v49, %v676_v37  ;;  %v720_v61 = vmul.f32 %v1347_v41, %v704_v29  ;;  %v1357_v37 = vld [vmem:[%s1472_s16 + $0x17] ss:$0 sm:$0xff] }
  0x60   : > { %v721_v62 = vmul.f32 %v1347_v41, %v705_v40  ;;  %v703_v0 = vadd.f32 %v701_v50, %v677_v42  ;;  %v710_v1 = vadd.f32 %v708_v52, %v684_v43  ;;  %v711_v2 = vadd.f32 %v709_v53, %v685_v44  ;;  %v1359_v43 = vld [vmem:[%s1472_s16 + $0x5f] ss:$0 sm:$0xff]  ;;  %v808_v53 = vld [vmem:[%s1847_s0 + $0x18] sm:$0x1] }
  0x61   : > { %v716_v3 = vadd.f32 %v714_v54, %v690_v45  ;;  %v717_v5 = vadd.f32 %v715_v55, %v691_v47  ;;  %v722_v6 = vadd.f32 %v720_v61, %v696_v48  ;;  %v726_v7 = vmul.f32 %v1348_v46, %v704_v29  ;;  %v1360_v48 = vld [vmem:[%s1472_s16 + $0x83] ss:$0 sm:$0xff] }
  0x62   : > { %v727_v8 = vmul.f32 %v1348_v46, %v705_v40  ;;  %v734_v11 = vmul.f32 %v1349_v57, %v730_v51  ;;  %v735_v12 = vmul.f32 %v1349_v57, %v731_v56  ;;  %v740_v13 = vmul.f32 %v1350_v58, %v730_v51 }
  0x63   : > { %v741_v14 = vmul.f32 %v1350_v58, %v731_v56  ;;  %v723_v17 = vadd.f32 %v721_v62, %v697_v59  ;;  %v728_v18 = vadd.f32 %v726_v7, %v702_v60  ;;  %v746_v19 = vmul.f32 %v1351_v63, %v730_v51  ;;  %v1361_v58 = vld [vmem:[%s1472_s16 + $0x18] ss:$0 sm:$0xff]  ;;  %v1362_v59 = vld [vmem:[%s1472_s16 + $0x3c] ss:$0 sm:$0xff] }
  0x64   : > { %v747_v20 = vmul.f32 %v1351_v63, %v731_v56  ;;  %v729_v22 = vadd.f32 %v727_v8, %v703_v0  ;;  %v736_v23 = vadd.f32 %v734_v11, %v710_v1  ;;  %v737_v24 = vadd.f32 %v735_v12, %v711_v2  ;;  %v809_v0 = vld [vmem:[%s1847_s0 + $0x40] sm:$0x1]  ;;  %v834_v11 = vld [vmem:[%s1847_s0 + $0x19] sm:$0x1] }
  0x65   : > { %v742_v25 = vadd.f32 %v740_v13, %v716_v3  ;;  %v743_v27 = vadd.f32 %v741_v14, %v717_v5  ;;  %v748_v28 = vadd.f32 %v746_v19, %v722_v6  ;;  %v752_v29 = vmul.f32 %v1352_v4, %v730_v51  ;;  %v1363_v1 = vld [vmem:[%s1472_s16 + $0x60] ss:$0 sm:$0xff]  ;;  %v1364_v6 = vld [vmem:[%s1472_s16 + $0x84] ss:$0 sm:$0xff] }
  0x66   : > { %v753_v30 = vmul.f32 %v1352_v4, %v731_v56  ;;  %v760_v33 = vmul.f32 %v1353_v15, %v756_v9  ;;  %v761_v34 = vmul.f32 %v1353_v15, %v757_v10  ;;  %v766_v35 = vmul.f32 %v1354_v16, %v756_v9 }
  0x67   : > { %v767_v36 = vmul.f32 %v1354_v16, %v757_v10  ;;  %v749_v39 = vadd.f32 %v747_v20, %v723_v17  ;;  %v754_v40 = vadd.f32 %v752_v29, %v728_v18  ;;  %v772_v41 = vmul.f32 %v1355_v21, %v756_v9  ;;  %v1365_v16 = vld [vmem:[%s1472_s16 + $0x19] ss:$0 sm:$0xff]  ;;  %v1366_v17 = vld [vmem:[%s1472_s16 + $0x3d] ss:$0 sm:$0xff] }
  0x68   : > { %v773_v42 = vmul.f32 %v1355_v21, %v757_v10  ;;  %v755_v44 = vadd.f32 %v753_v30, %v729_v22  ;;  %v762_v45 = vadd.f32 %v760_v33, %v736_v23  ;;  %v763_v46 = vadd.f32 %v761_v34, %v737_v24  ;;  %v835_v22 = vld [vmem:[%s1847_s0 + $0x41] sm:$0x1]  ;;  %v860_v33 = vld [vmem:[%s1847_s0 + $0x1a] sm:$0x1] }
  0x69   : > { %v768_v47 = vadd.f32 %v766_v35, %v742_v25  ;;  %v769_v49 = vadd.f32 %v767_v36, %v743_v27  ;;  %v774_v50 = vadd.f32 %v772_v41, %v748_v28  ;;  %v778_v51 = vmul.f32 %v1356_v26, %v756_v9  ;;  %v1367_v23 = vld [vmem:[%s1472_s16 + $0x61] ss:$0 sm:$0xff]  ;;  %v1368_v28 = vld [vmem:[%s1472_s16 + $0x85] ss:$0 sm:$0xff] }
  0x6a   : > { %v779_v52 = vmul.f32 %v1356_v26, %v757_v10  ;;  %v786_v54 = vmul.f32 %v1357_v37, %v782_v31  ;;  %v787_v55 = vmul.f32 %v1357_v37, %v783_v32  ;;  %v792_v56 = vmul.f32 %v1358_v38, %v782_v31 }
  0x6b   : > { %v793_v57 = vmul.f32 %v1358_v38, %v783_v32  ;;  %v775_v60 = vadd.f32 %v773_v42, %v749_v39  ;;  %v780_v61 = vadd.f32 %v778_v51, %v754_v40  ;;  %v798_v62 = vmul.f32 %v1359_v43, %v782_v31  ;;  %v861_v38 = vld [vmem:[%s1847_s0 + $0x42] sm:$0x1]  ;;  %v1369_v39 = vld [vmem:[%s1472_s16 + $0x1a] ss:$0 sm:$0xff]  ;;  %v1370_v40 = vld [vmem:[%s1472_s16 + $0x3e] ss:$0 sm:$0xff] }
  0x6c   : > { %v799_v63 = vmul.f32 %v1359_v43, %v783_v32  ;;  %v781_v2 = vadd.f32 %v779_v52, %v755_v44  ;;  %v788_v3 = vadd.f32 %v786_v54, %v762_v45  ;;  %v789_v4 = vadd.f32 %v787_v55, %v763_v46  ;;  %v1371_v45 = vld [vmem:[%s1472_s16 + $0x62] ss:$0 sm:$0xff]  ;;  %v886_v55 = vld [vmem:[%s1847_s0 + $0x1b] sm:$0x1] }
  0x6d   : > { %v794_v5 = vadd.f32 %v792_v56, %v768_v47  ;;  %v795_v7 = vadd.f32 %v793_v57, %v769_v49  ;;  %v800_v8 = vadd.f32 %v798_v62, %v774_v50  ;;  %v804_v9 = vmul.f32 %v1360_v48, %v782_v31  ;;  %v1372_v50 = vld [vmem:[%s1472_s16 + $0x86] ss:$0 sm:$0xff]  ;;  %v887_v56 = vld [vmem:[%s1847_s0 + $0x43] sm:$0x1]  ;;  %v1374_v62 = vld [vmem:[%s1472_s16 + $0x3f] ss:$0 sm:$0xff] }
  0x6e   : > { %v805_v10 = vmul.f32 %v1360_v48, %v783_v32  ;;  %v812_v12 = vmul.f32 %v1361_v58, %v808_v53  ;;  %v813_v13 = vmul.f32 %v1361_v58, %v809_v0  ;;  %v818_v14 = vmul.f32 %v1362_v59, %v808_v53 }
  0x6f   : > { %v819_v15 = vmul.f32 %v1362_v59, %v809_v0  ;;  %v801_v18 = vadd.f32 %v799_v63, %v775_v60  ;;  %v806_v19 = vadd.f32 %v804_v9, %v780_v61  ;;  %v824_v20 = vmul.f32 %v1363_v1, %v808_v53  ;;  %v1373_v61 = vld [vmem:[%s1472_s16 + $0x1b] ss:$0 sm:$0xff] }
  0x70   : > { %v825_v21 = vmul.f32 %v1363_v1, %v809_v0  ;;  %v807_v24 = vadd.f32 %v805_v10, %v781_v2  ;;  %v814_v25 = vadd.f32 %v812_v12, %v788_v3  ;;  %v815_v26 = vadd.f32 %v813_v13, %v789_v4  ;;  %v1375_v3 = vld [vmem:[%s1472_s16 + $0x63] ss:$0 sm:$0xff]  ;;  %v912_v13 = vld [vmem:[%s1847_s0 + $0x1c] sm:$0x1] }
  0x71   : > { %v820_v27 = vadd.f32 %v818_v14, %v794_v5  ;;  %v821_v29 = vadd.f32 %v819_v15, %v795_v7  ;;  %v826_v30 = vadd.f32 %v824_v20, %v800_v8  ;;  %v830_v31 = vmul.f32 %v1364_v6, %v808_v53  ;;  %v1376_v8 = vld [vmem:[%s1472_s16 + $0x87] ss:$0 sm:$0xff]  ;;  %v913_v14 = vld [vmem:[%s1847_s0 + $0x44] sm:$0x1]  ;;  %v1378_v20 = vld [vmem:[%s1472_s16 + $0x40] ss:$0 sm:$0xff] }
  0x72   : > { %v831_v32 = vmul.f32 %v1364_v6, %v809_v0  ;;  %v838_v34 = vmul.f32 %v1365_v16, %v834_v11  ;;  %v839_v35 = vmul.f32 %v1365_v16, %v835_v22  ;;  %v844_v36 = vmul.f32 %v1366_v17, %v834_v11 }
  0x73   : > { %v845_v37 = vmul.f32 %v1366_v17, %v835_v22  ;;  %v827_v41 = vadd.f32 %v825_v21, %v801_v18  ;;  %v832_v42 = vadd.f32 %v830_v31, %v806_v19  ;;  %v850_v43 = vmul.f32 %v1367_v23, %v834_v11  ;;  %v1377_v19 = vld [vmem:[%s1472_s16 + $0x1c] ss:$0 sm:$0xff] }
  0x74   : > { %v851_v44 = vmul.f32 %v1367_v23, %v835_v22  ;;  %v833_v46 = vadd.f32 %v831_v32, %v807_v24  ;;  %v840_v47 = vadd.f32 %v838_v34, %v814_v25  ;;  %v841_v48 = vadd.f32 %v839_v35, %v815_v26  ;;  %v1379_v25 = vld [vmem:[%s1472_s16 + $0x64] ss:$0 sm:$0xff]  ;;  %v938_v35 = vld [vmem:[%s1847_s0 + $0x1d] sm:$0x1] }
  0x75   : > { %v846_v49 = vadd.f32 %v844_v36, %v820_v27  ;;  %v847_v51 = vadd.f32 %v845_v37, %v821_v29  ;;  %v852_v52 = vadd.f32 %v850_v43, %v826_v30  ;;  %v856_v53 = vmul.f32 %v1368_v28, %v834_v11  ;;  %v1380_v30 = vld [vmem:[%s1472_s16 + $0x88] ss:$0 sm:$0xff] }
  0x76   : > { %v857_v54 = vmul.f32 %v1368_v28, %v835_v22  ;;  %v864_v57 = vmul.f32 %v1369_v39, %v860_v33  ;;  %v865_v58 = vmul.f32 %v1369_v39, %v861_v38  ;;  %v870_v59 = vmul.f32 %v1370_v40, %v860_v33 }
  0x77   : > { %v871_v60 = vmul.f32 %v1370_v40, %v861_v38  ;;  %v853_v63 = vadd.f32 %v851_v44, %v827_v41  ;;  %v858_v0 = vadd.f32 %v856_v53, %v832_v42  ;;  %v876_v1 = vmul.f32 %v1371_v45, %v860_v33  ;;  %v1381_v40 = vld [vmem:[%s1472_s16 + $0x1d] ss:$0 sm:$0xff]  ;;  %v1382_v41 = vld [vmem:[%s1472_s16 + $0x41] ss:$0 sm:$0xff] }
  0x78   : > { %v877_v2 = vmul.f32 %v1371_v45, %v861_v38  ;;  %v859_v4 = vadd.f32 %v857_v54, %v833_v46  ;;  %v866_v5 = vadd.f32 %v864_v57, %v840_v47  ;;  %v867_v6 = vadd.f32 %v865_v58, %v841_v48  ;;  %v939_v46 = vld [vmem:[%s1847_s0 + $0x45] sm:$0x1] }
  0x79   : > { %v872_v7 = vadd.f32 %v870_v59, %v846_v49  ;;  %v873_v9 = vadd.f32 %v871_v60, %v847_v51  ;;  %v878_v10 = vadd.f32 %v876_v1, %v852_v52  ;;  %v882_v11 = vmul.f32 %v1372_v50, %v860_v33  ;;  %v1383_v47 = vld [vmem:[%s1472_s16 + $0x65] ss:$0 sm:$0xff] }
  0x7a   : > { %v883_v12 = vmul.f32 %v1372_v50, %v861_v38  ;;  %v890_v15 = vmul.f32 %v1373_v61, %v886_v55  ;;  %v891_v16 = vmul.f32 %v1373_v61, %v887_v56  ;;  %v896_v17 = vmul.f32 %v1374_v62, %v886_v55  ;;  %v1385_v61 = vld [vmem:[%s1472_s16 + $0x1e] ss:$0 sm:$0xff] }
  0x7b   : > { %v897_v18 = vmul.f32 %v1374_v62, %v887_v56  ;;  %v879_v21 = vadd.f32 %v877_v2, %v853_v63  ;;  %v884_v22 = vadd.f32 %v882_v11, %v858_v0  ;;  %v902_v23 = vmul.f32 %v1375_v3, %v886_v55  ;;  %v1386_v62 = vld [vmem:[%s1472_s16 + $0x42] ss:$0 sm:$0xff] }
  0x7c   : > { %v903_v24 = vmul.f32 %v1375_v3, %v887_v56  ;;  %v885_v26 = vadd.f32 %v883_v12, %v859_v4  ;;  %v892_v27 = vadd.f32 %v890_v15, %v866_v5  ;;  %v893_v28 = vadd.f32 %v891_v16, %v867_v6  ;;  %v964_v3 = vld [vmem:[%s1847_s0 + $0x1e] sm:$0x1]  ;;  %v965_v4 = vld [vmem:[%s1847_s0 + $0x46] sm:$0x1] }
  0x7d   : > { %v898_v29 = vadd.f32 %v896_v17, %v872_v7  ;;  %v899_v31 = vadd.f32 %v897_v18, %v873_v9  ;;  %v904_v32 = vadd.f32 %v902_v23, %v878_v10  ;;  %v908_v33 = vmul.f32 %v1376_v8, %v886_v55  ;;  %v1387_v5 = vld [vmem:[%s1472_s16 + $0x66] ss:$0 sm:$0xff] }
  0x7e   : > { %v909_v34 = vmul.f32 %v1376_v8, %v887_v56  ;;  %v916_v36 = vmul.f32 %v1377_v19, %v912_v13  ;;  %v917_v37 = vmul.f32 %v1377_v19, %v913_v14  ;;  %v922_v38 = vmul.f32 %v1378_v20, %v912_v13  ;;  %v1384_v56 = vld [vmem:[%s1472_s16 + $0x89] ss:$0 sm:$0xff]  ;;  %v1389_v19 = vld [vmem:[%s1472_s16 + $0x1f] ss:$0 sm:$0xff] }
  0x7f   : > { %v923_v39 = vmul.f32 %v1378_v20, %v913_v14  ;;  %v905_v42 = vadd.f32 %v903_v24, %v879_v21  ;;  %v910_v43 = vadd.f32 %v908_v33, %v884_v22  ;;  %v928_v44 = vmul.f32 %v1379_v25, %v912_v13  ;;  %v1390_v20 = vld [vmem:[%s1472_s16 + $0x43] ss:$0 sm:$0xff] }
  0x80   : > { %v929_v45 = vmul.f32 %v1379_v25, %v913_v14  ;;  %v911_v48 = vadd.f32 %v909_v34, %v885_v26  ;;  %v918_v49 = vadd.f32 %v916_v36, %v892_v27  ;;  %v919_v50 = vadd.f32 %v917_v37, %v893_v28  ;;  %v990_v25 = vld [vmem:[%s1847_s0 + $0x1f] sm:$0x1]  ;;  %v991_v26 = vld [vmem:[%s1847_s0 + $0x47] sm:$0x1]  ;;  %v1392_v36 = vld [vmem:[%s1472_s16 + $0x8b] ss:$0 sm:$0xff] }
  0x81   : > { %v924_v51 = vadd.f32 %v922_v38, %v898_v29  ;;  %v925_v52 = vadd.f32 %v923_v39, %v899_v31  ;;  %v930_v53 = vadd.f32 %v928_v44, %v904_v32  ;;  %v934_v54 = vmul.f32 %v1380_v30, %v912_v13  ;;  %v1391_v27 = vld [vmem:[%s1472_s16 + $0x67] ss:$0 sm:$0xff] }
  0x82   : > { %v935_v55 = vmul.f32 %v1380_v30, %v913_v14  ;;  %v942_v57 = vmul.f32 %v1381_v40, %v938_v35  ;;  %v943_v58 = vmul.f32 %v1381_v40, %v939_v46  ;;  %v948_v59 = vmul.f32 %v1382_v41, %v938_v35  ;;  %v1388_v14 = vld [vmem:[%s1472_s16 + $0x8a] ss:$0 sm:$0xff] }
  0x83   : > { %v949_v60 = vmul.f32 %v1382_v41, %v939_v46  ;;  %v931_v63 = vadd.f32 %v929_v45, %v905_v42  ;;  %v936_v0 = vadd.f32 %v934_v54, %v910_v43  ;;  %v954_v1 = vmul.f32 %v1383_v47, %v938_v35  ;;  %v1393_v41 = vld [vmem:[%s1472_s16 + $0x20] ss:$0 sm:$0xff]  ;;  %v1394_v42 = vld [vmem:[%s1472_s16 + $0x44] ss:$0 sm:$0xff] }
  0x84   : > { %v955_v2 = vmul.f32 %v1383_v47, %v939_v46  ;;  %v937_v6 = vadd.f32 %v935_v55, %v911_v48  ;;  %v944_v7 = vadd.f32 %v942_v57, %v918_v49  ;;  %v945_v8 = vadd.f32 %v943_v58, %v919_v50  ;;  %v1016_v47 = vld [vmem:[%s1847_s0 + $0x20] sm:$0x1]  ;;  %v1017_v48 = vld [vmem:[%s1847_s0 + $0x48] sm:$0x1]  ;;  %v1396_v58 = vld [vmem:[%s1472_s16 + $0x8c] ss:$0 sm:$0xff] }
  0x85   : > { %v950_v9 = vadd.f32 %v948_v59, %v924_v51  ;;  %v951_v10 = vadd.f32 %v949_v60, %v925_v52  ;;  %v956_v11 = vadd.f32 %v954_v1, %v930_v53  ;;  %v960_v12 = vmul.f32 %v1384_v56, %v938_v35  ;;  %v1395_v49 = vld [vmem:[%s1472_s16 + $0x68] ss:$0 sm:$0xff] }
  0x86   : > { %v961_v13 = vmul.f32 %v1384_v56, %v939_v46  ;;  %v968_v15 = vmul.f32 %v1385_v61, %v964_v3  ;;  %v969_v16 = vmul.f32 %v1385_v61, %v965_v4  ;;  %v974_v17 = vmul.f32 %v1386_v62, %v964_v3 }
  0x87   : > { %v975_v18 = vmul.f32 %v1386_v62, %v965_v4  ;;  %v957_v21 = vadd.f32 %v955_v2, %v931_v63  ;;  %v962_v22 = vadd.f32 %v960_v12, %v936_v0  ;;  %v980_v23 = vmul.f32 %v1387_v5, %v964_v3  ;;  %v1397_v63 = vld [vmem:[%s1472_s16 + $0x21] ss:$0 sm:$0xff]  ;;  %v1398_v0 = vld [vmem:[%s1472_s16 + $0x45] ss:$0 sm:$0xff] }
  0x88   : > { %v981_v24 = vmul.f32 %v1387_v5, %v965_v4  ;;  %v963_v28 = vadd.f32 %v961_v13, %v937_v6  ;;  %v970_v29 = vadd.f32 %v968_v15, %v944_v7  ;;  %v971_v30 = vadd.f32 %v969_v16, %v945_v8  ;;  %v1042_v5 = vld [vmem:[%s1847_s0 + $0x21] sm:$0x1]  ;;  %v1043_v6 = vld [vmem:[%s1847_s0 + $0x49] sm:$0x1]  ;;  %v1400_v16 = vld [vmem:[%s1472_s16 + $0x8d] ss:$0 sm:$0xff] }
  0x89   : > { %v976_v31 = vadd.f32 %v974_v17, %v950_v9  ;;  %v977_v32 = vadd.f32 %v975_v18, %v951_v10  ;;  %v982_v33 = vadd.f32 %v980_v23, %v956_v11  ;;  %v986_v34 = vmul.f32 %v1388_v14, %v964_v3  ;;  %v1399_v7 = vld [vmem:[%s1472_s16 + $0x69] ss:$0 sm:$0xff] }
  0x8a   : > { %v987_v35 = vmul.f32 %v1388_v14, %v965_v4  ;;  %v994_v37 = vmul.f32 %v1389_v19, %v990_v25  ;;  %v995_v38 = vmul.f32 %v1389_v19, %v991_v26  ;;  %v1000_v39 = vmul.f32 %v1390_v20, %v990_v25 }
  0x8b   : > { %v1001_v40 = vmul.f32 %v1390_v20, %v991_v26  ;;  %v983_v43 = vadd.f32 %v981_v24, %v957_v21  ;;  %v988_v44 = vadd.f32 %v986_v34, %v962_v22  ;;  %v1006_v45 = vmul.f32 %v1391_v27, %v990_v25  ;;  %v1401_v21 = vld [vmem:[%s1472_s16 + $0x22] ss:$0 sm:$0xff]  ;;  %v1402_v22 = vld [vmem:[%s1472_s16 + $0x46] ss:$0 sm:$0xff] }
  0x8c   : > { %v1007_v46 = vmul.f32 %v1391_v27, %v991_v26  ;;  %v989_v50 = vadd.f32 %v987_v35, %v963_v28  ;;  %v996_v51 = vadd.f32 %v994_v37, %v970_v29  ;;  %v997_v52 = vadd.f32 %v995_v38, %v971_v30  ;;  %v1068_v27 = vld [vmem:[%s1847_s0 + $0x22] sm:$0x1]  ;;  %v1069_v28 = vld [vmem:[%s1847_s0 + $0x4a] sm:$0x1]  ;;  %v1404_v37 = vld [vmem:[%s1472_s16 + $0x8e] ss:$0 sm:$0xff] }
  0x8d   : > { %v1002_v53 = vadd.f32 %v1000_v39, %v976_v31  ;;  %v1003_v54 = vadd.f32 %v1001_v40, %v977_v32  ;;  %v1008_v55 = vadd.f32 %v1006_v45, %v982_v33  ;;  %v1012_v56 = vmul.f32 %v1392_v36, %v990_v25  ;;  %v1403_v29 = vld [vmem:[%s1472_s16 + $0x6a] ss:$0 sm:$0xff] }
  0x8e   : > { %v1013_v57 = vmul.f32 %v1392_v36, %v991_v26  ;;  %v1020_v59 = vmul.f32 %v1393_v41, %v1016_v47  ;;  %v1021_v60 = vmul.f32 %v1393_v41, %v1017_v48  ;;  %v1026_v61 = vmul.f32 %v1394_v42, %v1016_v47 }
  0x8f   : > { %v1027_v62 = vmul.f32 %v1394_v42, %v1017_v48  ;;  %v1009_v1 = vadd.f32 %v1007_v46, %v983_v43  ;;  %v1014_v2 = vadd.f32 %v1012_v56, %v988_v44  ;;  %v1032_v3 = vmul.f32 %v1395_v49, %v1016_v47  ;;  %v1405_v42 = vld [vmem:[%s1472_s16 + $0x23] ss:$0 sm:$0xff]  ;;  %v1406_v43 = vld [vmem:[%s1472_s16 + $0x47] ss:$0 sm:$0xff] }
  0x90   : > { %v1033_v4 = vmul.f32 %v1395_v49, %v1017_v48  ;;  %v1015_v8 = vadd.f32 %v1013_v57, %v989_v50  ;;  %v1022_v9 = vadd.f32 %v1020_v59, %v996_v51  ;;  %v1023_v10 = vadd.f32 %v1021_v60, %v997_v52  ;;  %v1095_v49 = vld [vmem:[%s1847_s0 + $0x4b] sm:$0x1]  ;;  %v1408_v59 = vld [vmem:[%s1472_s16 + $0x8f] ss:$0 sm:$0xff] }
  0x91   : > { %v1028_v11 = vadd.f32 %v1026_v61, %v1002_v53  ;;  %v1029_v12 = vadd.f32 %v1027_v62, %v1003_v54  ;;  %v1034_v13 = vadd.f32 %v1032_v3, %v1008_v55  ;;  %v1038_v14 = vmul.f32 %v1396_v58, %v1016_v47  ;;  %v1407_v50 = vld [vmem:[%s1472_s16 + $0x6b] ss:$0 sm:$0xff] }
  0x92   : > { %v1039_v15 = vmul.f32 %v1396_v58, %v1017_v48  ;;  %v1046_v17 = vmul.f32 %v1397_v63, %v1042_v5  ;;  %v1047_v18 = vmul.f32 %v1397_v63, %v1043_v6  ;;  %v1052_v19 = vmul.f32 %v1398_v0, %v1042_v5  ;;  %v1094_v48 = vld [vmem:[%s1847_s0 + $0x23] sm:$0x1] }
  0x93   : > { %v1053_v20 = vmul.f32 %v1398_v0, %v1043_v6  ;;  %v1035_v23 = vadd.f32 %v1033_v4, %v1009_v1  ;;  %v1040_v24 = vadd.f32 %v1038_v14, %v1014_v2  ;;  %v1058_v25 = vmul.f32 %v1399_v7, %v1042_v5 }
  0x94   : > { %v1059_v26 = vmul.f32 %v1399_v7, %v1043_v6  ;;  %v1041_v30 = vadd.f32 %v1039_v15, %v1015_v8  ;;  %v1048_v31 = vadd.f32 %v1046_v17, %v1022_v9  ;;  %v1049_v32 = vadd.f32 %v1047_v18, %v1023_v10 }
  0x95   : > { %v1054_v33 = vadd.f32 %v1052_v19, %v1028_v11  ;;  %v1055_v34 = vadd.f32 %v1053_v20, %v1029_v12  ;;  %v1064_v35 = vmul.f32 %v1400_v16, %v1042_v5  ;;  %v1065_v36 = vmul.f32 %v1400_v16, %v1043_v6 }
  0x96   : > { %v1072_v38 = vmul.f32 %v1401_v21, %v1068_v27  ;;  %v1073_v39 = vmul.f32 %v1401_v21, %v1069_v28  ;;  %v1078_v40 = vmul.f32 %v1402_v22, %v1068_v27  ;;  %v1079_v41 = vmul.f32 %v1402_v22, %v1069_v28 }
  0x97   : > { %v1060_v44 = vadd.f32 %v1058_v25, %v1034_v13  ;;  %v1061_v45 = vadd.f32 %v1059_v26, %v1035_v23  ;;  %v1066_v46 = vadd.f32 %v1064_v35, %v1040_v24  ;;  %v1084_v47 = vmul.f32 %v1403_v29, %v1068_v27 }
  0x98   : > { %v1067_v51 = vadd.f32 %v1065_v36, %v1041_v30  ;;  %v1074_v52 = vadd.f32 %v1072_v38, %v1048_v31  ;;  %v1075_v53 = vadd.f32 %v1073_v39, %v1049_v32  ;;  %v1085_v54 = vmul.f32 %v1403_v29, %v1069_v28 }
  0x99   : > { %v1080_v55 = vadd.f32 %v1078_v40, %v1054_v33  ;;  %v1081_v56 = vadd.f32 %v1079_v41, %v1055_v34  ;;  %v1090_v57 = vmul.f32 %v1404_v37, %v1068_v27  ;;  %v1091_v58 = vmul.f32 %v1404_v37, %v1069_v28 }
  0x9a   : > { %v1098_v60 = vmul.f32 %v1405_v42, %v1094_v48  ;;  %v1099_v61 = vmul.f32 %v1405_v42, %v1095_v49  ;;  %v1104_v62 = vmul.f32 %v1406_v43, %v1094_v48  ;;  %v1105_v63 = vmul.f32 %v1406_v43, %v1095_v49 }
  0x9b   : > { %v1086_v0 = vadd.f32 %v1084_v47, %v1060_v44  ;;  %v1110_v1 = vmul.f32 %v1407_v50, %v1094_v48  ;;  %v1087_v2 = vadd.f32 %v1085_v54, %v1061_v45  ;;  %v1111_v5 = vmul.f32 %v1407_v50, %v1095_v49 }
  0x9c   : > { %v1100_v3 = vadd.f32 %v1098_v60, %v1074_v52  ;;  %v1101_v4 = vadd.f32 %v1099_v61, %v1075_v53  ;;  %v1092_v6 = vadd.f32 %v1090_v57, %v1066_v46  ;;  %v1106_v7 = vadd.f32 %v1104_v62, %v1080_v55 }
  0x9d   : > { %v1116_v8 = vmul.f32 %v1408_v59, %v1094_v48  ;;  %v1093_v9 = vadd.f32 %v1091_v58, %v1067_v51  ;;  %v1107_v10 = vadd.f32 %v1105_v63, %v1081_v56  ;;  %v1117_v11 = vmul.f32 %v1408_v59, %v1095_v49 }
  0x9e   : > { %v1112_v12 = vadd.f32 %v1110_v1, %v1086_v0  ;;  %1121 = vst.msk [vmem:[%s191_s26] sm:$0x1] %vm1120_vm0, %v1100_v3  ;;  %v1113_v13 = vadd.f32 %v1111_v5, %v1087_v2 }
  0x9f   : > { %1122 = vst.msk [vmem:[%s191_s26 + $0x4] sm:$0x1] %vm1120_vm0, %v1101_v4  ;;  %v1118_v14 = vadd.f32 %v1116_v8, %v1092_v6  ;;  %v1119_v15 = vadd.f32 %v1117_v11, %v1093_v9 }
  0xa0   : > { %1123 = vst.msk [vmem:[%s191_s26 + $0x1] sm:$0x1] %vm1120_vm0, %v1106_v7 }
  0xa1   : > { %1124 = vst.msk [vmem:[%s191_s26 + $0x5] sm:$0x1] %vm1120_vm0, %v1107_v10 }
  0xa2   : > { %1125 = vst.msk [vmem:[%s191_s26 + $0x2] sm:$0x1] %vm1120_vm0, %v1112_v12 }
  0xa3   : > { %1126 = vst.msk [vmem:[%s191_s26 + $0x6] sm:$0x1] %vm1120_vm0, %v1113_v13 }
  0xa4   : > { %1127 = vst.msk [vmem:[%s191_s26 + $0x3] sm:$0x1] %vm1120_vm0, %v1118_v14 }
  0xa5   : > { %1128 = vst.msk [vmem:[%s191_s26 + $0x7] sm:$0x1] %vm1120_vm0, %v1119_v15 }
  0xa6 PF: > { %s12_s11 = sadd.s32 1, %s1431_s11   ;;  %s1850_s9 = smov %s1427_s10 }
  0xa7   : > { %p9_p5 = scmp.ge.s32.totalorder %s12_s11, 6   ;;  %s1851_s10 = smov %s1853_s12 }
  0xa9   :  { %11 = sbr.rel (!%p9_p5) target bundleno = 2 (0x2), region = 61 }

</bundles_post_ra>
